<compile_context>
chip_gen: v6e
topology: v6e:2x2x1
jax: 0.10.0
libtpu: 0.0.40
codegen_flags: <defaults>
</compile_context>

<pallas_src>
import functools

import jax
import jax.numpy as jnp
from jax import lax
from jax.experimental import pallas as pl
from jax.experimental.pallas import tpu as pltpu


def _round_up(x, m):
    return (x + m - 1) // m * m


def _inception_kernel(x_ref, w_ref, b_ref, o_ref, p_ref, acc_ref, *,
                      kmax, wp, cin_pad, nb, npix_tile):
    """One (batch-group, pixel-tile) grid step.

    x_ref  : (Nb, 1, Cin_pad, L_tile)        bf16  halo-overlapped flat input tile
    w_ref  : (kmax, Cout, kmax*Cin_pad)      bf16  branch-averaged weights per kernel row
    b_ref  : (Cout, 1)                       f32   branch-averaged bias
    o_ref  : (Nb, Cout, npix_tile)                 lane-dense flat output tile
    p_ref  : (2, kmax*Cin_pad, Nb*npix_tile) bf16  double-buffered per-row patch slab
    acc_ref: (Cout, Nb*npix_tile)            f32   matmul accumulator
    """
    for dy in range(kmax):                       # static unroll over kernel rows
        slot = dy & 1                            # double buffer: staging of row dy+1
        for b in range(nb):                      # can overlap the matmul of row dy
            for dx in range(kmax):
                shift = dy * wp + dx             # static lane offset of tap (dy, dx)
                p_ref[slot,
                      pl.ds(dx * cin_pad, cin_pad),
                      pl.ds(b * npix_tile, npix_tile)] = x_ref[
                          b, 0, :, pl.ds(shift, npix_tile)]
        row = jnp.dot(w_ref[dy], p_ref[slot], preferred_element_type=jnp.float32)
        if dy == 0:
            acc_ref[...] = row                   # first row initializes the accumulator
        else:
            acc_ref[...] += row
    out = acc_ref[...] + b_ref[...]
    for b in range(nb):
        o_ref[b] = out[:, b * npix_tile:(b + 1) * npix_tile].astype(o_ref.dtype)


def inception_block_v1(x_nchw, weights, biases, *, compute_dtype=jnp.bfloat16):
    """Pallas Inception_Block_V1.forward (stride=1, the module default).

    x_nchw : (N, Cin, H, W) float32   -- PyTorch NCHW convention
    weights: list of (k, k, Cin, Cout) HWIO conv weights, k = 2*i + 1
    biases : list of (Cout,) biases
    returns: (N, Cout, H, W)
    """
    num_kernels = len(weights)
    kmax = 2 * (num_kernels - 1) + 1
    pad = kmax // 2
    N, Cin, H, W = x_nchw.shape
    Cout = weights[0].shape[-1]
    Hp, Wp = H + 2 * pad, W + 2 * pad

    cdt = jnp.dtype(compute_dtype)
    sublane = 32 // cdt.itemsize                 # f32 -> 8, bf16 -> 16
    cin_pad = _round_up(Cin, sublane)
    k_row = kmax * cin_pad

    # ---- batch-invariant parameter prep (hoisted out of the kernel) ----------
    w_pad = []
    for i, w in enumerate(weights):
        p = pad - i
        w_pad.append(jnp.pad(w, ((p, p), (p, p), (0, 0), (0, 0))))
    w_mean = jnp.mean(jnp.stack(w_pad, 0), axis=0)               # (kmax,kmax,Cin,Cout)
    w_mean = jnp.pad(w_mean, ((0, 0), (0, 0), (0, cin_pad - Cin), (0, 0)))
    # per-kernel-row packing: w_rows[dy, co, dx*cin_pad + ci] = w_mean[dy, dx, ci, co]
    w_rows = jnp.transpose(w_mean, (0, 3, 1, 2)).reshape(kmax, Cout, k_row)
    w_rows = w_rows.astype(compute_dtype)
    b_mean = jnp.mean(jnp.stack(biases, 0), axis=0).reshape(Cout, 1).astype(jnp.float32)

    # ---- pixel tiling (flat index p = h*Wp + w, lane-dense, 128-aligned) ------
    hw = H * Wp
    npix_tile = _round_up(hw, 128) if hw <= 1024 else 512
    n_tiles = _round_up(hw, npix_tile) // npix_tile
    npix = n_tiles * npix_tile
    max_shift = (kmax - 1) * Wp + (kmax - 1)
    l_tile = _round_up(npix_tile + max_shift, 128)   # haloed input-tile width
    L = npix_tile * (n_tiles - 1) + l_tile

    # ---- batch packing: Nb images share one grid step (weights batch-invariant)
    nb = 1
    for d in range(1, N + 1):
        if N % d == 0 and d * npix_tile <= 1024:
            nb = d
    while nb > 1 and (N // nb) * n_tiles < 2:        # keep >= 2 steps (v7x megacore)
        nb -= 1
        while nb > 1 and N % nb:
            nb -= 1

    # ---- flat, channel-padded, zero-padded input + halo-overlapped lane tiles -
    xp = jnp.pad(x_nchw, ((0, 0), (0, cin_pad - Cin), (pad, pad), (pad, pad)))
    x_flat = jnp.pad(xp.reshape(N, cin_pad, Hp * Wp),
                     ((0, 0), (0, 0), (0, L - Hp * Wp))).astype(compute_dtype)
    x_tiles = jnp.stack(
        [x_flat[:, :, t * npix_tile:t * npix_tile + l_tile] for t in range(n_tiles)],
        axis=1)                                      # (N, n_tiles, cin_pad, l_tile)

    kernel = functools.partial(_inception_kernel, kmax=kmax, wp=Wp,
                               cin_pad=cin_pad, nb=nb, npix_tile=npix_tile)

    # ---- explicit VMEM budget (double-buffered blocks + scratch + headroom) ---
    out_isz = jnp.dtype(x_nchw.dtype).itemsize
    est = (2 * (nb * cin_pad * l_tile * cdt.itemsize           # input blocks (x2)
                + nb * Cout * npix_tile * out_isz)             # output blocks (x2)
           + kmax * Cout * k_row * cdt.itemsize + Cout * 4     # weights + bias
           + 2 * k_row * nb * npix_tile * cdt.itemsize         # patch slab (double buf)
           + Cout * nb * npix_tile * 4)                        # f32 accumulator
    vmem_limit = int(min(max(2 * est + (8 << 20), 32 << 20), 64 << 20))

    out_flat = pl.pallas_call(
        kernel,
        out_shape=jax.ShapeDtypeStruct((N, Cout, npix), x_nchw.dtype),
        grid_spec=pltpu.PrefetchScalarGridSpec(
            num_scalar_prefetch=0,
            grid=(N // nb, n_tiles),
            in_specs=[
                pl.BlockSpec((nb, 1, cin_pad, l_tile), lambda n, t: (n, t, 0, 0)),
                pl.BlockSpec((kmax, Cout, k_row), lambda n, t: (0, 0, 0)),
                pl.BlockSpec((Cout, 1), lambda n, t: (0, 0)),
            ],
            out_specs=pl.BlockSpec((nb, Cout, npix_tile), lambda n, t: (n, 0, t)),
            scratch_shapes=[
                pltpu.VMEM((2, k_row, nb * npix_tile), compute_dtype),
                pltpu.VMEM((Cout, nb * npix_tile), jnp.float32),
            ],
        ),
        compiler_params=pltpu.CompilerParams(
            dimension_semantics=("parallel", "parallel"),
            vmem_limit_bytes=vmem_limit,
        ),
    )(x_tiles, w_rows, b_mean)

    # Drop the lane-padding tail and the "wrap-around" columns w in [W, Wp).
    out = out_flat[:, :, :H * Wp].reshape(N, Cout, H, Wp)[:, :, :, :W]
    return out


def inception_block_v1_reference(x_nchw, weights, biases):
    """Pure-JAX reference matching the PyTorch forward exactly."""
    outs = []
    for i, (w, b) in enumerate(zip(weights, biases)):
        o = lax.conv_general_dilated(
            x_nchw, w, window_strides=(1, 1), padding=[(i, i), (i, i)],
            dimension_numbers=('NCHW', 'HWIO', 'NCHW'),
            precision=lax.Precision.HIGHEST)
        outs.append(o + b[None, :, None, None])
    return jnp.mean(jnp.stack(outs, -1), -1)


def _run_case(N, Cin, Cout, H, W, num_kernels, *, seed, bias_scale=0.0):
    key = jax.random.PRNGKey(seed)
    key, kx = jax.random.split(key)
    x = jax.random.normal(kx, (N, Cin, H, W), jnp.float32)
    weights, biases = [], []
    for i in range(num_kernels):
        k = 2 * i + 1
        key, kw, kb = jax.random.split(key, 3)
        # kaiming_normal_(mode='fan_out', nonlinearity='relu'): std = sqrt(2/(Cout*k*k))
        std = (2.0 / (Cout * k * k)) ** 0.5
        weights.append(std * jax.random.normal(kw, (k, k, Cin, Cout), jnp.float32))
        biases.append(bias_scale * jax.random.normal(kb, (Cout,), jnp.float32))
    out = jax.block_until_ready(inception_block_v1(x, weights, biases))
    ref = inception_block_v1_reference(x, weights, biases)
    assert out.shape == ref.shape, (out.shape, ref.shape)
    err = float(jnp.max(jnp.abs(out - ref)))
    assert err < 3e-2, f"max abs err {err}"
    return err


if __name__ == "__main__":
    # Module-consistent toy shapes (bias = 0, as the PyTorch init produces).
    _run_case(2, 4, 8, 16, 16, 6, seed=0, bias_scale=0.0)
    # Exercises the multi-tile + batch-packed path (nb=2, 3 pixel tiles) and the
    # bias plumbing (as if init_weight=False left nonzero Conv2d biases).
    _run_case(4, 3, 8, 24, 40, 3, seed=0, bias_scale=0.1)
    print("KERNEL_OK")
</pallas_src>

<mosaic_0001>
module attributes {stable_mosaic.version = 11 : i64} {
  func.func @_inception_kernel(%arg0: i32, %arg1: i32, %arg2: memref<1x1x16x896xbf16, #tpu.memory_space<vmem>>, %arg3: memref<11x8x176xbf16, #tpu.memory_space<vmem>>, %arg4: memref<8x1xf32, #tpu.memory_space<vmem>>, %arg5: memref<1x8x512xf32, #tpu.memory_space<vmem>>, %arg6: memref<2x176x512xbf16, #tpu.memory_space<vmem>>, %arg7: memref<8x512xf32, #tpu.memory_space<vmem>>) attributes {dimension_semantics = [#tpu.dimension_semantics<parallel>, #tpu.dimension_semantics<parallel>], iteration_bounds = array<i64: 2, 1>, scalar_prefetch = 0 : i64, scratch_operands = 2 : i64, tpu.core_type = #tpu.core_type<tc>, window_params = [{transform_indices = @transform_0, window_bounds = array<i64: 1, 1, 16, 896>}, {pipeline_mode = #tpu.pipeline_mode<synchronous>, transform_indices = @transform_1, window_bounds = array<i64: 11, 8, 176>}, {pipeline_mode = #tpu.pipeline_mode<synchronous>, transform_indices = @transform_2, window_bounds = array<i64: 8, 1>}, {transform_indices = @transform_3, window_bounds = array<i64: 1, 8, 512>}]} {
    %c0 = arith.constant 0 : index
    %c0_0 = arith.constant 0 : index
    %c0_1 = arith.constant 0 : index
    %c0_2 = arith.constant 0 : index
    %0 = vector.load %arg2[%c0, %c0_0, %c0_1, %c0_2] : memref<1x1x16x896xbf16, #tpu.memory_space<vmem>>, vector<1x1x16x512xbf16>
    %1 = vector.shape_cast %0 : vector<1x1x16x512xbf16> to vector<16x512xbf16>
    %c0_3 = arith.constant 0 : index
    %c0_4 = arith.constant 0 : index
    %c0_5 = arith.constant 0 : index
    %2 = vector.load %arg6[%c0_3, %c0_4, %c0_5] : memref<2x176x512xbf16, #tpu.memory_space<vmem>>, vector<1x16x512xbf16>
    %3 = vector.shape_cast %2 : vector<1x16x512xbf16> to vector<16x512xbf16>
    %4 = vector.shape_cast %1 : vector<16x512xbf16> to vector<1x16x512xbf16>
    tpu.vector_store %arg6[%c0_3, %c0_4, %c0_5], %4 {strides = array<i32>} : memref<2x176x512xbf16, #tpu.memory_space<vmem>>, vector<1x16x512xbf16>,
    %c0_6 = arith.constant 0 : index
    %c0_7 = arith.constant 0 : index
    %c0_8 = arith.constant 0 : index
    %c1 = arith.constant 1 : index
    %5 = vector.load %arg2[%c0_6, %c0_7, %c0_8, %c1] : memref<1x1x16x896xbf16, #tpu.memory_space<vmem>>, vector<1x1x16x512xbf16>
    %6 = vector.shape_cast %5 : vector<1x1x16x512xbf16> to vector<16x512xbf16>
    %c0_9 = arith.constant 0 : index
    %c16 = arith.constant 16 : index
    %c0_10 = arith.constant 0 : index
    %7 = vector.load %arg6[%c0_9, %c16, %c0_10] : memref<2x176x512xbf16, #tpu.memory_space<vmem>>, vector<1x16x512xbf16>
    %8 = vector.shape_cast %7 : vector<1x16x512xbf16> to vector<16x512xbf16>
    %9 = vector.shape_cast %6 : vector<16x512xbf16> to vector<1x16x512xbf16>
    tpu.vector_store %arg6[%c0_9, %c16, %c0_10], %9 {strides = array<i32>} : memref<2x176x512xbf16, #tpu.memory_space<vmem>>, vector<1x16x512xbf16>,
    %c0_11 = arith.constant 0 : index
    %c0_12 = arith.constant 0 : index
    %c0_13 = arith.constant 0 : index
    %c2 = arith.constant 2 : index
    %10 = vector.load %arg2[%c0_11, %c0_12, %c0_13, %c2] : memref<1x1x16x896xbf16, #tpu.memory_space<vmem>>, vector<1x1x16x512xbf16>
    %11 = vector.shape_cast %10 : vector<1x1x16x512xbf16> to vector<16x512xbf16>
    %c0_14 = arith.constant 0 : index
    %c32 = arith.constant 32 : index
    %c0_15 = arith.constant 0 : index
    %12 = vector.load %arg6[%c0_14, %c32, %c0_15] : memref<2x176x512xbf16, #tpu.memory_space<vmem>>, vector<1x16x512xbf16>
    %13 = vector.shape_cast %12 : vector<1x16x512xbf16> to vector<16x512xbf16>
    %14 = vector.shape_cast %11 : vector<16x512xbf16> to vector<1x16x512xbf16>
    tpu.vector_store %arg6[%c0_14, %c32, %c0_15], %14 {strides = array<i32>} : memref<2x176x512xbf16, #tpu.memory_space<vmem>>, vector<1x16x512xbf16>,
    %c0_16 = arith.constant 0 : index
    %c0_17 = arith.constant 0 : index
    %c0_18 = arith.constant 0 : index
    %c3 = arith.constant 3 : index
    %15 = vector.load %arg2[%c0_16, %c0_17, %c0_18, %c3] : memref<1x1x16x896xbf16, #tpu.memory_space<vmem>>, vector<1x1x16x512xbf16>
    %16 = vector.shape_cast %15 : vector<1x1x16x512xbf16> to vector<16x512xbf16>
    %c0_19 = arith.constant 0 : index
    %c48 = arith.constant 48 : index
    %c0_20 = arith.constant 0 : index
    %17 = vector.load %arg6[%c0_19, %c48, %c0_20] : memref<2x176x512xbf16, #tpu.memory_space<vmem>>, vector<1x16x512xbf16>
    %18 = vector.shape_cast %17 : vector<1x16x512xbf16> to vector<16x512xbf16>
    %19 = vector.shape_cast %16 : vector<16x512xbf16> to vector<1x16x512xbf16>
    tpu.vector_store %arg6[%c0_19, %c48, %c0_20], %19 {strides = array<i32>} : memref<2x176x512xbf16, #tpu.memory_space<vmem>>, vector<1x16x512xbf16>,
    %c0_21 = arith.constant 0 : index
    %c0_22 = arith.constant 0 : index
    %c0_23 = arith.constant 0 : index
    %c4 = arith.constant 4 : index
    %20 = vector.load %arg2[%c0_21, %c0_22, %c0_23, %c4] : memref<1x1x16x896xbf16, #tpu.memory_space<vmem>>, vector<1x1x16x512xbf16>
    %21 = vector.shape_cast %20 : vector<1x1x16x512xbf16> to vector<16x512xbf16>
    %c0_24 = arith.constant 0 : index
    %c64 = arith.constant 64 : index
    %c0_25 = arith.constant 0 : index
    %22 = vector.load %arg6[%c0_24, %c64, %c0_25] : memref<2x176x512xbf16, #tpu.memory_space<vmem>>, vector<1x16x512xbf16>
    %23 = vector.shape_cast %22 : vector<1x16x512xbf16> to vector<16x512xbf16>
    %24 = vector.shape_cast %21 : vector<16x512xbf16> to vector<1x16x512xbf16>
    tpu.vector_store %arg6[%c0_24, %c64, %c0_25], %24 {strides = array<i32>} : memref<2x176x512xbf16, #tpu.memory_space<vmem>>, vector<1x16x512xbf16>,
    %c0_26 = arith.constant 0 : index
    %c0_27 = arith.constant 0 : index
    %c0_28 = arith.constant 0 : index
    %c5 = arith.constant 5 : index
    %25 = vector.load %arg2[%c0_26, %c0_27, %c0_28, %c5] : memref<1x1x16x896xbf16, #tpu.memory_space<vmem>>, vector<1x1x16x512xbf16>
    %26 = vector.shape_cast %25 : vector<1x1x16x512xbf16> to vector<16x512xbf16>
    %c0_29 = arith.constant 0 : index
    %c80 = arith.constant 80 : index
    %c0_30 = arith.constant 0 : index
    %27 = vector.load %arg6[%c0_29, %c80, %c0_30] : memref<2x176x512xbf16, #tpu.memory_space<vmem>>, vector<1x16x512xbf16>
    %28 = vector.shape_cast %27 : vector<1x16x512xbf16> to vector<16x512xbf16>
    %29 = vector.shape_cast %26 : vector<16x512xbf16> to vector<1x16x512xbf16>
    tpu.vector_store %arg6[%c0_29, %c80, %c0_30], %29 {strides = array<i32>} : memref<2x176x512xbf16, #tpu.memory_space<vmem>>, vector<1x16x512xbf16>,
    %c0_31 = arith.constant 0 : index
    %c0_32 = arith.constant 0 : index
    %c0_33 = arith.constant 0 : index
    %c6 = arith.constant 6 : index
    %30 = vector.load %arg2[%c0_31, %c0_32, %c0_33, %c6] : memref<1x1x16x896xbf16, #tpu.memory_space<vmem>>, vector<1x1x16x512xbf16>
    %31 = vector.shape_cast %30 : vector<1x1x16x512xbf16> to vector<16x512xbf16>
    %c0_34 = arith.constant 0 : index
    %c96 = arith.constant 96 : index
    %c0_35 = arith.constant 0 : index
    %32 = vector.load %arg6[%c0_34, %c96, %c0_35] : memref<2x176x512xbf16, #tpu.memory_space<vmem>>, vector<1x16x512xbf16>
    %33 = vector.shape_cast %32 : vector<1x16x512xbf16> to vector<16x512xbf16>
    %34 = vector.shape_cast %31 : vector<16x512xbf16> to vector<1x16x512xbf16>
    tpu.vector_store %arg6[%c0_34, %c96, %c0_35], %34 {strides = array<i32>} : memref<2x176x512xbf16, #tpu.memory_space<vmem>>, vector<1x16x512xbf16>,
    %c0_36 = arith.constant 0 : index
    %c0_37 = arith.constant 0 : index
    %c0_38 = arith.constant 0 : index
    %c7 = arith.constant 7 : index
    %35 = vector.load %arg2[%c0_36, %c0_37, %c0_38, %c7] : memref<1x1x16x896xbf16, #tpu.memory_space<vmem>>, vector<1x1x16x512xbf16>
    %36 = vector.shape_cast %35 : vector<1x1x16x512xbf16> to vector<16x512xbf16>
    %c0_39 = arith.constant 0 : index
    %c112 = arith.constant 112 : index
    %c0_40 = arith.constant 0 : index
    %37 = vector.load %arg6[%c0_39, %c112, %c0_40] : memref<2x176x512xbf16, #tpu.memory_space<vmem>>, vector<1x16x512xbf16>
    %38 = vector.shape_cast %37 : vector<1x16x512xbf16> to vector<16x512xbf16>
    %39 = vector.shape_cast %36 : vector<16x512xbf16> to vector<1x16x512xbf16>
    tpu.vector_store %arg6[%c0_39, %c112, %c0_40], %39 {strides = array<i32>} : memref<2x176x512xbf16, #tpu.memory_space<vmem>>, vector<1x16x512xbf16>,
    %c0_41 = arith.constant 0 : index
    %c0_42 = arith.constant 0 : index
    %c0_43 = arith.constant 0 : index
    %c8 = arith.constant 8 : index
    %40 = vector.load %arg2[%c0_41, %c0_42, %c0_43, %c8] : memref<1x1x16x896xbf16, #tpu.memory_space<vmem>>, vector<1x1x16x512xbf16>
    %41 = vector.shape_cast %40 : vector<1x1x16x512xbf16> to vector<16x512xbf16>
    %c0_44 = arith.constant 0 : index
    %c128 = arith.constant 128 : index
    %c0_45 = arith.constant 0 : index
    %42 = vector.load %arg6[%c0_44, %c128, %c0_45] : memref<2x176x512xbf16, #tpu.memory_space<vmem>>, vector<1x16x512xbf16>
    %43 = vector.shape_cast %42 : vector<1x16x512xbf16> to vector<16x512xbf16>
    %44 = vector.shape_cast %41 : vector<16x512xbf16> to vector<1x16x512xbf16>
    tpu.vector_store %arg6[%c0_44, %c128, %c0_45], %44 {strides = array<i32>} : memref<2x176x512xbf16, #tpu.memory_space<vmem>>, vector<1x16x512xbf16>,
    %c0_46 = arith.constant 0 : index
    %c0_47 = arith.constant 0 : index
    %c0_48 = arith.constant 0 : index
    %c9 = arith.constant 9 : index
    %45 = vector.load %arg2[%c0_46, %c0_47, %c0_48, %c9] : memref<1x1x16x896xbf16, #tpu.memory_space<vmem>>, vector<1x1x16x512xbf16>
    %46 = vector.shape_cast %45 : vector<1x1x16x512xbf16> to vector<16x512xbf16>
    %c0_49 = arith.constant 0 : index
    %c144 = arith.constant 144 : index
    %c0_50 = arith.constant 0 : index
    %47 = vector.load %arg6[%c0_49, %c144, %c0_50] : memref<2x176x512xbf16, #tpu.memory_space<vmem>>, vector<1x16x512xbf16>
    %48 = vector.shape_cast %47 : vector<1x16x512xbf16> to vector<16x512xbf16>
    %49 = vector.shape_cast %46 : vector<16x512xbf16> to vector<1x16x512xbf16>
    tpu.vector_store %arg6[%c0_49, %c144, %c0_50], %49 {strides = array<i32>} : memref<2x176x512xbf16, #tpu.memory_space<vmem>>, vector<1x16x512xbf16>,
    %c0_51 = arith.constant 0 : index
    %c0_52 = arith.constant 0 : index
    %c0_53 = arith.constant 0 : index
    %c10 = arith.constant 10 : index
    %50 = vector.load %arg2[%c0_51, %c0_52, %c0_53, %c10] : memref<1x1x16x896xbf16, #tpu.memory_space<vmem>>, vector<1x1x16x512xbf16>
    %51 = vector.shape_cast %50 : vector<1x1x16x512xbf16> to vector<16x512xbf16>
    %c0_54 = arith.constant 0 : index
    %c160 = arith.constant 160 : index
    %c0_55 = arith.constant 0 : index
    %52 = vector.load %arg6[%c0_54, %c160, %c0_55] : memref<2x176x512xbf16, #tpu.memory_space<vmem>>, vector<1x16x512xbf16>
    %53 = vector.shape_cast %52 : vector<1x16x512xbf16> to vector<16x512xbf16>
    %54 = vector.shape_cast %51 : vector<16x512xbf16> to vector<1x16x512xbf16>
    tpu.vector_store %arg6[%c0_54, %c160, %c0_55], %54 {strides = array<i32>} : memref<2x176x512xbf16, #tpu.memory_space<vmem>>, vector<1x16x512xbf16>,
    %c0_56 = arith.constant 0 : index
    %c0_57 = arith.constant 0 : index
    %c0_58 = arith.constant 0 : index
    %55 = vector.load %arg3[%c0_56, %c0_57, %c0_58] : memref<11x8x176xbf16, #tpu.memory_space<vmem>>, vector<1x8x176xbf16>
    %56 = vector.shape_cast %55 : vector<1x8x176xbf16> to vector<8x176xbf16>
    %c0_59 = arith.constant 0 : index
    %c0_60 = arith.constant 0 : index
    %c0_61 = arith.constant 0 : index
    %57 = vector.load %arg6[%c0_59, %c0_60, %c0_61] : memref<2x176x512xbf16, #tpu.memory_space<vmem>>, vector<1x176x512xbf16>
    %58 = vector.shape_cast %57 : vector<1x176x512xbf16> to vector<176x512xbf16>
    %cst = arith.constant dense<0.000000e+00> : vector<8x512xf32>
    %59 = tpu.matmul %56, %58, %cst {dimension_numbers = #tpu.dot_dimension_numbers<[1], [0], [0], [1], [0, 0, 1, 1], [], []>} : vector<8x176xbf16>, vector<176x512xbf16>, vector<8x512xf32> -> vector<8x512xf32>
    %c0_62 = arith.constant 0 : index
    %c0_63 = arith.constant 0 : index
    %60 = vector.load %arg7[%c0_62, %c0_63] : memref<8x512xf32, #tpu.memory_space<vmem>>, vector<8x512xf32>
    tpu.vector_store %arg7[%c0_62, %c0_63], %59 {strides = array<i32>} : memref<8x512xf32, #tpu.memory_space<vmem>>, vector<8x512xf32>,
    %c0_64 = arith.constant 0 : index
    %c0_65 = arith.constant 0 : index
    %c0_66 = arith.constant 0 : index
    %c26 = arith.constant 26 : index
    %61 = vector.load %arg2[%c0_64, %c0_65, %c0_66, %c26] : memref<1x1x16x896xbf16, #tpu.memory_space<vmem>>, vector<1x1x16x512xbf16>
    %62 = vector.shape_cast %61 : vector<1x1x16x512xbf16> to vector<16x512xbf16>
    %c1_67 = arith.constant 1 : index
    %c0_68 = arith.constant 0 : index
    %c0_69 = arith.constant 0 : index
    %63 = vector.load %arg6[%c1_67, %c0_68, %c0_69] : memref<2x176x512xbf16, #tpu.memory_space<vmem>>, vector<1x16x512xbf16>
    %64 = vector.shape_cast %63 : vector<1x16x512xbf16> to vector<16x512xbf16>
    %65 = vector.shape_cast %62 : vector<16x512xbf16> to vector<1x16x512xbf16>
    tpu.vector_store %arg6[%c1_67, %c0_68, %c0_69], %65 {strides = array<i32>} : memref<2x176x512xbf16, #tpu.memory_space<vmem>>, vector<1x16x512xbf16>,
    %c0_70 = arith.constant 0 : index
    %c0_71 = arith.constant 0 : index
    %c0_72 = arith.constant 0 : index
    %c27 = arith.constant 27 : index
    %66 = vector.load %arg2[%c0_70, %c0_71, %c0_72, %c27] : memref<1x1x16x896xbf16, #tpu.memory_space<vmem>>, vector<1x1x16x512xbf16>
    %67 = vector.shape_cast %66 : vector<1x1x16x512xbf16> to vector<16x512xbf16>
    %c1_73 = arith.constant 1 : index
    %c16_74 = arith.constant 16 : index
    %c0_75 = arith.constant 0 : index
    %68 = vector.load %arg6[%c1_73, %c16_74, %c0_75] : memref<2x176x512xbf16, #tpu.memory_space<vmem>>, vector<1x16x512xbf16>
    %69 = vector.shape_cast %68 : vector<1x16x512xbf16> to vector<16x512xbf16>
    %70 = vector.shape_cast %67 : vector<16x512xbf16> to vector<1x16x512xbf16>
    tpu.vector_store %arg6[%c1_73, %c16_74, %c0_75], %70 {strides = array<i32>} : memref<2x176x512xbf16, #tpu.memory_space<vmem>>, vector<1x16x512xbf16>,
    %c0_76 = arith.constant 0 : index
    %c0_77 = arith.constant 0 : index
    %c0_78 = arith.constant 0 : index
    %c28 = arith.constant 28 : index
    %71 = vector.load %arg2[%c0_76, %c0_77, %c0_78, %c28] : memref<1x1x16x896xbf16, #tpu.memory_space<vmem>>, vector<1x1x16x512xbf16>
    %72 = vector.shape_cast %71 : vector<1x1x16x512xbf16> to vector<16x512xbf16>
    %c1_79 = arith.constant 1 : index
    %c32_80 = arith.constant 32 : index
    %c0_81 = arith.constant 0 : index
    %73 = vector.load %arg6[%c1_79, %c32_80, %c0_81] : memref<2x176x512xbf16, #tpu.memory_space<vmem>>, vector<1x16x512xbf16>
    %74 = vector.shape_cast %73 : vector<1x16x512xbf16> to vector<16x512xbf16>
    %75 = vector.shape_cast %72 : vector<16x512xbf16> to vector<1x16x512xbf16>
    tpu.vector_store %arg6[%c1_79, %c32_80, %c0_81], %75 {strides = array<i32>} : memref<2x176x512xbf16, #tpu.memory_space<vmem>>, vector<1x16x512xbf16>,
    %c0_82 = arith.constant 0 : index
    %c0_83 = arith.constant 0 : index
    %c0_84 = arith.constant 0 : index
    %c29 = arith.constant 29 : index
    %76 = vector.load %arg2[%c0_82, %c0_83, %c0_84, %c29] : memref<1x1x16x896xbf16, #tpu.memory_space<vmem>>, vector<1x1x16x512xbf16>
    %77 = vector.shape_cast %76 : vector<1x1x16x512xbf16> to vector<16x512xbf16>
    %c1_85 = arith.constant 1 : index
    %c48_86 = arith.constant 48 : index
    %c0_87 = arith.constant 0 : index
    %78 = vector.load %arg6[%c1_85, %c48_86, %c0_87] : memref<2x176x512xbf16, #tpu.memory_space<vmem>>, vector<1x16x512xbf16>
    %79 = vector.shape_cast %78 : vector<1x16x512xbf16> to vector<16x512xbf16>
    %80 = vector.shape_cast %77 : vector<16x512xbf16> to vector<1x16x512xbf16>
    tpu.vector_store %arg6[%c1_85, %c48_86, %c0_87], %80 {strides = array<i32>} : memref<2x176x512xbf16, #tpu.memory_space<vmem>>, vector<1x16x512xbf16>,
    %c0_88 = arith.constant 0 : index
    %c0_89 = arith.constant 0 : index
    %c0_90 = arith.constant 0 : index
    %c30 = arith.constant 30 : index
    %81 = vector.load %arg2[%c0_88, %c0_89, %c0_90, %c30] : memref<1x1x16x896xbf16, #tpu.memory_space<vmem>>, vector<1x1x16x512xbf16>
    %82 = vector.shape_cast %81 : vector<1x1x16x512xbf16> to vector<16x512xbf16>
    %c1_91 = arith.constant 1 : index
    %c64_92 = arith.constant 64 : index
    %c0_93 = arith.constant 0 : index
    %83 = vector.load %arg6[%c1_91, %c64_92, %c0_93] : memref<2x176x512xbf16, #tpu.memory_space<vmem>>, vector<1x16x512xbf16>
    %84 = vector.shape_cast %83 : vector<1x16x512xbf16> to vector<16x512xbf16>
    %85 = vector.shape_cast %82 : vector<16x512xbf16> to vector<1x16x512xbf16>
    tpu.vector_store %arg6[%c1_91, %c64_92, %c0_93], %85 {strides = array<i32>} : memref<2x176x512xbf16, #tpu.memory_space<vmem>>, vector<1x16x512xbf16>,
    %c0_94 = arith.constant 0 : index
    %c0_95 = arith.constant 0 : index
    %c0_96 = arith.constant 0 : index
    %c31 = arith.constant 31 : index
    %86 = vector.load %arg2[%c0_94, %c0_95, %c0_96, %c31] : memref<1x1x16x896xbf16, #tpu.memory_space<vmem>>, vector<1x1x16x512xbf16>
    %87 = vector.shape_cast %86 : vector<1x1x16x512xbf16> to vector<16x512xbf16>
    %c1_97 = arith.constant 1 : index
    %c80_98 = arith.constant 80 : index
    %c0_99 = arith.constant 0 : index
    %88 = vector.load %arg6[%c1_97, %c80_98, %c0_99] : memref<2x176x512xbf16, #tpu.memory_space<vmem>>, vector<1x16x512xbf16>
    %89 = vector.shape_cast %88 : vector<1x16x512xbf16> to vector<16x512xbf16>
    %90 = vector.shape_cast %87 : vector<16x512xbf16> to vector<1x16x512xbf16>
    tpu.vector_store %arg6[%c1_97, %c80_98, %c0_99], %90 {strides = array<i32>} : memref<2x176x512xbf16, #tpu.memory_space<vmem>>, vector<1x16x512xbf16>,
    %c0_100 = arith.constant 0 : index
    %c0_101 = arith.constant 0 : index
    %c0_102 = arith.constant 0 : index
    %c32_103 = arith.constant 32 : index
    %91 = vector.load %arg2[%c0_100, %c0_101, %c0_102, %c32_103] : memref<1x1x16x896xbf16, #tpu.memory_space<vmem>>, vector<1x1x16x512xbf16>
    %92 = vector.shape_cast %91 : vector<1x1x16x512xbf16> to vector<16x512xbf16>
    %c1_104 = arith.constant 1 : index
    %c96_105 = arith.constant 96 : index
    %c0_106 = arith.constant 0 : index
    %93 = vector.load %arg6[%c1_104, %c96_105, %c0_106] : memref<2x176x512xbf16, #tpu.memory_space<vmem>>, vector<1x16x512xbf16>
    %94 = vector.shape_cast %93 : vector<1x16x512xbf16> to vector<16x512xbf16>
    %95 = vector.shape_cast %92 : vector<16x512xbf16> to vector<1x16x512xbf16>
    tpu.vector_store %arg6[%c1_104, %c96_105, %c0_106], %95 {strides = array<i32>} : memref<2x176x512xbf16, #tpu.memory_space<vmem>>, vector<1x16x512xbf16>,
    %c0_107 = arith.constant 0 : index
    %c0_108 = arith.constant 0 : index
    %c0_109 = arith.constant 0 : index
    %c33 = arith.constant 33 : index
    %96 = vector.load %arg2[%c0_107, %c0_108, %c0_109, %c33] : memref<1x1x16x896xbf16, #tpu.memory_space<vmem>>, vector<1x1x16x512xbf16>
    %97 = vector.shape_cast %96 : vector<1x1x16x512xbf16> to vector<16x512xbf16>
    %c1_110 = arith.constant 1 : index
    %c112_111 = arith.constant 112 : index
    %c0_112 = arith.constant 0 : index
    %98 = vector.load %arg6[%c1_110, %c112_111, %c0_112] : memref<2x176x512xbf16, #tpu.memory_space<vmem>>, vector<1x16x512xbf16>
    %99 = vector.shape_cast %98 : vector<1x16x512xbf16> to vector<16x512xbf16>
    %100 = vector.shape_cast %97 : vector<16x512xbf16> to vector<1x16x512xbf16>
    tpu.vector_store %arg6[%c1_110, %c112_111, %c0_112], %100 {strides = array<i32>} : memref<2x176x512xbf16, #tpu.memory_space<vmem>>, vector<1x16x512xbf16>,
    %c0_113 = arith.constant 0 : index
    %c0_114 = arith.constant 0 : index
    %c0_115 = arith.constant 0 : index
    %c34 = arith.constant 34 : index
    %101 = vector.load %arg2[%c0_113, %c0_114, %c0_115, %c34] : memref<1x1x16x896xbf16, #tpu.memory_space<vmem>>, vector<1x1x16x512xbf16>
    %102 = vector.shape_cast %101 : vector<1x1x16x512xbf16> to vector<16x512xbf16>
    %c1_116 = arith.constant 1 : index
    %c128_117 = arith.constant 128 : index
    %c0_118 = arith.constant 0 : index
    %103 = vector.load %arg6[%c1_116, %c128_117, %c0_118] : memref<2x176x512xbf16, #tpu.memory_space<vmem>>, vector<1x16x512xbf16>
    %104 = vector.shape_cast %103 : vector<1x16x512xbf16> to vector<16x512xbf16>
    %105 = vector.shape_cast %102 : vector<16x512xbf16> to vector<1x16x512xbf16>
    tpu.vector_store %arg6[%c1_116, %c128_117, %c0_118], %105 {strides = array<i32>} : memref<2x176x512xbf16, #tpu.memory_space<vmem>>, vector<1x16x512xbf16>,
    %c0_119 = arith.constant 0 : index
    %c0_120 = arith.constant 0 : index
    %c0_121 = arith.constant 0 : index
    %c35 = arith.constant 35 : index
    %106 = vector.load %arg2[%c0_119, %c0_120, %c0_121, %c35] : memref<1x1x16x896xbf16, #tpu.memory_space<vmem>>, vector<1x1x16x512xbf16>
    %107 = vector.shape_cast %106 : vector<1x1x16x512xbf16> to vector<16x512xbf16>
    %c1_122 = arith.constant 1 : index
    %c144_123 = arith.constant 144 : index
    %c0_124 = arith.constant 0 : index
    %108 = vector.load %arg6[%c1_122, %c144_123, %c0_124] : memref<2x176x512xbf16, #tpu.memory_space<vmem>>, vector<1x16x512xbf16>
    %109 = vector.shape_cast %108 : vector<1x16x512xbf16> to vector<16x512xbf16>
    %110 = vector.shape_cast %107 : vector<16x512xbf16> to vector<1x16x512xbf16>
    tpu.vector_store %arg6[%c1_122, %c144_123, %c0_124], %110 {strides = array<i32>} : memref<2x176x512xbf16, #tpu.memory_space<vmem>>, vector<1x16x512xbf16>,
    %c0_125 = arith.constant 0 : index
    %c0_126 = arith.constant 0 : index
    %c0_127 = arith.constant 0 : index
    %c36 = arith.constant 36 : index
    %111 = vector.load %arg2[%c0_125, %c0_126, %c0_127, %c36] : memref<1x1x16x896xbf16, #tpu.memory_space<vmem>>, vector<1x1x16x512xbf16>
    %112 = vector.shape_cast %111 : vector<1x1x16x512xbf16> to vector<16x512xbf16>
    %c1_128 = arith.constant 1 : index
    %c160_129 = arith.constant 160 : index
    %c0_130 = arith.constant 0 : index
    %113 = vector.load %arg6[%c1_128, %c160_129, %c0_130] : memref<2x176x512xbf16, #tpu.memory_space<vmem>>, vector<1x16x512xbf16>
    %114 = vector.shape_cast %113 : vector<1x16x512xbf16> to vector<16x512xbf16>
    %115 = vector.shape_cast %112 : vector<16x512xbf16> to vector<1x16x512xbf16>
    tpu.vector_store %arg6[%c1_128, %c160_129, %c0_130], %115 {strides = array<i32>} : memref<2x176x512xbf16, #tpu.memory_space<vmem>>, vector<1x16x512xbf16>,
    %c1_131 = arith.constant 1 : index
    %c0_132 = arith.constant 0 : index
    %c0_133 = arith.constant 0 : index
    %116 = vector.load %arg3[%c1_131, %c0_132, %c0_133] : memref<11x8x176xbf16, #tpu.memory_space<vmem>>, vector<1x8x176xbf16>
    %117 = vector.shape_cast %116 : vector<1x8x176xbf16> to vector<8x176xbf16>
    %c1_134 = arith.constant 1 : index
    %c0_135 = arith.constant 0 : index
    %c0_136 = arith.constant 0 : index
    %118 = vector.load %arg6[%c1_134, %c0_135, %c0_136] : memref<2x176x512xbf16, #tpu.memory_space<vmem>>, vector<1x176x512xbf16>
    %119 = vector.shape_cast %118 : vector<1x176x512xbf16> to vector<176x512xbf16>
    %cst_137 = arith.constant dense<0.000000e+00> : vector<8x512xf32>
    %120 = tpu.matmul %117, %119, %cst_137 {dimension_numbers = #tpu.dot_dimension_numbers<[1], [0], [0], [1], [0, 0, 1, 1], [], []>} : vector<8x176xbf16>, vector<176x512xbf16>, vector<8x512xf32> -> vector<8x512xf32>
    %c0_138 = arith.constant 0 : index
    %c0_139 = arith.constant 0 : index
    %121 = vector.load %arg7[%c0_138, %c0_139] : memref<8x512xf32, #tpu.memory_space<vmem>>, vector<8x512xf32>
    %122 = arith.addf %121, %120 : vector<8x512xf32>
    %c0_140 = arith.constant 0 : index
    %c0_141 = arith.constant 0 : index
    %123 = vector.load %arg7[%c0_140, %c0_141] : memref<8x512xf32, #tpu.memory_space<vmem>>, vector<8x512xf32>
    tpu.vector_store %arg7[%c0_140, %c0_141], %122 {strides = array<i32>} : memref<8x512xf32, #tpu.memory_space<vmem>>, vector<8x512xf32>,
    %c0_142 = arith.constant 0 : index
    %c0_143 = arith.constant 0 : index
    %c0_144 = arith.constant 0 : index
    %c52 = arith.constant 52 : index
    %124 = vector.load %arg2[%c0_142, %c0_143, %c0_144, %c52] : memref<1x1x16x896xbf16, #tpu.memory_space<vmem>>, vector<1x1x16x512xbf16>
    %125 = vector.shape_cast %124 : vector<1x1x16x512xbf16> to vector<16x512xbf16>
    %c0_145 = arith.constant 0 : index
    %c0_146 = arith.constant 0 : index
    %c0_147 = arith.constant 0 : index
    %126 = vector.load %arg6[%c0_145, %c0_146, %c0_147] : memref<2x176x512xbf16, #tpu.memory_space<vmem>>, vector<1x16x512xbf16>
    %127 = vector.shape_cast %126 : vector<1x16x512xbf16> to vector<16x512xbf16>
    %128 = vector.shape_cast %125 : vector<16x512xbf16> to vector<1x16x512xbf16>
    tpu.vector_store %arg6[%c0_145, %c0_146, %c0_147], %128 {strides = array<i32>} : memref<2x176x512xbf16, #tpu.memory_space<vmem>>, vector<1x16x512xbf16>,
    %c0_148 = arith.constant 0 : index
    %c0_149 = arith.constant 0 : index
    %c0_150 = arith.constant 0 : index
    %c53 = arith.constant 53 : index
    %129 = vector.load %arg2[%c0_148, %c0_149, %c0_150, %c53] : memref<1x1x16x896xbf16, #tpu.memory_space<vmem>>, vector<1x1x16x512xbf16>
    %130 = vector.shape_cast %129 : vector<1x1x16x512xbf16> to vector<16x512xbf16>
    %c0_151 = arith.constant 0 : index
    %c16_152 = arith.constant 16 : index
    %c0_153 = arith.constant 0 : index
    %131 = vector.load %arg6[%c0_151, %c16_152, %c0_153] : memref<2x176x512xbf16, #tpu.memory_space<vmem>>, vector<1x16x512xbf16>
    %132 = vector.shape_cast %131 : vector<1x16x512xbf16> to vector<16x512xbf16>
    %133 = vector.shape_cast %130 : vector<16x512xbf16> to vector<1x16x512xbf16>
    tpu.vector_store %arg6[%c0_151, %c16_152, %c0_153], %133 {strides = array<i32>} : memref<2x176x512xbf16, #tpu.memory_space<vmem>>, vector<1x16x512xbf16>,
    %c0_154 = arith.constant 0 : index
    %c0_155 = arith.constant 0 : index
    %c0_156 = arith.constant 0 : index
    %c54 = arith.constant 54 : index
    %134 = vector.load %arg2[%c0_154, %c0_155, %c0_156, %c54] : memref<1x1x16x896xbf16, #tpu.memory_space<vmem>>, vector<1x1x16x512xbf16>
    %135 = vector.shape_cast %134 : vector<1x1x16x512xbf16> to vector<16x512xbf16>
    %c0_157 = arith.constant 0 : index
    %c32_158 = arith.constant 32 : index
    %c0_159 = arith.constant 0 : index
    %136 = vector.load %arg6[%c0_157, %c32_158, %c0_159] : memref<2x176x512xbf16, #tpu.memory_space<vmem>>, vector<1x16x512xbf16>
    %137 = vector.shape_cast %136 : vector<1x16x512xbf16> to vector<16x512xbf16>
    %138 = vector.shape_cast %135 : vector<16x512xbf16> to vector<1x16x512xbf16>
    tpu.vector_store %arg6[%c0_157, %c32_158, %c0_159], %138 {strides = array<i32>} : memref<2x176x512xbf16, #tpu.memory_space<vmem>>, vector<1x16x512xbf16>,
    %c0_160 = arith.constant 0 : index
    %c0_161 = arith.constant 0 : index
    %c0_162 = arith.constant 0 : index
    %c55 = arith.constant 55 : index
    %139 = vector.load %arg2[%c0_160, %c0_161, %c0_162, %c55] : memref<1x1x16x896xbf16, #tpu.memory_space<vmem>>, vector<1x1x16x512xbf16>
    %140 = vector.shape_cast %139 : vector<1x1x16x512xbf16> to vector<16x512xbf16>
    %c0_163 = arith.constant 0 : index
    %c48_164 = arith.constant 48 : index
    %c0_165 = arith.constant 0 : index
    %141 = vector.load %arg6[%c0_163, %c48_164, %c0_165] : memref<2x176x512xbf16, #tpu.memory_space<vmem>>, vector<1x16x512xbf16>
    %142 = vector.shape_cast %141 : vector<1x16x512xbf16> to vector<16x512xbf16>
    %143 = vector.shape_cast %140 : vector<16x512xbf16> to vector<1x16x512xbf16>
    tpu.vector_store %arg6[%c0_163, %c48_164, %c0_165], %143 {strides = array<i32>} : memref<2x176x512xbf16, #tpu.memory_space<vmem>>, vector<1x16x512xbf16>,
    %c0_166 = arith.constant 0 : index
    %c0_167 = arith.constant 0 : index
    %c0_168 = arith.constant 0 : index
    %c56 = arith.constant 56 : index
    %144 = vector.load %arg2[%c0_166, %c0_167, %c0_168, %c56] : memref<1x1x16x896xbf16, #tpu.memory_space<vmem>>, vector<1x1x16x512xbf16>
    %145 = vector.shape_cast %144 : vector<1x1x16x512xbf16> to vector<16x512xbf16>
    %c0_169 = arith.constant 0 : index
    %c64_170 = arith.constant 64 : index
    %c0_171 = arith.constant 0 : index
    %146 = vector.load %arg6[%c0_169, %c64_170, %c0_171] : memref<2x176x512xbf16, #tpu.memory_space<vmem>>, vector<1x16x512xbf16>
    %147 = vector.shape_cast %146 : vector<1x16x512xbf16> to vector<16x512xbf16>
    %148 = vector.shape_cast %145 : vector<16x512xbf16> to vector<1x16x512xbf16>
    tpu.vector_store %arg6[%c0_169, %c64_170, %c0_171], %148 {strides = array<i32>} : memref<2x176x512xbf16, #tpu.memory_space<vmem>>, vector<1x16x512xbf16>,
    %c0_172 = arith.constant 0 : index
    %c0_173 = arith.constant 0 : index
    %c0_174 = arith.constant 0 : index
    %c57 = arith.constant 57 : index
    %149 = vector.load %arg2[%c0_172, %c0_173, %c0_174, %c57] : memref<1x1x16x896xbf16, #tpu.memory_space<vmem>>, vector<1x1x16x512xbf16>
    %150 = vector.shape_cast %149 : vector<1x1x16x512xbf16> to vector<16x512xbf16>
    %c0_175 = arith.constant 0 : index
    %c80_176 = arith.constant 80 : index
    %c0_177 = arith.constant 0 : index
    %151 = vector.load %arg6[%c0_175, %c80_176, %c0_177] : memref<2x176x512xbf16, #tpu.memory_space<vmem>>, vector<1x16x512xbf16>
    %152 = vector.shape_cast %151 : vector<1x16x512xbf16> to vector<16x512xbf16>
    %153 = vector.shape_cast %150 : vector<16x512xbf16> to vector<1x16x512xbf16>
    tpu.vector_store %arg6[%c0_175, %c80_176, %c0_177], %153 {strides = array<i32>} : memref<2x176x512xbf16, #tpu.memory_space<vmem>>, vector<1x16x512xbf16>,
    %c0_178 = arith.constant 0 : index
    %c0_179 = arith.constant 0 : index
    %c0_180 = arith.constant 0 : index
    %c58 = arith.constant 58 : index
    %154 = vector.load %arg2[%c0_178, %c0_179, %c0_180, %c58] : memref<1x1x16x896xbf16, #tpu.memory_space<vmem>>, vector<1x1x16x512xbf16>
    %155 = vector.shape_cast %154 : vector<1x1x16x512xbf16> to vector<16x512xbf16>
    %c0_181 = arith.constant 0 : index
    %c96_182 = arith.constant 96 : index
    %c0_183 = arith.constant 0 : index
    %156 = vector.load %arg6[%c0_181, %c96_182, %c0_183] : memref<2x176x512xbf16, #tpu.memory_space<vmem>>, vector<1x16x512xbf16>
    %157 = vector.shape_cast %156 : vector<1x16x512xbf16> to vector<16x512xbf16>
    %158 = vector.shape_cast %155 : vector<16x512xbf16> to vector<1x16x512xbf16>
    tpu.vector_store %arg6[%c0_181, %c96_182, %c0_183], %158 {strides = array<i32>} : memref<2x176x512xbf16, #tpu.memory_space<vmem>>, vector<1x16x512xbf16>,
    %c0_184 = arith.constant 0 : index
    %c0_185 = arith.constant 0 : index
    %c0_186 = arith.constant 0 : index
    %c59 = arith.constant 59 : index
    %159 = vector.load %arg2[%c0_184, %c0_185, %c0_186, %c59] : memref<1x1x16x896xbf16, #tpu.memory_space<vmem>>, vector<1x1x16x512xbf16>
    %160 = vector.shape_cast %159 : vector<1x1x16x512xbf16> to vector<16x512xbf16>
    %c0_187 = arith.constant 0 : index
    %c112_188 = arith.constant 112 : index
    %c0_189 = arith.constant 0 : index
    %161 = vector.load %arg6[%c0_187, %c112_188, %c0_189] : memref<2x176x512xbf16, #tpu.memory_space<vmem>>, vector<1x16x512xbf16>
    %162 = vector.shape_cast %161 : vector<1x16x512xbf16> to vector<16x512xbf16>
    %163 = vector.shape_cast %160 : vector<16x512xbf16> to vector<1x16x512xbf16>
    tpu.vector_store %arg6[%c0_187, %c112_188, %c0_189], %163 {strides = array<i32>} : memref<2x176x512xbf16, #tpu.memory_space<vmem>>, vector<1x16x512xbf16>,
    %c0_190 = arith.constant 0 : index
    %c0_191 = arith.constant 0 : index
    %c0_192 = arith.constant 0 : index
    %c60 = arith.constant 60 : index
    %164 = vector.load %arg2[%c0_190, %c0_191, %c0_192, %c60] : memref<1x1x16x896xbf16, #tpu.memory_space<vmem>>, vector<1x1x16x512xbf16>
    %165 = vector.shape_cast %164 : vector<1x1x16x512xbf16> to vector<16x512xbf16>
    %c0_193 = arith.constant 0 : index
    %c128_194 = arith.constant 128 : index
    %c0_195 = arith.constant 0 : index
    %166 = vector.load %arg6[%c0_193, %c128_194, %c0_195] : memref<2x176x512xbf16, #tpu.memory_space<vmem>>, vector<1x16x512xbf16>
    %167 = vector.shape_cast %166 : vector<1x16x512xbf16> to vector<16x512xbf16>
    %168 = vector.shape_cast %165 : vector<16x512xbf16> to vector<1x16x512xbf16>
    tpu.vector_store %arg6[%c0_193, %c128_194, %c0_195], %168 {strides = array<i32>} : memref<2x176x512xbf16, #tpu.memory_space<vmem>>, vector<1x16x512xbf16>,
    %c0_196 = arith.constant 0 : index
    %c0_197 = arith.constant 0 : index
    %c0_198 = arith.constant 0 : index
    %c61 = arith.constant 61 : index
    %169 = vector.load %arg2[%c0_196, %c0_197, %c0_198, %c61] : memref<1x1x16x896xbf16, #tpu.memory_space<vmem>>, vector<1x1x16x512xbf16>
    %170 = vector.shape_cast %169 : vector<1x1x16x512xbf16> to vector<16x512xbf16>
    %c0_199 = arith.constant 0 : index
    %c144_200 = arith.constant 144 : index
    %c0_201 = arith.constant 0 : index
    %171 = vector.load %arg6[%c0_199, %c144_200, %c0_201] : memref<2x176x512xbf16, #tpu.memory_space<vmem>>, vector<1x16x512xbf16>
    %172 = vector.shape_cast %171 : vector<1x16x512xbf16> to vector<16x512xbf16>
    %173 = vector.shape_cast %170 : vector<16x512xbf16> to vector<1x16x512xbf16>
    tpu.vector_store %arg6[%c0_199, %c144_200, %c0_201], %173 {strides = array<i32>} : memref<2x176x512xbf16, #tpu.memory_space<vmem>>, vector<1x16x512xbf16>,
    %c0_202 = arith.constant 0 : index
    %c0_203 = arith.constant 0 : index
    %c0_204 = arith.constant 0 : index
    %c62 = arith.constant 62 : index
    %174 = vector.load %arg2[%c0_202, %c0_203, %c0_204, %c62] : memref<1x1x16x896xbf16, #tpu.memory_space<vmem>>, vector<1x1x16x512xbf16>
    %175 = vector.shape_cast %174 : vector<1x1x16x512xbf16> to vector<16x512xbf16>
    %c0_205 = arith.constant 0 : index
    %c160_206 = arith.constant 160 : index
    %c0_207 = arith.constant 0 : index
    %176 = vector.load %arg6[%c0_205, %c160_206, %c0_207] : memref<2x176x512xbf16, #tpu.memory_space<vmem>>, vector<1x16x512xbf16>
    %177 = vector.shape_cast %176 : vector<1x16x512xbf16> to vector<16x512xbf16>
    %178 = vector.shape_cast %175 : vector<16x512xbf16> to vector<1x16x512xbf16>
    tpu.vector_store %arg6[%c0_205, %c160_206, %c0_207], %178 {strides = array<i32>} : memref<2x176x512xbf16, #tpu.memory_space<vmem>>, vector<1x16x512xbf16>,
    %c2_208 = arith.constant 2 : index
    %c0_209 = arith.constant 0 : index
    %c0_210 = arith.constant 0 : index
    %179 = vector.load %arg3[%c2_208, %c0_209, %c0_210] : memref<11x8x176xbf16, #tpu.memory_space<vmem>>, vector<1x8x176xbf16>
    %180 = vector.shape_cast %179 : vector<1x8x176xbf16> to vector<8x176xbf16>
    %c0_211 = arith.constant 0 : index
    %c0_212 = arith.constant 0 : index
    %c0_213 = arith.constant 0 : index
    %181 = vector.load %arg6[%c0_211, %c0_212, %c0_213] : memref<2x176x512xbf16, #tpu.memory_space<vmem>>, vector<1x176x512xbf16>
    %182 = vector.shape_cast %181 : vector<1x176x512xbf16> to vector<176x512xbf16>
    %cst_214 = arith.constant dense<0.000000e+00> : vector<8x512xf32>
    %183 = tpu.matmul %180, %182, %cst_214 {dimension_numbers = #tpu.dot_dimension_numbers<[1], [0], [0], [1], [0, 0, 1, 1], [], []>} : vector<8x176xbf16>, vector<176x512xbf16>, vector<8x512xf32> -> vector<8x512xf32>
    %c0_215 = arith.constant 0 : index
    %c0_216 = arith.constant 0 : index
    %184 = vector.load %arg7[%c0_215, %c0_216] : memref<8x512xf32, #tpu.memory_space<vmem>>, vector<8x512xf32>
    %185 = arith.addf %184, %183 : vector<8x512xf32>
    %c0_217 = arith.constant 0 : index
    %c0_218 = arith.constant 0 : index
    %186 = vector.load %arg7[%c0_217, %c0_218] : memref<8x512xf32, #tpu.memory_space<vmem>>, vector<8x512xf32>
    tpu.vector_store %arg7[%c0_217, %c0_218], %185 {strides = array<i32>} : memref<8x512xf32, #tpu.memory_space<vmem>>, vector<8x512xf32>,
    %c0_219 = arith.constant 0 : index
    %c0_220 = arith.constant 0 : index
    %c0_221 = arith.constant 0 : index
    %c78 = arith.constant 78 : index
    %187 = vector.load %arg2[%c0_219, %c0_220, %c0_221, %c78] : memref<1x1x16x896xbf16, #tpu.memory_space<vmem>>, vector<1x1x16x512xbf16>
    %188 = vector.shape_cast %187 : vector<1x1x16x512xbf16> to vector<16x512xbf16>
    %c1_222 = arith.constant 1 : index
    %c0_223 = arith.constant 0 : index
    %c0_224 = arith.constant 0 : index
    %189 = vector.load %arg6[%c1_222, %c0_223, %c0_224] : memref<2x176x512xbf16, #tpu.memory_space<vmem>>, vector<1x16x512xbf16>
    %190 = vector.shape_cast %189 : vector<1x16x512xbf16> to vector<16x512xbf16>
    %191 = vector.shape_cast %188 : vector<16x512xbf16> to vector<1x16x512xbf16>
    tpu.vector_store %arg6[%c1_222, %c0_223, %c0_224], %191 {strides = array<i32>} : memref<2x176x512xbf16, #tpu.memory_space<vmem>>, vector<1x16x512xbf16>,
    %c0_225 = arith.constant 0 : index
    %c0_226 = arith.constant 0 : index
    %c0_227 = arith.constant 0 : index
    %c79 = arith.constant 79 : index
    %192 = vector.load %arg2[%c0_225, %c0_226, %c0_227, %c79] : memref<1x1x16x896xbf16, #tpu.memory_space<vmem>>, vector<1x1x16x512xbf16>
    %193 = vector.shape_cast %192 : vector<1x1x16x512xbf16> to vector<16x512xbf16>
    %c1_228 = arith.constant 1 : index
    %c16_229 = arith.constant 16 : index
    %c0_230 = arith.constant 0 : index
    %194 = vector.load %arg6[%c1_228, %c16_229, %c0_230] : memref<2x176x512xbf16, #tpu.memory_space<vmem>>, vector<1x16x512xbf16>
    %195 = vector.shape_cast %194 : vector<1x16x512xbf16> to vector<16x512xbf16>
    %196 = vector.shape_cast %193 : vector<16x512xbf16> to vector<1x16x512xbf16>
    tpu.vector_store %arg6[%c1_228, %c16_229, %c0_230], %196 {strides = array<i32>} : memref<2x176x512xbf16, #tpu.memory_space<vmem>>, vector<1x16x512xbf16>,
    %c0_231 = arith.constant 0 : index
    %c0_232 = arith.constant 0 : index
    %c0_233 = arith.constant 0 : index
    %c80_234 = arith.constant 80 : index
    %197 = vector.load %arg2[%c0_231, %c0_232, %c0_233, %c80_234] : memref<1x1x16x896xbf16, #tpu.memory_space<vmem>>, vector<1x1x16x512xbf16>
    %198 = vector.shape_cast %197 : vector<1x1x16x512xbf16> to vector<16x512xbf16>
    %c1_235 = arith.constant 1 : index
    %c32_236 = arith.constant 32 : index
    %c0_237 = arith.constant 0 : index
    %199 = vector.load %arg6[%c1_235, %c32_236, %c0_237] : memref<2x176x512xbf16, #tpu.memory_space<vmem>>, vector<1x16x512xbf16>
    %200 = vector.shape_cast %199 : vector<1x16x512xbf16> to vector<16x512xbf16>
    %201 = vector.shape_cast %198 : vector<16x512xbf16> to vector<1x16x512xbf16>
    tpu.vector_store %arg6[%c1_235, %c32_236, %c0_237], %201 {strides = array<i32>} : memref<2x176x512xbf16, #tpu.memory_space<vmem>>, vector<1x16x512xbf16>,
    %c0_238 = arith.constant 0 : index
    %c0_239 = arith.constant 0 : index
    %c0_240 = arith.constant 0 : index
    %c81 = arith.constant 81 : index
    %202 = vector.load %arg2[%c0_238, %c0_239, %c0_240, %c81] : memref<1x1x16x896xbf16, #tpu.memory_space<vmem>>, vector<1x1x16x512xbf16>
    %203 = vector.shape_cast %202 : vector<1x1x16x512xbf16> to vector<16x512xbf16>
    %c1_241 = arith.constant 1 : index
    %c48_242 = arith.constant 48 : index
    %c0_243 = arith.constant 0 : index
    %204 = vector.load %arg6[%c1_241, %c48_242, %c0_243] : memref<2x176x512xbf16, #tpu.memory_space<vmem>>, vector<1x16x512xbf16>
    %205 = vector.shape_cast %204 : vector<1x16x512xbf16> to vector<16x512xbf16>
    %206 = vector.shape_cast %203 : vector<16x512xbf16> to vector<1x16x512xbf16>
    tpu.vector_store %arg6[%c1_241, %c48_242, %c0_243], %206 {strides = array<i32>} : memref<2x176x512xbf16, #tpu.memory_space<vmem>>, vector<1x16x512xbf16>,
    %c0_244 = arith.constant 0 : index
    %c0_245 = arith.constant 0 : index
    %c0_246 = arith.constant 0 : index
    %c82 = arith.constant 82 : index
    %207 = vector.load %arg2[%c0_244, %c0_245, %c0_246, %c82] : memref<1x1x16x896xbf16, #tpu.memory_space<vmem>>, vector<1x1x16x512xbf16>
    %208 = vector.shape_cast %207 : vector<1x1x16x512xbf16> to vector<16x512xbf16>
    %c1_247 = arith.constant 1 : index
    %c64_248 = arith.constant 64 : index
    %c0_249 = arith.constant 0 : index
    %209 = vector.load %arg6[%c1_247, %c64_248, %c0_249] : memref<2x176x512xbf16, #tpu.memory_space<vmem>>, vector<1x16x512xbf16>
    %210 = vector.shape_cast %209 : vector<1x16x512xbf16> to vector<16x512xbf16>
    %211 = vector.shape_cast %208 : vector<16x512xbf16> to vector<1x16x512xbf16>
    tpu.vector_store %arg6[%c1_247, %c64_248, %c0_249], %211 {strides = array<i32>} : memref<2x176x512xbf16, #tpu.memory_space<vmem>>, vector<1x16x512xbf16>,
    %c0_250 = arith.constant 0 : index
    %c0_251 = arith.constant 0 : index
    %c0_252 = arith.constant 0 : index
    %c83 = arith.constant 83 : index
    %212 = vector.load %arg2[%c0_250, %c0_251, %c0_252, %c83] : memref<1x1x16x896xbf16, #tpu.memory_space<vmem>>, vector<1x1x16x512xbf16>
    %213 = vector.shape_cast %212 : vector<1x1x16x512xbf16> to vector<16x512xbf16>
    %c1_253 = arith.constant 1 : index
    %c80_254 = arith.constant 80 : index
    %c0_255 = arith.constant 0 : index
    %214 = vector.load %arg6[%c1_253, %c80_254, %c0_255] : memref<2x176x512xbf16, #tpu.memory_space<vmem>>, vector<1x16x512xbf16>
    %215 = vector.shape_cast %214 : vector<1x16x512xbf16> to vector<16x512xbf16>
    %216 = vector.shape_cast %213 : vector<16x512xbf16> to vector<1x16x512xbf16>
    tpu.vector_store %arg6[%c1_253, %c80_254, %c0_255], %216 {strides = array<i32>} : memref<2x176x512xbf16, #tpu.memory_space<vmem>>, vector<1x16x512xbf16>,
    %c0_256 = arith.constant 0 : index
    %c0_257 = arith.constant 0 : index
    %c0_258 = arith.constant 0 : index
    %c84 = arith.constant 84 : index
    %217 = vector.load %arg2[%c0_256, %c0_257, %c0_258, %c84] : memref<1x1x16x896xbf16, #tpu.memory_space<vmem>>, vector<1x1x16x512xbf16>
    %218 = vector.shape_cast %217 : vector<1x1x16x512xbf16> to vector<16x512xbf16>
    %c1_259 = arith.constant 1 : index
    %c96_260 = arith.constant 96 : index
    %c0_261 = arith.constant 0 : index
    %219 = vector.load %arg6[%c1_259, %c96_260, %c0_261] : memref<2x176x512xbf16, #tpu.memory_space<vmem>>, vector<1x16x512xbf16>
    %220 = vector.shape_cast %219 : vector<1x16x512xbf16> to vector<16x512xbf16>
    %221 = vector.shape_cast %218 : vector<16x512xbf16> to vector<1x16x512xbf16>
    tpu.vector_store %arg6[%c1_259, %c96_260, %c0_261], %221 {strides = array<i32>} : memref<2x176x512xbf16, #tpu.memory_space<vmem>>, vector<1x16x512xbf16>,
    %c0_262 = arith.constant 0 : index
    %c0_263 = arith.constant 0 : index
    %c0_264 = arith.constant 0 : index
    %c85 = arith.constant 85 : index
    %222 = vector.load %arg2[%c0_262, %c0_263, %c0_264, %c85] : memref<1x1x16x896xbf16, #tpu.memory_space<vmem>>, vector<1x1x16x512xbf16>
    %223 = vector.shape_cast %222 : vector<1x1x16x512xbf16> to vector<16x512xbf16>
    %c1_265 = arith.constant 1 : index
    %c112_266 = arith.constant 112 : index
    %c0_267 = arith.constant 0 : index
    %224 = vector.load %arg6[%c1_265, %c112_266, %c0_267] : memref<2x176x512xbf16, #tpu.memory_space<vmem>>, vector<1x16x512xbf16>
    %225 = vector.shape_cast %224 : vector<1x16x512xbf16> to vector<16x512xbf16>
    %226 = vector.shape_cast %223 : vector<16x512xbf16> to vector<1x16x512xbf16>
    tpu.vector_store %arg6[%c1_265, %c112_266, %c0_267], %226 {strides = array<i32>} : memref<2x176x512xbf16, #tpu.memory_space<vmem>>, vector<1x16x512xbf16>,
    %c0_268 = arith.constant 0 : index
    %c0_269 = arith.constant 0 : index
    %c0_270 = arith.constant 0 : index
    %c86 = arith.constant 86 : index
    %227 = vector.load %arg2[%c0_268, %c0_269, %c0_270, %c86] : memref<1x1x16x896xbf16, #tpu.memory_space<vmem>>, vector<1x1x16x512xbf16>
    %228 = vector.shape_cast %227 : vector<1x1x16x512xbf16> to vector<16x512xbf16>
    %c1_271 = arith.constant 1 : index
    %c128_272 = arith.constant 128 : index
    %c0_273 = arith.constant 0 : index
    %229 = vector.load %arg6[%c1_271, %c128_272, %c0_273] : memref<2x176x512xbf16, #tpu.memory_space<vmem>>, vector<1x16x512xbf16>
    %230 = vector.shape_cast %229 : vector<1x16x512xbf16> to vector<16x512xbf16>
    %231 = vector.shape_cast %228 : vector<16x512xbf16> to vector<1x16x512xbf16>
    tpu.vector_store %arg6[%c1_271, %c128_272, %c0_273], %231 {strides = array<i32>} : memref<2x176x512xbf16, #tpu.memory_space<vmem>>, vector<1x16x512xbf16>,
    %c0_274 = arith.constant 0 : index
    %c0_275 = arith.constant 0 : index
    %c0_276 = arith.constant 0 : index
    %c87 = arith.constant 87 : index
    %232 = vector.load %arg2[%c0_274, %c0_275, %c0_276, %c87] : memref<1x1x16x896xbf16, #tpu.memory_space<vmem>>, vector<1x1x16x512xbf16>
    %233 = vector.shape_cast %232 : vector<1x1x16x512xbf16> to vector<16x512xbf16>
    %c1_277 = arith.constant 1 : index
    %c144_278 = arith.constant 144 : index
    %c0_279 = arith.constant 0 : index
    %234 = vector.load %arg6[%c1_277, %c144_278, %c0_279] : memref<2x176x512xbf16, #tpu.memory_space<vmem>>, vector<1x16x512xbf16>
    %235 = vector.shape_cast %234 : vector<1x16x512xbf16> to vector<16x512xbf16>
    %236 = vector.shape_cast %233 : vector<16x512xbf16> to vector<1x16x512xbf16>
    tpu.vector_store %arg6[%c1_277, %c144_278, %c0_279], %236 {strides = array<i32>} : memref<2x176x512xbf16, #tpu.memory_space<vmem>>, vector<1x16x512xbf16>,
    %c0_280 = arith.constant 0 : index
    %c0_281 = arith.constant 0 : index
    %c0_282 = arith.constant 0 : index
    %c88 = arith.constant 88 : index
    %237 = vector.load %arg2[%c0_280, %c0_281, %c0_282, %c88] : memref<1x1x16x896xbf16, #tpu.memory_space<vmem>>, vector<1x1x16x512xbf16>
    %238 = vector.shape_cast %237 : vector<1x1x16x512xbf16> to vector<16x512xbf16>
    %c1_283 = arith.constant 1 : index
    %c160_284 = arith.constant 160 : index
    %c0_285 = arith.constant 0 : index
    %239 = vector.load %arg6[%c1_283, %c160_284, %c0_285] : memref<2x176x512xbf16, #tpu.memory_space<vmem>>, vector<1x16x512xbf16>
    %240 = vector.shape_cast %239 : vector<1x16x512xbf16> to vector<16x512xbf16>
    %241 = vector.shape_cast %238 : vector<16x512xbf16> to vector<1x16x512xbf16>
    tpu.vector_store %arg6[%c1_283, %c160_284, %c0_285], %241 {strides = array<i32>} : memref<2x176x512xbf16, #tpu.memory_space<vmem>>, vector<1x16x512xbf16>,
    %c3_286 = arith.constant 3 : index
    %c0_287 = arith.constant 0 : index
    %c0_288 = arith.constant 0 : index
    %242 = vector.load %arg3[%c3_286, %c0_287, %c0_288] : memref<11x8x176xbf16, #tpu.memory_space<vmem>>, vector<1x8x176xbf16>
    %243 = vector.shape_cast %242 : vector<1x8x176xbf16> to vector<8x176xbf16>
    %c1_289 = arith.constant 1 : index
    %c0_290 = arith.constant 0 : index
    %c0_291 = arith.constant 0 : index
    %244 = vector.load %arg6[%c1_289, %c0_290, %c0_291] : memref<2x176x512xbf16, #tpu.memory_space<vmem>>, vector<1x176x512xbf16>
    %245 = vector.shape_cast %244 : vector<1x176x512xbf16> to vector<176x512xbf16>
    %cst_292 = arith.constant dense<0.000000e+00> : vector<8x512xf32>
    %246 = tpu.matmul %243, %245, %cst_292 {dimension_numbers = #tpu.dot_dimension_numbers<[1], [0], [0], [1], [0, 0, 1, 1], [], []>} : vector<8x176xbf16>, vector<176x512xbf16>, vector<8x512xf32> -> vector<8x512xf32>
    %c0_293 = arith.constant 0 : index
    %c0_294 = arith.constant 0 : index
    %247 = vector.load %arg7[%c0_293, %c0_294] : memref<8x512xf32, #tpu.memory_space<vmem>>, vector<8x512xf32>
    %248 = arith.addf %247, %246 : vector<8x512xf32>
    %c0_295 = arith.constant 0 : index
    %c0_296 = arith.constant 0 : index
    %249 = vector.load %arg7[%c0_295, %c0_296] : memref<8x512xf32, #tpu.memory_space<vmem>>, vector<8x512xf32>
    tpu.vector_store %arg7[%c0_295, %c0_296], %248 {strides = array<i32>} : memref<8x512xf32, #tpu.memory_space<vmem>>, vector<8x512xf32>,
    %c0_297 = arith.constant 0 : index
    %c0_298 = arith.constant 0 : index
    %c0_299 = arith.constant 0 : index
    %c104 = arith.constant 104 : index
    %250 = vector.load %arg2[%c0_297, %c0_298, %c0_299, %c104] : memref<1x1x16x896xbf16, #tpu.memory_space<vmem>>, vector<1x1x16x512xbf16>
    %251 = vector.shape_cast %250 : vector<1x1x16x512xbf16> to vector<16x512xbf16>
    %c0_300 = arith.constant 0 : index
    %c0_301 = arith.constant 0 : index
    %c0_302 = arith.constant 0 : index
    %252 = vector.load %arg6[%c0_300, %c0_301, %c0_302] : memref<2x176x512xbf16, #tpu.memory_space<vmem>>, vector<1x16x512xbf16>
    %253 = vector.shape_cast %252 : vector<1x16x512xbf16> to vector<16x512xbf16>
    %254 = vector.shape_cast %251 : vector<16x512xbf16> to vector<1x16x512xbf16>
    tpu.vector_store %arg6[%c0_300, %c0_301, %c0_302], %254 {strides = array<i32>} : memref<2x176x512xbf16, #tpu.memory_space<vmem>>, vector<1x16x512xbf16>,
    %c0_303 = arith.constant 0 : index
    %c0_304 = arith.constant 0 : index
    %c0_305 = arith.constant 0 : index
    %c105 = arith.constant 105 : index
    %255 = vector.load %arg2[%c0_303, %c0_304, %c0_305, %c105] : memref<1x1x16x896xbf16, #tpu.memory_space<vmem>>, vector<1x1x16x512xbf16>
    %256 = vector.shape_cast %255 : vector<1x1x16x512xbf16> to vector<16x512xbf16>
    %c0_306 = arith.constant 0 : index
    %c16_307 = arith.constant 16 : index
    %c0_308 = arith.constant 0 : index
    %257 = vector.load %arg6[%c0_306, %c16_307, %c0_308] : memref<2x176x512xbf16, #tpu.memory_space<vmem>>, vector<1x16x512xbf16>
    %258 = vector.shape_cast %257 : vector<1x16x512xbf16> to vector<16x512xbf16>
    %259 = vector.shape_cast %256 : vector<16x512xbf16> to vector<1x16x512xbf16>
    tpu.vector_store %arg6[%c0_306, %c16_307, %c0_308], %259 {strides = array<i32>} : memref<2x176x512xbf16, #tpu.memory_space<vmem>>, vector<1x16x512xbf16>,
    %c0_309 = arith.constant 0 : index
    %c0_310 = arith.constant 0 : index
    %c0_311 = arith.constant 0 : index
    %c106 = arith.constant 106 : index
    %260 = vector.load %arg2[%c0_309, %c0_310, %c0_311, %c106] : memref<1x1x16x896xbf16, #tpu.memory_space<vmem>>, vector<1x1x16x512xbf16>
    %261 = vector.shape_cast %260 : vector<1x1x16x512xbf16> to vector<16x512xbf16>
    %c0_312 = arith.constant 0 : index
    %c32_313 = arith.constant 32 : index
    %c0_314 = arith.constant 0 : index
    %262 = vector.load %arg6[%c0_312, %c32_313, %c0_314] : memref<2x176x512xbf16, #tpu.memory_space<vmem>>, vector<1x16x512xbf16>
    %263 = vector.shape_cast %262 : vector<1x16x512xbf16> to vector<16x512xbf16>
    %264 = vector.shape_cast %261 : vector<16x512xbf16> to vector<1x16x512xbf16>
    tpu.vector_store %arg6[%c0_312, %c32_313, %c0_314], %264 {strides = array<i32>} : memref<2x176x512xbf16, #tpu.memory_space<vmem>>, vector<1x16x512xbf16>,
    %c0_315 = arith.constant 0 : index
    %c0_316 = arith.constant 0 : index
    %c0_317 = arith.constant 0 : index
    %c107 = arith.constant 107 : index
    %265 = vector.load %arg2[%c0_315, %c0_316, %c0_317, %c107] : memref<1x1x16x896xbf16, #tpu.memory_space<vmem>>, vector<1x1x16x512xbf16>
    %266 = vector.shape_cast %265 : vector<1x1x16x512xbf16> to vector<16x512xbf16>
    %c0_318 = arith.constant 0 : index
    %c48_319 = arith.constant 48 : index
    %c0_320 = arith.constant 0 : index
    %267 = vector.load %arg6[%c0_318, %c48_319, %c0_320] : memref<2x176x512xbf16, #tpu.memory_space<vmem>>, vector<1x16x512xbf16>
    %268 = vector.shape_cast %267 : vector<1x16x512xbf16> to vector<16x512xbf16>
    %269 = vector.shape_cast %266 : vector<16x512xbf16> to vector<1x16x512xbf16>
    tpu.vector_store %arg6[%c0_318, %c48_319, %c0_320], %269 {strides = array<i32>} : memref<2x176x512xbf16, #tpu.memory_space<vmem>>, vector<1x16x512xbf16>,
    %c0_321 = arith.constant 0 : index
    %c0_322 = arith.constant 0 : index
    %c0_323 = arith.constant 0 : index
    %c108 = arith.constant 108 : index
    %270 = vector.load %arg2[%c0_321, %c0_322, %c0_323, %c108] : memref<1x1x16x896xbf16, #tpu.memory_space<vmem>>, vector<1x1x16x512xbf16>
    %271 = vector.shape_cast %270 : vector<1x1x16x512xbf16> to vector<16x512xbf16>
    %c0_324 = arith.constant 0 : index
    %c64_325 = arith.constant 64 : index
    %c0_326 = arith.constant 0 : index
    %272 = vector.load %arg6[%c0_324, %c64_325, %c0_326] : memref<2x176x512xbf16, #tpu.memory_space<vmem>>, vector<1x16x512xbf16>
    %273 = vector.shape_cast %272 : vector<1x16x512xbf16> to vector<16x512xbf16>
    %274 = vector.shape_cast %271 : vector<16x512xbf16> to vector<1x16x512xbf16>
    tpu.vector_store %arg6[%c0_324, %c64_325, %c0_326], %274 {strides = array<i32>} : memref<2x176x512xbf16, #tpu.memory_space<vmem>>, vector<1x16x512xbf16>,
    %c0_327 = arith.constant 0 : index
    %c0_328 = arith.constant 0 : index
    %c0_329 = arith.constant 0 : index
    %c109 = arith.constant 109 : index
    %275 = vector.load %arg2[%c0_327, %c0_328, %c0_329, %c109] : memref<1x1x16x896xbf16, #tpu.memory_space<vmem>>, vector<1x1x16x512xbf16>
    %276 = vector.shape_cast %275 : vector<1x1x16x512xbf16> to vector<16x512xbf16>
    %c0_330 = arith.constant 0 : index
    %c80_331 = arith.constant 80 : index
    %c0_332 = arith.constant 0 : index
    %277 = vector.load %arg6[%c0_330, %c80_331, %c0_332] : memref<2x176x512xbf16, #tpu.memory_space<vmem>>, vector<1x16x512xbf16>
    %278 = vector.shape_cast %277 : vector<1x16x512xbf16> to vector<16x512xbf16>
    %279 = vector.shape_cast %276 : vector<16x512xbf16> to vector<1x16x512xbf16>
    tpu.vector_store %arg6[%c0_330, %c80_331, %c0_332], %279 {strides = array<i32>} : memref<2x176x512xbf16, #tpu.memory_space<vmem>>, vector<1x16x512xbf16>,
    %c0_333 = arith.constant 0 : index
    %c0_334 = arith.constant 0 : index
    %c0_335 = arith.constant 0 : index
    %c110 = arith.constant 110 : index
    %280 = vector.load %arg2[%c0_333, %c0_334, %c0_335, %c110] : memref<1x1x16x896xbf16, #tpu.memory_space<vmem>>, vector<1x1x16x512xbf16>
    %281 = vector.shape_cast %280 : vector<1x1x16x512xbf16> to vector<16x512xbf16>
    %c0_336 = arith.constant 0 : index
    %c96_337 = arith.constant 96 : index
    %c0_338 = arith.constant 0 : index
    %282 = vector.load %arg6[%c0_336, %c96_337, %c0_338] : memref<2x176x512xbf16, #tpu.memory_space<vmem>>, vector<1x16x512xbf16>
    %283 = vector.shape_cast %282 : vector<1x16x512xbf16> to vector<16x512xbf16>
    %284 = vector.shape_cast %281 : vector<16x512xbf16> to vector<1x16x512xbf16>
    tpu.vector_store %arg6[%c0_336, %c96_337, %c0_338], %284 {strides = array<i32>} : memref<2x176x512xbf16, #tpu.memory_space<vmem>>, vector<1x16x512xbf16>,
    %c0_339 = arith.constant 0 : index
    %c0_340 = arith.constant 0 : index
    %c0_341 = arith.constant 0 : index
    %c111 = arith.constant 111 : index
    %285 = vector.load %arg2[%c0_339, %c0_340, %c0_341, %c111] : memref<1x1x16x896xbf16, #tpu.memory_space<vmem>>, vector<1x1x16x512xbf16>
    %286 = vector.shape_cast %285 : vector<1x1x16x512xbf16> to vector<16x512xbf16>
    %c0_342 = arith.constant 0 : index
    %c112_343 = arith.constant 112 : index
    %c0_344 = arith.constant 0 : index
    %287 = vector.load %arg6[%c0_342, %c112_343, %c0_344] : memref<2x176x512xbf16, #tpu.memory_space<vmem>>, vector<1x16x512xbf16>
    %288 = vector.shape_cast %287 : vector<1x16x512xbf16> to vector<16x512xbf16>
    %289 = vector.shape_cast %286 : vector<16x512xbf16> to vector<1x16x512xbf16>
    tpu.vector_store %arg6[%c0_342, %c112_343, %c0_344], %289 {strides = array<i32>} : memref<2x176x512xbf16, #tpu.memory_space<vmem>>, vector<1x16x512xbf16>,
    %c0_345 = arith.constant 0 : index
    %c0_346 = arith.constant 0 : index
    %c0_347 = arith.constant 0 : index
    %c112_348 = arith.constant 112 : index
    %290 = vector.load %arg2[%c0_345, %c0_346, %c0_347, %c112_348] : memref<1x1x16x896xbf16, #tpu.memory_space<vmem>>, vector<1x1x16x512xbf16>
    %291 = vector.shape_cast %290 : vector<1x1x16x512xbf16> to vector<16x512xbf16>
    %c0_349 = arith.constant 0 : index
    %c128_350 = arith.constant 128 : index
    %c0_351 = arith.constant 0 : index
    %292 = vector.load %arg6[%c0_349, %c128_350, %c0_351] : memref<2x176x512xbf16, #tpu.memory_space<vmem>>, vector<1x16x512xbf16>
    %293 = vector.shape_cast %292 : vector<1x16x512xbf16> to vector<16x512xbf16>
    %294 = vector.shape_cast %291 : vector<16x512xbf16> to vector<1x16x512xbf16>
    tpu.vector_store %arg6[%c0_349, %c128_350, %c0_351], %294 {strides = array<i32>} : memref<2x176x512xbf16, #tpu.memory_space<vmem>>, vector<1x16x512xbf16>,
    %c0_352 = arith.constant 0 : index
    %c0_353 = arith.constant 0 : index
    %c0_354 = arith.constant 0 : index
    %c113 = arith.constant 113 : index
    %295 = vector.load %arg2[%c0_352, %c0_353, %c0_354, %c113] : memref<1x1x16x896xbf16, #tpu.memory_space<vmem>>, vector<1x1x16x512xbf16>
    %296 = vector.shape_cast %295 : vector<1x1x16x512xbf16> to vector<16x512xbf16>
    %c0_355 = arith.constant 0 : index
    %c144_356 = arith.constant 144 : index
    %c0_357 = arith.constant 0 : index
    %297 = vector.load %arg6[%c0_355, %c144_356, %c0_357] : memref<2x176x512xbf16, #tpu.memory_space<vmem>>, vector<1x16x512xbf16>
    %298 = vector.shape_cast %297 : vector<1x16x512xbf16> to vector<16x512xbf16>
    %299 = vector.shape_cast %296 : vector<16x512xbf16> to vector<1x16x512xbf16>
    tpu.vector_store %arg6[%c0_355, %c144_356, %c0_357], %299 {strides = array<i32>} : memref<2x176x512xbf16, #tpu.memory_space<vmem>>, vector<1x16x512xbf16>,
    %c0_358 = arith.constant 0 : index
    %c0_359 = arith.constant 0 : index
    %c0_360 = arith.constant 0 : index
    %c114 = arith.constant 114 : index
    %300 = vector.load %arg2[%c0_358, %c0_359, %c0_360, %c114] : memref<1x1x16x896xbf16, #tpu.memory_space<vmem>>, vector<1x1x16x512xbf16>
    %301 = vector.shape_cast %300 : vector<1x1x16x512xbf16> to vector<16x512xbf16>
    %c0_361 = arith.constant 0 : index
    %c160_362 = arith.constant 160 : index
    %c0_363 = arith.constant 0 : index
    %302 = vector.load %arg6[%c0_361, %c160_362, %c0_363] : memref<2x176x512xbf16, #tpu.memory_space<vmem>>, vector<1x16x512xbf16>
    %303 = vector.shape_cast %302 : vector<1x16x512xbf16> to vector<16x512xbf16>
    %304 = vector.shape_cast %301 : vector<16x512xbf16> to vector<1x16x512xbf16>
    tpu.vector_store %arg6[%c0_361, %c160_362, %c0_363], %304 {strides = array<i32>} : memref<2x176x512xbf16, #tpu.memory_space<vmem>>, vector<1x16x512xbf16>,
    %c4_364 = arith.constant 4 : index
    %c0_365 = arith.constant 0 : index
    %c0_366 = arith.constant 0 : index
    %305 = vector.load %arg3[%c4_364, %c0_365, %c0_366] : memref<11x8x176xbf16, #tpu.memory_space<vmem>>, vector<1x8x176xbf16>
    %306 = vector.shape_cast %305 : vector<1x8x176xbf16> to vector<8x176xbf16>
    %c0_367 = arith.constant 0 : index
    %c0_368 = arith.constant 0 : index
    %c0_369 = arith.constant 0 : index
    %307 = vector.load %arg6[%c0_367, %c0_368, %c0_369] : memref<2x176x512xbf16, #tpu.memory_space<vmem>>, vector<1x176x512xbf16>
    %308 = vector.shape_cast %307 : vector<1x176x512xbf16> to vector<176x512xbf16>
    %cst_370 = arith.constant dense<0.000000e+00> : vector<8x512xf32>
    %309 = tpu.matmul %306, %308, %cst_370 {dimension_numbers = #tpu.dot_dimension_numbers<[1], [0], [0], [1], [0, 0, 1, 1], [], []>} : vector<8x176xbf16>, vector<176x512xbf16>, vector<8x512xf32> -> vector<8x512xf32>
    %c0_371 = arith.constant 0 : index
    %c0_372 = arith.constant 0 : index
    %310 = vector.load %arg7[%c0_371, %c0_372] : memref<8x512xf32, #tpu.memory_space<vmem>>, vector<8x512xf32>
    %311 = arith.addf %310, %309 : vector<8x512xf32>
    %c0_373 = arith.constant 0 : index
    %c0_374 = arith.constant 0 : index
    %312 = vector.load %arg7[%c0_373, %c0_374] : memref<8x512xf32, #tpu.memory_space<vmem>>, vector<8x512xf32>
    tpu.vector_store %arg7[%c0_373, %c0_374], %311 {strides = array<i32>} : memref<8x512xf32, #tpu.memory_space<vmem>>, vector<8x512xf32>,
    %c0_375 = arith.constant 0 : index
    %c0_376 = arith.constant 0 : index
    %c0_377 = arith.constant 0 : index
    %c130 = arith.constant 130 : index
    %313 = vector.load %arg2[%c0_375, %c0_376, %c0_377, %c130] : memref<1x1x16x896xbf16, #tpu.memory_space<vmem>>, vector<1x1x16x512xbf16>
    %314 = vector.shape_cast %313 : vector<1x1x16x512xbf16> to vector<16x512xbf16>
    %c1_378 = arith.constant 1 : index
    %c0_379 = arith.constant 0 : index
    %c0_380 = arith.constant 0 : index
    %315 = vector.load %arg6[%c1_378, %c0_379, %c0_380] : memref<2x176x512xbf16, #tpu.memory_space<vmem>>, vector<1x16x512xbf16>
    %316 = vector.shape_cast %315 : vector<1x16x512xbf16> to vector<16x512xbf16>
    %317 = vector.shape_cast %314 : vector<16x512xbf16> to vector<1x16x512xbf16>
    tpu.vector_store %arg6[%c1_378, %c0_379, %c0_380], %317 {strides = array<i32>} : memref<2x176x512xbf16, #tpu.memory_space<vmem>>, vector<1x16x512xbf16>,
    %c0_381 = arith.constant 0 : index
    %c0_382 = arith.constant 0 : index
    %c0_383 = arith.constant 0 : index
    %c131 = arith.constant 131 : index
    %318 = vector.load %arg2[%c0_381, %c0_382, %c0_383, %c131] : memref<1x1x16x896xbf16, #tpu.memory_space<vmem>>, vector<1x1x16x512xbf16>
    %319 = vector.shape_cast %318 : vector<1x1x16x512xbf16> to vector<16x512xbf16>
    %c1_384 = arith.constant 1 : index
    %c16_385 = arith.constant 16 : index
    %c0_386 = arith.constant 0 : index
    %320 = vector.load %arg6[%c1_384, %c16_385, %c0_386] : memref<2x176x512xbf16, #tpu.memory_space<vmem>>, vector<1x16x512xbf16>
    %321 = vector.shape_cast %320 : vector<1x16x512xbf16> to vector<16x512xbf16>
    %322 = vector.shape_cast %319 : vector<16x512xbf16> to vector<1x16x512xbf16>
    tpu.vector_store %arg6[%c1_384, %c16_385, %c0_386], %322 {strides = array<i32>} : memref<2x176x512xbf16, #tpu.memory_space<vmem>>, vector<1x16x512xbf16>,
    %c0_387 = arith.constant 0 : index
    %c0_388 = arith.constant 0 : index
    %c0_389 = arith.constant 0 : index
    %c132 = arith.constant 132 : index
    %323 = vector.load %arg2[%c0_387, %c0_388, %c0_389, %c132] : memref<1x1x16x896xbf16, #tpu.memory_space<vmem>>, vector<1x1x16x512xbf16>
    %324 = vector.shape_cast %323 : vector<1x1x16x512xbf16> to vector<16x512xbf16>
    %c1_390 = arith.constant 1 : index
    %c32_391 = arith.constant 32 : index
    %c0_392 = arith.constant 0 : index
    %325 = vector.load %arg6[%c1_390, %c32_391, %c0_392] : memref<2x176x512xbf16, #tpu.memory_space<vmem>>, vector<1x16x512xbf16>
    %326 = vector.shape_cast %325 : vector<1x16x512xbf16> to vector<16x512xbf16>
    %327 = vector.shape_cast %324 : vector<16x512xbf16> to vector<1x16x512xbf16>
    tpu.vector_store %arg6[%c1_390, %c32_391, %c0_392], %327 {strides = array<i32>} : memref<2x176x512xbf16, #tpu.memory_space<vmem>>, vector<1x16x512xbf16>,
    %c0_393 = arith.constant 0 : index
    %c0_394 = arith.constant 0 : index
    %c0_395 = arith.constant 0 : index
    %c133 = arith.constant 133 : index
    %328 = vector.load %arg2[%c0_393, %c0_394, %c0_395, %c133] : memref<1x1x16x896xbf16, #tpu.memory_space<vmem>>, vector<1x1x16x512xbf16>
    %329 = vector.shape_cast %328 : vector<1x1x16x512xbf16> to vector<16x512xbf16>
    %c1_396 = arith.constant 1 : index
    %c48_397 = arith.constant 48 : index
    %c0_398 = arith.constant 0 : index
    %330 = vector.load %arg6[%c1_396, %c48_397, %c0_398] : memref<2x176x512xbf16, #tpu.memory_space<vmem>>, vector<1x16x512xbf16>
    %331 = vector.shape_cast %330 : vector<1x16x512xbf16> to vector<16x512xbf16>
    %332 = vector.shape_cast %329 : vector<16x512xbf16> to vector<1x16x512xbf16>
    tpu.vector_store %arg6[%c1_396, %c48_397, %c0_398], %332 {strides = array<i32>} : memref<2x176x512xbf16, #tpu.memory_space<vmem>>, vector<1x16x512xbf16>,
    %c0_399 = arith.constant 0 : index
    %c0_400 = arith.constant 0 : index
    %c0_401 = arith.constant 0 : index
    %c134 = arith.constant 134 : index
    %333 = vector.load %arg2[%c0_399, %c0_400, %c0_401, %c134] : memref<1x1x16x896xbf16, #tpu.memory_space<vmem>>, vector<1x1x16x512xbf16>
    %334 = vector.shape_cast %333 : vector<1x1x16x512xbf16> to vector<16x512xbf16>
    %c1_402 = arith.constant 1 : index
    %c64_403 = arith.constant 64 : index
    %c0_404 = arith.constant 0 : index
    %335 = vector.load %arg6[%c1_402, %c64_403, %c0_404] : memref<2x176x512xbf16, #tpu.memory_space<vmem>>, vector<1x16x512xbf16>
    %336 = vector.shape_cast %335 : vector<1x16x512xbf16> to vector<16x512xbf16>
    %337 = vector.shape_cast %334 : vector<16x512xbf16> to vector<1x16x512xbf16>
    tpu.vector_store %arg6[%c1_402, %c64_403, %c0_404], %337 {strides = array<i32>} : memref<2x176x512xbf16, #tpu.memory_space<vmem>>, vector<1x16x512xbf16>,
    %c0_405 = arith.constant 0 : index
    %c0_406 = arith.constant 0 : index
    %c0_407 = arith.constant 0 : index
    %c135 = arith.constant 135 : index
    %338 = vector.load %arg2[%c0_405, %c0_406, %c0_407, %c135] : memref<1x1x16x896xbf16, #tpu.memory_space<vmem>>, vector<1x1x16x512xbf16>
    %339 = vector.shape_cast %338 : vector<1x1x16x512xbf16> to vector<16x512xbf16>
    %c1_408 = arith.constant 1 : index
    %c80_409 = arith.constant 80 : index
    %c0_410 = arith.constant 0 : index
    %340 = vector.load %arg6[%c1_408, %c80_409, %c0_410] : memref<2x176x512xbf16, #tpu.memory_space<vmem>>, vector<1x16x512xbf16>
    %341 = vector.shape_cast %340 : vector<1x16x512xbf16> to vector<16x512xbf16>
    %342 = vector.shape_cast %339 : vector<16x512xbf16> to vector<1x16x512xbf16>
    tpu.vector_store %arg6[%c1_408, %c80_409, %c0_410], %342 {strides = array<i32>} : memref<2x176x512xbf16, #tpu.memory_space<vmem>>, vector<1x16x512xbf16>,
    %c0_411 = arith.constant 0 : index
    %c0_412 = arith.constant 0 : index
    %c0_413 = arith.constant 0 : index
    %c136 = arith.constant 136 : index
    %343 = vector.load %arg2[%c0_411, %c0_412, %c0_413, %c136] : memref<1x1x16x896xbf16, #tpu.memory_space<vmem>>, vector<1x1x16x512xbf16>
    %344 = vector.shape_cast %343 : vector<1x1x16x512xbf16> to vector<16x512xbf16>
    %c1_414 = arith.constant 1 : index
    %c96_415 = arith.constant 96 : index
    %c0_416 = arith.constant 0 : index
    %345 = vector.load %arg6[%c1_414, %c96_415, %c0_416] : memref<2x176x512xbf16, #tpu.memory_space<vmem>>, vector<1x16x512xbf16>
    %346 = vector.shape_cast %345 : vector<1x16x512xbf16> to vector<16x512xbf16>
    %347 = vector.shape_cast %344 : vector<16x512xbf16> to vector<1x16x512xbf16>
    tpu.vector_store %arg6[%c1_414, %c96_415, %c0_416], %347 {strides = array<i32>} : memref<2x176x512xbf16, #tpu.memory_space<vmem>>, vector<1x16x512xbf16>,
    %c0_417 = arith.constant 0 : index
    %c0_418 = arith.constant 0 : index
    %c0_419 = arith.constant 0 : index
    %c137 = arith.constant 137 : index
    %348 = vector.load %arg2[%c0_417, %c0_418, %c0_419, %c137] : memref<1x1x16x896xbf16, #tpu.memory_space<vmem>>, vector<1x1x16x512xbf16>
    %349 = vector.shape_cast %348 : vector<1x1x16x512xbf16> to vector<16x512xbf16>
    %c1_420 = arith.constant 1 : index
    %c112_421 = arith.constant 112 : index
    %c0_422 = arith.constant 0 : index
    %350 = vector.load %arg6[%c1_420, %c112_421, %c0_422] : memref<2x176x512xbf16, #tpu.memory_space<vmem>>, vector<1x16x512xbf16>
    %351 = vector.shape_cast %350 : vector<1x16x512xbf16> to vector<16x512xbf16>
    %352 = vector.shape_cast %349 : vector<16x512xbf16> to vector<1x16x512xbf16>
    tpu.vector_store %arg6[%c1_420, %c112_421, %c0_422], %352 {strides = array<i32>} : memref<2x176x512xbf16, #tpu.memory_space<vmem>>, vector<1x16x512xbf16>,
    %c0_423 = arith.constant 0 : index
    %c0_424 = arith.constant 0 : index
    %c0_425 = arith.constant 0 : index
    %c138 = arith.constant 138 : index
    %353 = vector.load %arg2[%c0_423, %c0_424, %c0_425, %c138] : memref<1x1x16x896xbf16, #tpu.memory_space<vmem>>, vector<1x1x16x512xbf16>
    %354 = vector.shape_cast %353 : vector<1x1x16x512xbf16> to vector<16x512xbf16>
    %c1_426 = arith.constant 1 : index
    %c128_427 = arith.constant 128 : index
    %c0_428 = arith.constant 0 : index
    %355 = vector.load %arg6[%c1_426, %c128_427, %c0_428] : memref<2x176x512xbf16, #tpu.memory_space<vmem>>, vector<1x16x512xbf16>
    %356 = vector.shape_cast %355 : vector<1x16x512xbf16> to vector<16x512xbf16>
    %357 = vector.shape_cast %354 : vector<16x512xbf16> to vector<1x16x512xbf16>
    tpu.vector_store %arg6[%c1_426, %c128_427, %c0_428], %357 {strides = array<i32>} : memref<2x176x512xbf16, #tpu.memory_space<vmem>>, vector<1x16x512xbf16>,
    %c0_429 = arith.constant 0 : index
    %c0_430 = arith.constant 0 : index
    %c0_431 = arith.constant 0 : index
    %c139 = arith.constant 139 : index
    %358 = vector.load %arg2[%c0_429, %c0_430, %c0_431, %c139] : memref<1x1x16x896xbf16, #tpu.memory_space<vmem>>, vector<1x1x16x512xbf16>
    %359 = vector.shape_cast %358 : vector<1x1x16x512xbf16> to vector<16x512xbf16>
    %c1_432 = arith.constant 1 : index
    %c144_433 = arith.constant 144 : index
    %c0_434 = arith.constant 0 : index
    %360 = vector.load %arg6[%c1_432, %c144_433, %c0_434] : memref<2x176x512xbf16, #tpu.memory_space<vmem>>, vector<1x16x512xbf16>
    %361 = vector.shape_cast %360 : vector<1x16x512xbf16> to vector<16x512xbf16>
    %362 = vector.shape_cast %359 : vector<16x512xbf16> to vector<1x16x512xbf16>
    tpu.vector_store %arg6[%c1_432, %c144_433, %c0_434], %362 {strides = array<i32>} : memref<2x176x512xbf16, #tpu.memory_space<vmem>>, vector<1x16x512xbf16>,
    %c0_435 = arith.constant 0 : index
    %c0_436 = arith.constant 0 : index
    %c0_437 = arith.constant 0 : index
    %c140 = arith.constant 140 : index
    %363 = vector.load %arg2[%c0_435, %c0_436, %c0_437, %c140] : memref<1x1x16x896xbf16, #tpu.memory_space<vmem>>, vector<1x1x16x512xbf16>
    %364 = vector.shape_cast %363 : vector<1x1x16x512xbf16> to vector<16x512xbf16>
    %c1_438 = arith.constant 1 : index
    %c160_439 = arith.constant 160 : index
    %c0_440 = arith.constant 0 : index
    %365 = vector.load %arg6[%c1_438, %c160_439, %c0_440] : memref<2x176x512xbf16, #tpu.memory_space<vmem>>, vector<1x16x512xbf16>
    %366 = vector.shape_cast %365 : vector<1x16x512xbf16> to vector<16x512xbf16>
    %367 = vector.shape_cast %364 : vector<16x512xbf16> to vector<1x16x512xbf16>
    tpu.vector_store %arg6[%c1_438, %c160_439, %c0_440], %367 {strides = array<i32>} : memref<2x176x512xbf16, #tpu.memory_space<vmem>>, vector<1x16x512xbf16>,
    %c5_441 = arith.constant 5 : index
    %c0_442 = arith.constant 0 : index
    %c0_443 = arith.constant 0 : index
    %368 = vector.load %arg3[%c5_441, %c0_442, %c0_443] : memref<11x8x176xbf16, #tpu.memory_space<vmem>>, vector<1x8x176xbf16>
    %369 = vector.shape_cast %368 : vector<1x8x176xbf16> to vector<8x176xbf16>
    %c1_444 = arith.constant 1 : index
    %c0_445 = arith.constant 0 : index
    %c0_446 = arith.constant 0 : index
    %370 = vector.load %arg6[%c1_444, %c0_445, %c0_446] : memref<2x176x512xbf16, #tpu.memory_space<vmem>>, vector<1x176x512xbf16>
    %371 = vector.shape_cast %370 : vector<1x176x512xbf16> to vector<176x512xbf16>
    %cst_447 = arith.constant dense<0.000000e+00> : vector<8x512xf32>
    %372 = tpu.matmul %369, %371, %cst_447 {dimension_numbers = #tpu.dot_dimension_numbers<[1], [0], [0], [1], [0, 0, 1, 1], [], []>} : vector<8x176xbf16>, vector<176x512xbf16>, vector<8x512xf32> -> vector<8x512xf32>
    %c0_448 = arith.constant 0 : index
    %c0_449 = arith.constant 0 : index
    %373 = vector.load %arg7[%c0_448, %c0_449] : memref<8x512xf32, #tpu.memory_space<vmem>>, vector<8x512xf32>
    %374 = arith.addf %373, %372 : vector<8x512xf32>
    %c0_450 = arith.constant 0 : index
    %c0_451 = arith.constant 0 : index
    %375 = vector.load %arg7[%c0_450, %c0_451] : memref<8x512xf32, #tpu.memory_space<vmem>>, vector<8x512xf32>
    tpu.vector_store %arg7[%c0_450, %c0_451], %374 {strides = array<i32>} : memref<8x512xf32, #tpu.memory_space<vmem>>, vector<8x512xf32>,
    %c0_452 = arith.constant 0 : index
    %c0_453 = arith.constant 0 : index
    %c0_454 = arith.constant 0 : index
    %c156 = arith.constant 156 : index
    %376 = vector.load %arg2[%c0_452, %c0_453, %c0_454, %c156] : memref<1x1x16x896xbf16, #tpu.memory_space<vmem>>, vector<1x1x16x512xbf16>
    %377 = vector.shape_cast %376 : vector<1x1x16x512xbf16> to vector<16x512xbf16>
    %c0_455 = arith.constant 0 : index
    %c0_456 = arith.constant 0 : index
    %c0_457 = arith.constant 0 : index
    %378 = vector.load %arg6[%c0_455, %c0_456, %c0_457] : memref<2x176x512xbf16, #tpu.memory_space<vmem>>, vector<1x16x512xbf16>
    %379 = vector.shape_cast %378 : vector<1x16x512xbf16> to vector<16x512xbf16>
    %380 = vector.shape_cast %377 : vector<16x512xbf16> to vector<1x16x512xbf16>
    tpu.vector_store %arg6[%c0_455, %c0_456, %c0_457], %380 {strides = array<i32>} : memref<2x176x512xbf16, #tpu.memory_space<vmem>>, vector<1x16x512xbf16>,
    %c0_458 = arith.constant 0 : index
    %c0_459 = arith.constant 0 : index
    %c0_460 = arith.constant 0 : index
    %c157 = arith.constant 157 : index
    %381 = vector.load %arg2[%c0_458, %c0_459, %c0_460, %c157] : memref<1x1x16x896xbf16, #tpu.memory_space<vmem>>, vector<1x1x16x512xbf16>
    %382 = vector.shape_cast %381 : vector<1x1x16x512xbf16> to vector<16x512xbf16>
    %c0_461 = arith.constant 0 : index
    %c16_462 = arith.constant 16 : index
    %c0_463 = arith.constant 0 : index
    %383 = vector.load %arg6[%c0_461, %c16_462, %c0_463] : memref<2x176x512xbf16, #tpu.memory_space<vmem>>, vector<1x16x512xbf16>
    %384 = vector.shape_cast %383 : vector<1x16x512xbf16> to vector<16x512xbf16>
    %385 = vector.shape_cast %382 : vector<16x512xbf16> to vector<1x16x512xbf16>
    tpu.vector_store %arg6[%c0_461, %c16_462, %c0_463], %385 {strides = array<i32>} : memref<2x176x512xbf16, #tpu.memory_space<vmem>>, vector<1x16x512xbf16>,
    %c0_464 = arith.constant 0 : index
    %c0_465 = arith.constant 0 : index
    %c0_466 = arith.constant 0 : index
    %c158 = arith.constant 158 : index
    %386 = vector.load %arg2[%c0_464, %c0_465, %c0_466, %c158] : memref<1x1x16x896xbf16, #tpu.memory_space<vmem>>, vector<1x1x16x512xbf16>
    %387 = vector.shape_cast %386 : vector<1x1x16x512xbf16> to vector<16x512xbf16>
    %c0_467 = arith.constant 0 : index
    %c32_468 = arith.constant 32 : index
    %c0_469 = arith.constant 0 : index
    %388 = vector.load %arg6[%c0_467, %c32_468, %c0_469] : memref<2x176x512xbf16, #tpu.memory_space<vmem>>, vector<1x16x512xbf16>
    %389 = vector.shape_cast %388 : vector<1x16x512xbf16> to vector<16x512xbf16>
    %390 = vector.shape_cast %387 : vector<16x512xbf16> to vector<1x16x512xbf16>
    tpu.vector_store %arg6[%c0_467, %c32_468, %c0_469], %390 {strides = array<i32>} : memref<2x176x512xbf16, #tpu.memory_space<vmem>>, vector<1x16x512xbf16>,
    %c0_470 = arith.constant 0 : index
    %c0_471 = arith.constant 0 : index
    %c0_472 = arith.constant 0 : index
    %c159 = arith.constant 159 : index
    %391 = vector.load %arg2[%c0_470, %c0_471, %c0_472, %c159] : memref<1x1x16x896xbf16, #tpu.memory_space<vmem>>, vector<1x1x16x512xbf16>
    %392 = vector.shape_cast %391 : vector<1x1x16x512xbf16> to vector<16x512xbf16>
    %c0_473 = arith.constant 0 : index
    %c48_474 = arith.constant 48 : index
    %c0_475 = arith.constant 0 : index
    %393 = vector.load %arg6[%c0_473, %c48_474, %c0_475] : memref<2x176x512xbf16, #tpu.memory_space<vmem>>, vector<1x16x512xbf16>
    %394 = vector.shape_cast %393 : vector<1x16x512xbf16> to vector<16x512xbf16>
    %395 = vector.shape_cast %392 : vector<16x512xbf16> to vector<1x16x512xbf16>
    tpu.vector_store %arg6[%c0_473, %c48_474, %c0_475], %395 {strides = array<i32>} : memref<2x176x512xbf16, #tpu.memory_space<vmem>>, vector<1x16x512xbf16>,
    %c0_476 = arith.constant 0 : index
    %c0_477 = arith.constant 0 : index
    %c0_478 = arith.constant 0 : index
    %c160_479 = arith.constant 160 : index
    %396 = vector.load %arg2[%c0_476, %c0_477, %c0_478, %c160_479] : memref<1x1x16x896xbf16, #tpu.memory_space<vmem>>, vector<1x1x16x512xbf16>
    %397 = vector.shape_cast %396 : vector<1x1x16x512xbf16> to vector<16x512xbf16>
    %c0_480 = arith.constant 0 : index
    %c64_481 = arith.constant 64 : index
    %c0_482 = arith.constant 0 : index
    %398 = vector.load %arg6[%c0_480, %c64_481, %c0_482] : memref<2x176x512xbf16, #tpu.memory_space<vmem>>, vector<1x16x512xbf16>
    %399 = vector.shape_cast %398 : vector<1x16x512xbf16> to vector<16x512xbf16>
    %400 = vector.shape_cast %397 : vector<16x512xbf16> to vector<1x16x512xbf16>
    tpu.vector_store %arg6[%c0_480, %c64_481, %c0_482], %400 {strides = array<i32>} : memref<2x176x512xbf16, #tpu.memory_space<vmem>>, vector<1x16x512xbf16>,
    %c0_483 = arith.constant 0 : index
    %c0_484 = arith.constant 0 : index
    %c0_485 = arith.constant 0 : index
    %c161 = arith.constant 161 : index
    %401 = vector.load %arg2[%c0_483, %c0_484, %c0_485, %c161] : memref<1x1x16x896xbf16, #tpu.memory_space<vmem>>, vector<1x1x16x512xbf16>
    %402 = vector.shape_cast %401 : vector<1x1x16x512xbf16> to vector<16x512xbf16>
    %c0_486 = arith.constant 0 : index
    %c80_487 = arith.constant 80 : index
    %c0_488 = arith.constant 0 : index
    %403 = vector.load %arg6[%c0_486, %c80_487, %c0_488] : memref<2x176x512xbf16, #tpu.memory_space<vmem>>, vector<1x16x512xbf16>
    %404 = vector.shape_cast %403 : vector<1x16x512xbf16> to vector<16x512xbf16>
    %405 = vector.shape_cast %402 : vector<16x512xbf16> to vector<1x16x512xbf16>
    tpu.vector_store %arg6[%c0_486, %c80_487, %c0_488], %405 {strides = array<i32>} : memref<2x176x512xbf16, #tpu.memory_space<vmem>>, vector<1x16x512xbf16>,
    %c0_489 = arith.constant 0 : index
    %c0_490 = arith.constant 0 : index
    %c0_491 = arith.constant 0 : index
    %c162 = arith.constant 162 : index
    %406 = vector.load %arg2[%c0_489, %c0_490, %c0_491, %c162] : memref<1x1x16x896xbf16, #tpu.memory_space<vmem>>, vector<1x1x16x512xbf16>
    %407 = vector.shape_cast %406 : vector<1x1x16x512xbf16> to vector<16x512xbf16>
    %c0_492 = arith.constant 0 : index
    %c96_493 = arith.constant 96 : index
    %c0_494 = arith.constant 0 : index
    %408 = vector.load %arg6[%c0_492, %c96_493, %c0_494] : memref<2x176x512xbf16, #tpu.memory_space<vmem>>, vector<1x16x512xbf16>
    %409 = vector.shape_cast %408 : vector<1x16x512xbf16> to vector<16x512xbf16>
    %410 = vector.shape_cast %407 : vector<16x512xbf16> to vector<1x16x512xbf16>
    tpu.vector_store %arg6[%c0_492, %c96_493, %c0_494], %410 {strides = array<i32>} : memref<2x176x512xbf16, #tpu.memory_space<vmem>>, vector<1x16x512xbf16>,
    %c0_495 = arith.constant 0 : index
    %c0_496 = arith.constant 0 : index
    %c0_497 = arith.constant 0 : index
    %c163 = arith.constant 163 : index
    %411 = vector.load %arg2[%c0_495, %c0_496, %c0_497, %c163] : memref<1x1x16x896xbf16, #tpu.memory_space<vmem>>, vector<1x1x16x512xbf16>
    %412 = vector.shape_cast %411 : vector<1x1x16x512xbf16> to vector<16x512xbf16>
    %c0_498 = arith.constant 0 : index
    %c112_499 = arith.constant 112 : index
    %c0_500 = arith.constant 0 : index
    %413 = vector.load %arg6[%c0_498, %c112_499, %c0_500] : memref<2x176x512xbf16, #tpu.memory_space<vmem>>, vector<1x16x512xbf16>
    %414 = vector.shape_cast %413 : vector<1x16x512xbf16> to vector<16x512xbf16>
    %415 = vector.shape_cast %412 : vector<16x512xbf16> to vector<1x16x512xbf16>
    tpu.vector_store %arg6[%c0_498, %c112_499, %c0_500], %415 {strides = array<i32>} : memref<2x176x512xbf16, #tpu.memory_space<vmem>>, vector<1x16x512xbf16>,
    %c0_501 = arith.constant 0 : index
    %c0_502 = arith.constant 0 : index
    %c0_503 = arith.constant 0 : index
    %c164 = arith.constant 164 : index
    %416 = vector.load %arg2[%c0_501, %c0_502, %c0_503, %c164] : memref<1x1x16x896xbf16, #tpu.memory_space<vmem>>, vector<1x1x16x512xbf16>
    %417 = vector.shape_cast %416 : vector<1x1x16x512xbf16> to vector<16x512xbf16>
    %c0_504 = arith.constant 0 : index
    %c128_505 = arith.constant 128 : index
    %c0_506 = arith.constant 0 : index
    %418 = vector.load %arg6[%c0_504, %c128_505, %c0_506] : memref<2x176x512xbf16, #tpu.memory_space<vmem>>, vector<1x16x512xbf16>
    %419 = vector.shape_cast %418 : vector<1x16x512xbf16> to vector<16x512xbf16>
    %420 = vector.shape_cast %417 : vector<16x512xbf16> to vector<1x16x512xbf16>
    tpu.vector_store %arg6[%c0_504, %c128_505, %c0_506], %420 {strides = array<i32>} : memref<2x176x512xbf16, #tpu.memory_space<vmem>>, vector<1x16x512xbf16>,
    %c0_507 = arith.constant 0 : index
    %c0_508 = arith.constant 0 : index
    %c0_509 = arith.constant 0 : index
    %c165 = arith.constant 165 : index
    %421 = vector.load %arg2[%c0_507, %c0_508, %c0_509, %c165] : memref<1x1x16x896xbf16, #tpu.memory_space<vmem>>, vector<1x1x16x512xbf16>
    %422 = vector.shape_cast %421 : vector<1x1x16x512xbf16> to vector<16x512xbf16>
    %c0_510 = arith.constant 0 : index
    %c144_511 = arith.constant 144 : index
    %c0_512 = arith.constant 0 : index
    %423 = vector.load %arg6[%c0_510, %c144_511, %c0_512] : memref<2x176x512xbf16, #tpu.memory_space<vmem>>, vector<1x16x512xbf16>
    %424 = vector.shape_cast %423 : vector<1x16x512xbf16> to vector<16x512xbf16>
    %425 = vector.shape_cast %422 : vector<16x512xbf16> to vector<1x16x512xbf16>
    tpu.vector_store %arg6[%c0_510, %c144_511, %c0_512], %425 {strides = array<i32>} : memref<2x176x512xbf16, #tpu.memory_space<vmem>>, vector<1x16x512xbf16>,
    %c0_513 = arith.constant 0 : index
    %c0_514 = arith.constant 0 : index
    %c0_515 = arith.constant 0 : index
    %c166 = arith.constant 166 : index
    %426 = vector.load %arg2[%c0_513, %c0_514, %c0_515, %c166] : memref<1x1x16x896xbf16, #tpu.memory_space<vmem>>, vector<1x1x16x512xbf16>
    %427 = vector.shape_cast %426 : vector<1x1x16x512xbf16> to vector<16x512xbf16>
    %c0_516 = arith.constant 0 : index
    %c160_517 = arith.constant 160 : index
    %c0_518 = arith.constant 0 : index
    %428 = vector.load %arg6[%c0_516, %c160_517, %c0_518] : memref<2x176x512xbf16, #tpu.memory_space<vmem>>, vector<1x16x512xbf16>
    %429 = vector.shape_cast %428 : vector<1x16x512xbf16> to vector<16x512xbf16>
    %430 = vector.shape_cast %427 : vector<16x512xbf16> to vector<1x16x512xbf16>
    tpu.vector_store %arg6[%c0_516, %c160_517, %c0_518], %430 {strides = array<i32>} : memref<2x176x512xbf16, #tpu.memory_space<vmem>>, vector<1x16x512xbf16>,
    %c6_519 = arith.constant 6 : index
    %c0_520 = arith.constant 0 : index
    %c0_521 = arith.constant 0 : index
    %431 = vector.load %arg3[%c6_519, %c0_520, %c0_521] : memref<11x8x176xbf16, #tpu.memory_space<vmem>>, vector<1x8x176xbf16>
    %432 = vector.shape_cast %431 : vector<1x8x176xbf16> to vector<8x176xbf16>
    %c0_522 = arith.constant 0 : index
    %c0_523 = arith.constant 0 : index
    %c0_524 = arith.constant 0 : index
    %433 = vector.load %arg6[%c0_522, %c0_523, %c0_524] : memref<2x176x512xbf16, #tpu.memory_space<vmem>>, vector<1x176x512xbf16>
    %434 = vector.shape_cast %433 : vector<1x176x512xbf16> to vector<176x512xbf16>
    %cst_525 = arith.constant dense<0.000000e+00> : vector<8x512xf32>
    %435 = tpu.matmul %432, %434, %cst_525 {dimension_numbers = #tpu.dot_dimension_numbers<[1], [0], [0], [1], [0, 0, 1, 1], [], []>} : vector<8x176xbf16>, vector<176x512xbf16>, vector<8x512xf32> -> vector<8x512xf32>
    %c0_526 = arith.constant 0 : index
    %c0_527 = arith.constant 0 : index
    %436 = vector.load %arg7[%c0_526, %c0_527] : memref<8x512xf32, #tpu.memory_space<vmem>>, vector<8x512xf32>
    %437 = arith.addf %436, %435 : vector<8x512xf32>
    %c0_528 = arith.constant 0 : index
    %c0_529 = arith.constant 0 : index
    %438 = vector.load %arg7[%c0_528, %c0_529] : memref<8x512xf32, #tpu.memory_space<vmem>>, vector<8x512xf32>
    tpu.vector_store %arg7[%c0_528, %c0_529], %437 {strides = array<i32>} : memref<8x512xf32, #tpu.memory_space<vmem>>, vector<8x512xf32>,
    %c0_530 = arith.constant 0 : index
    %c0_531 = arith.constant 0 : index
    %c0_532 = arith.constant 0 : index
    %c182 = arith.constant 182 : index
    %439 = vector.load %arg2[%c0_530, %c0_531, %c0_532, %c182] : memref<1x1x16x896xbf16, #tpu.memory_space<vmem>>, vector<1x1x16x512xbf16>
    %440 = vector.shape_cast %439 : vector<1x1x16x512xbf16> to vector<16x512xbf16>
    %c1_533 = arith.constant 1 : index
    %c0_534 = arith.constant 0 : index
    %c0_535 = arith.constant 0 : index
    %441 = vector.load %arg6[%c1_533, %c0_534, %c0_535] : memref<2x176x512xbf16, #tpu.memory_space<vmem>>, vector<1x16x512xbf16>
    %442 = vector.shape_cast %441 : vector<1x16x512xbf16> to vector<16x512xbf16>
    %443 = vector.shape_cast %440 : vector<16x512xbf16> to vector<1x16x512xbf16>
    tpu.vector_store %arg6[%c1_533, %c0_534, %c0_535], %443 {strides = array<i32>} : memref<2x176x512xbf16, #tpu.memory_space<vmem>>, vector<1x16x512xbf16>,
    %c0_536 = arith.constant 0 : index
    %c0_537 = arith.constant 0 : index
    %c0_538 = arith.constant 0 : index
    %c183 = arith.constant 183 : index
    %444 = vector.load %arg2[%c0_536, %c0_537, %c0_538, %c183] : memref<1x1x16x896xbf16, #tpu.memory_space<vmem>>, vector<1x1x16x512xbf16>
    %445 = vector.shape_cast %444 : vector<1x1x16x512xbf16> to vector<16x512xbf16>
    %c1_539 = arith.constant 1 : index
    %c16_540 = arith.constant 16 : index
    %c0_541 = arith.constant 0 : index
    %446 = vector.load %arg6[%c1_539, %c16_540, %c0_541] : memref<2x176x512xbf16, #tpu.memory_space<vmem>>, vector<1x16x512xbf16>
    %447 = vector.shape_cast %446 : vector<1x16x512xbf16> to vector<16x512xbf16>
    %448 = vector.shape_cast %445 : vector<16x512xbf16> to vector<1x16x512xbf16>
    tpu.vector_store %arg6[%c1_539, %c16_540, %c0_541], %448 {strides = array<i32>} : memref<2x176x512xbf16, #tpu.memory_space<vmem>>, vector<1x16x512xbf16>,
    %c0_542 = arith.constant 0 : index
    %c0_543 = arith.constant 0 : index
    %c0_544 = arith.constant 0 : index
    %c184 = arith.constant 184 : index
    %449 = vector.load %arg2[%c0_542, %c0_543, %c0_544, %c184] : memref<1x1x16x896xbf16, #tpu.memory_space<vmem>>, vector<1x1x16x512xbf16>
    %450 = vector.shape_cast %449 : vector<1x1x16x512xbf16> to vector<16x512xbf16>
    %c1_545 = arith.constant 1 : index
    %c32_546 = arith.constant 32 : index
    %c0_547 = arith.constant 0 : index
    %451 = vector.load %arg6[%c1_545, %c32_546, %c0_547] : memref<2x176x512xbf16, #tpu.memory_space<vmem>>, vector<1x16x512xbf16>
    %452 = vector.shape_cast %451 : vector<1x16x512xbf16> to vector<16x512xbf16>
    %453 = vector.shape_cast %450 : vector<16x512xbf16> to vector<1x16x512xbf16>
    tpu.vector_store %arg6[%c1_545, %c32_546, %c0_547], %453 {strides = array<i32>} : memref<2x176x512xbf16, #tpu.memory_space<vmem>>, vector<1x16x512xbf16>,
    %c0_548 = arith.constant 0 : index
    %c0_549 = arith.constant 0 : index
    %c0_550 = arith.constant 0 : index
    %c185 = arith.constant 185 : index
    %454 = vector.load %arg2[%c0_548, %c0_549, %c0_550, %c185] : memref<1x1x16x896xbf16, #tpu.memory_space<vmem>>, vector<1x1x16x512xbf16>
    %455 = vector.shape_cast %454 : vector<1x1x16x512xbf16> to vector<16x512xbf16>
    %c1_551 = arith.constant 1 : index
    %c48_552 = arith.constant 48 : index
    %c0_553 = arith.constant 0 : index
    %456 = vector.load %arg6[%c1_551, %c48_552, %c0_553] : memref<2x176x512xbf16, #tpu.memory_space<vmem>>, vector<1x16x512xbf16>
    %457 = vector.shape_cast %456 : vector<1x16x512xbf16> to vector<16x512xbf16>
    %458 = vector.shape_cast %455 : vector<16x512xbf16> to vector<1x16x512xbf16>
    tpu.vector_store %arg6[%c1_551, %c48_552, %c0_553], %458 {strides = array<i32>} : memref<2x176x512xbf16, #tpu.memory_space<vmem>>, vector<1x16x512xbf16>,
    %c0_554 = arith.constant 0 : index
    %c0_555 = arith.constant 0 : index
    %c0_556 = arith.constant 0 : index
    %c186 = arith.constant 186 : index
    %459 = vector.load %arg2[%c0_554, %c0_555, %c0_556, %c186] : memref<1x1x16x896xbf16, #tpu.memory_space<vmem>>, vector<1x1x16x512xbf16>
    %460 = vector.shape_cast %459 : vector<1x1x16x512xbf16> to vector<16x512xbf16>
    %c1_557 = arith.constant 1 : index
    %c64_558 = arith.constant 64 : index
    %c0_559 = arith.constant 0 : index
    %461 = vector.load %arg6[%c1_557, %c64_558, %c0_559] : memref<2x176x512xbf16, #tpu.memory_space<vmem>>, vector<1x16x512xbf16>
    %462 = vector.shape_cast %461 : vector<1x16x512xbf16> to vector<16x512xbf16>
    %463 = vector.shape_cast %460 : vector<16x512xbf16> to vector<1x16x512xbf16>
    tpu.vector_store %arg6[%c1_557, %c64_558, %c0_559], %463 {strides = array<i32>} : memref<2x176x512xbf16, #tpu.memory_space<vmem>>, vector<1x16x512xbf16>,
    %c0_560 = arith.constant 0 : index
    %c0_561 = arith.constant 0 : index
    %c0_562 = arith.constant 0 : index
    %c187 = arith.constant 187 : index
    %464 = vector.load %arg2[%c0_560, %c0_561, %c0_562, %c187] : memref<1x1x16x896xbf16, #tpu.memory_space<vmem>>, vector<1x1x16x512xbf16>
    %465 = vector.shape_cast %464 : vector<1x1x16x512xbf16> to vector<16x512xbf16>
    %c1_563 = arith.constant 1 : index
    %c80_564 = arith.constant 80 : index
    %c0_565 = arith.constant 0 : index
    %466 = vector.load %arg6[%c1_563, %c80_564, %c0_565] : memref<2x176x512xbf16, #tpu.memory_space<vmem>>, vector<1x16x512xbf16>
    %467 = vector.shape_cast %466 : vector<1x16x512xbf16> to vector<16x512xbf16>
    %468 = vector.shape_cast %465 : vector<16x512xbf16> to vector<1x16x512xbf16>
    tpu.vector_store %arg6[%c1_563, %c80_564, %c0_565], %468 {strides = array<i32>} : memref<2x176x512xbf16, #tpu.memory_space<vmem>>, vector<1x16x512xbf16>,
    %c0_566 = arith.constant 0 : index
    %c0_567 = arith.constant 0 : index
    %c0_568 = arith.constant 0 : index
    %c188 = arith.constant 188 : index
    %469 = vector.load %arg2[%c0_566, %c0_567, %c0_568, %c188] : memref<1x1x16x896xbf16, #tpu.memory_space<vmem>>, vector<1x1x16x512xbf16>
    %470 = vector.shape_cast %469 : vector<1x1x16x512xbf16> to vector<16x512xbf16>
    %c1_569 = arith.constant 1 : index
    %c96_570 = arith.constant 96 : index
    %c0_571 = arith.constant 0 : index
    %471 = vector.load %arg6[%c1_569, %c96_570, %c0_571] : memref<2x176x512xbf16, #tpu.memory_space<vmem>>, vector<1x16x512xbf16>
    %472 = vector.shape_cast %471 : vector<1x16x512xbf16> to vector<16x512xbf16>
    %473 = vector.shape_cast %470 : vector<16x512xbf16> to vector<1x16x512xbf16>
    tpu.vector_store %arg6[%c1_569, %c96_570, %c0_571], %473 {strides = array<i32>} : memref<2x176x512xbf16, #tpu.memory_space<vmem>>, vector<1x16x512xbf16>,
    %c0_572 = arith.constant 0 : index
    %c0_573 = arith.constant 0 : index
    %c0_574 = arith.constant 0 : index
    %c189 = arith.constant 189 : index
    %474 = vector.load %arg2[%c0_572, %c0_573, %c0_574, %c189] : memref<1x1x16x896xbf16, #tpu.memory_space<vmem>>, vector<1x1x16x512xbf16>
    %475 = vector.shape_cast %474 : vector<1x1x16x512xbf16> to vector<16x512xbf16>
    %c1_575 = arith.constant 1 : index
    %c112_576 = arith.constant 112 : index
    %c0_577 = arith.constant 0 : index
    %476 = vector.load %arg6[%c1_575, %c112_576, %c0_577] : memref<2x176x512xbf16, #tpu.memory_space<vmem>>, vector<1x16x512xbf16>
    %477 = vector.shape_cast %476 : vector<1x16x512xbf16> to vector<16x512xbf16>
    %478 = vector.shape_cast %475 : vector<16x512xbf16> to vector<1x16x512xbf16>
    tpu.vector_store %arg6[%c1_575, %c112_576, %c0_577], %478 {strides = array<i32>} : memref<2x176x512xbf16, #tpu.memory_space<vmem>>, vector<1x16x512xbf16>,
    %c0_578 = arith.constant 0 : index
    %c0_579 = arith.constant 0 : index
    %c0_580 = arith.constant 0 : index
    %c190 = arith.constant 190 : index
    %479 = vector.load %arg2[%c0_578, %c0_579, %c0_580, %c190] : memref<1x1x16x896xbf16, #tpu.memory_space<vmem>>, vector<1x1x16x512xbf16>
    %480 = vector.shape_cast %479 : vector<1x1x16x512xbf16> to vector<16x512xbf16>
    %c1_581 = arith.constant 1 : index
    %c128_582 = arith.constant 128 : index
    %c0_583 = arith.constant 0 : index
    %481 = vector.load %arg6[%c1_581, %c128_582, %c0_583] : memref<2x176x512xbf16, #tpu.memory_space<vmem>>, vector<1x16x512xbf16>
    %482 = vector.shape_cast %481 : vector<1x16x512xbf16> to vector<16x512xbf16>
    %483 = vector.shape_cast %480 : vector<16x512xbf16> to vector<1x16x512xbf16>
    tpu.vector_store %arg6[%c1_581, %c128_582, %c0_583], %483 {strides = array<i32>} : memref<2x176x512xbf16, #tpu.memory_space<vmem>>, vector<1x16x512xbf16>,
    %c0_584 = arith.constant 0 : index
    %c0_585 = arith.constant 0 : index
    %c0_586 = arith.constant 0 : index
    %c191 = arith.constant 191 : index
    %484 = vector.load %arg2[%c0_584, %c0_585, %c0_586, %c191] : memref<1x1x16x896xbf16, #tpu.memory_space<vmem>>, vector<1x1x16x512xbf16>
    %485 = vector.shape_cast %484 : vector<1x1x16x512xbf16> to vector<16x512xbf16>
    %c1_587 = arith.constant 1 : index
    %c144_588 = arith.constant 144 : index
    %c0_589 = arith.constant 0 : index
    %486 = vector.load %arg6[%c1_587, %c144_588, %c0_589] : memref<2x176x512xbf16, #tpu.memory_space<vmem>>, vector<1x16x512xbf16>
    %487 = vector.shape_cast %486 : vector<1x16x512xbf16> to vector<16x512xbf16>
    %488 = vector.shape_cast %485 : vector<16x512xbf16> to vector<1x16x512xbf16>
    tpu.vector_store %arg6[%c1_587, %c144_588, %c0_589], %488 {strides = array<i32>} : memref<2x176x512xbf16, #tpu.memory_space<vmem>>, vector<1x16x512xbf16>,
    %c0_590 = arith.constant 0 : index
    %c0_591 = arith.constant 0 : index
    %c0_592 = arith.constant 0 : index
    %c192 = arith.constant 192 : index
    %489 = vector.load %arg2[%c0_590, %c0_591, %c0_592, %c192] : memref<1x1x16x896xbf16, #tpu.memory_space<vmem>>, vector<1x1x16x512xbf16>
    %490 = vector.shape_cast %489 : vector<1x1x16x512xbf16> to vector<16x512xbf16>
    %c1_593 = arith.constant 1 : index
    %c160_594 = arith.constant 160 : index
    %c0_595 = arith.constant 0 : index
    %491 = vector.load %arg6[%c1_593, %c160_594, %c0_595] : memref<2x176x512xbf16, #tpu.memory_space<vmem>>, vector<1x16x512xbf16>
    %492 = vector.shape_cast %491 : vector<1x16x512xbf16> to vector<16x512xbf16>
    %493 = vector.shape_cast %490 : vector<16x512xbf16> to vector<1x16x512xbf16>
    tpu.vector_store %arg6[%c1_593, %c160_594, %c0_595], %493 {strides = array<i32>} : memref<2x176x512xbf16, #tpu.memory_space<vmem>>, vector<1x16x512xbf16>,
    %c7_596 = arith.constant 7 : index
    %c0_597 = arith.constant 0 : index
    %c0_598 = arith.constant 0 : index
    %494 = vector.load %arg3[%c7_596, %c0_597, %c0_598] : memref<11x8x176xbf16, #tpu.memory_space<vmem>>, vector<1x8x176xbf16>
    %495 = vector.shape_cast %494 : vector<1x8x176xbf16> to vector<8x176xbf16>
    %c1_599 = arith.constant 1 : index
    %c0_600 = arith.constant 0 : index
    %c0_601 = arith.constant 0 : index
    %496 = vector.load %arg6[%c1_599, %c0_600, %c0_601] : memref<2x176x512xbf16, #tpu.memory_space<vmem>>, vector<1x176x512xbf16>
    %497 = vector.shape_cast %496 : vector<1x176x512xbf16> to vector<176x512xbf16>
    %cst_602 = arith.constant dense<0.000000e+00> : vector<8x512xf32>
    %498 = tpu.matmul %495, %497, %cst_602 {dimension_numbers = #tpu.dot_dimension_numbers<[1], [0], [0], [1], [0, 0, 1, 1], [], []>} : vector<8x176xbf16>, vector<176x512xbf16>, vector<8x512xf32> -> vector<8x512xf32>
    %c0_603 = arith.constant 0 : index
    %c0_604 = arith.constant 0 : index
    %499 = vector.load %arg7[%c0_603, %c0_604] : memref<8x512xf32, #tpu.memory_space<vmem>>, vector<8x512xf32>
    %500 = arith.addf %499, %498 : vector<8x512xf32>
    %c0_605 = arith.constant 0 : index
    %c0_606 = arith.constant 0 : index
    %501 = vector.load %arg7[%c0_605, %c0_606] : memref<8x512xf32, #tpu.memory_space<vmem>>, vector<8x512xf32>
    tpu.vector_store %arg7[%c0_605, %c0_606], %500 {strides = array<i32>} : memref<8x512xf32, #tpu.memory_space<vmem>>, vector<8x512xf32>,
    %c0_607 = arith.constant 0 : index
    %c0_608 = arith.constant 0 : index
    %c0_609 = arith.constant 0 : index
    %c208 = arith.constant 208 : index
    %502 = vector.load %arg2[%c0_607, %c0_608, %c0_609, %c208] : memref<1x1x16x896xbf16, #tpu.memory_space<vmem>>, vector<1x1x16x512xbf16>
    %503 = vector.shape_cast %502 : vector<1x1x16x512xbf16> to vector<16x512xbf16>
    %c0_610 = arith.constant 0 : index
    %c0_611 = arith.constant 0 : index
    %c0_612 = arith.constant 0 : index
    %504 = vector.load %arg6[%c0_610, %c0_611, %c0_612] : memref<2x176x512xbf16, #tpu.memory_space<vmem>>, vector<1x16x512xbf16>
    %505 = vector.shape_cast %504 : vector<1x16x512xbf16> to vector<16x512xbf16>
    %506 = vector.shape_cast %503 : vector<16x512xbf16> to vector<1x16x512xbf16>
    tpu.vector_store %arg6[%c0_610, %c0_611, %c0_612], %506 {strides = array<i32>} : memref<2x176x512xbf16, #tpu.memory_space<vmem>>, vector<1x16x512xbf16>,
    %c0_613 = arith.constant 0 : index
    %c0_614 = arith.constant 0 : index
    %c0_615 = arith.constant 0 : index
    %c209 = arith.constant 209 : index
    %507 = vector.load %arg2[%c0_613, %c0_614, %c0_615, %c209] : memref<1x1x16x896xbf16, #tpu.memory_space<vmem>>, vector<1x1x16x512xbf16>
    %508 = vector.shape_cast %507 : vector<1x1x16x512xbf16> to vector<16x512xbf16>
    %c0_616 = arith.constant 0 : index
    %c16_617 = arith.constant 16 : index
    %c0_618 = arith.constant 0 : index
    %509 = vector.load %arg6[%c0_616, %c16_617, %c0_618] : memref<2x176x512xbf16, #tpu.memory_space<vmem>>, vector<1x16x512xbf16>
    %510 = vector.shape_cast %509 : vector<1x16x512xbf16> to vector<16x512xbf16>
    %511 = vector.shape_cast %508 : vector<16x512xbf16> to vector<1x16x512xbf16>
    tpu.vector_store %arg6[%c0_616, %c16_617, %c0_618], %511 {strides = array<i32>} : memref<2x176x512xbf16, #tpu.memory_space<vmem>>, vector<1x16x512xbf16>,
    %c0_619 = arith.constant 0 : index
    %c0_620 = arith.constant 0 : index
    %c0_621 = arith.constant 0 : index
    %c210 = arith.constant 210 : index
    %512 = vector.load %arg2[%c0_619, %c0_620, %c0_621, %c210] : memref<1x1x16x896xbf16, #tpu.memory_space<vmem>>, vector<1x1x16x512xbf16>
    %513 = vector.shape_cast %512 : vector<1x1x16x512xbf16> to vector<16x512xbf16>
    %c0_622 = arith.constant 0 : index
    %c32_623 = arith.constant 32 : index
    %c0_624 = arith.constant 0 : index
    %514 = vector.load %arg6[%c0_622, %c32_623, %c0_624] : memref<2x176x512xbf16, #tpu.memory_space<vmem>>, vector<1x16x512xbf16>
    %515 = vector.shape_cast %514 : vector<1x16x512xbf16> to vector<16x512xbf16>
    %516 = vector.shape_cast %513 : vector<16x512xbf16> to vector<1x16x512xbf16>
    tpu.vector_store %arg6[%c0_622, %c32_623, %c0_624], %516 {strides = array<i32>} : memref<2x176x512xbf16, #tpu.memory_space<vmem>>, vector<1x16x512xbf16>,
    %c0_625 = arith.constant 0 : index
    %c0_626 = arith.constant 0 : index
    %c0_627 = arith.constant 0 : index
    %c211 = arith.constant 211 : index
    %517 = vector.load %arg2[%c0_625, %c0_626, %c0_627, %c211] : memref<1x1x16x896xbf16, #tpu.memory_space<vmem>>, vector<1x1x16x512xbf16>
    %518 = vector.shape_cast %517 : vector<1x1x16x512xbf16> to vector<16x512xbf16>
    %c0_628 = arith.constant 0 : index
    %c48_629 = arith.constant 48 : index
    %c0_630 = arith.constant 0 : index
    %519 = vector.load %arg6[%c0_628, %c48_629, %c0_630] : memref<2x176x512xbf16, #tpu.memory_space<vmem>>, vector<1x16x512xbf16>
    %520 = vector.shape_cast %519 : vector<1x16x512xbf16> to vector<16x512xbf16>
    %521 = vector.shape_cast %518 : vector<16x512xbf16> to vector<1x16x512xbf16>
    tpu.vector_store %arg6[%c0_628, %c48_629, %c0_630], %521 {strides = array<i32>} : memref<2x176x512xbf16, #tpu.memory_space<vmem>>, vector<1x16x512xbf16>,
    %c0_631 = arith.constant 0 : index
    %c0_632 = arith.constant 0 : index
    %c0_633 = arith.constant 0 : index
    %c212 = arith.constant 212 : index
    %522 = vector.load %arg2[%c0_631, %c0_632, %c0_633, %c212] : memref<1x1x16x896xbf16, #tpu.memory_space<vmem>>, vector<1x1x16x512xbf16>
    %523 = vector.shape_cast %522 : vector<1x1x16x512xbf16> to vector<16x512xbf16>
    %c0_634 = arith.constant 0 : index
    %c64_635 = arith.constant 64 : index
    %c0_636 = arith.constant 0 : index
    %524 = vector.load %arg6[%c0_634, %c64_635, %c0_636] : memref<2x176x512xbf16, #tpu.memory_space<vmem>>, vector<1x16x512xbf16>
    %525 = vector.shape_cast %524 : vector<1x16x512xbf16> to vector<16x512xbf16>
    %526 = vector.shape_cast %523 : vector<16x512xbf16> to vector<1x16x512xbf16>
    tpu.vector_store %arg6[%c0_634, %c64_635, %c0_636], %526 {strides = array<i32>} : memref<2x176x512xbf16, #tpu.memory_space<vmem>>, vector<1x16x512xbf16>,
    %c0_637 = arith.constant 0 : index
    %c0_638 = arith.constant 0 : index
    %c0_639 = arith.constant 0 : index
    %c213 = arith.constant 213 : index
    %527 = vector.load %arg2[%c0_637, %c0_638, %c0_639, %c213] : memref<1x1x16x896xbf16, #tpu.memory_space<vmem>>, vector<1x1x16x512xbf16>
    %528 = vector.shape_cast %527 : vector<1x1x16x512xbf16> to vector<16x512xbf16>
    %c0_640 = arith.constant 0 : index
    %c80_641 = arith.constant 80 : index
    %c0_642 = arith.constant 0 : index
    %529 = vector.load %arg6[%c0_640, %c80_641, %c0_642] : memref<2x176x512xbf16, #tpu.memory_space<vmem>>, vector<1x16x512xbf16>
    %530 = vector.shape_cast %529 : vector<1x16x512xbf16> to vector<16x512xbf16>
    %531 = vector.shape_cast %528 : vector<16x512xbf16> to vector<1x16x512xbf16>
    tpu.vector_store %arg6[%c0_640, %c80_641, %c0_642], %531 {strides = array<i32>} : memref<2x176x512xbf16, #tpu.memory_space<vmem>>, vector<1x16x512xbf16>,
    %c0_643 = arith.constant 0 : index
    %c0_644 = arith.constant 0 : index
    %c0_645 = arith.constant 0 : index
    %c214 = arith.constant 214 : index
    %532 = vector.load %arg2[%c0_643, %c0_644, %c0_645, %c214] : memref<1x1x16x896xbf16, #tpu.memory_space<vmem>>, vector<1x1x16x512xbf16>
    %533 = vector.shape_cast %532 : vector<1x1x16x512xbf16> to vector<16x512xbf16>
    %c0_646 = arith.constant 0 : index
    %c96_647 = arith.constant 96 : index
    %c0_648 = arith.constant 0 : index
    %534 = vector.load %arg6[%c0_646, %c96_647, %c0_648] : memref<2x176x512xbf16, #tpu.memory_space<vmem>>, vector<1x16x512xbf16>
    %535 = vector.shape_cast %534 : vector<1x16x512xbf16> to vector<16x512xbf16>
    %536 = vector.shape_cast %533 : vector<16x512xbf16> to vector<1x16x512xbf16>
    tpu.vector_store %arg6[%c0_646, %c96_647, %c0_648], %536 {strides = array<i32>} : memref<2x176x512xbf16, #tpu.memory_space<vmem>>, vector<1x16x512xbf16>,
    %c0_649 = arith.constant 0 : index
    %c0_650 = arith.constant 0 : index
    %c0_651 = arith.constant 0 : index
    %c215 = arith.constant 215 : index
    %537 = vector.load %arg2[%c0_649, %c0_650, %c0_651, %c215] : memref<1x1x16x896xbf16, #tpu.memory_space<vmem>>, vector<1x1x16x512xbf16>
    %538 = vector.shape_cast %537 : vector<1x1x16x512xbf16> to vector<16x512xbf16>
    %c0_652 = arith.constant 0 : index
    %c112_653 = arith.constant 112 : index
    %c0_654 = arith.constant 0 : index
    %539 = vector.load %arg6[%c0_652, %c112_653, %c0_654] : memref<2x176x512xbf16, #tpu.memory_space<vmem>>, vector<1x16x512xbf16>
    %540 = vector.shape_cast %539 : vector<1x16x512xbf16> to vector<16x512xbf16>
    %541 = vector.shape_cast %538 : vector<16x512xbf16> to vector<1x16x512xbf16>
    tpu.vector_store %arg6[%c0_652, %c112_653, %c0_654], %541 {strides = array<i32>} : memref<2x176x512xbf16, #tpu.memory_space<vmem>>, vector<1x16x512xbf16>,
    %c0_655 = arith.constant 0 : index
    %c0_656 = arith.constant 0 : index
    %c0_657 = arith.constant 0 : index
    %c216 = arith.constant 216 : index
    %542 = vector.load %arg2[%c0_655, %c0_656, %c0_657, %c216] : memref<1x1x16x896xbf16, #tpu.memory_space<vmem>>, vector<1x1x16x512xbf16>
    %543 = vector.shape_cast %542 : vector<1x1x16x512xbf16> to vector<16x512xbf16>
    %c0_658 = arith.constant 0 : index
    %c128_659 = arith.constant 128 : index
    %c0_660 = arith.constant 0 : index
    %544 = vector.load %arg6[%c0_658, %c128_659, %c0_660] : memref<2x176x512xbf16, #tpu.memory_space<vmem>>, vector<1x16x512xbf16>
    %545 = vector.shape_cast %544 : vector<1x16x512xbf16> to vector<16x512xbf16>
    %546 = vector.shape_cast %543 : vector<16x512xbf16> to vector<1x16x512xbf16>
    tpu.vector_store %arg6[%c0_658, %c128_659, %c0_660], %546 {strides = array<i32>} : memref<2x176x512xbf16, #tpu.memory_space<vmem>>, vector<1x16x512xbf16>,
    %c0_661 = arith.constant 0 : index
    %c0_662 = arith.constant 0 : index
    %c0_663 = arith.constant 0 : index
    %c217 = arith.constant 217 : index
    %547 = vector.load %arg2[%c0_661, %c0_662, %c0_663, %c217] : memref<1x1x16x896xbf16, #tpu.memory_space<vmem>>, vector<1x1x16x512xbf16>
    %548 = vector.shape_cast %547 : vector<1x1x16x512xbf16> to vector<16x512xbf16>
    %c0_664 = arith.constant 0 : index
    %c144_665 = arith.constant 144 : index
    %c0_666 = arith.constant 0 : index
    %549 = vector.load %arg6[%c0_664, %c144_665, %c0_666] : memref<2x176x512xbf16, #tpu.memory_space<vmem>>, vector<1x16x512xbf16>
    %550 = vector.shape_cast %549 : vector<1x16x512xbf16> to vector<16x512xbf16>
    %551 = vector.shape_cast %548 : vector<16x512xbf16> to vector<1x16x512xbf16>
    tpu.vector_store %arg6[%c0_664, %c144_665, %c0_666], %551 {strides = array<i32>} : memref<2x176x512xbf16, #tpu.memory_space<vmem>>, vector<1x16x512xbf16>,
    %c0_667 = arith.constant 0 : index
    %c0_668 = arith.constant 0 : index
    %c0_669 = arith.constant 0 : index
    %c218 = arith.constant 218 : index
    %552 = vector.load %arg2[%c0_667, %c0_668, %c0_669, %c218] : memref<1x1x16x896xbf16, #tpu.memory_space<vmem>>, vector<1x1x16x512xbf16>
    %553 = vector.shape_cast %552 : vector<1x1x16x512xbf16> to vector<16x512xbf16>
    %c0_670 = arith.constant 0 : index
    %c160_671 = arith.constant 160 : index
    %c0_672 = arith.constant 0 : index
    %554 = vector.load %arg6[%c0_670, %c160_671, %c0_672] : memref<2x176x512xbf16, #tpu.memory_space<vmem>>, vector<1x16x512xbf16>
    %555 = vector.shape_cast %554 : vector<1x16x512xbf16> to vector<16x512xbf16>
    %556 = vector.shape_cast %553 : vector<16x512xbf16> to vector<1x16x512xbf16>
    tpu.vector_store %arg6[%c0_670, %c160_671, %c0_672], %556 {strides = array<i32>} : memref<2x176x512xbf16, #tpu.memory_space<vmem>>, vector<1x16x512xbf16>,
    %c8_673 = arith.constant 8 : index
    %c0_674 = arith.constant 0 : index
    %c0_675 = arith.constant 0 : index
    %557 = vector.load %arg3[%c8_673, %c0_674, %c0_675] : memref<11x8x176xbf16, #tpu.memory_space<vmem>>, vector<1x8x176xbf16>
    %558 = vector.shape_cast %557 : vector<1x8x176xbf16> to vector<8x176xbf16>
    %c0_676 = arith.constant 0 : index
    %c0_677 = arith.constant 0 : index
    %c0_678 = arith.constant 0 : index
    %559 = vector.load %arg6[%c0_676, %c0_677, %c0_678] : memref<2x176x512xbf16, #tpu.memory_space<vmem>>, vector<1x176x512xbf16>
    %560 = vector.shape_cast %559 : vector<1x176x512xbf16> to vector<176x512xbf16>
    %cst_679 = arith.constant dense<0.000000e+00> : vector<8x512xf32>
    %561 = tpu.matmul %558, %560, %cst_679 {dimension_numbers = #tpu.dot_dimension_numbers<[1], [0], [0], [1], [0, 0, 1, 1], [], []>} : vector<8x176xbf16>, vector<176x512xbf16>, vector<8x512xf32> -> vector<8x512xf32>
    %c0_680 = arith.constant 0 : index
    %c0_681 = arith.constant 0 : index
    %562 = vector.load %arg7[%c0_680, %c0_681] : memref<8x512xf32, #tpu.memory_space<vmem>>, vector<8x512xf32>
    %563 = arith.addf %562, %561 : vector<8x512xf32>
    %c0_682 = arith.constant 0 : index
    %c0_683 = arith.constant 0 : index
    %564 = vector.load %arg7[%c0_682, %c0_683] : memref<8x512xf32, #tpu.memory_space<vmem>>, vector<8x512xf32>
    tpu.vector_store %arg7[%c0_682, %c0_683], %563 {strides = array<i32>} : memref<8x512xf32, #tpu.memory_space<vmem>>, vector<8x512xf32>,
    %c0_684 = arith.constant 0 : index
    %c0_685 = arith.constant 0 : index
    %c0_686 = arith.constant 0 : index
    %c234 = arith.constant 234 : index
    %565 = vector.load %arg2[%c0_684, %c0_685, %c0_686, %c234] : memref<1x1x16x896xbf16, #tpu.memory_space<vmem>>, vector<1x1x16x512xbf16>
    %566 = vector.shape_cast %565 : vector<1x1x16x512xbf16> to vector<16x512xbf16>
    %c1_687 = arith.constant 1 : index
    %c0_688 = arith.constant 0 : index
    %c0_689 = arith.constant 0 : index
    %567 = vector.load %arg6[%c1_687, %c0_688, %c0_689] : memref<2x176x512xbf16, #tpu.memory_space<vmem>>, vector<1x16x512xbf16>
    %568 = vector.shape_cast %567 : vector<1x16x512xbf16> to vector<16x512xbf16>
    %569 = vector.shape_cast %566 : vector<16x512xbf16> to vector<1x16x512xbf16>
    tpu.vector_store %arg6[%c1_687, %c0_688, %c0_689], %569 {strides = array<i32>} : memref<2x176x512xbf16, #tpu.memory_space<vmem>>, vector<1x16x512xbf16>,
    %c0_690 = arith.constant 0 : index
    %c0_691 = arith.constant 0 : index
    %c0_692 = arith.constant 0 : index
    %c235 = arith.constant 235 : index
    %570 = vector.load %arg2[%c0_690, %c0_691, %c0_692, %c235] : memref<1x1x16x896xbf16, #tpu.memory_space<vmem>>, vector<1x1x16x512xbf16>
    %571 = vector.shape_cast %570 : vector<1x1x16x512xbf16> to vector<16x512xbf16>
    %c1_693 = arith.constant 1 : index
    %c16_694 = arith.constant 16 : index
    %c0_695 = arith.constant 0 : index
    %572 = vector.load %arg6[%c1_693, %c16_694, %c0_695] : memref<2x176x512xbf16, #tpu.memory_space<vmem>>, vector<1x16x512xbf16>
    %573 = vector.shape_cast %572 : vector<1x16x512xbf16> to vector<16x512xbf16>
    %574 = vector.shape_cast %571 : vector<16x512xbf16> to vector<1x16x512xbf16>
    tpu.vector_store %arg6[%c1_693, %c16_694, %c0_695], %574 {strides = array<i32>} : memref<2x176x512xbf16, #tpu.memory_space<vmem>>, vector<1x16x512xbf16>,
    %c0_696 = arith.constant 0 : index
    %c0_697 = arith.constant 0 : index
    %c0_698 = arith.constant 0 : index
    %c236 = arith.constant 236 : index
    %575 = vector.load %arg2[%c0_696, %c0_697, %c0_698, %c236] : memref<1x1x16x896xbf16, #tpu.memory_space<vmem>>, vector<1x1x16x512xbf16>
    %576 = vector.shape_cast %575 : vector<1x1x16x512xbf16> to vector<16x512xbf16>
    %c1_699 = arith.constant 1 : index
    %c32_700 = arith.constant 32 : index
    %c0_701 = arith.constant 0 : index
    %577 = vector.load %arg6[%c1_699, %c32_700, %c0_701] : memref<2x176x512xbf16, #tpu.memory_space<vmem>>, vector<1x16x512xbf16>
    %578 = vector.shape_cast %577 : vector<1x16x512xbf16> to vector<16x512xbf16>
    %579 = vector.shape_cast %576 : vector<16x512xbf16> to vector<1x16x512xbf16>
    tpu.vector_store %arg6[%c1_699, %c32_700, %c0_701], %579 {strides = array<i32>} : memref<2x176x512xbf16, #tpu.memory_space<vmem>>, vector<1x16x512xbf16>,
    %c0_702 = arith.constant 0 : index
    %c0_703 = arith.constant 0 : index
    %c0_704 = arith.constant 0 : index
    %c237 = arith.constant 237 : index
    %580 = vector.load %arg2[%c0_702, %c0_703, %c0_704, %c237] : memref<1x1x16x896xbf16, #tpu.memory_space<vmem>>, vector<1x1x16x512xbf16>
    %581 = vector.shape_cast %580 : vector<1x1x16x512xbf16> to vector<16x512xbf16>
    %c1_705 = arith.constant 1 : index
    %c48_706 = arith.constant 48 : index
    %c0_707 = arith.constant 0 : index
    %582 = vector.load %arg6[%c1_705, %c48_706, %c0_707] : memref<2x176x512xbf16, #tpu.memory_space<vmem>>, vector<1x16x512xbf16>
    %583 = vector.shape_cast %582 : vector<1x16x512xbf16> to vector<16x512xbf16>
    %584 = vector.shape_cast %581 : vector<16x512xbf16> to vector<1x16x512xbf16>
    tpu.vector_store %arg6[%c1_705, %c48_706, %c0_707], %584 {strides = array<i32>} : memref<2x176x512xbf16, #tpu.memory_space<vmem>>, vector<1x16x512xbf16>,
    %c0_708 = arith.constant 0 : index
    %c0_709 = arith.constant 0 : index
    %c0_710 = arith.constant 0 : index
    %c238 = arith.constant 238 : index
    %585 = vector.load %arg2[%c0_708, %c0_709, %c0_710, %c238] : memref<1x1x16x896xbf16, #tpu.memory_space<vmem>>, vector<1x1x16x512xbf16>
    %586 = vector.shape_cast %585 : vector<1x1x16x512xbf16> to vector<16x512xbf16>
    %c1_711 = arith.constant 1 : index
    %c64_712 = arith.constant 64 : index
    %c0_713 = arith.constant 0 : index
    %587 = vector.load %arg6[%c1_711, %c64_712, %c0_713] : memref<2x176x512xbf16, #tpu.memory_space<vmem>>, vector<1x16x512xbf16>
    %588 = vector.shape_cast %587 : vector<1x16x512xbf16> to vector<16x512xbf16>
    %589 = vector.shape_cast %586 : vector<16x512xbf16> to vector<1x16x512xbf16>
    tpu.vector_store %arg6[%c1_711, %c64_712, %c0_713], %589 {strides = array<i32>} : memref<2x176x512xbf16, #tpu.memory_space<vmem>>, vector<1x16x512xbf16>,
    %c0_714 = arith.constant 0 : index
    %c0_715 = arith.constant 0 : index
    %c0_716 = arith.constant 0 : index
    %c239 = arith.constant 239 : index
    %590 = vector.load %arg2[%c0_714, %c0_715, %c0_716, %c239] : memref<1x1x16x896xbf16, #tpu.memory_space<vmem>>, vector<1x1x16x512xbf16>
    %591 = vector.shape_cast %590 : vector<1x1x16x512xbf16> to vector<16x512xbf16>
    %c1_717 = arith.constant 1 : index
    %c80_718 = arith.constant 80 : index
    %c0_719 = arith.constant 0 : index
    %592 = vector.load %arg6[%c1_717, %c80_718, %c0_719] : memref<2x176x512xbf16, #tpu.memory_space<vmem>>, vector<1x16x512xbf16>
    %593 = vector.shape_cast %592 : vector<1x16x512xbf16> to vector<16x512xbf16>
    %594 = vector.shape_cast %591 : vector<16x512xbf16> to vector<1x16x512xbf16>
    tpu.vector_store %arg6[%c1_717, %c80_718, %c0_719], %594 {strides = array<i32>} : memref<2x176x512xbf16, #tpu.memory_space<vmem>>, vector<1x16x512xbf16>,
    %c0_720 = arith.constant 0 : index
    %c0_721 = arith.constant 0 : index
    %c0_722 = arith.constant 0 : index
    %c240 = arith.constant 240 : index
    %595 = vector.load %arg2[%c0_720, %c0_721, %c0_722, %c240] : memref<1x1x16x896xbf16, #tpu.memory_space<vmem>>, vector<1x1x16x512xbf16>
    %596 = vector.shape_cast %595 : vector<1x1x16x512xbf16> to vector<16x512xbf16>
    %c1_723 = arith.constant 1 : index
    %c96_724 = arith.constant 96 : index
    %c0_725 = arith.constant 0 : index
    %597 = vector.load %arg6[%c1_723, %c96_724, %c0_725] : memref<2x176x512xbf16, #tpu.memory_space<vmem>>, vector<1x16x512xbf16>
    %598 = vector.shape_cast %597 : vector<1x16x512xbf16> to vector<16x512xbf16>
    %599 = vector.shape_cast %596 : vector<16x512xbf16> to vector<1x16x512xbf16>
    tpu.vector_store %arg6[%c1_723, %c96_724, %c0_725], %599 {strides = array<i32>} : memref<2x176x512xbf16, #tpu.memory_space<vmem>>, vector<1x16x512xbf16>,
    %c0_726 = arith.constant 0 : index
    %c0_727 = arith.constant 0 : index
    %c0_728 = arith.constant 0 : index
    %c241 = arith.constant 241 : index
    %600 = vector.load %arg2[%c0_726, %c0_727, %c0_728, %c241] : memref<1x1x16x896xbf16, #tpu.memory_space<vmem>>, vector<1x1x16x512xbf16>
    %601 = vector.shape_cast %600 : vector<1x1x16x512xbf16> to vector<16x512xbf16>
    %c1_729 = arith.constant 1 : index
    %c112_730 = arith.constant 112 : index
    %c0_731 = arith.constant 0 : index
    %602 = vector.load %arg6[%c1_729, %c112_730, %c0_731] : memref<2x176x512xbf16, #tpu.memory_space<vmem>>, vector<1x16x512xbf16>
    %603 = vector.shape_cast %602 : vector<1x16x512xbf16> to vector<16x512xbf16>
    %604 = vector.shape_cast %601 : vector<16x512xbf16> to vector<1x16x512xbf16>
    tpu.vector_store %arg6[%c1_729, %c112_730, %c0_731], %604 {strides = array<i32>} : memref<2x176x512xbf16, #tpu.memory_space<vmem>>, vector<1x16x512xbf16>,
    %c0_732 = arith.constant 0 : index
    %c0_733 = arith.constant 0 : index
    %c0_734 = arith.constant 0 : index
    %c242 = arith.constant 242 : index
    %605 = vector.load %arg2[%c0_732, %c0_733, %c0_734, %c242] : memref<1x1x16x896xbf16, #tpu.memory_space<vmem>>, vector<1x1x16x512xbf16>
    %606 = vector.shape_cast %605 : vector<1x1x16x512xbf16> to vector<16x512xbf16>
    %c1_735 = arith.constant 1 : index
    %c128_736 = arith.constant 128 : index
    %c0_737 = arith.constant 0 : index
    %607 = vector.load %arg6[%c1_735, %c128_736, %c0_737] : memref<2x176x512xbf16, #tpu.memory_space<vmem>>, vector<1x16x512xbf16>
    %608 = vector.shape_cast %607 : vector<1x16x512xbf16> to vector<16x512xbf16>
    %609 = vector.shape_cast %606 : vector<16x512xbf16> to vector<1x16x512xbf16>
    tpu.vector_store %arg6[%c1_735, %c128_736, %c0_737], %609 {strides = array<i32>} : memref<2x176x512xbf16, #tpu.memory_space<vmem>>, vector<1x16x512xbf16>,
    %c0_738 = arith.constant 0 : index
    %c0_739 = arith.constant 0 : index
    %c0_740 = arith.constant 0 : index
    %c243 = arith.constant 243 : index
    %610 = vector.load %arg2[%c0_738, %c0_739, %c0_740, %c243] : memref<1x1x16x896xbf16, #tpu.memory_space<vmem>>, vector<1x1x16x512xbf16>
    %611 = vector.shape_cast %610 : vector<1x1x16x512xbf16> to vector<16x512xbf16>
    %c1_741 = arith.constant 1 : index
    %c144_742 = arith.constant 144 : index
    %c0_743 = arith.constant 0 : index
    %612 = vector.load %arg6[%c1_741, %c144_742, %c0_743] : memref<2x176x512xbf16, #tpu.memory_space<vmem>>, vector<1x16x512xbf16>
    %613 = vector.shape_cast %612 : vector<1x16x512xbf16> to vector<16x512xbf16>
    %614 = vector.shape_cast %611 : vector<16x512xbf16> to vector<1x16x512xbf16>
    tpu.vector_store %arg6[%c1_741, %c144_742, %c0_743], %614 {strides = array<i32>} : memref<2x176x512xbf16, #tpu.memory_space<vmem>>, vector<1x16x512xbf16>,
    %c0_744 = arith.constant 0 : index
    %c0_745 = arith.constant 0 : index
    %c0_746 = arith.constant 0 : index
    %c244 = arith.constant 244 : index
    %615 = vector.load %arg2[%c0_744, %c0_745, %c0_746, %c244] : memref<1x1x16x896xbf16, #tpu.memory_space<vmem>>, vector<1x1x16x512xbf16>
    %616 = vector.shape_cast %615 : vector<1x1x16x512xbf16> to vector<16x512xbf16>
    %c1_747 = arith.constant 1 : index
    %c160_748 = arith.constant 160 : index
    %c0_749 = arith.constant 0 : index
    %617 = vector.load %arg6[%c1_747, %c160_748, %c0_749] : memref<2x176x512xbf16, #tpu.memory_space<vmem>>, vector<1x16x512xbf16>
    %618 = vector.shape_cast %617 : vector<1x16x512xbf16> to vector<16x512xbf16>
    %619 = vector.shape_cast %616 : vector<16x512xbf16> to vector<1x16x512xbf16>
    tpu.vector_store %arg6[%c1_747, %c160_748, %c0_749], %619 {strides = array<i32>} : memref<2x176x512xbf16, #tpu.memory_space<vmem>>, vector<1x16x512xbf16>,
    %c9_750 = arith.constant 9 : index
    %c0_751 = arith.constant 0 : index
    %c0_752 = arith.constant 0 : index
    %620 = vector.load %arg3[%c9_750, %c0_751, %c0_752] : memref<11x8x176xbf16, #tpu.memory_space<vmem>>, vector<1x8x176xbf16>
    %621 = vector.shape_cast %620 : vector<1x8x176xbf16> to vector<8x176xbf16>
    %c1_753 = arith.constant 1 : index
    %c0_754 = arith.constant 0 : index
    %c0_755 = arith.constant 0 : index
    %622 = vector.load %arg6[%c1_753, %c0_754, %c0_755] : memref<2x176x512xbf16, #tpu.memory_space<vmem>>, vector<1x176x512xbf16>
    %623 = vector.shape_cast %622 : vector<1x176x512xbf16> to vector<176x512xbf16>
    %cst_756 = arith.constant dense<0.000000e+00> : vector<8x512xf32>
    %624 = tpu.matmul %621, %623, %cst_756 {dimension_numbers = #tpu.dot_dimension_numbers<[1], [0], [0], [1], [0, 0, 1, 1], [], []>} : vector<8x176xbf16>, vector<176x512xbf16>, vector<8x512xf32> -> vector<8x512xf32>
    %c0_757 = arith.constant 0 : index
    %c0_758 = arith.constant 0 : index
    %625 = vector.load %arg7[%c0_757, %c0_758] : memref<8x512xf32, #tpu.memory_space<vmem>>, vector<8x512xf32>
    %626 = arith.addf %625, %624 : vector<8x512xf32>
    %c0_759 = arith.constant 0 : index
    %c0_760 = arith.constant 0 : index
    %627 = vector.load %arg7[%c0_759, %c0_760] : memref<8x512xf32, #tpu.memory_space<vmem>>, vector<8x512xf32>
    tpu.vector_store %arg7[%c0_759, %c0_760], %626 {strides = array<i32>} : memref<8x512xf32, #tpu.memory_space<vmem>>, vector<8x512xf32>,
    %c0_761 = arith.constant 0 : index
    %c0_762 = arith.constant 0 : index
    %c0_763 = arith.constant 0 : index
    %c260 = arith.constant 260 : index
    %628 = vector.load %arg2[%c0_761, %c0_762, %c0_763, %c260] : memref<1x1x16x896xbf16, #tpu.memory_space<vmem>>, vector<1x1x16x512xbf16>
    %629 = vector.shape_cast %628 : vector<1x1x16x512xbf16> to vector<16x512xbf16>
    %c0_764 = arith.constant 0 : index
    %c0_765 = arith.constant 0 : index
    %c0_766 = arith.constant 0 : index
    %630 = vector.load %arg6[%c0_764, %c0_765, %c0_766] : memref<2x176x512xbf16, #tpu.memory_space<vmem>>, vector<1x16x512xbf16>
    %631 = vector.shape_cast %630 : vector<1x16x512xbf16> to vector<16x512xbf16>
    %632 = vector.shape_cast %629 : vector<16x512xbf16> to vector<1x16x512xbf16>
    tpu.vector_store %arg6[%c0_764, %c0_765, %c0_766], %632 {strides = array<i32>} : memref<2x176x512xbf16, #tpu.memory_space<vmem>>, vector<1x16x512xbf16>,
    %c0_767 = arith.constant 0 : index
    %c0_768 = arith.constant 0 : index
    %c0_769 = arith.constant 0 : index
    %c261 = arith.constant 261 : index
    %633 = vector.load %arg2[%c0_767, %c0_768, %c0_769, %c261] : memref<1x1x16x896xbf16, #tpu.memory_space<vmem>>, vector<1x1x16x512xbf16>
    %634 = vector.shape_cast %633 : vector<1x1x16x512xbf16> to vector<16x512xbf16>
    %c0_770 = arith.constant 0 : index
    %c16_771 = arith.constant 16 : index
    %c0_772 = arith.constant 0 : index
    %635 = vector.load %arg6[%c0_770, %c16_771, %c0_772] : memref<2x176x512xbf16, #tpu.memory_space<vmem>>, vector<1x16x512xbf16>
    %636 = vector.shape_cast %635 : vector<1x16x512xbf16> to vector<16x512xbf16>
    %637 = vector.shape_cast %634 : vector<16x512xbf16> to vector<1x16x512xbf16>
    tpu.vector_store %arg6[%c0_770, %c16_771, %c0_772], %637 {strides = array<i32>} : memref<2x176x512xbf16, #tpu.memory_space<vmem>>, vector<1x16x512xbf16>,
    %c0_773 = arith.constant 0 : index
    %c0_774 = arith.constant 0 : index
    %c0_775 = arith.constant 0 : index
    %c262 = arith.constant 262 : index
    %638 = vector.load %arg2[%c0_773, %c0_774, %c0_775, %c262] : memref<1x1x16x896xbf16, #tpu.memory_space<vmem>>, vector<1x1x16x512xbf16>
    %639 = vector.shape_cast %638 : vector<1x1x16x512xbf16> to vector<16x512xbf16>
    %c0_776 = arith.constant 0 : index
    %c32_777 = arith.constant 32 : index
    %c0_778 = arith.constant 0 : index
    %640 = vector.load %arg6[%c0_776, %c32_777, %c0_778] : memref<2x176x512xbf16, #tpu.memory_space<vmem>>, vector<1x16x512xbf16>
    %641 = vector.shape_cast %640 : vector<1x16x512xbf16> to vector<16x512xbf16>
    %642 = vector.shape_cast %639 : vector<16x512xbf16> to vector<1x16x512xbf16>
    tpu.vector_store %arg6[%c0_776, %c32_777, %c0_778], %642 {strides = array<i32>} : memref<2x176x512xbf16, #tpu.memory_space<vmem>>, vector<1x16x512xbf16>,
    %c0_779 = arith.constant 0 : index
    %c0_780 = arith.constant 0 : index
    %c0_781 = arith.constant 0 : index
    %c263 = arith.constant 263 : index
    %643 = vector.load %arg2[%c0_779, %c0_780, %c0_781, %c263] : memref<1x1x16x896xbf16, #tpu.memory_space<vmem>>, vector<1x1x16x512xbf16>
    %644 = vector.shape_cast %643 : vector<1x1x16x512xbf16> to vector<16x512xbf16>
    %c0_782 = arith.constant 0 : index
    %c48_783 = arith.constant 48 : index
    %c0_784 = arith.constant 0 : index
    %645 = vector.load %arg6[%c0_782, %c48_783, %c0_784] : memref<2x176x512xbf16, #tpu.memory_space<vmem>>, vector<1x16x512xbf16>
    %646 = vector.shape_cast %645 : vector<1x16x512xbf16> to vector<16x512xbf16>
    %647 = vector.shape_cast %644 : vector<16x512xbf16> to vector<1x16x512xbf16>
    tpu.vector_store %arg6[%c0_782, %c48_783, %c0_784], %647 {strides = array<i32>} : memref<2x176x512xbf16, #tpu.memory_space<vmem>>, vector<1x16x512xbf16>,
    %c0_785 = arith.constant 0 : index
    %c0_786 = arith.constant 0 : index
    %c0_787 = arith.constant 0 : index
    %c264 = arith.constant 264 : index
    %648 = vector.load %arg2[%c0_785, %c0_786, %c0_787, %c264] : memref<1x1x16x896xbf16, #tpu.memory_space<vmem>>, vector<1x1x16x512xbf16>
    %649 = vector.shape_cast %648 : vector<1x1x16x512xbf16> to vector<16x512xbf16>
    %c0_788 = arith.constant 0 : index
    %c64_789 = arith.constant 64 : index
    %c0_790 = arith.constant 0 : index
    %650 = vector.load %arg6[%c0_788, %c64_789, %c0_790] : memref<2x176x512xbf16, #tpu.memory_space<vmem>>, vector<1x16x512xbf16>
    %651 = vector.shape_cast %650 : vector<1x16x512xbf16> to vector<16x512xbf16>
    %652 = vector.shape_cast %649 : vector<16x512xbf16> to vector<1x16x512xbf16>
    tpu.vector_store %arg6[%c0_788, %c64_789, %c0_790], %652 {strides = array<i32>} : memref<2x176x512xbf16, #tpu.memory_space<vmem>>, vector<1x16x512xbf16>,
    %c0_791 = arith.constant 0 : index
    %c0_792 = arith.constant 0 : index
    %c0_793 = arith.constant 0 : index
    %c265 = arith.constant 265 : index
    %653 = vector.load %arg2[%c0_791, %c0_792, %c0_793, %c265] : memref<1x1x16x896xbf16, #tpu.memory_space<vmem>>, vector<1x1x16x512xbf16>
    %654 = vector.shape_cast %653 : vector<1x1x16x512xbf16> to vector<16x512xbf16>
    %c0_794 = arith.constant 0 : index
    %c80_795 = arith.constant 80 : index
    %c0_796 = arith.constant 0 : index
    %655 = vector.load %arg6[%c0_794, %c80_795, %c0_796] : memref<2x176x512xbf16, #tpu.memory_space<vmem>>, vector<1x16x512xbf16>
    %656 = vector.shape_cast %655 : vector<1x16x512xbf16> to vector<16x512xbf16>
    %657 = vector.shape_cast %654 : vector<16x512xbf16> to vector<1x16x512xbf16>
    tpu.vector_store %arg6[%c0_794, %c80_795, %c0_796], %657 {strides = array<i32>} : memref<2x176x512xbf16, #tpu.memory_space<vmem>>, vector<1x16x512xbf16>,
    %c0_797 = arith.constant 0 : index
    %c0_798 = arith.constant 0 : index
    %c0_799 = arith.constant 0 : index
    %c266 = arith.constant 266 : index
    %658 = vector.load %arg2[%c0_797, %c0_798, %c0_799, %c266] : memref<1x1x16x896xbf16, #tpu.memory_space<vmem>>, vector<1x1x16x512xbf16>
    %659 = vector.shape_cast %658 : vector<1x1x16x512xbf16> to vector<16x512xbf16>
    %c0_800 = arith.constant 0 : index
    %c96_801 = arith.constant 96 : index
    %c0_802 = arith.constant 0 : index
    %660 = vector.load %arg6[%c0_800, %c96_801, %c0_802] : memref<2x176x512xbf16, #tpu.memory_space<vmem>>, vector<1x16x512xbf16>
    %661 = vector.shape_cast %660 : vector<1x16x512xbf16> to vector<16x512xbf16>
    %662 = vector.shape_cast %659 : vector<16x512xbf16> to vector<1x16x512xbf16>
    tpu.vector_store %arg6[%c0_800, %c96_801, %c0_802], %662 {strides = array<i32>} : memref<2x176x512xbf16, #tpu.memory_space<vmem>>, vector<1x16x512xbf16>,
    %c0_803 = arith.constant 0 : index
    %c0_804 = arith.constant 0 : index
    %c0_805 = arith.constant 0 : index
    %c267 = arith.constant 267 : index
    %663 = vector.load %arg2[%c0_803, %c0_804, %c0_805, %c267] : memref<1x1x16x896xbf16, #tpu.memory_space<vmem>>, vector<1x1x16x512xbf16>
    %664 = vector.shape_cast %663 : vector<1x1x16x512xbf16> to vector<16x512xbf16>
    %c0_806 = arith.constant 0 : index
    %c112_807 = arith.constant 112 : index
    %c0_808 = arith.constant 0 : index
    %665 = vector.load %arg6[%c0_806, %c112_807, %c0_808] : memref<2x176x512xbf16, #tpu.memory_space<vmem>>, vector<1x16x512xbf16>
    %666 = vector.shape_cast %665 : vector<1x16x512xbf16> to vector<16x512xbf16>
    %667 = vector.shape_cast %664 : vector<16x512xbf16> to vector<1x16x512xbf16>
    tpu.vector_store %arg6[%c0_806, %c112_807, %c0_808], %667 {strides = array<i32>} : memref<2x176x512xbf16, #tpu.memory_space<vmem>>, vector<1x16x512xbf16>,
    %c0_809 = arith.constant 0 : index
    %c0_810 = arith.constant 0 : index
    %c0_811 = arith.constant 0 : index
    %c268 = arith.constant 268 : index
    %668 = vector.load %arg2[%c0_809, %c0_810, %c0_811, %c268] : memref<1x1x16x896xbf16, #tpu.memory_space<vmem>>, vector<1x1x16x512xbf16>
    %669 = vector.shape_cast %668 : vector<1x1x16x512xbf16> to vector<16x512xbf16>
    %c0_812 = arith.constant 0 : index
    %c128_813 = arith.constant 128 : index
    %c0_814 = arith.constant 0 : index
    %670 = vector.load %arg6[%c0_812, %c128_813, %c0_814] : memref<2x176x512xbf16, #tpu.memory_space<vmem>>, vector<1x16x512xbf16>
    %671 = vector.shape_cast %670 : vector<1x16x512xbf16> to vector<16x512xbf16>
    %672 = vector.shape_cast %669 : vector<16x512xbf16> to vector<1x16x512xbf16>
    tpu.vector_store %arg6[%c0_812, %c128_813, %c0_814], %672 {strides = array<i32>} : memref<2x176x512xbf16, #tpu.memory_space<vmem>>, vector<1x16x512xbf16>,
    %c0_815 = arith.constant 0 : index
    %c0_816 = arith.constant 0 : index
    %c0_817 = arith.constant 0 : index
    %c269 = arith.constant 269 : index
    %673 = vector.load %arg2[%c0_815, %c0_816, %c0_817, %c269] : memref<1x1x16x896xbf16, #tpu.memory_space<vmem>>, vector<1x1x16x512xbf16>
    %674 = vector.shape_cast %673 : vector<1x1x16x512xbf16> to vector<16x512xbf16>
    %c0_818 = arith.constant 0 : index
    %c144_819 = arith.constant 144 : index
    %c0_820 = arith.constant 0 : index
    %675 = vector.load %arg6[%c0_818, %c144_819, %c0_820] : memref<2x176x512xbf16, #tpu.memory_space<vmem>>, vector<1x16x512xbf16>
    %676 = vector.shape_cast %675 : vector<1x16x512xbf16> to vector<16x512xbf16>
    %677 = vector.shape_cast %674 : vector<16x512xbf16> to vector<1x16x512xbf16>
    tpu.vector_store %arg6[%c0_818, %c144_819, %c0_820], %677 {strides = array<i32>} : memref<2x176x512xbf16, #tpu.memory_space<vmem>>, vector<1x16x512xbf16>,
    %c0_821 = arith.constant 0 : index
    %c0_822 = arith.constant 0 : index
    %c0_823 = arith.constant 0 : index
    %c270 = arith.constant 270 : index
    %678 = vector.load %arg2[%c0_821, %c0_822, %c0_823, %c270] : memref<1x1x16x896xbf16, #tpu.memory_space<vmem>>, vector<1x1x16x512xbf16>
    %679 = vector.shape_cast %678 : vector<1x1x16x512xbf16> to vector<16x512xbf16>
    %c0_824 = arith.constant 0 : index
    %c160_825 = arith.constant 160 : index
    %c0_826 = arith.constant 0 : index
    %680 = vector.load %arg6[%c0_824, %c160_825, %c0_826] : memref<2x176x512xbf16, #tpu.memory_space<vmem>>, vector<1x16x512xbf16>
    %681 = vector.shape_cast %680 : vector<1x16x512xbf16> to vector<16x512xbf16>
    %682 = vector.shape_cast %679 : vector<16x512xbf16> to vector<1x16x512xbf16>
    tpu.vector_store %arg6[%c0_824, %c160_825, %c0_826], %682 {strides = array<i32>} : memref<2x176x512xbf16, #tpu.memory_space<vmem>>, vector<1x16x512xbf16>,
    %c10_827 = arith.constant 10 : index
    %c0_828 = arith.constant 0 : index
    %c0_829 = arith.constant 0 : index
    %683 = vector.load %arg3[%c10_827, %c0_828, %c0_829] : memref<11x8x176xbf16, #tpu.memory_space<vmem>>, vector<1x8x176xbf16>
    %684 = vector.shape_cast %683 : vector<1x8x176xbf16> to vector<8x176xbf16>
    %c0_830 = arith.constant 0 : index
    %c0_831 = arith.constant 0 : index
    %c0_832 = arith.constant 0 : index
    %685 = vector.load %arg6[%c0_830, %c0_831, %c0_832] : memref<2x176x512xbf16, #tpu.memory_space<vmem>>, vector<1x176x512xbf16>
    %686 = vector.shape_cast %685 : vector<1x176x512xbf16> to vector<176x512xbf16>
    %cst_833 = arith.constant dense<0.000000e+00> : vector<8x512xf32>
    %687 = tpu.matmul %684, %686, %cst_833 {dimension_numbers = #tpu.dot_dimension_numbers<[1], [0], [0], [1], [0, 0, 1, 1], [], []>} : vector<8x176xbf16>, vector<176x512xbf16>, vector<8x512xf32> -> vector<8x512xf32>
    %c0_834 = arith.constant 0 : index
    %c0_835 = arith.constant 0 : index
    %688 = vector.load %arg7[%c0_834, %c0_835] : memref<8x512xf32, #tpu.memory_space<vmem>>, vector<8x512xf32>
    %689 = arith.addf %688, %687 : vector<8x512xf32>
    %c0_836 = arith.constant 0 : index
    %c0_837 = arith.constant 0 : index
    %690 = vector.load %arg7[%c0_836, %c0_837] : memref<8x512xf32, #tpu.memory_space<vmem>>, vector<8x512xf32>
    tpu.vector_store %arg7[%c0_836, %c0_837], %689 {strides = array<i32>} : memref<8x512xf32, #tpu.memory_space<vmem>>, vector<8x512xf32>,
    %c0_838 = arith.constant 0 : index
    %c0_839 = arith.constant 0 : index
    %691 = vector.load %arg7[%c0_838, %c0_839] : memref<8x512xf32, #tpu.memory_space<vmem>>, vector<8x512xf32>
    %c0_840 = arith.constant 0 : index
    %c0_841 = arith.constant 0 : index
    %692 = vector.load %arg4[%c0_840, %c0_841] : memref<8x1xf32, #tpu.memory_space<vmem>>, vector<8x1xf32>
    %693 = vector.broadcast %692 : vector<8x1xf32> to vector<8x512xf32>
    %694 = arith.addf %691, %693 : vector<8x512xf32>
    %c0_842 = arith.constant 0 : index
    %c0_843 = arith.constant 0 : index
    %c0_844 = arith.constant 0 : index
    %695 = vector.load %arg5[%c0_842, %c0_843, %c0_844] : memref<1x8x512xf32, #tpu.memory_space<vmem>>, vector<1x8x512xf32>
    %696 = vector.shape_cast %695 : vector<1x8x512xf32> to vector<8x512xf32>
    %697 = vector.shape_cast %694 : vector<8x512xf32> to vector<1x8x512xf32>
    tpu.vector_store %arg5[%c0_842, %c0_843, %c0_844], %697 {strides = array<i32>} : memref<1x8x512xf32, #tpu.memory_space<vmem>>, vector<1x8x512xf32>,
    return
  }
  func.func @transform_0(%arg0: i32, %arg1: i32) -> (i32, i32, i32, i32) {
    %c0_i32 = arith.constant 0 : i32
    %c0_i32_0 = arith.constant 0 : i32
    %c0_i32_1 = arith.constant 0 : i32
    return %arg0, %arg1, %c0_i32, %c0_i32_0 : i32, i32, i32, i32
  }
  func.func @transform_1(%arg0: i32, %arg1: i32) -> (i32, i32, i32) {
    %c0_i32 = arith.constant 0 : i32
    %c0_i32_0 = arith.constant 0 : i32
    %c0_i32_1 = arith.constant 0 : i32
    %c0_i32_2 = arith.constant 0 : i32
    return %c0_i32, %c0_i32_0, %c0_i32_1 : i32, i32, i32
  }
  func.func @transform_2(%arg0: i32, %arg1: i32) -> (i32, i32) {
    %c0_i32 = arith.constant 0 : i32
    %c0_i32_0 = arith.constant 0 : i32
    %c0_i32_1 = arith.constant 0 : i32
    return %c0_i32, %c0_i32_0 : i32, i32
  }
  func.func @transform_3(%arg0: i32, %arg1: i32) -> (i32, i32, i32) {
    %c0_i32 = arith.constant 0 : i32
    %c0_i32_0 = arith.constant 0 : i32
    return %arg0, %c0_i32, %arg1 : i32, i32, i32
  }
}

</mosaic_0001>

<bundles_post_ra>
// kernel: tpu_custom_call.1
= control target key start
LH: loop header
LB: loop body
LE: loop exit
PB: predicated region body
PF: predicated region fallthrough
CT: control target
= control target key end

     0   :  { %8 = vsyncpa [#allocation5], 0  ;;  %s15588_s0 = inlined_call_operand.hbm [shape: bf16[2,1,16,896], index: 0, kind: input, shape index: {}]   ;;  %s15589_s1 = inlined_call_operand.hbm [shape: bf16[11,8,176], index: 1, kind: input, shape index: {}]   ;;  %s15590_s2 = inlined_call_operand.vmem [shape: f32[8,1], index: 2, kind: input, shape index: {}]   ;;  %s15591_s3 = inlined_call_operand.hbm [shape: f32[2,8,512], index: 3, kind: output, shape index: {}]  }
   0x1   :  { %10 = vsyncpa [#allocation5 + $0x1], 0 }
   0x2   :  { %11 = vsyncpa [#allocation8], 0 }
   0x3   :  { %12 = vsyncpa [#allocation6], 0 }
   0x4   :  { %14 = vsyncpa [#allocation6 + $0x1], 0  ;;  %s10955_s12 = smov 0   ;;  %s10957_s13 = smov 0  }
   0x5   :  { %s10959_s14 = smov 0   ;;  %s10961_s15 = smov 0  }
   0x6   :  { %s10963_s16 = smov 0   ;;  %s10965_s17 = smov 0  }
   0x7 LB: > { %s10000_s18 = sadd.s32 4294967295, %s10859_s17   ;;  %s10001_s19 = sadd.s32 4294967294, %s10859_s17   ;;  %s10859_s17 = sphi %s10965_s17, %s20_s17   ;;  %s10855_s16 = sphi %s10963_s16, %s16244_s16   ;;  %s10851_s15 = sphi %s10961_s15, %s16243_s15   ;;  %s10847_s14 = sphi %s10959_s14, %s16242_s14   ;;  %s10843_s13 = sphi %s10957_s13, %s16241_s13   ;;  %s10839_s12 = sphi %s10955_s12, %s16240_s12  }
   0x8   : > { %p54_p0 = scmp.ne.s32.totalorder %s10843_s13, %s10839_s12  ;;  %p10989_p1 = scmp.eq.s32.totalorder %s10000_s18, 0 }
   0x9   : > { %p10993_p2 = scmp.eq.s32.totalorder %s10000_s18, 1  ;;  %p128_p3 = scmp.eq.s32.totalorder %s10001_s19, 1 }
   0xa   : > { %p10999_p4 = por %p10989_p1, %p54_p0  ;;  %p10002_p5 = scmp.ge.s32.totalorder %s10859_s17, 1 }
   0xb   : > { %p11004_p6 = por %p128_p3, %p54_p0  ;;  %p135_p7 = scmp.lt.s32.totalorder %s10859_s17, 3 }
   0xc   : > { %s15787_s22 = scalar_select %p10999_p4, 1, 0 }
   0xd   : > { %s15788_s23 = scalar_select %p11004_p6, 1, 0 }
   0xe   : > { %p11009_p8 = pnand %p10002_p5, %p135_p7  ;;  %s10861_s25 = smov [#allocation7]  }
   0xf   : > { %s147_s26 = sshll.u32 %s10861_s25, 4  ;;  %p10004_p10 = scmp.ge.s32.totalorder %s10859_s17, 2  ;;  %s148_s26 = int_to_ptr.vmem [resolvable:$true] %s147_s26 }
  0x10   : > { %p10554_p9 = pneg %p11009_p8  ;;  %s32_s28 = sadd.s32 1, %s10855_s16 }
  0x11   : > { %s10732_s29 = scalar_lea.vmem %s148_s26, 1408  ;;  %p10740_p5 = scmp.lt.s32.totalorder %s148_s26, %s148_s26 }
  0x12   : > { %p11018_p11 = pnand %p10554_p9, %p10989_p1  ;;  %p10733_p13 = scmp.ne.s32.totalorder %s148_s26, %s10732_s29 }
  0x13   : > { %p10741_p7 = scmp.lt.s32.totalorder %s10732_s29, %s10732_s29 }
  0x14   : > { %p10723_p12 = pneg %p11018_p11 }
  0x15   : > { %p10742_p6 = por %p10741_p7, %p10740_p5 }
  0x16   : > { %p10735_p0 = pnand %p10733_p13, %p10723_p12 }
  0x18   : > { %p10736_p3 = pneg %p10735_p0 }
  0x1a   : > { %p10743_p4 = pnand %p10742_p6, %p10736_p3 }
  0x1c   : > { %10746 = shalt.err (!%p10743_p4)
}
  0x1d   : > { %s10862_s30 = smov 128   ;;  %s10863_s4 = smov 8  }
  0x1e   : > { %10557 = dma.hbm_to_vmem [thread:$0]  (!%p11018_p11), %s15589_s1, 1408, %s148_s26, [#allocation8], %s10862_s30, %s10862_s30, %s10863_s4  }
  0x1f   : > { %p34_p6 = scmp.ge.s32.totalorder %s32_s28, 2  ;;  %s41_s7 = sadd.s32 1, %s10847_s14 }
  0x20   : > { %p48_p4 = scmp.ne.s32.totalorder %s10847_s14, %s10843_s13  ;;  %p49_p9 = scmp.eq.s32.totalorder %s10859_s17, 0 }
  0x21   : > { %s16246_s28 = smov (%p34_p6, %s32_s28), 0  ;;  %p10567_p0 = scmp.lt.s32.totalorder %s10859_s17, 2 }
  0x22   : > { %p50_p12 = por %p49_p9, %p48_p4  ;;  %p11038_p13 = por %p10993_p2, %p48_p4 }
  0x23   : > { %s36_s9 = ssub.s32 %s10855_s16, %s16246_s28  ;;  %s164_s10 = sand.u32 1, %s10847_s14  }
  0x24   : > { %p39_p3 = scmp.eq.s32.totalorder %s36_s9, 0  ;;  %s10543_s11 = smul.u32 56, %s164_s10 }
  0x25   : > { %s10544_s19 = smul.u32 896, %s10855_s16  ;;  %p11050_p11 = pnand %p10567_p0, %p50_p12 }
  0x26   : > { %s11047_s18 = scalar_select %p39_p3, %s10847_s14, %s41_s7  }
  0x27   : > { %s168_s25 = scalar_lea.vmem [#allocation4], %s10543_s11  ;;  %s176_s30 = scalar_lea.hbm %s15588_s0, %s10544_s19 }
  0x28   : > { %s177_s26 = sshll.u32 %s168_s25, 4  ;;  %s165_s4 = scalar_lea.sflag [#allocation5], %s164_s10  ;;  %s178_s26 = int_to_ptr.vmem [resolvable:$true] %s177_s26 }
  0x29   : > { %p10749_p2 = pneg %p11050_p11  ;;  %s10760_s5 = scalar_lea.vmem %s178_s26, 896 }
  0x2a   : > { %p10761_p5 = scmp.ne.s32.totalorder %s178_s26, %s10760_s5  ;;  %s10864_s6 = smov [#allocation4]  }
  0x2b   : > { %s10765_s7 = sshll.u32 %s10864_s6, 4  ;;  %s10766_s7 = int_to_ptr.vmem [resolvable:$false] %s10765_s7 }
  0x2c   : > { %p10763_p7 = pnand %p10761_p5, %p10749_p2  ;;  %s10767_s9 = scalar_lea.vmem %s10766_s7, 1792 }
  0x2d   : > { %p10768_p4 = scmp.lt.s32.totalorder %s178_s26, %s10766_s7  ;;  %p10769_p9 = scmp.lt.s32.totalorder %s10767_s9, %s10760_s5 }
  0x2e   : > { %p10764_p6 = pneg %p10763_p7 }
  0x2f   : > { %p10770_p12 = por %p10769_p9, %p10768_p4 }
  0x31   : > { %p10771_p0 = pnand %p10770_p12, %p10764_p6 }
  0x33   : > { %10774 = shalt.err (!%p10771_p0)
}
  0x34   : > { %s10865_s11 = smov 448   ;;  %s10866_s19 = smov 28  }
  0x35   : > { %10561 = dma.hbm_to_vmem [thread:$0]  (!%p11050_p11), %s176_s30, 896, %s178_s26, %s165_s4, %s10865_s11, %s10865_s11, %s10866_s19  }
  0x36   : > { %189 = sbr.rel (%p11009_p8) target bundleno = 1848 (0x738), region = 32 }
  0x3b   : > { %s11064_s10 = sand.u32 1, %s10843_s13   ;;  %p15793_p3 = scmp.ne.s32.totalorder %s15787_s22, 0 }
  0x3c   : > { %s10545_s25 = smul.u32 56, %s11064_s10  ;;  %s192_s29 = scalar_lea.sflag [#allocation5], %s11064_s10 }
  0x3e   : > { %s11068_s21 = scalar_lea.vmem [#allocation4], %s10545_s25 }
  0x3f   : > { %10826 = dma.done.wait (%p15793_p3), %s192_s29, 896  }
  0x40   : > { %10828 = vsyncadd (%p15793_p3), %s192_s29, 4294966400 }
  0x41   : > { %10830 = dma.done.wait (%p10989_p1), [#allocation8], 1408  }
  0x42   : > { %10832 = vsyncadd (%p10989_p1), [#allocation8], 4294965888  ;;  %v234_v0 = vld [vmem:[%s11068_s21 + $0x10] sm:$0xf]  ;;  %v11080_v1 = vld [vmem:[%s11068_s21] sm:$0xff]  ;;  %s10867_s24 = smov 127  }
  0x43   : > { %248 = vrot.lane.b32.xlu1 %v234_v0, %s10867_s24  ;;  %244 = vrot.lane.b32.xlu0 %v11080_v1, %s10867_s24  ;;  %v11084_v2 = vld [vmem:[%s11068_s21 + $0x1c] sm:$0xff]  ;;  %v11087_v3 = vld [vmem:[%s11068_s21 + $0x8] sm:$0xff]  ;;  %s10868_s20 = smov 126   ;;  %s10869_s22 = smov 125   ;;  %vm262_vm0 = vcmask 1043456   ;;  %vm15784_vm1 = vcmask 990208  }
  0x44   : > { %v237_v4 = vld [vmem:[%s11068_s21 + $0x2c] sm:$0xf]  ;;  %v11093_v5 = vld [vmem:[%s11068_s21 + $0x24] sm:$0xff]  ;;  %v282_v6 = vld [vmem:[%s11068_s21 + $0x10] sm:$0xf]  ;;  %s10870_s26 = smov 124  }
  0x45   : > { %v285_v7 = vld [vmem:[%s11068_s21 + $0x2c] sm:$0xf]  ;;  %v329_v8 = vld [vmem:[%s11068_s21 + $0x10] sm:$0xf]  ;;  %s10871_s27 = smov 123   ;;  %s10872_s30 = smov 122  }
  0x46   : > { %v332_v9 = vld [vmem:[%s11068_s21 + $0x2c] sm:$0xf]  ;;  %v376_v10 = vld [vmem:[%s11068_s21 + $0x10] sm:$0xf]  ;;  %s10873_s4 = smov 121   ;;  %s10874_s5 = smov 120  }
  0x47   : > { %250 = vrot.lane.b32.xlu1 %v11084_v2, %s10867_s24  ;;  %246 = vrot.lane.b32.xlu0 %v11087_v3, %s10867_s24  ;;  %v379_v11 = vld [vmem:[%s11068_s21 + $0x2c] sm:$0xf]  ;;  %v423_v12 = vld [vmem:[%s11068_s21 + $0x10] sm:$0xf]  ;;  %s10875_s6 = smov 119   ;;  %s10876_s7 = smov 118  }
  0x48   : > { %v426_v13 = vld [vmem:[%s11068_s21 + $0x2c] sm:$0xf]  ;;  %v470_v14 = vld [vmem:[%s11068_s21 + $0x10] sm:$0xf]  ;;  %s10877_s9 = smov 102   ;;  %s10878_s11 = smov 101  }
  0x49   : > { %v473_v15 = vld [vmem:[%s11068_s21 + $0x2c] sm:$0xf]  ;;  %v517_v16 = vld [vmem:[%s11068_s21 + $0x10] sm:$0xf]  ;;  %s10879_s19 = smov 100   ;;  %s10880_s25 = smov 99  }
  0x4a   : > { %v520_v17 = vld [vmem:[%s11068_s21 + $0x2c] sm:$0xf]  ;;  %v564_v18 = vld [vmem:[%s11068_s21 + $0x10] sm:$0xf]  ;;  %s10881_s29 = smov 98   ;;  %vm15783_vm2 = vcmask 998400  }
  0x4b   : > { %254 = vrot.lane.b32.xlu1 %v237_v4, %s10867_s24  ;;  %252 = vrot.lane.b32.xlu0 %v11093_v5, %s10867_s24  ;;  %v567_v19 = vld [vmem:[%s11068_s21 + $0x2c] sm:$0xf]  ;;  %v611_v20 = vld [vmem:[%s11068_s21 + $0x10] sm:$0xf]  ;;  %s10882_s24 = smov 97   ;;  %vm15768_vm3 = vcmask 1006592  }
  0x4c   : > { %v614_v21 = vld [vmem:[%s11068_s21 + $0x2c] sm:$0xf]  ;;  %v658_v22 = vld [vmem:[%s11068_s21 + $0x10] sm:$0xf]  ;;  %vm15753_vm4 = vcmask 1014784   ;;  %vm358_vm5 = vcmask 1022976  }
  0x4d   : > { %v661_v23 = vld [vmem:[%s11068_s21 + $0x2c] sm:$0xf]  ;;  %v1066_v28 = vld [vmem:[%s11068_s21 + $0x10] sm:$0xf]  ;;  %vm311_vm6 = vcmask 1031168   ;;  %vm974_vm7 = vcmask 392192  }
  0x4e   : > { %v1069_v31 = vld [vmem:[%s11068_s21 + $0x2c] sm:$0xf]  ;;  %v1114_v36 = vld [vmem:[%s11068_s21 + $0x10] sm:$0xf]  ;;  %vm264_vm8 = vcmask 1039360   ;;  %vm640_vm9 = vcmask 973824  }
  0x4f   : > { %294 = vrot.lane.b32.xlu1 %v11087_v3, %s10868_s20  ;;  %292 = vrot.lane.b32.xlu0 %v11080_v1, %s10868_s20  ;;  %v1117_v39 = vld [vmem:[%s11068_s21 + $0x2c] sm:$0xf]  ;;  %v1161_v44 = vld [vmem:[%s11068_s21 + $0x10] sm:$0xf]  ;;  %vm687_vm10 = vcmask 965632   ;;  %vm593_vm11 = vcmask 982016  }
  0x50   : > { %v1164_v47 = vld [vmem:[%s11068_s21 + $0x2c] sm:$0xf]  ;;  %v1208_v52 = vld [vmem:[%s11068_s21 + $0x10] sm:$0xf]  ;;  %vm15651_vm12 = vcmask 777216   ;;  %vm15627_vm13 = vcmask 785408  }
  0x51   : > { %v1211_v55 = vld [vmem:[%s11068_s21 + $0x2c] sm:$0xf]  ;;  %v1255_v60 = vld [vmem:[%s11068_s21 + $0x10] sm:$0xf]  ;;  %vm15630_vm14 = vcmask 793600   ;;  %vm15648_vm15 = vcmask 801792  }
  0x52   : > { %v1258_v63 = vld [vmem:[%s11068_s21 + $0x2c] sm:$0xf] }
  0x53   : > { %298 = vrot.lane.b32.xlu1 %v11084_v2, %s10868_s20  ;;  %296 = vrot.lane.b32.xlu0 %v282_v6, %s10868_s20 }
  0x57   : > { %302 = vrot.lane.b32.xlu1 %v285_v7, %s10868_s20  ;;  %300 = vrot.lane.b32.xlu0 %v11093_v5, %s10868_s20 }
  0x5b   : > { %341 = vrot.lane.b32.xlu1 %v11087_v3, %s10869_s22  ;;  %339 = vrot.lane.b32.xlu0 %v11080_v1, %s10869_s22 }
  0x5f   : > { %345 = vrot.lane.b32.xlu1 %v11084_v2, %s10869_s22  ;;  %343 = vrot.lane.b32.xlu0 %v329_v8, %s10869_s22  ;;  %v1302_v8 = vld [vmem:[%s11068_s21 + $0x10] sm:$0xf] }
  0x63   : > { %349 = vrot.lane.b32.xlu1 %v332_v9, %s10869_s22  ;;  %347 = vrot.lane.b32.xlu0 %v11093_v5, %s10869_s22 }
  0x67   : > { %388 = vrot.lane.b32.xlu1 %v11087_v3, %s10870_s26  ;;  %386 = vrot.lane.b32.xlu0 %v11080_v1, %s10870_s26 }
  0x6b   : > { %392 = vrot.lane.b32.xlu1 %v11084_v2, %s10870_s26  ;;  %390 = vrot.lane.b32.xlu0 %v376_v10, %s10870_s26 }
  0x6f   : > { %396 = vrot.lane.b32.xlu1 %v379_v11, %s10870_s26  ;;  %394 = vrot.lane.b32.xlu0 %v11093_v5, %s10870_s26  ;;  %v1305_v11 = vld [vmem:[%s11068_s21 + $0x2c] sm:$0xf] }
  0x73   : > { %435 = vrot.lane.b32.xlu1 %v11087_v3, %s10871_s27  ;;  %433 = vrot.lane.b32.xlu0 %v11080_v1, %s10871_s27 }
  0x77   : > { %439 = vrot.lane.b32.xlu1 %v11084_v2, %s10871_s27  ;;  %437 = vrot.lane.b32.xlu0 %v423_v12, %s10871_s27 }
  0x7b   : > { %443 = vrot.lane.b32.xlu1 %v426_v13, %s10871_s27  ;;  %441 = vrot.lane.b32.xlu0 %v11093_v5, %s10871_s27 }
  0x7f   : > { %482 = vrot.lane.b32.xlu1 %v11087_v3, %s10872_s30  ;;  %480 = vrot.lane.b32.xlu0 %v11080_v1, %s10872_s30 }
  0x83   : > { %486 = vrot.lane.b32.xlu1 %v11084_v2, %s10872_s30  ;;  %484 = vrot.lane.b32.xlu0 %v470_v14, %s10872_s30 }
  0x87   : > { %490 = vrot.lane.b32.xlu1 %v473_v15, %s10872_s30  ;;  %488 = vrot.lane.b32.xlu0 %v11093_v5, %s10872_s30 }
  0x8b   : > { %529 = vrot.lane.b32.xlu1 %v11087_v3, %s10873_s4  ;;  %527 = vrot.lane.b32.xlu0 %v11080_v1, %s10873_s4 }
  0x8f   : > { %533 = vrot.lane.b32.xlu1 %v11084_v2, %s10873_s4  ;;  %531 = vrot.lane.b32.xlu0 %v517_v16, %s10873_s4  ;;  %v1349_v16 = vld [vmem:[%s11068_s21 + $0x10] sm:$0xf] }
  0x93   : > { %537 = vrot.lane.b32.xlu1 %v520_v17, %s10873_s4  ;;  %535 = vrot.lane.b32.xlu0 %v11093_v5, %s10873_s4 }
  0x97   : > { %576 = vrot.lane.b32.xlu1 %v11087_v3, %s10874_s5  ;;  %574 = vrot.lane.b32.xlu0 %v11080_v1, %s10874_s5 }
  0x9b   : > { %580 = vrot.lane.b32.xlu1 %v11084_v2, %s10874_s5  ;;  %578 = vrot.lane.b32.xlu0 %v564_v18, %s10874_s5 }
  0x9f   : > { %584 = vrot.lane.b32.xlu1 %v567_v19, %s10874_s5  ;;  %582 = vrot.lane.b32.xlu0 %v11093_v5, %s10874_s5 }
  0xa3   : > { %623 = vrot.lane.b32.xlu1 %v11087_v3, %s10875_s6  ;;  %621 = vrot.lane.b32.xlu0 %v11080_v1, %s10875_s6 }
  0xa7   : > { %627 = vrot.lane.b32.xlu1 %v11084_v2, %s10875_s6  ;;  %625 = vrot.lane.b32.xlu0 %v611_v20, %s10875_s6 }
  0xab   : > { %631 = vrot.lane.b32.xlu1 %v614_v21, %s10875_s6  ;;  %629 = vrot.lane.b32.xlu0 %v11093_v5, %s10875_s6 }
  0xaf   : > { %670 = vrot.lane.b32.xlu1 %v11087_v3, %s10876_s7  ;;  %668 = vrot.lane.b32.xlu0 %v11080_v1, %s10876_s7 }
  0xb3   : > { %674 = vrot.lane.b32.xlu1 %v11084_v2, %s10876_s7  ;;  %672 = vrot.lane.b32.xlu0 %v658_v22, %s10876_s7 }
  0xb5   : > { %v11201_v24 = vpop.permute.xlu1 %248  ;;  %v11203_v25 = vpop.permute.xlu0 %244 }
  0xb6   : > { %15794 = vst [vmem:[#allocation13_spill] sm:$0xff] %v11201_v24  ;;  %15795 = vst [vmem:[#allocation14_spill] sm:$0xff] %v11203_v25 }
  0xb7   : > { %678 = vrot.lane.b32.xlu1 %v661_v23, %s10876_s7  ;;  %676 = vrot.lane.b32.xlu0 %v11093_v5, %s10876_s7 }
  0xb9   : > { %v11208_v26 = vpop.permute.xlu1 %250  ;;  %v11210_v27 = vpop.permute.xlu0 %246 }
  0xba   : > { %15796 = vst [vmem:[#allocation15_spill] sm:$0xff] %v11208_v26  ;;  %15797 = vst [vmem:[#allocation16_spill] sm:$0xff] %v11210_v27 }
  0xbb   : > { %1078 = vrot.lane.b32.xlu1 %v11087_v3, %s10877_s9  ;;  %1076 = vrot.lane.b32.xlu0 %v11080_v1, %s10877_s9 }
  0xbd   : > { %v11215_v29 = vpop.permute.xlu1 %254  ;;  %v11217_v30 = vpop.permute.xlu0 %252 }
  0xbf   : > { %1082 = vrot.lane.b32.xlu1 %v11084_v2, %s10877_s9  ;;  %1080 = vrot.lane.b32.xlu0 %v1066_v28, %s10877_s9 }
  0xc1   : > { %v11221_v32 = vpop.permute.xlu1 %294  ;;  %v11223_v33 = vpop.permute.xlu0 %292 }
  0xc3   : > { %1086 = vrot.lane.b32.xlu1 %v1069_v31, %s10877_s9  ;;  %1084 = vrot.lane.b32.xlu0 %v11093_v5, %s10877_s9  ;;  %s15604_s9 = smov 96  }
  0xc5   : > { %v11226_v34 = vpop.permute.xlu1 %298  ;;  %v11228_v35 = vpop.permute.xlu0 %296 }
  0xc7   : > { %1126 = vrot.lane.b32.xlu1 %v11087_v3, %s10878_s11  ;;  %1124 = vrot.lane.b32.xlu0 %v11080_v1, %s10878_s11 }
  0xc9   : > { %v11233_v37 = vpop.permute.xlu1 %302  ;;  %v11235_v38 = vpop.permute.xlu0 %300 }
  0xcb   : > { %1130 = vrot.lane.b32.xlu1 %v11084_v2, %s10878_s11  ;;  %1128 = vrot.lane.b32.xlu0 %v1114_v36, %s10878_s11 }
  0xcd   : > { %v11239_v40 = vpop.permute.xlu1 %341  ;;  %v11241_v41 = vpop.permute.xlu0 %339 }
  0xcf   : > { %1134 = vrot.lane.b32.xlu1 %v1117_v39, %s10878_s11  ;;  %1132 = vrot.lane.b32.xlu0 %v11093_v5, %s10878_s11  ;;  %s15598_s11 = smov 95  }
  0xd1   : > { %v11244_v42 = vpop.permute.xlu1 %345  ;;  %v11246_v43 = vpop.permute.xlu0 %343 }
  0xd3   : > { %1173 = vrot.lane.b32.xlu1 %v11087_v3, %s10879_s19  ;;  %1171 = vrot.lane.b32.xlu0 %v11080_v1, %s10879_s19 }
  0xd5   : > { %v11253_v45 = vpop.permute.xlu1 %349  ;;  %v11255_v46 = vpop.permute.xlu0 %347 }
  0xd7   : > { %1177 = vrot.lane.b32.xlu1 %v11084_v2, %s10879_s19  ;;  %1175 = vrot.lane.b32.xlu0 %v1161_v44, %s10879_s19 }
  0xd9   : > { %v11261_v48 = vpop.permute.xlu1 %388  ;;  %v11263_v49 = vpop.permute.xlu0 %386 }
  0xdb   : > { %1181 = vrot.lane.b32.xlu1 %v1164_v47, %s10879_s19  ;;  %1179 = vrot.lane.b32.xlu0 %v11093_v5, %s10879_s19 }
  0xdd   : > { %v11268_v50 = vpop.permute.xlu1 %392  ;;  %v11270_v51 = vpop.permute.xlu0 %390 }
  0xdf   : > { %1220 = vrot.lane.b32.xlu1 %v11087_v3, %s10880_s25  ;;  %1218 = vrot.lane.b32.xlu0 %v11080_v1, %s10880_s25 }
  0xe1   : > { %v11277_v53 = vpop.permute.xlu1 %396  ;;  %v11279_v54 = vpop.permute.xlu0 %394 }
  0xe2   : > { %v402_v14 = vrot.slane %v11279_v54, 4 }
  0xe3   : > { %1224 = vrot.lane.b32.xlu1 %v11084_v2, %s10880_s25  ;;  %1222 = vrot.lane.b32.xlu0 %v1208_v52, %s10880_s25 }
  0xe5   : > { %v11285_v56 = vpop.permute.xlu1 %435  ;;  %v11287_v57 = vpop.permute.xlu0 %433 }
  0xe6   : > { %v15597_v21 = vrot.slane %v11285_v56, 4  ;;  %v445_v22 = vrot.slane %v11287_v57, 4 }
  0xe7   : > { %1228 = vrot.lane.b32.xlu1 %v1211_v55, %s10880_s25  ;;  %1226 = vrot.lane.b32.xlu0 %v11093_v5, %s10880_s25 }
  0xe8   : > { %v451_v17 = vsel %vm262_vm0, %v445_v22, %v15597_v21 }
  0xe9   : > { %v11292_v58 = vpop.permute.xlu1 %439  ;;  %v11294_v59 = vpop.permute.xlu0 %437 }
  0xea   : > { %v447_v22 = vrot.slane %v11294_v59, 4 }
  0xeb   : > { %1267 = vrot.lane.b32.xlu1 %v11087_v3, %s10881_s29  ;;  %1265 = vrot.lane.b32.xlu0 %v11080_v1, %s10881_s29 }
  0xed   : > { %v11301_v61 = vpop.permute.xlu1 %443  ;;  %v11303_v62 = vpop.permute.xlu0 %441 }
  0xee   : > { %v450_v52 = vrot.slane %v11301_v61, 4  ;;  %v449_v55 = vrot.slane %v11303_v62, 4  ;;  %v398_v61 = vrot.slane %v11263_v49, 4 }
  0xef   : > { %1271 = vrot.lane.b32.xlu1 %v11084_v2, %s10881_s29  ;;  %1269 = vrot.lane.b32.xlu0 %v1255_v60, %s10881_s29 }
  0xf0   : > { %v458_v21 = vsel %vm262_vm0, %v449_v55, %v450_v52 }
  0xf1   : > { %v11309_v0 = vpop.permute.xlu1 %482  ;;  %v11311_v4 = vpop.permute.xlu0 %480 }
  0xf3   : > { %1275 = vrot.lane.b32.xlu1 %v1258_v63, %s10881_s29  ;;  %1273 = vrot.lane.b32.xlu0 %v11093_v5, %s10881_s29  ;;  %v493_v63 = vrot.slane %v11309_v0, 4 }
  0xf5   : > { %v11316_v6 = vpop.permute.xlu1 %486  ;;  %v11318_v7 = vpop.permute.xlu0 %484 }
  0xf7   : > { %1314 = vrot.lane.b32.xlu1 %v11087_v3, %s10882_s24  ;;  %1312 = vrot.lane.b32.xlu0 %v11080_v1, %s10882_s24 }
  0xf9   : > { %v491_v9 = vpop.permute.xlu1 %490  ;;  %v489_v10 = vpop.permute.xlu0 %488 }
  0xfa   : > { %v497_v23 = vrot.slane %v491_v9, 4  ;;  %v496_v28 = vrot.slane %v489_v10, 4  ;;  %v495_v9 = vrot.slane %v11316_v6, 4 }
  0xfb   : > { %1318 = vrot.lane.b32.xlu1 %v11084_v2, %s10882_s24  ;;  %1316 = vrot.lane.b32.xlu0 %v1302_v8, %s10882_s24  ;;  %v492_v8 = vrot.slane %v11311_v4, 4 }
  0xfc   : > { %v505_v15 = vsel %vm262_vm0, %v496_v28, %v497_v23  ;;  %v503_v47 = vsel %vm262_vm0, %v495_v9, %v496_v28  ;;  %v15799_v9 = vrot.slane %v11261_v48, 4 }
  0xfd   : > { %v11329_v12 = vpop.permute.xlu1 %529  ;;  %v11331_v13 = vpop.permute.xlu0 %527  ;;  %v498_v24 = vsel %vm262_vm0, %v492_v8, %v493_v63  ;;  %v506_v28 = vsel %vm15783_vm2, %v489_v10, %v505_v15  ;;  %v504_v59 = vsel %vm15783_vm2, %v11316_v6, %v503_v47  ;;  %v401_v47 = vrot.slane %v11268_v50, 4 }
  0xfe   : > { %v540_v31 = vrot.slane %v11329_v12, 4  ;;  %v539_v36 = vrot.slane %v11331_v13, 4 }
  0xff   : > { %1322 = vrot.lane.b32.xlu1 %v1305_v11, %s10882_s24  ;;  %1320 = vrot.lane.b32.xlu0 %v11093_v5, %s10882_s24  ;;  %v494_v11 = vrot.slane %v11318_v7, 4  ;;  %v448_v7 = vrot.slane %v11292_v58, 4 }
 0x100   : > { %v545_v18 = vsel %vm262_vm0, %v539_v36, %v540_v31 }
 0x101   : > { %v534_v39 = vpop.permute.xlu1 %533  ;;  %v532_v44 = vpop.permute.xlu0 %531  ;;  %v501_v23 = vsel %vm262_vm0, %v493_v63, %v494_v11  ;;  %v547_v63 = vsel %vm15784_vm1, %v11331_v13, %v545_v18  ;;  %v456_v6 = vsel %vm262_vm0, %v448_v7, %v449_v55  ;;  %v356_v55 = vrot.slane %v11253_v45, 4 }
 0x102   : > { %v541_v60 = vrot.slane %v532_v44, 4  ;;  %v403_v44 = vrot.slane %v11277_v53, 4  ;;  %v542_v25 = vrot.slane %v534_v39, 4  ;;  %v404_v11 = vsel %vm262_vm0, %v398_v61, %v15799_v9 }
 0x103   : > { %1361 = vrot.lane.b32.xlu1 %v11087_v3, %s15604_s9  ;;  %1359 = vrot.lane.b32.xlu0 %v11080_v1, %s15604_s9  ;;  %v459_v7 = vsel %vm15768_vm3, %v11303_v62, %v458_v21  ;;  %v409_v62 = vsel %vm262_vm0, %v401_v47, %v402_v14  ;;  %v11423_v21 = vld [vmem:[#allocation7] sm:$0xff]  ;;  %v353_v61 = vrot.slane %v11246_v43, 4  ;;  %v307_v47 = vrot.slane %v11226_v34, 4 }
 0x104   : > { %v548_v26 = vsel %vm262_vm0, %v540_v31, %v541_v60  ;;  %v411_v45 = vsel %vm262_vm0, %v402_v14, %v403_v44  ;;  %v10010_v43 = vcombine.high %v11423_v21, %v11423_v21 }
 0x105   : > { %v538_v20 = vpop.permute.xlu1 %537  ;;  %v536_v19 = vpop.permute.xlu0 %535  ;;  %v549_v10 = vsel %vm15784_vm1, %v11329_v12, %v548_v26  ;;  %v502_v26 = vsel %vm15783_vm2, %v11309_v0, %v501_v23  ;;  %v400_v12 = vrot.slane %v11270_v51, 4  ;;  %v453_v23 = vsel %vm15768_vm3, %v11287_v57, %v451_v17 }
 0x106   : > { %v544_v53 = vrot.slane %v538_v20, 4  ;;  %v543_v27 = vrot.slane %v536_v19, 4  ;;  %v1352_v20 = vld [vmem:[%s11068_s21 + $0x2c] sm:$0xf]  ;;  %v10037_v44 = vcombine.low %v502_v26, %v506_v28  ;;  %v15800_v17 = vmov %v15799_v9  ;;  %10055 = vmatprep.mubr.msk.bf16.mxu0 %vm974_vm7, %v10010_v43  ;;  %10056 = vmatprep.mubr.msk.bf16.mxu1 %vm974_vm7, %v10010_v43 }
 0x107   : > { %1365 = vrot.lane.b32.xlu1 %v11084_v2, %s15604_s9  ;;  %1363 = vrot.lane.b32.xlu0 %v1349_v16, %s15604_s9  ;;  %v407_v14 = vsel %vm262_vm0, %v15800_v17, %v400_v12  ;;  %v15806_v9 = vrot.slane %v11223_v33, 4 }
 0x108   : > { %v550_v36 = vsel %vm262_vm0, %v542_v25, %v543_v27  ;;  %v552_v31 = vsel %vm262_vm0, %v543_v27, %v544_v53  ;;  %v500_v25 = vsel %vm15783_vm2, %v11311_v4, %v498_v24  ;;  %v15798_v24 = vrot.slane %v11285_v56, 4 }
 0x109   : > { %v11383_v52 = vpop.permute.xlu1 %576  ;;  %v11385_v60 = vpop.permute.xlu0 %574  ;;  %v551_v8 = vsel %vm15784_vm1, %v534_v39, %v550_v36  ;;  %v553_v15 = vsel %vm15784_vm1, %v536_v19, %v552_v31  ;;  %v10036_v19 = vcombine.high %v500_v25, %v504_v59  ;;  %v10038_v39 = vcombine.high %v502_v26, %v506_v28  ;;  %v1396_v31 = vld [vmem:[%s11068_s21 + $0x10] sm:$0xf] }
 0x10a   : > { %v10040_v27 = vcombine.high %v547_v63, %v551_v8  ;;  %v10042_v16 = vcombine.high %v549_v10, %v553_v15  ;;  %v10039_v13 = vcombine.low %v547_v63, %v551_v8  ;;  %v10041_v18 = vcombine.low %v549_v10, %v553_v15 }
 0x10b   : > { %1369 = vrot.lane.b32.xlu1 %v1352_v20, %s15604_s9  ;;  %1367 = vrot.lane.b32.xlu0 %v11093_v5, %s15604_s9  ;;  %v454_v4 = vsel %vm262_vm0, %v15798_v24, %v447_v22  ;;  %v457_v53 = vsel %vm15768_vm3, %v11292_v58, %v456_v6  ;;  %v355_v22 = vrot.slane %v11255_v46, 4  ;;  %v10035_v58 = vcombine.low %v500_v25, %v504_v59  ;;  %s10888_s9 = smov 76  }
 0x10c   : > { %978 = vmatprep.subr.bf16.mxu0 %v10040_v27  ;;  %1019 = vmatprep.subr.bf16.mxu1 %v10042_v16  ;;  %v455_v57 = vsel %vm15768_vm3, %v11285_v56, %v454_v4  ;;  %v10032_v20 = vcombine.high %v453_v23, %v457_v53  ;;  %v15801_v63 = vrot.slane %v11239_v40, 4  ;;  %v15802_v8 = vrot.slane %v11241_v41, 4 }
 0x10d   : > { %v11412_v0 = vpop.permute.xlu1 %580  ;;  %979 = vmatpush1.bf16.msra.mxu0 %v10039_v13  ;;  %1020 = vmatpush1.bf16.msra.mxu1 %v10041_v18  ;;  %v11414_v51 = vpop.permute.xlu0 %578  ;;  %v10034_v36 = vcombine.high %v455_v57, %v459_v7  ;;  %v412_v28 = vsel %vm15753_vm4, %v11279_v54, %v411_v45  ;;  %v410_v15 = vsel %vm15753_vm4, %v11268_v50, %v409_v62  ;;  %v308_v25 = vrot.slane %v11235_v38, 4  ;;  %v15808_v62 = vld [vmem:[#allocation13_spill] sm:$0xff] }
 0x10e   : > { %980 = vmatprep.subr.bf16.mxu0 %v10036_v19  ;;  %1021 = vmatprep.subr.bf16.mxu1 %v10038_v39  ;;  %v357_v59 = vsel %vm262_vm0, %v15802_v8, %v15801_v63  ;;  %v364_v27 = vsel %vm262_vm0, %v355_v22, %v356_v55  ;;  %v406_v16 = vsel %vm15753_vm4, %v11263_v49, %v404_v11  ;;  %v15803_v54 = vrot.slane %v11244_v42, 4  ;;  %v1399_v19 = vld [vmem:[%s11068_s21 + $0x2c] sm:$0xf] }
 0x10f   : > { %1408 = vrot.lane.b32.xlu1 %v11087_v3, %s15598_s11  ;;  %1406 = vrot.lane.b32.xlu0 %v11080_v1, %s15598_s11  ;;  %v10031_v50 = vcombine.low %v453_v23, %v457_v53  ;;  %v10033_v13 = vcombine.low %v455_v57, %v459_v7  ;;  %v408_v18 = vsel %vm15753_vm4, %v11261_v48, %v407_v14  ;;  %v306_v49 = vrot.slane %v11228_v35, 4 }
 0x110   : > { %v362_v6 = vsel %vm262_vm0, %v15803_v54, %v355_v22  ;;  %v15804_v26 = vmov %v15801_v63  ;;  %v10028_v24 = vcombine.high %v406_v16, %v410_v15  ;;  %v10030_v4 = vcombine.high %v408_v18, %v412_v28 }
 0x111   : > { %v11445_v56 = vpop.permute.xlu1 %584  ;;  %981 = vmatpush1.bf16.msra.mxu0 %v10035_v58  ;;  %1022 = vmatpush1.bf16.msra.mxu1 %v10037_v44  ;;  %v11447_v10 = vpop.permute.xlu0 %582  ;;  %v360_v12 = vsel %vm262_vm0, %v15804_v26, %v353_v61  ;;  %v261_v39 = vrot.slane %v11215_v29, 4  ;;  %v15805_v55 = vrot.slane %v11221_v32, 4  ;;  %v365_v35 = vsel %vm358_vm5, %v11255_v46, %v364_v27  ;;  %v15809_v44 = vld [vmem:[#allocation15_spill] sm:$0xff] }
 0x112   : > { %982 = vmatprep.subr.bf16.mxu0 %v10032_v20  ;;  %1023 = vmatprep.subr.bf16.mxu1 %v10034_v36  ;;  %v363_v53 = vsel %vm358_vm5, %v11244_v42, %v362_v6  ;;  %v260_v29 = vrot.slane %v11217_v30, 4  ;;  %v15807_v22 = vrot.slane %v11233_v37, 4  ;;  %v359_v23 = vsel %vm358_vm5, %v11241_v41, %v357_v59  ;;  %v15811_v36 = vld [vmem:[#allocation16_spill] sm:$0xff] }
 0x113   : > { %1412 = vrot.lane.b32.xlu1 %v11084_v2, %s15598_s11  ;;  %1410 = vrot.lane.b32.xlu0 %v1396_v31, %s15598_s11  ;;  %v310_v48 = vsel %vm262_vm0, %v15806_v9, %v15805_v55  ;;  %v315_v46 = vsel %vm262_vm0, %v307_v47, %v308_v25  ;;  %v258_v61 = vrot.slane %v15808_v62, 4  ;;  %v10027_v42 = vcombine.low %v406_v16, %v410_v15 }
 0x114   : > { %v317_v45 = vsel %vm262_vm0, %v308_v25, %v15807_v22  ;;  %v10029_v58 = vcombine.low %v408_v18, %v412_v28  ;;  %v361_v37 = vsel %vm358_vm5, %v11239_v40, %v360_v12  ;;  %v259_v57 = vrot.slane %v15809_v44, 4  ;;  %v15813_v28 = vld [vmem:[#allocation14_spill] sm:$0xff] }
 0x115   : > { %v11479_v11 = vpop.permute.xlu1 %623  ;;  %983 = vmatpush1.bf16.msra.mxu0 %v10031_v50  ;;  %1024 = vmatpush1.bf16.msra.mxu1 %v10033_v13  ;;  %v11481_v7 = vpop.permute.xlu0 %621  ;;  %v15810_v41 = vmov %v15805_v55  ;;  %v10024_v14 = vcombine.high %v359_v23, %v363_v53  ;;  %v10026_v20 = vcombine.high %v361_v37, %v365_v35  ;;  %v15812_v31 = vrot.slane %v15811_v36, 4  ;;  %v1446_v55 = vld [vmem:[%s11068_s21 + $0x2c] sm:$0xf] }
 0x116   : > { %984 = vmatprep.subr.bf16.mxu0 %v10028_v24  ;;  %1025 = vmatprep.subr.bf16.mxu1 %v10030_v4  ;;  %v313_v17 = vsel %vm262_vm0, %v15810_v41, %v306_v49  ;;  %v318_v63 = vsel %vm311_vm6, %v11235_v38, %v317_v45  ;;  %v316_v59 = vsel %vm311_vm6, %v11226_v34, %v315_v46  ;;  %v256_v15 = vrot.slane %v15813_v28, 4 }
 0x117   : > { %1416 = vrot.lane.b32.xlu1 %v1399_v19, %s15598_s11  ;;  %1414 = vrot.lane.b32.xlu0 %v11093_v5, %s15598_s11  ;;  %v266_v43 = vsel %vm262_vm0, %v15812_v31, %v258_v61  ;;  %v270_v25 = vsel %vm262_vm0, %v260_v29, %v261_v39  ;;  %v312_v27 = vsel %vm311_vm6, %v11223_v33, %v310_v48  ;;  %s15600_s11 = smov 94   ;;  %v1443_v33 = vld [vmem:[%s11068_s21 + $0x10] sm:$0xf]  ;;  %v587_v45 = vrot.slane %v11383_v52, 4 }
 0x118   : > { %v268_v38 = vsel %vm262_vm0, %v259_v57, %v260_v29  ;;  %v10023_v34 = vcombine.low %v359_v23, %v363_v53  ;;  %v10025_v16 = vcombine.low %v361_v37, %v365_v35  ;;  %v314_v54 = vsel %vm311_vm6, %v11221_v32, %v313_v17 }
 0x119   : > { %v11507_v8 = vpop.permute.xlu1 %627  ;;  %985 = vmatpush1.bf16.msra.mxu0 %v10027_v42  ;;  %1026 = vmatpush1.bf16.msra.mxu1 %v10029_v58  ;;  %v11509_v40 = vpop.permute.xlu0 %625  ;;  %v10020_v6 = vcombine.high %v312_v27, %v316_v59  ;;  %v10022_v47 = vcombine.high %v314_v54, %v318_v63  ;;  %v15814_v50 = vmov %v15812_v31  ;;  %v271_v18 = vsel %vm264_vm8, %v11217_v30, %v270_v25 }
 0x11a   : > { %986 = vmatprep.subr.bf16.mxu0 %v10024_v14  ;;  %1027 = vmatprep.subr.bf16.mxu1 %v10026_v20  ;;  %v263_v13 = vsel %vm262_vm0, %v256_v15, %v15814_v50  ;;  %v269_v12 = vsel %vm264_vm8, %v15809_v44, %v268_v38  ;;  %v267_v32 = vsel %vm264_vm8, %v15811_v36, %v266_v43  ;;  %v586_v23 = vrot.slane %v11385_v60, 4  ;;  %v1490_v43 = vld [vmem:[%s11068_s21 + $0x10] sm:$0xf]  ;;  %v1493_v50 = vld [vmem:[%s11068_s21 + $0x2c] sm:$0xf] }
 0x11b   : > { %1455 = vrot.lane.b32.xlu1 %v11087_v3, %s15600_s11  ;;  %1453 = vrot.lane.b32.xlu0 %v11080_v1, %s15600_s11  ;;  %v10019_v30 = vcombine.low %v312_v27, %v316_v59  ;;  %v10021_v24 = vcombine.low %v314_v54, %v318_v63  ;;  %v265_v4 = vsel %vm264_vm8, %v15813_v28, %v263_v13  ;;  %v591_v41 = vrot.slane %v11445_v56, 4  ;;  %v11590_v13 = vld [vmem:[%s11068_s21 + $0x24] sm:$0xff] }
 0x11c   : > { %v10016_v19 = vcombine.high %v265_v4, %v269_v12  ;;  %v10018_v39 = vcombine.high %v267_v32, %v271_v18  ;;  %v10012_v35 = vcombine.high %v11080_v1, %v11084_v2  ;;  %v10014_v53 = vcombine.high %v11087_v3, %v11093_v5 }
 0x11d   : > { %v632_v49 = vpop.permute.xlu1 %631  ;;  %987 = vmatpush1.bf16.msra.mxu0 %v10023_v34  ;;  %1028 = vmatpush1.bf16.msra.mxu1 %v10025_v16  ;;  %v11530_v26 = vpop.permute.xlu0 %629  ;;  %v10015_v29 = vcombine.low %v265_v4, %v269_v12  ;;  %v10017_v22 = vcombine.low %v267_v32, %v271_v18  ;;  %v10011_v46 = vcombine.low %v11080_v1, %v11084_v2  ;;  %v590_v17 = vrot.slane %v11447_v10, 4 }
 0x11e   : > { %988 = vmatprep.subr.bf16.mxu0 %v10020_v6  ;;  %1029 = vmatprep.subr.bf16.mxu1 %v10022_v47  ;;  %v10013_v62 = vcombine.low %v11087_v3, %v11093_v5  ;;  %v638_v61 = vrot.slane %v632_v49, 4  ;;  %v637_v42 = vrot.slane %v11530_v26, 4  ;;  %v633_v20 = vrot.slane %v11481_v7, 4 }
 0x11f   : > { %1459 = vrot.lane.b32.xlu1 %v11084_v2, %s15600_s11  ;;  %1457 = vrot.lane.b32.xlu0 %v1443_v33, %s15600_s11  ;;  %v636_v36 = vrot.slane %v11507_v8, 4  ;;  %v635_v31 = vrot.slane %v11509_v40, 4  ;;  %v592_v56 = vsel %vm262_vm0, %v586_v23, %v587_v45  ;;  %v589_v63 = vrot.slane %v11412_v0, 4 }
 0x120   : > { %v646_v59 = vsel %vm262_vm0, %v637_v42, %v638_v61  ;;  %v588_v34 = vrot.slane %v11414_v51, 4  ;;  %v599_v16 = vsel %vm262_vm0, %v590_v17, %v591_v41  ;;  %v1540_v41 = vld [vmem:[%s11068_s21 + $0x2c] sm:$0xf]  ;;  %vm15634_vm8 = vcmask 809984  }
 0x121   : > { %v11542_v9 = vpop.permute.xlu1 %670  ;;  %989 = vmatpush1.bf16.msra.mxu0 %v10019_v30  ;;  %1030 = vmatpush1.bf16.msra.mxu1 %v10021_v24  ;;  %v669_v48 = vpop.permute.xlu0 %668  ;;  %v647_v47 = vsel %vm640_vm9, %v11530_v26, %v646_v59 }
 0x122   : > { %990 = vmatprep.subr.bf16.mxu0 %v10016_v19  ;;  %1031 = vmatprep.subr.bf16.mxu1 %v10018_v39  ;;  %v681_v58 = vrot.slane %v11542_v9, 4  ;;  %v680_v37 = vrot.slane %v669_v48, 4  ;;  %v597_v19 = vsel %vm262_vm0, %v589_v63, %v590_v17  ;;  %v10009_v17 = vcombine.low %v11423_v21, %v11423_v21  ;;  %v1953_v21 = vld [vmem:[%s11068_s21 + $0x10] sm:$0xf] }
 0x123   : > { %1463 = vrot.lane.b32.xlu1 %v1446_v55, %s15600_s11  ;;  %1461 = vrot.lane.b32.xlu0 %v11093_v5, %s15600_s11  ;;  %v634_v5 = vrot.slane %v11479_v11, 4  ;;  %s15602_s11 = smov 93  }
 0x124   : > { %v686_v40 = vsel %vm262_vm0, %v680_v37, %v681_v58 }
 0x125   : > { %v675_v44 = vpop.permute.xlu1 %674  ;;  %991 = vmatpush1.bf16.msra.mxu0 %v10015_v29  ;;  %1032 = vmatpush1.bf16.msra.mxu1 %v10017_v22  ;;  %v673_v57 = vpop.permute.xlu0 %672  ;;  %v639_v54 = vsel %vm262_vm0, %v633_v20, %v634_v5  ;;  %v642_v6 = vsel %vm262_vm0, %v634_v5, %v635_v31  ;;  %v688_v49 = vsel %vm687_vm10, %v669_v48, %v686_v40  ;;  %v11619_v29 = vld [vmem:[%s11068_s21] sm:$0xff] }
 0x126   : > { %v682_v14 = vrot.slane %v673_v57, 4  ;;  %992 = vmatprep.subr.bf16.mxu0 %v10012_v35  ;;  %1033 = vmatprep.subr.bf16.mxu1 %v10014_v53  ;;  %v641_v24 = vsel %vm640_vm9, %v11481_v7, %v639_v54  ;;  %v595_v7 = vsel %vm262_vm0, %v587_v45, %v588_v34  ;;  %v11616_v53 = vld [vmem:[%s11068_s21 + $0x8] sm:$0xff]  ;;  %v600_v22 = vsel %vm593_vm11, %v11447_v10, %v599_v16  ;;  %v2047_v54 = vld [vmem:[%s11068_s21 + $0x10] sm:$0xf] }
 0x127   : > { %1502 = vrot.lane.b32.xlu1 %v11087_v3, %s15602_s11  ;;  %1500 = vrot.lane.b32.xlu0 %v11080_v1, %s15602_s11  ;;  %v644_v1 = vsel %vm262_vm0, %v636_v36, %v637_v42  ;;  %v683_v3 = vrot.slane %v675_v44, 4  ;;  %v594_v45 = vsel %vm593_vm11, %v11385_v60, %v592_v56  ;;  %v596_v61 = vsel %vm593_vm11, %v11383_v52, %v595_v7  ;;  %v1537_v60 = vld [vmem:[%s11068_s21 + $0x10] sm:$0xf] }
 0x128   : > { %v689_v25 = vsel %vm262_vm0, %v681_v58, %v682_v14  ;;  %v645_v18 = vsel %vm640_vm9, %v11507_v8, %v644_v1  ;;  %v11638_v58 = vld [vmem:[%s11068_s21 + $0x1c] sm:$0xff]  ;;  %v10045_v52 = vcombine.low %v596_v61, %v600_v22 }
 0x129   : > { %v679_v28 = vpop.permute.xlu1 %678  ;;  %v677_v15 = vpop.permute.xlu0 %676  ;;  %993 = vmatpush1.bf16.msra.mxu0 %v10011_v46  ;;  %1034 = vmatpush1.bf16.msra.mxu1 %v10013_v62  ;;  %v690_v30 = vsel %vm687_vm10, %v11542_v9, %v689_v25  ;;  %v643_v9 = vsel %vm640_vm9, %v11479_v11, %v642_v6  ;;  %v10048_v48 = vcombine.high %v641_v24, %v645_v18  ;;  %v2003_v25 = vld [vmem:[%s11068_s21 + $0x2c] sm:$0xf] }
 0x12a   : > { %v685_v27 = vrot.slane %v679_v28, 4  ;;  %v684_v38 = vrot.slane %v677_v15, 4  ;;  %v10050_v35 = vcombine.high %v643_v9, %v647_v47  ;;  %v598_v11 = vsel %vm593_vm11, %v11412_v0, %v597_v19 }
 0x12b   : > { %1506 = vrot.lane.b32.xlu1 %v11084_v2, %s15602_s11  ;;  %1504 = vrot.lane.b32.xlu0 %v1490_v43, %s15602_s11  ;;  %v10047_v10 = vcombine.low %v641_v24, %v645_v18  ;;  %v10049_v62 = vcombine.low %v643_v9, %v647_v47  ;;  %v10044_v42 = vcombine.high %v594_v45, %v598_v11  ;;  %v1956_v43 = vld [vmem:[%s11068_s21 + $0x2c] sm:$0xf] }
 0x12c   : > { %v693_v33 = vsel %vm262_vm0, %v684_v38, %v685_v27  ;;  %v691_v51 = vsel %vm262_vm0, %v683_v3, %v684_v38  ;;  %v10046_v0 = vcombine.high %v596_v61, %v600_v22  ;;  %v10043_v57 = vcombine.low %v594_v45, %v598_v11  ;;  %v2097_v24 = vld [vmem:[%s11068_s21 + $0x2c] sm:$0xf] }
 0x12d   : > { %v694_v12 = vsel %vm687_vm10, %v677_v15, %v693_v33  ;;  %v11597_v2 = vpop.permute.xlu1 %1078  ;;  %v11599_v32 = vpop.permute.xlu0 %1076  ;;  %v692_v26 = vsel %vm687_vm10, %v675_v44, %v691_v51  ;;  %v2000_v15 = vld [vmem:[%s11068_s21 + $0x10] sm:$0xf]  ;;  %v2050_v33 = vld [vmem:[%s11068_s21 + $0x2c] sm:$0xf] }
 0x12e   : > { %15815 = vst [vmem:[#allocation13_spill] sm:$0xff] %v11597_v2  ;;  %15816 = vst [vmem:[#allocation15_spill] sm:$0xff] %v11599_v32  ;;  %v10052_v4 = vcombine.high %v688_v49, %v692_v26  ;;  %v10054_v8 = vcombine.high %v690_v30, %v694_v12  ;;  %v10051_v39 = vcombine.low %v688_v49, %v692_v26 }
 0x12f   : > { %1510 = vrot.lane.b32.xlu1 %v1493_v50, %s15602_s11  ;;  %1508 = vrot.lane.b32.xlu0 %v11590_v13, %s15602_s11  ;;  %v10053_v55 = vcombine.low %v690_v30, %v694_v12  ;;  %s15606_s11 = smov 92   ;;  %v2094_v12 = vld [vmem:[%s11068_s21 + $0x10] sm:$0xf] }
 0x130   : > { %1004 = vmatprep.subr.bf16.mxu0 %v10052_v4  ;;  %1045 = vmatprep.subr.bf16.mxu1 %v10054_v8 }
 0x131   : > { %v11623_v23 = vpop.permute.xlu1 %1082  ;;  %v11625_v46 = vpop.permute.xlu0 %1080  ;;  %1005 = vmatpush2.bf16.msra.mxu0 %v10051_v39  ;;  %1046 = vmatpush2.bf16.msra.mxu1 %v10053_v55  ;;  %v2141_v55 = vld [vmem:[%s11068_s21 + $0x10] sm:$0xf] }
 0x132   : > { %15817 = vst [vmem:[#allocation16_spill] sm:$0xff] %v11623_v23  ;;  %15818 = vst [vmem:[#allocation14_spill] sm:$0xff] %v11625_v46  ;;  %1006 = vmatprep.subr.bf16.mxu0 %v10048_v48  ;;  %1047 = vmatprep.subr.bf16.mxu1 %v10050_v35  ;;  %v2144_v48 = vld [vmem:[%s11068_s21 + $0x2c] sm:$0xf] }
 0x133   : > { %1549 = vrot.lane.b32.xlu1 %v11616_v53, %s15606_s11  ;;  %1547 = vrot.lane.b32.xlu0 %v11619_v29, %s15606_s11 }
 0x135   : > { %v11641_v37 = vpop.permute.xlu1 %1086  ;;  %v11643_v44 = vpop.permute.xlu0 %1084  ;;  %1007 = vmatpush2.bf16.msra.mxu0 %v10047_v10  ;;  %1048 = vmatpush2.bf16.msra.mxu1 %v10049_v62  ;;  %v2188_v10 = vld [vmem:[%s11068_s21 + $0x10] sm:$0xf] }
 0x136   : > { %15819 = vst [vmem:[#allocation17_spill] sm:$0xff] %v11641_v37  ;;  %15820 = vst [vmem:[#allocation18_spill] sm:$0xff] %v11643_v44  ;;  %1008 = vmatprep.subr.bf16.mxu0 %v10044_v42  ;;  %1049 = vmatprep.subr.bf16.mxu1 %v10046_v0  ;;  %v2191_v42 = vld [vmem:[%s11068_s21 + $0x2c] sm:$0xf] }
 0x137   : > { %1553 = vrot.lane.b32.xlu1 %v11638_v58, %s15606_s11  ;;  %1551 = vrot.lane.b32.xlu0 %v1537_v60, %s15606_s11 }
 0x139   : > { %v11651_v14 = vpop.permute.xlu1 %1126  ;;  %v11653_v5 = vpop.permute.xlu0 %1124  ;;  %1009 = vmatpush2.bf16.msra.mxu0 %v10043_v57  ;;  %1050 = vmatpush2.bf16.msra.mxu1 %v10045_v52 }
 0x13a   : > { %15821 = vst [vmem:[#allocation19_spill] sm:$0xff] %v11651_v14  ;;  %15822 = vst [vmem:[#allocation20_spill] sm:$0xff] %v11653_v5 }
 0x13b   : > { %1557 = vrot.lane.b32.xlu1 %v1540_v41, %s15606_s11  ;;  %1555 = vrot.lane.b32.xlu0 %v11590_v13, %s15606_s11  ;;  %s10889_s11 = smov 75  }
 0x13c   : > { %1011 = vmatmul.mubr.bf16.vlgmr.msra.gmra.mxu0 %v10009_v17  ;;  %1052 = vmatmul.mubr.bf16.vlgmr.msra.gmra.mxu1 %v10009_v17 }
 0x13d   : > { %v11658_v20 = vpop.permute.xlu1 %1130  ;;  %v11660_v36 = vpop.permute.xlu0 %1128 }
 0x13e   : > { %15823 = vst [vmem:[#allocation21_spill] sm:$0xff] %v11658_v20  ;;  %15824 = vst [vmem:[#allocation22_spill] sm:$0xff] %v11660_v36 }
 0x13f   : > { %1965 = vrot.lane.b32.xlu1 %v11616_v53, %s10888_s9  ;;  %1963 = vrot.lane.b32.xlu0 %v11619_v29, %s10888_s9 }
 0x141   : > { %v11665_v31 = vpop.permute.xlu1 %1134  ;;  %v11667_v56 = vpop.permute.xlu0 %1132 }
 0x142   : > { %15825 = vst [vmem:[#allocation23_spill] sm:$0xff] %v11667_v56 }
 0x143   : > { %1969 = vrot.lane.b32.xlu1 %v11638_v58, %s10888_s9  ;;  %1967 = vrot.lane.b32.xlu0 %v1953_v21, %s10888_s9 }
 0x145   : > { %v11671_v63 = vpop.permute.xlu1 %1173  ;;  %v11673_v59 = vpop.permute.xlu0 %1171 }
 0x147   : > { %1973 = vrot.lane.b32.xlu1 %v1956_v43, %s10888_s9  ;;  %1971 = vrot.lane.b32.xlu0 %v11590_v13, %s10888_s9  ;;  %s15608_s9 = smov 74  }
 0x149   : > { %v11676_v40 = vpop.permute.xlu1 %1177  ;;  %v11678_v28 = vpop.permute.xlu0 %1175 }
 0x14b   : > { %2012 = vrot.lane.b32.xlu1 %v11616_v53, %s10889_s11  ;;  %2010 = vrot.lane.b32.xlu0 %v11619_v29, %s10889_s11 }
 0x14d   : > { %v11683_v1 = vpop.permute.xlu1 %1181  ;;  %v11685_v3 = vpop.permute.xlu0 %1179 }
 0x14f   : > { %2016 = vrot.lane.b32.xlu1 %v11638_v58, %s10889_s11  ;;  %2014 = vrot.lane.b32.xlu0 %v2000_v15, %s10889_s11 }
 0x151   : > { %v11689_v27 = vpop.permute.xlu1 %1220  ;;  %v11691_v38 = vpop.permute.xlu0 %1218 }
 0x153   : > { %2020 = vrot.lane.b32.xlu1 %v2003_v25, %s10889_s11  ;;  %2018 = vrot.lane.b32.xlu0 %v11590_v13, %s10889_s11  ;;  %s15610_s11 = smov 73  }
 0x155   : > { %v11694_v34 = vpop.permute.xlu1 %1224  ;;  %v11696_v16 = vpop.permute.xlu0 %1222 }
 0x157   : > { %2059 = vrot.lane.b32.xlu1 %v11616_v53, %s15608_s9  ;;  %2057 = vrot.lane.b32.xlu0 %v11619_v29, %s15608_s9 }
 0x159   : > { %v11703_v6 = vpop.permute.xlu1 %1228  ;;  %v11705_v47 = vpop.permute.xlu0 %1226 }
 0x15b   : > { %2063 = vrot.lane.b32.xlu1 %v11638_v58, %s15608_s9  ;;  %2061 = vrot.lane.b32.xlu0 %v2047_v54, %s15608_s9  ;;  %v2235_v54 = vld [vmem:[%s11068_s21 + $0x10] sm:$0xf] }
 0x15d   : > { %v11711_v50 = vpop.permute.xlu1 %1267  ;;  %v11713_v51 = vpop.permute.xlu0 %1265 }
 0x15e   : > { %v15614_v57 = vrot.slane %v11711_v50, 4  ;;  %v1277_v52 = vrot.slane %v11713_v51, 4 }
 0x15f   : > { %2067 = vrot.lane.b32.xlu1 %v2050_v33, %s15608_s9  ;;  %2065 = vrot.lane.b32.xlu0 %v11590_v13, %s15608_s9  ;;  %s15639_s9 = smov 72  }
 0x161   : > { %v11718_v18 = vpop.permute.xlu1 %1271  ;;  %v11720_v49 = vpop.permute.xlu0 %1269 }
 0x163   : > { %2106 = vrot.lane.b32.xlu1 %v11616_v53, %s15610_s11  ;;  %2104 = vrot.lane.b32.xlu0 %v11619_v29, %s15610_s11 }
 0x165   : > { %v11727_v26 = vpop.permute.xlu1 %1275  ;;  %v11729_v30 = vpop.permute.xlu0 %1273 }
 0x167   : > { %2110 = vrot.lane.b32.xlu1 %v11638_v58, %s15610_s11  ;;  %2108 = vrot.lane.b32.xlu0 %v2094_v12, %s15610_s11 }
 0x169   : > { %v11735_v4 = vpop.permute.xlu1 %1314  ;;  %v11737_v8 = vpop.permute.xlu0 %1312 }
 0x16b   : > { %2114 = vrot.lane.b32.xlu1 %v2097_v24, %s15610_s11  ;;  %2112 = vrot.lane.b32.xlu0 %v11590_v13, %s15610_s11  ;;  %s15612_s11 = smov 71  }
 0x16d   : > { %v11742_v19 = vpop.permute.xlu1 %1318  ;;  %v11744_v39 = vpop.permute.xlu0 %1316 }
 0x16e   : > { %v1326_v14 = vrot.slane %v11744_v39, 4 }
 0x16f   : > { %2153 = vrot.lane.b32.xlu1 %v11616_v53, %s15639_s9  ;;  %2151 = vrot.lane.b32.xlu0 %v11619_v29, %s15639_s9 }
 0x171   : > { %v11751_v9 = vpop.permute.xlu1 %1322  ;;  %v11753_v7 = vpop.permute.xlu0 %1320 }
 0x172   : > { %v1329_v41 = vrot.slane %v11751_v9, 4  ;;  %v1328_v43 = vrot.slane %v11753_v7, 4 }
 0x173   : > { %2157 = vrot.lane.b32.xlu1 %v11638_v58, %s15639_s9  ;;  %2155 = vrot.lane.b32.xlu0 %v2141_v55, %s15639_s9 }
 0x175   : > { %v11759_v35 = vpop.permute.xlu1 %1361  ;;  %v11761_v22 = vpop.permute.xlu0 %1359 }
 0x176   : > { %v1372_v15 = vrot.slane %v11759_v35, 4 }
 0x177   : > { %2161 = vrot.lane.b32.xlu1 %v2144_v48, %s15639_s9  ;;  %2159 = vrot.lane.b32.xlu0 %v11590_v13, %s15639_s9  ;;  %v11796_v48 = vsel %vm262_vm0, %v1277_v52, %v15614_v57  ;;  %v1325_v52 = vrot.slane %v11735_v4, 4  ;;  %v1327_v57 = vrot.slane %v11742_v19, 4  ;;  %s10899_s9 = smov 50  }
 0x179   : > { %v11766_v11 = vpop.permute.xlu1 %1365  ;;  %v11768_v45 = vpop.permute.xlu0 %1363 }
 0x17a   : > { %v1373_v9 = vrot.slane %v11768_v45, 4  ;;  %v1337_v45 = vsel %vm262_vm0, %v1328_v43, %v1329_v41 }
 0x17b   : > { %2200 = vrot.lane.b32.xlu1 %v11616_v53, %s15612_s11  ;;  %2198 = vrot.lane.b32.xlu0 %v11619_v29, %s15612_s11 }
 0x17d   : > { %v1370_v62 = vpop.permute.xlu1 %1369  ;;  %v11775_v61 = vpop.permute.xlu0 %1367 }
 0x17e   : > { %v1376_v21 = vrot.slane %v1370_v62, 4  ;;  %v1375_v25 = vrot.slane %v11775_v61, 4  ;;  %v1324_v62 = vrot.slane %v11737_v8, 4 }
 0x17f   : > { %2204 = vrot.lane.b32.xlu1 %v11638_v58, %s15612_s11  ;;  %2202 = vrot.lane.b32.xlu0 %v2188_v10, %s15612_s11 }
 0x180   : > { %v1384_v37 = vsel %vm262_vm0, %v1375_v25, %v1376_v21 }
 0x181   : > { %v1409_v0 = vpop.permute.xlu1 %1408  ;;  %v1407_v60 = vpop.permute.xlu0 %1406 }
 0x182   : > { %v1419_v33 = vrot.slane %v1409_v0, 4  ;;  %v1418_v12 = vrot.slane %v1407_v60, 4 }
 0x183   : > { %2208 = vrot.lane.b32.xlu1 %v2191_v42, %s15612_s11  ;;  %2206 = vrot.lane.b32.xlu0 %v11590_v13, %s15612_s11  ;;  %s15628_s11 = smov 70   ;;  %v1374_v42 = vrot.slane %v11766_v11, 4 }
 0x184   : > { %v1424_v10 = vsel %vm262_vm0, %v1418_v12, %v1419_v33 }
 0x185   : > { %v1413_v24 = vpop.permute.xlu1 %1412  ;;  %v1411_v55 = vpop.permute.xlu0 %1410  ;;  %v1382_v12 = vsel %vm262_vm0, %v1374_v42, %v1375_v25  ;;  %v1426_v41 = vsel %vm15651_vm12, %v1407_v60, %v1424_v10  ;;  %v1280_v60 = vrot.slane %v11718_v18, 4  ;;  %v1333_v10 = vsel %vm262_vm0, %v1325_v52, %v1326_v14 }
 0x186   : > { %v1420_v17 = vrot.slane %v1411_v55, 4  ;;  %v1371_v55 = vrot.slane %v11761_v22, 4  ;;  %v1421_v46 = vrot.slane %v1413_v24, 4 }
 0x187   : > { %2247 = vrot.lane.b32.xlu1 %v11616_v53, %s15628_s11  ;;  %2245 = vrot.lane.b32.xlu0 %v11619_v29, %s15628_s11 }
 0x188   : > { %v1427_v23 = vsel %vm262_vm0, %v1419_v33, %v1420_v17  ;;  %v1377_v36 = vsel %vm262_vm0, %v1371_v55, %v1372_v15  ;;  %v1380_v17 = vsel %vm262_vm0, %v1372_v15, %v1373_v9  ;;  %v2238_v33 = vld [vmem:[%s11068_s21 + $0x2c] sm:$0xf]  ;;  %v1385_v15 = vsel %vm15627_vm13, %v11775_v61, %v1384_v37 }
 0x189   : > { %v1417_v32 = vpop.permute.xlu1 %1416  ;;  %v1415_v2 = vpop.permute.xlu0 %1414  ;;  %v1428_v21 = vsel %vm15651_vm12, %v1409_v0, %v1427_v23  ;;  %v1335_v0 = vsel %vm262_vm0, %v1327_v57, %v1328_v43  ;;  %v1330_v37 = vsel %vm262_vm0, %v1324_v62, %v1325_v52  ;;  %v1379_v61 = vsel %vm15627_vm13, %v11761_v22, %v1377_v36  ;;  %v11868_v22 = vld [vmem:[#allocation7 + $0x8] sm:$0xff] }
 0x18a   : > { %v1423_v44 = vrot.slane %v1417_v32, 4  ;;  %v1422_v5 = vrot.slane %v1415_v2, 4  ;;  %v1235_v9 = vrot.slane %v11703_v6, 4  ;;  %v15826_v62 = vrot.slane %v11727_v26, 4 }
 0x18b   : > { %2251 = vrot.lane.b32.xlu1 %v11638_v58, %s15628_s11  ;;  %2249 = vrot.lane.b32.xlu0 %v2235_v54, %s15628_s11  ;;  %v15827_v36 = vrot.slane %v11729_v30, 4  ;;  %v1336_v14 = vsel %vm15630_vm14, %v11742_v19, %v1335_v0  ;;  %v1234_v52 = vrot.slane %v11705_v47, 4  ;;  %v1332_v6 = vsel %vm15630_vm14, %v11737_v8, %v1330_v37 }
 0x18c   : > { %v1431_v32 = vsel %vm262_vm0, %v1422_v5, %v1423_v44  ;;  %v1429_v39 = vsel %vm262_vm0, %v1421_v46, %v1422_v5  ;;  %v1383_v46 = vsel %vm15627_vm13, %v11766_v11, %v1382_v12  ;;  %v1230_v5 = vrot.slane %v11691_v38, 4 }
 0x18d   : > { %v1432_v20 = vsel %vm15651_vm12, %v1415_v2, %v1431_v32  ;;  %v11832_v56 = vpop.permute.xlu1 %1455  ;;  %v11834_v54 = vpop.permute.xlu0 %1453  ;;  %v1430_v25 = vsel %vm15651_vm12, %v1413_v24, %v1429_v39  ;;  %v1381_v11 = vsel %vm15627_vm13, %v11759_v35, %v1380_v17  ;;  %v1279_v24 = vrot.slane %v11720_v49, 4 }
 0x18e   : > { %v10089_v42 = vcombine.low %v1428_v21, %v1432_v20  ;;  %v10087_v44 = vcombine.low %v1426_v41, %v1430_v25  ;;  %v10088_v2 = vcombine.high %v1426_v41, %v1430_v25  ;;  %v10090_v23 = vcombine.high %v1428_v21, %v1432_v20 }
 0x18f   : > { %2255 = vrot.lane.b32.xlu1 %v2238_v33, %s15628_s11  ;;  %2253 = vrot.lane.b32.xlu0 %v11590_v13, %s15628_s11  ;;  %v10084_v43 = vcombine.high %v1379_v61, %v1383_v46  ;;  %v10086_v55 = vcombine.high %v1381_v11, %v1385_v15  ;;  %v1290_v35 = vsel %vm262_vm0, %v15827_v36, %v15826_v62  ;;  %vm15633_vm13 = vcmask 818176   ;;  %s15631_s11 = smov 69  }
 0x190   : > { %1857 = vmatprep.subr.bf16.mxu0 %v10088_v2  ;;  %1898 = vmatprep.subr.bf16.mxu1 %v10090_v23  ;;  %v1338_v49 = vsel %vm15630_vm14, %v11753_v7, %v1337_v45  ;;  %v15828_v26 = vmov %v15827_v36  ;;  %v10058_v7 = vcombine.high %v11868_v22, %v11868_v22  ;;  %v1233_v19 = vrot.slane %v11694_v34, 4 }
 0x191   : > { %v11854_v20 = vpop.permute.xlu1 %1459  ;;  %v11856_v57 = vpop.permute.xlu0 %1457  ;;  %1858 = vmatpush1.bf16.msra.mxu0 %v10087_v44  ;;  %1899 = vmatpush1.bf16.msra.mxu1 %v10089_v42  ;;  %v1288_v12 = vsel %vm262_vm0, %v1280_v60, %v15828_v26  ;;  %v1334_v45 = vsel %vm15630_vm14, %v11735_v4, %v1333_v10  ;;  %v10085_v17 = vcombine.low %v1381_v11, %v1385_v15  ;;  %v1232_v8 = vrot.slane %v11696_v16, 4  ;;  %v2282_v15 = vld [vmem:[%s11068_s21 + $0x10] sm:$0xf] }
 0x192   : > { %1859 = vmatprep.subr.bf16.mxu0 %v10084_v43  ;;  %1900 = vmatprep.subr.bf16.mxu1 %v10086_v55  ;;  %v10083_v32 = vcombine.low %v1379_v61, %v1383_v46  ;;  %v15829_v33 = vrot.slane %v11711_v50, 4  ;;  %v10080_v4 = vcombine.high %v1332_v6, %v1336_v14  ;;  %v10082_v25 = vcombine.high %v1334_v45, %v1338_v49  ;;  %v15835_v26 = vld [vmem:[#allocation21_spill] sm:$0xff] }
 0x193   : > { %2294 = vrot.lane.b32.xlu1 %v11616_v53, %s15631_s11  ;;  %2292 = vrot.lane.b32.xlu0 %v11619_v29, %s15631_s11  ;;  %v1188_v42 = vrot.slane %v11683_v1, 4  ;;  %v15830_v44 = vrot.slane %v11689_v27, 4  ;;  %v1291_v46 = vsel %vm15648_vm15, %v11729_v30, %v1290_v35  ;;  %v1289_v2 = vsel %vm15648_vm15, %v11718_v18, %v1288_v12 }
 0x194   : > { %v1286_v39 = vsel %vm262_vm0, %v15829_v33, %v1279_v24  ;;  %10103 = vmatprep.mubr.msk.bf16.mxu0 %vm974_vm7, %v10058_v7  ;;  %10104 = vmatprep.mubr.msk.bf16.mxu1 %vm974_vm7, %v10058_v7  ;;  %v1187_v23 = vrot.slane %v11685_v3, 4  ;;  %v1243_v0 = vsel %vm262_vm0, %v1234_v52, %v1235_v9  ;;  %v1285_v1 = vsel %vm15648_vm15, %v11713_v51, %v11796_v48 }
 0x195   : > { %v11889_v41 = vpop.permute.xlu1 %1463  ;;  %v11891_v21 = vpop.permute.xlu0 %1461  ;;  %v1236_v16 = vsel %vm262_vm0, %v1230_v5, %v15830_v44  ;;  %1860 = vmatpush1.bf16.msra.mxu0 %v10083_v32  ;;  %1901 = vmatpush1.bf16.msra.mxu1 %v10085_v17  ;;  %v1241_v5 = vsel %vm262_vm0, %v1233_v19, %v1234_v52  ;;  %vm1143_vm14 = vcmask 826368   ;;  %v1186_v30 = vrot.slane %v11676_v40, 4 }
 0x196   : > { %1861 = vmatprep.subr.bf16.mxu0 %v10080_v4  ;;  %1902 = vmatprep.subr.bf16.mxu1 %v10082_v25  ;;  %v1287_v60 = vsel %vm15648_vm15, %v11711_v50, %v1286_v39  ;;  %v10081_v18 = vcombine.low %v1334_v45, %v1338_v49  ;;  %v10079_v37 = vcombine.low %v1332_v6, %v1336_v14  ;;  %v1185_v51 = vrot.slane %v11678_v28, 4  ;;  %v2285_v50 = vld [vmem:[%s11068_s21 + $0x2c] sm:$0xf]  ;;  %v15834_v49 = vld [vmem:[#allocation23_spill] sm:$0xff] }
 0x197   : > { %2298 = vrot.lane.b32.xlu1 %v11638_v58, %s15631_s11  ;;  %2296 = vrot.lane.b32.xlu0 %v2282_v15, %s15631_s11  ;;  %v15831_v48 = vmov %v15830_v44  ;;  %v10076_v10 = vcombine.high %v1285_v1, %v1289_v2  ;;  %v10078_v43 = vcombine.high %v1287_v60, %v1291_v46  ;;  %v1141_v55 = vrot.slane %v11665_v31, 4  ;;  %v15839_v25 = vld [vmem:[#allocation19_spill] sm:$0xff] }
 0x198   : > { %v1239_v61 = vsel %vm262_vm0, %v15831_v48, %v1232_v8  ;;  %v15832_v9 = vrot.slane %v11671_v63, 4  ;;  %v15833_v62 = vrot.slane %v11673_v59, 4  ;;  %v1244_v28 = vsel %vm15634_vm8, %v11705_v47, %v1243_v0 }
 0x199   : > { %v11920_v11 = vpop.permute.xlu1 %1502  ;;  %v11922_v24 = vpop.permute.xlu0 %1500  ;;  %1862 = vmatpush1.bf16.msra.mxu0 %v10079_v37  ;;  %1903 = vmatpush1.bf16.msra.mxu1 %v10081_v18  ;;  %v1242_v35 = vsel %vm15634_vm8, %v11694_v34, %v1241_v5  ;;  %v1140_v14 = vrot.slane %v15834_v49, 4  ;;  %v1196_v52 = vsel %vm262_vm0, %v1187_v23, %v1188_v42  ;;  %v1238_v31 = vsel %vm15634_vm8, %v11691_v38, %v1236_v16  ;;  %v15836_v34 = vld [vmem:[#allocation22_spill] sm:$0xff]  ;;  %v15841_v42 = vld [vmem:[#allocation20_spill] sm:$0xff] }
 0x19a   : > { %v1189_v36 = vsel %vm262_vm0, %v15833_v62, %v15832_v9  ;;  %1863 = vmatprep.subr.bf16.mxu0 %v10076_v10  ;;  %1904 = vmatprep.subr.bf16.mxu1 %v10078_v43  ;;  %v1194_v6 = vsel %vm262_vm0, %v1186_v30, %v1187_v23  ;;  %v1139_v12 = vrot.slane %v15835_v26, 4  ;;  %v1240_v47 = vsel %vm15634_vm8, %v11689_v27, %v1239_v61  ;;  %v15838_v27 = vld [vmem:[#allocation17_spill] sm:$0xff]  ;;  %v15843_v23 = vld [vmem:[#allocation18_spill] sm:$0xff] }
 0x19b   : > { %v10077_v7 = vcombine.low %v1287_v60, %v1291_v46  ;;  %v10075_v19 = vcombine.low %v1285_v1, %v1289_v2  ;;  %2302 = vrot.lane.b32.xlu1 %v2285_v50, %s15631_s11  ;;  %2300 = vrot.lane.b32.xlu0 %v11590_v13, %s15631_s11  ;;  %v1138_v45 = vrot.slane %v15836_v34, 4  ;;  %v15837_v38 = vmov %v15832_v9  ;;  %v15844_v60 = vld [vmem:[#allocation16_spill] sm:$0xff]  ;;  %s15635_s11 = smov 68   ;;  %v15847_v9 = vld [vmem:[#allocation13_spill] sm:$0xff] }
 0x19c   : > { %v1192_v17 = vsel %vm262_vm0, %v15837_v38, %v1185_v51  ;;  %v10072_v33 = vcombine.high %v1238_v31, %v1242_v35  ;;  %v10074_v39 = vcombine.high %v1240_v47, %v1244_v28  ;;  %v1093_v4 = vrot.slane %v15838_v27, 4 }
 0x19d   : > { %v11950_v32 = vpop.permute.xlu1 %1506  ;;  %v11952_v8 = vpop.permute.xlu0 %1504  ;;  %v15840_v15 = vrot.slane %v15839_v25, 4  ;;  %v15842_v44 = vrot.slane %v15841_v42, 4  ;;  %v1197_v46 = vsel %vm15633_vm13, %v11685_v3, %v1196_v52  ;;  %1864 = vmatpush1.bf16.msra.mxu0 %v10075_v19  ;;  %1905 = vmatpush1.bf16.msra.mxu1 %v10077_v7  ;;  %v1195_v2 = vsel %vm15633_vm13, %v11676_v40, %v1194_v6 }
 0x19e   : > { %v1092_v0 = vrot.slane %v15843_v23, 4  ;;  %v1149_v1 = vsel %vm262_vm0, %v1140_v14, %v1141_v55  ;;  %v1191_v5 = vsel %vm15633_vm13, %v11673_v59, %v1189_v36  ;;  %1865 = vmatprep.subr.bf16.mxu0 %v10072_v33  ;;  %1906 = vmatprep.subr.bf16.mxu1 %v10074_v39  ;;  %v1147_v30 = vsel %vm262_vm0, %v1139_v12, %v1140_v14  ;;  %v15845_v59 = vld [vmem:[#allocation14_spill] sm:$0xff]  ;;  %v15849_v36 = vld [vmem:[#allocation15_spill] sm:$0xff]  ;;  %v2332_v33 = vld [vmem:[%s11068_s21 + $0x2c] sm:$0xf] }
 0x19f   : > { %v1142_v16 = vsel %vm262_vm0, %v15842_v44, %v15840_v15  ;;  %v1091_v18 = vrot.slane %v15844_v60, 4  ;;  %v1193_v3 = vsel %vm15633_vm13, %v11671_v63, %v1192_v17  ;;  %v10073_v37 = vcombine.low %v1240_v47, %v1244_v28  ;;  %2341 = vrot.lane.b32.xlu1 %v11616_v53, %s15635_s11  ;;  %2339 = vrot.lane.b32.xlu0 %v11619_v29, %s15635_s11  ;;  %v2329_v55 = vld [vmem:[%s11068_s21 + $0x10] sm:$0xf] }
 0x1a0   : > { %v10071_v51 = vcombine.low %v1238_v31, %v1242_v35  ;;  %v1090_v40 = vrot.slane %v15845_v59, 4  ;;  %v15846_v48 = vmov %v15840_v15  ;;  %v10068_v63 = vcombine.high %v1191_v5, %v1195_v2 }
 0x1a1   : > { %v1145_v61 = vsel %vm262_vm0, %v15846_v48, %v1138_v45  ;;  %v11980_v10 = vpop.permute.xlu1 %1510  ;;  %v11982_v43 = vpop.permute.xlu0 %1508  ;;  %v10070_v50 = vcombine.high %v1193_v3, %v1197_v46  ;;  %v15848_v62 = vrot.slane %v15847_v9, 4  ;;  %v15850_v28 = vrot.slane %v15849_v36, 4  ;;  %1907 = vmatpush1.bf16.msra.mxu1 %v10073_v37 }
 0x1a2   : > { %v1150_v14 = vsel %vm1143_vm14, %v15834_v49, %v1149_v1  ;;  %1866 = vmatpush1.bf16.msra.mxu0 %v10071_v51  ;;  %v1148_v52 = vsel %vm1143_vm14, %v15835_v26, %v1147_v30  ;;  %v1101_v31 = vsel %vm262_vm0, %v1092_v0, %v1093_v4  ;;  %v1144_v6 = vsel %vm1143_vm14, %v15841_v42, %v1142_v16 }
 0x1a3   : > { %v1094_v35 = vsel %vm262_vm0, %v15850_v28, %v15848_v62  ;;  %1867 = vmatprep.subr.bf16.mxu0 %v10068_v63  ;;  %1908 = vmatprep.subr.bf16.mxu1 %v10070_v50  ;;  %v1099_v12 = vsel %vm262_vm0, %v1091_v18, %v1092_v0  ;;  %vm1095_vm13 = vcmask 834560   ;;  %v1146_v47 = vsel %vm1143_vm14, %v15839_v25, %v1145_v61 }
 0x1a4   : > { %v10069_v49 = vcombine.low %v1193_v3, %v1197_v46  ;;  %v10067_v7 = vcombine.low %v1191_v5, %v1195_v2  ;;  %2345 = vrot.lane.b32.xlu1 %v11638_v58, %s15635_s11  ;;  %2343 = vrot.lane.b32.xlu0 %v2329_v55, %s15635_s11  ;;  %v15851_v26 = vmov %v15848_v62  ;;  %v10064_v38 = vcombine.high %v1144_v6, %v1148_v52 }
 0x1a5   : > { %v1097_v19 = vsel %vm262_vm0, %v15851_v26, %v1090_v40  ;;  %v12006_v34 = vpop.permute.xlu1 %1549  ;;  %v12008_v45 = vpop.permute.xlu0 %1547  ;;  %v10066_v17 = vcombine.high %v1146_v47, %v1150_v14  ;;  %v1102_v39 = vsel %vm1095_vm13, %v15843_v23, %v1101_v31  ;;  %v1100_v27 = vsel %vm1095_vm13, %v15844_v60, %v1099_v12 }
 0x1a6   : > { %1868 = vmatpush1.bf16.msra.mxu0 %v10067_v7  ;;  %1909 = vmatpush1.bf16.msra.mxu1 %v10069_v49  ;;  %v1096_v4 = vsel %vm1095_vm13, %v15849_v36, %v1094_v35  ;;  %v1098_v25 = vsel %vm1095_vm13, %v15847_v9, %v1097_v19  ;;  %v10065_v15 = vcombine.low %v1146_v47, %v1150_v14  ;;  %v1560_v44 = vrot.slane %v12006_v34, 4  ;;  %v2376_v9 = vld [vmem:[%s11068_s21 + $0x10] sm:$0xf] }
 0x1a7   : > { %1869 = vmatprep.subr.bf16.mxu0 %v10064_v38  ;;  %1910 = vmatprep.subr.bf16.mxu1 %v10066_v17  ;;  %v10063_v42 = vcombine.low %v1144_v6, %v1148_v52  ;;  %v1559_v16 = vrot.slane %v12008_v45, 4  ;;  %v10060_v23 = vcombine.high %v1096_v4, %v1100_v27  ;;  %v10062_v0 = vcombine.high %v1098_v25, %v1102_v39  ;;  %v2379_v38 = vld [vmem:[%s11068_s21 + $0x2c] sm:$0xf] }
 0x1a8   : > { %2349 = vrot.lane.b32.xlu1 %v2332_v33, %s15635_s11  ;;  %2347 = vrot.lane.b32.xlu0 %v11590_v13, %s15635_s11  ;;  %v10061_v1 = vcombine.low %v1098_v25, %v1102_v39  ;;  %vm1519_vm14 = vcmask 760832   ;;  %vm15647_vm8 = vcmask 752640   ;;  %v1513_v30 = vrot.slane %v11920_v11, 4  ;;  %s15637_s11 = smov 67  }
 0x1a9   : > { %v1554_v46 = vpop.permute.xlu1 %1553  ;;  %v1552_v2 = vpop.permute.xlu0 %1551  ;;  %v1512_v60 = vrot.slane %v11922_v24, 4  ;;  %v1517_v18 = vrot.slane %v11980_v10, 4  ;;  %v1516_v3 = vrot.slane %v11982_v43, 4  ;;  %v1466_v37 = vrot.slane %v11832_v56, 4 }
 0x1aa   : > { %v1561_v5 = vrot.slane %v1552_v2, 4  ;;  %1870 = vmatpush1.bf16.msra.mxu0 %v10063_v42  ;;  %1911 = vmatpush1.bf16.msra.mxu1 %v10065_v15  ;;  %v1465_v51 = vrot.slane %v11834_v54, 4  ;;  %v1514_v59 = vrot.slane %v11952_v8, 4  ;;  %v10059_v40 = vcombine.low %v1096_v4, %v1100_v27 }
 0x1ab   : > { %1871 = vmatprep.subr.bf16.mxu0 %v10060_v23  ;;  %1912 = vmatprep.subr.bf16.mxu1 %v10062_v0  ;;  %v1468_v48 = vrot.slane %v11854_v20, 4  ;;  %v1470_v61 = vrot.slane %v11889_v41, 4  ;;  %v1515_v10 = vrot.slane %v11950_v32, 4  ;;  %v1565_v63 = vsel %vm262_vm0, %v1559_v16, %v1560_v44 }
 0x1ac   : > { %2388 = vrot.lane.b32.xlu1 %v11616_v53, %s15637_s11  ;;  %2386 = vrot.lane.b32.xlu0 %v11619_v29, %s15637_s11  ;;  %v1562_v8 = vrot.slane %v1554_v46, 4  ;;  %v1568_v62 = vsel %vm262_vm0, %v1560_v44, %v1561_v5  ;;  %v1469_v35 = vrot.slane %v11891_v21, 4  ;;  %v1518_v14 = vsel %vm262_vm0, %v1512_v60, %v1513_v30  ;;  %v2423_v60 = vld [vmem:[%s11068_s21 + $0x10] sm:$0xf] }
 0x1ad   : > { %v1558_v50 = vpop.permute.xlu1 %1557  ;;  %v1556_v55 = vpop.permute.xlu0 %1555  ;;  %v1525_v41 = vsel %vm262_vm0, %v1516_v3, %v1517_v18  ;;  %v1523_v52 = vsel %vm262_vm0, %v1515_v10, %v1516_v3  ;;  %v1467_v31 = vrot.slane %v11856_v57, 4  ;;  %v1521_v6 = vsel %vm262_vm0, %v1513_v30, %v1514_v59  ;;  %v2426_v3 = vld [vmem:[%s11068_s21 + $0x2c] sm:$0xf] }
 0x1ae   : > { %v1564_v36 = vrot.slane %v1558_v50, 4  ;;  %v1563_v28 = vrot.slane %v1556_v55, 4  ;;  %1872 = vmatpush1.bf16.msra.mxu0 %v10059_v40  ;;  %1913 = vmatpush1.bf16.msra.mxu1 %v10061_v1  ;;  %v1567_v49 = vsel %vm15647_vm8, %v12008_v45, %v1565_v63  ;;  %v1569_v7 = vsel %vm15647_vm8, %v12006_v34, %v1568_v62  ;;  %v2839_v63 = vld [vmem:[%s11068_s21 + $0x10] sm:$0xf] }
 0x1af   : > { %v1526_v33 = vsel %vm1519_vm14, %v11982_v43, %v1525_v41  ;;  %v1524_v45 = vsel %vm1519_vm14, %v11950_v32, %v1523_v52  ;;  %v1478_v4 = vsel %vm262_vm0, %v1469_v35, %v1470_v61  ;;  %v1476_v15 = vsel %vm262_vm0, %v1468_v48, %v1469_v35  ;;  %v12120_v48 = vld [vmem:[%s11068_s21 + $0x8] sm:$0xff]  ;;  %v12123_v61 = vld [vmem:[%s11068_s21] sm:$0xff]  ;;  %v2886_v35 = vld [vmem:[%s11068_s21 + $0x10] sm:$0xf] }
 0x1b0   : > { %v1572_v12 = vsel %vm262_vm0, %v1563_v28, %v1564_v36  ;;  %2392 = vrot.lane.b32.xlu1 %v11638_v58, %s15637_s11  ;;  %2390 = vrot.lane.b32.xlu0 %v2376_v9, %s15637_s11  ;;  %v1570_v47 = vsel %vm262_vm0, %v1562_v8, %v1563_v28  ;;  %vm15663_vm13 = vcmask 769024   ;;  %v1471_v42 = vsel %vm262_vm0, %v1465_v51, %v1466_v37  ;;  %v2842_v9 = vld [vmem:[%s11068_s21 + $0x2c] sm:$0xf]  ;;  %v12150_v28 = vld [vmem:[%s11068_s21 + $0x1c] sm:$0xff] }
 0x1b1   : > { %v1573_v26 = vsel %vm15647_vm8, %v1556_v55, %v1572_v12  ;;  %v12057_v57 = vpop.permute.xlu1 %1965  ;;  %v12059_v19 = vpop.permute.xlu0 %1963  ;;  %v1571_v17 = vsel %vm15647_vm8, %v1554_v46, %v1570_v47  ;;  %v1520_v44 = vsel %vm1519_vm14, %v11922_v24, %v1518_v14  ;;  %v1522_v43 = vsel %vm1519_vm14, %v11920_v11, %v1521_v6  ;;  %v2889_v52 = vld [vmem:[%s11068_s21 + $0x2c] sm:$0xf] }
 0x1b2   : > { %15852 = vst [vmem:[#allocation23_spill] sm:$0xff] %v12057_v57  ;;  %15853 = vst [vmem:[#allocation21_spill] sm:$0xff] %v12059_v19  ;;  %v10101_v39 = vcombine.low %v1569_v7, %v1573_v26  ;;  %v10099_v27 = vcombine.low %v1567_v49, %v1571_v17  ;;  %v10100_v34 = vcombine.high %v1567_v49, %v1571_v17  ;;  %v2933_v49 = vld [vmem:[%s11068_s21 + $0x10] sm:$0xf]  ;;  %vm15666_vm8 = vcmask 564224  }
 0x1b3   : > { %v10102_v25 = vcombine.high %v1569_v7, %v1573_v26  ;;  %v1474_v32 = vsel %vm262_vm0, %v1466_v37, %v1467_v31  ;;  %v10096_v2 = vcombine.high %v1520_v44, %v1524_v45  ;;  %v10098_v23 = vcombine.high %v1522_v43, %v1526_v33  ;;  %v12108_v37 = vld [vmem:[%s11068_s21 + $0x24] sm:$0xff] }
 0x1b4   : > { %2396 = vrot.lane.b32.xlu1 %v2379_v38, %s15637_s11  ;;  %2394 = vrot.lane.b32.xlu0 %v11590_v13, %s15637_s11  ;;  %v1479_v24 = vsel %vm15663_vm13, %v11891_v21, %v1478_v4  ;;  %v1477_v11 = vsel %vm15663_vm13, %v11854_v20, %v1476_v15  ;;  %v1473_v13 = vsel %vm15663_vm13, %v11834_v54, %v1471_v42  ;;  %s15641_s11 = smov 66   ;;  %v2936_v38 = vld [vmem:[%s11068_s21 + $0x2c] sm:$0xf]  ;;  %vm15667_vm15 = vcmask 572416  }
 0x1b5   : > { %1883 = vmatprep.subr.bf16.mxu0 %v10100_v34  ;;  %1924 = vmatprep.subr.bf16.mxu1 %v10102_v25  ;;  %v12078_v16 = vpop.permute.xlu1 %1969  ;;  %v12080_v46 = vpop.permute.xlu0 %1967  ;;  %v1475_v0 = vsel %vm15663_vm13, %v11832_v56, %v1474_v32  ;;  %v10097_v1 = vcombine.low %v1522_v43, %v1526_v33  ;;  %v10095_v5 = vcombine.low %v1520_v44, %v1524_v45  ;;  %v2980_v45 = vld [vmem:[%s11068_s21 + $0x10] sm:$0xf]  ;;  %v2983_v25 = vld [vmem:[%s11068_s21 + $0x2c] sm:$0xf]  ;;  %vm15670_vm12 = vcmask 580608  }
 0x1b6   : > { %15854 = vst [vmem:[#allocation22_spill] sm:$0xff] %v12078_v16  ;;  %15855 = vst [vmem:[#allocation17_spill] sm:$0xff] %v12080_v46  ;;  %1884 = vmatpush2.bf16.msra.mxu0 %v10099_v27  ;;  %1925 = vmatpush2.bf16.msra.mxu1 %v10101_v39  ;;  %v10092_v54 = vcombine.high %v1473_v13, %v1477_v11  ;;  %v10094_v30 = vcombine.high %v1475_v0, %v1479_v24  ;;  %v3027_v32 = vld [vmem:[%s11068_s21 + $0x10] sm:$0xf]  ;;  %vm15688_vm13 = vcmask 588800  }
 0x1b7   : > { %1885 = vmatprep.subr.bf16.mxu0 %v10096_v2  ;;  %1926 = vmatprep.subr.bf16.mxu1 %v10098_v23  ;;  %v10093_v56 = vcombine.low %v1475_v0, %v1479_v24  ;;  %v10057_v51 = vcombine.low %v11868_v22, %v11868_v22  ;;  %v3030_v24 = vld [vmem:[%s11068_s21 + $0x2c] sm:$0xf] }
 0x1b8   : > { %2435 = vrot.lane.b32.xlu1 %v11616_v53, %s15641_s11  ;;  %2433 = vrot.lane.b32.xlu0 %v11619_v29, %s15641_s11  ;;  %v10091_v53 = vcombine.low %v1473_v13, %v1477_v11 }
 0x1b9   : > { %v12094_v21 = vpop.permute.xlu1 %1973  ;;  %v12096_v20 = vpop.permute.xlu0 %1971 }
 0x1ba   : > { %15856 = vst [vmem:[#allocation19_spill] sm:$0xff] %v12094_v21  ;;  %15857 = vst [vmem:[#allocation20_spill] sm:$0xff] %v12096_v20  ;;  %1886 = vmatpush2.bf16.msra.mxu0 %v10095_v5  ;;  %1927 = vmatpush2.bf16.msra.mxu1 %v10097_v1  ;;  %v3074_v5 = vld [vmem:[%s11068_s21 + $0x10] sm:$0xf] }
 0x1bb   : > { %1887 = vmatprep.subr.bf16.mxu0 %v10092_v54  ;;  %1928 = vmatprep.subr.bf16.mxu1 %v10094_v30  ;;  %v3077_v54 = vld [vmem:[%s11068_s21 + $0x2c] sm:$0xf] }
 0x1bc   : > { %2439 = vrot.lane.b32.xlu1 %v11638_v58, %s15641_s11  ;;  %2437 = vrot.lane.b32.xlu0 %v2423_v60, %s15641_s11 }
 0x1bd   : > { %v12102_v29 = vpop.permute.xlu1 %2012  ;;  %v12104_v18 = vpop.permute.xlu0 %2010 }
 0x1be   : > { %15858 = vst [vmem:[#allocation18_spill] sm:$0xff] %v12102_v29  ;;  %15859 = vst [vmem:[#allocation16_spill] sm:$0xff] %v12104_v18  ;;  %1888 = vmatpush2.bf16.msra.mxu0 %v10091_v53  ;;  %1929 = vmatpush2.bf16.msra.mxu1 %v10093_v56 }
 0x1c0   : > { %2443 = vrot.lane.b32.xlu1 %v2426_v3, %s15641_s11  ;;  %2441 = vrot.lane.b32.xlu0 %v12108_v37, %s15641_s11  ;;  %s10900_s11 = smov 49  }
 0x1c1   : > { %v12115_v59 = vpop.permute.xlu1 %2016  ;;  %v12117_v40 = vpop.permute.xlu0 %2014  ;;  %1890 = vmatmul.mubr.bf16.vlgmr.msra.gmra.mxu0 %v10057_v51  ;;  %1931 = vmatmul.mubr.bf16.vlgmr.msra.gmra.mxu1 %v10057_v51 }
 0x1c2   : > { %15860 = vst [vmem:[#allocation14_spill] sm:$0xff] %v12115_v59  ;;  %15861 = vst [vmem:[#allocation13_spill] sm:$0xff] %v12117_v40 }
 0x1c4   : > { %2851 = vrot.lane.b32.xlu1 %v12120_v48, %s10899_s9  ;;  %2849 = vrot.lane.b32.xlu0 %v12123_v61, %s10899_s9 }
 0x1c5   : > { %v12127_v22 = vpop.permute.xlu1 %2020  ;;  %v12129_v10 = vpop.permute.xlu0 %2018 }
 0x1c6   : > { %15862 = vst [vmem:[#allocation15_spill] sm:$0xff] %v12129_v10 }
 0x1c8   : > { %2855 = vrot.lane.b32.xlu1 %v11638_v58, %s10899_s9  ;;  %2853 = vrot.lane.b32.xlu0 %v2839_v63, %s10899_s9 }
 0x1c9   : > { %v12133_v50 = vpop.permute.xlu1 %2059  ;;  %v12135_v55 = vpop.permute.xlu0 %2057 }
 0x1cc   : > { %2859 = vrot.lane.b32.xlu1 %v2842_v9, %s10899_s9  ;;  %2857 = vrot.lane.b32.xlu0 %v12108_v37, %s10899_s9  ;;  %s15643_s9 = smov 48  }
 0x1cd   : > { %v12139_v8 = vpop.permute.xlu1 %2063  ;;  %v12141_v62 = vpop.permute.xlu0 %2061 }
 0x1d0   : > { %2898 = vrot.lane.b32.xlu1 %v12120_v48, %s10900_s11  ;;  %2896 = vrot.lane.b32.xlu0 %v12123_v61, %s10900_s11 }
 0x1d1   : > { %v12145_v58 = vpop.permute.xlu1 %2067  ;;  %v12147_v36 = vpop.permute.xlu0 %2065 }
 0x1d4   : > { %2902 = vrot.lane.b32.xlu1 %v12150_v28, %s10900_s11  ;;  %2900 = vrot.lane.b32.xlu0 %v2886_v35, %s10900_s11 }
 0x1d5   : > { %v12154_v14 = vpop.permute.xlu1 %2106  ;;  %v12156_v41 = vpop.permute.xlu0 %2104 }
 0x1d8   : > { %2906 = vrot.lane.b32.xlu1 %v2889_v52, %s10900_s11  ;;  %2904 = vrot.lane.b32.xlu0 %v12108_v37, %s10900_s11  ;;  %s15645_s11 = smov 47  }
 0x1d9   : > { %v12160_v31 = vpop.permute.xlu1 %2110  ;;  %v12162_v6 = vpop.permute.xlu0 %2108 }
 0x1dc   : > { %2945 = vrot.lane.b32.xlu1 %v12120_v48, %s15643_s9  ;;  %2943 = vrot.lane.b32.xlu0 %v12123_v61, %s15643_s9 }
 0x1dd   : > { %v12168_v12 = vpop.permute.xlu1 %2114  ;;  %v12170_v47 = vpop.permute.xlu0 %2112 }
 0x1e0   : > { %2949 = vrot.lane.b32.xlu1 %v12150_v28, %s15643_s9  ;;  %2947 = vrot.lane.b32.xlu0 %v2933_v49, %s15643_s9  ;;  %v3121_v49 = vld [vmem:[%s11068_s21 + $0x10] sm:$0xf] }
 0x1e1   : > { %v12176_v7 = vpop.permute.xlu1 %2153  ;;  %v12178_v26 = vpop.permute.xlu0 %2151 }
 0x1e2   : > { %v15652_v56 = vrot.slane %v12176_v7, 4  ;;  %v2163_v53 = vrot.slane %v12178_v26, 4 }
 0x1e4   : > { %2953 = vrot.lane.b32.xlu1 %v2936_v38, %s15643_s9  ;;  %2951 = vrot.lane.b32.xlu0 %v12108_v37, %s15643_s9  ;;  %s15649_s9 = smov 46  }
 0x1e5   : > { %v12184_v17 = vpop.permute.xlu1 %2157  ;;  %v12186_v33 = vpop.permute.xlu0 %2155 }
 0x1e8   : > { %2992 = vrot.lane.b32.xlu1 %v12120_v48, %s15645_s11  ;;  %2990 = vrot.lane.b32.xlu0 %v12123_v61, %s15645_s11 }
 0x1e9   : > { %v12192_v39 = vpop.permute.xlu1 %2161  ;;  %v12194_v27 = vpop.permute.xlu0 %2159 }
 0x1ec   : > { %2996 = vrot.lane.b32.xlu1 %v12150_v28, %s15645_s11  ;;  %2994 = vrot.lane.b32.xlu0 %v2980_v45, %s15645_s11 }
 0x1ed   : > { %v12200_v4 = vpop.permute.xlu1 %2200  ;;  %v12202_v34 = vpop.permute.xlu0 %2198 }
 0x1f0   : > { %3000 = vrot.lane.b32.xlu1 %v2983_v25, %s15645_s11  ;;  %2998 = vrot.lane.b32.xlu0 %v12108_v37, %s15645_s11  ;;  %s15668_s11 = smov 45  }
 0x1f1   : > { %v12208_v15 = vpop.permute.xlu1 %2204  ;;  %v12210_v42 = vpop.permute.xlu0 %2202 }
 0x1f2   : > { %v2212_v29 = vrot.slane %v12210_v42, 4 }
 0x1f4   : > { %3039 = vrot.lane.b32.xlu1 %v12120_v48, %s15649_s9  ;;  %3037 = vrot.lane.b32.xlu0 %v12123_v61, %s15649_s9 }
 0x1f5   : > { %v12216_v44 = vpop.permute.xlu1 %2208  ;;  %v12218_v43 = vpop.permute.xlu0 %2206 }
 0x1f6   : > { %v2215_v3 = vrot.slane %v12216_v44, 4  ;;  %v2214_v9 = vrot.slane %v12218_v43, 4 }
 0x1f8   : > { %3043 = vrot.lane.b32.xlu1 %v12150_v28, %s15649_s9  ;;  %3041 = vrot.lane.b32.xlu0 %v3027_v32, %s15649_s9 }
 0x1f9   : > { %v12224_v2 = vpop.permute.xlu1 %2247  ;;  %v12226_v23 = vpop.permute.xlu0 %2245 }
 0x1fa   : > { %v2258_v35 = vrot.slane %v12224_v2, 4 }
 0x1fc   : > { %3047 = vrot.lane.b32.xlu1 %v3030_v24, %s15649_s9  ;;  %3045 = vrot.lane.b32.xlu0 %v12108_v37, %s15649_s9  ;;  %v12262_v24 = vsel %vm262_vm0, %v2163_v53, %v15652_v56  ;;  %s15671_s9 = smov 44   ;;  %v2211_v53 = vrot.slane %v12200_v4, 4  ;;  %v2213_v56 = vrot.slane %v12208_v15, 4 }
 0x1fd   : > { %v12232_v11 = vpop.permute.xlu1 %2251  ;;  %v12234_v13 = vpop.permute.xlu0 %2249 }
 0x1fe   : > { %v2259_v44 = vrot.slane %v12234_v13, 4  ;;  %v2223_v13 = vsel %vm262_vm0, %v2214_v9, %v2215_v3 }
 0x200   : > { %3086 = vrot.lane.b32.xlu1 %v12120_v48, %s15668_s11  ;;  %3084 = vrot.lane.b32.xlu0 %v12123_v61, %s15668_s11 }
 0x201   : > { %v2256_v0 = vpop.permute.xlu1 %2255  ;;  %v12240_v1 = vpop.permute.xlu0 %2253 }
 0x202   : > { %v2262_v63 = vrot.slane %v2256_v0, 4  ;;  %v2261_v52 = vrot.slane %v12240_v1, 4  ;;  %v2210_v0 = vrot.slane %v12202_v34, 4 }
 0x204   : > { %3090 = vrot.lane.b32.xlu1 %v12150_v28, %s15668_s11  ;;  %3088 = vrot.lane.b32.xlu0 %v3074_v5, %s15668_s11  ;;  %v2270_v21 = vsel %vm262_vm0, %v2261_v52, %v2262_v63 }
 0x205   : > { %v2295_v30 = vpop.permute.xlu1 %2294  ;;  %v2293_v60 = vpop.permute.xlu0 %2292 }
 0x206   : > { %v2305_v38 = vrot.slane %v2295_v30, 4  ;;  %v2304_v45 = vrot.slane %v2293_v60, 4 }
 0x208   : > { %3094 = vrot.lane.b32.xlu1 %v3077_v54, %s15668_s11  ;;  %3092 = vrot.lane.b32.xlu0 %v12108_v37, %s15668_s11  ;;  %v2260_v54 = vrot.slane %v12232_v11, 4  ;;  %v2310_v5 = vsel %vm262_vm0, %v2304_v45, %v2305_v38  ;;  %s15675_s11 = smov 43  }
 0x209   : > { %v2299_v25 = vpop.permute.xlu1 %2298  ;;  %v2297_v32 = vpop.permute.xlu0 %2296  ;;  %v2312_v3 = vsel %vm15666_vm8, %v2293_v60, %v2310_v5  ;;  %v2166_v60 = vrot.slane %v12184_v17, 4  ;;  %v2219_v5 = vsel %vm262_vm0, %v2211_v53, %v2212_v29 }
 0x20a   : > { %v2306_v51 = vrot.slane %v2297_v32, 4  ;;  %v2257_v32 = vrot.slane %v12226_v23, 4  ;;  %v2307_v46 = vrot.slane %v2299_v25, 4  ;;  %v2268_v45 = vsel %vm262_vm0, %v2260_v54, %v2261_v52 }
 0x20c   : > { %3133 = vrot.lane.b32.xlu1 %v12120_v48, %s15671_s9  ;;  %3131 = vrot.lane.b32.xlu0 %v12123_v61, %s15671_s9  ;;  %v2313_v16 = vsel %vm262_vm0, %v2305_v38, %v2306_v51  ;;  %v2263_v40 = vsel %vm262_vm0, %v2257_v32, %v2258_v35  ;;  %v2266_v51 = vsel %vm262_vm0, %v2258_v35, %v2259_v44  ;;  %v3124_v38 = vld [vmem:[%s11068_s21 + $0x2c] sm:$0xf]  ;;  %v2121_v44 = vrot.slane %v12168_v12, 4 }
 0x20d   : > { %v2303_v19 = vpop.permute.xlu1 %2302  ;;  %v2301_v57 = vpop.permute.xlu0 %2300  ;;  %v2314_v63 = vsel %vm15666_vm8, %v2295_v30, %v2313_v16  ;;  %v2271_v35 = vsel %vm15667_vm15, %v12240_v1, %v2270_v21  ;;  %v2221_v30 = vsel %vm262_vm0, %v2213_v56, %v2214_v9  ;;  %v2216_v21 = vsel %vm262_vm0, %v2210_v0, %v2211_v53 }
 0x20e   : > { %v2309_v20 = vrot.slane %v2303_v19, 4  ;;  %v2308_v18 = vrot.slane %v2301_v57, 4  ;;  %v2265_v1 = vsel %vm15667_vm15, %v12226_v23, %v2263_v40  ;;  %v15863_v0 = vrot.slane %v12192_v39, 4  ;;  %v12334_v23 = vld [vmem:[#allocation7 + $0x10] sm:$0xff] }
 0x20f   : > { %v15864_v40 = vrot.slane %v12194_v27, 4  ;;  %v2222_v29 = vsel %vm15670_vm12, %v12208_v15, %v2221_v30  ;;  %v2120_v53 = vrot.slane %v12170_v47, 4  ;;  %v2218_v12 = vsel %vm15670_vm12, %v12202_v34, %v2216_v21 }
 0x210   : > { %3137 = vrot.lane.b32.xlu1 %v12150_v28, %s15671_s9  ;;  %3135 = vrot.lane.b32.xlu0 %v3121_v49, %s15671_s9  ;;  %v2317_v19 = vsel %vm262_vm0, %v2308_v18, %v2309_v20  ;;  %v2315_v42 = vsel %vm262_vm0, %v2307_v46, %v2308_v18  ;;  %v2269_v46 = vsel %vm15667_vm15, %v12232_v11, %v2268_v45  ;;  %v2116_v18 = vrot.slane %v12156_v41, 4 }
 0x211   : > { %v2318_v59 = vsel %vm15666_vm8, %v2301_v57, %v2317_v19  ;;  %v12298_v10 = vpop.permute.xlu1 %2341  ;;  %v12300_v49 = vpop.permute.xlu0 %2339  ;;  %v2316_v52 = vsel %vm15666_vm8, %v2299_v25, %v2315_v42  ;;  %vm15674_vm8 = vcmask 596992   ;;  %v2267_v11 = vsel %vm15667_vm15, %v12224_v2, %v2266_v51 }
 0x212   : > { %v10137_v54 = vcombine.low %v2314_v63, %v2318_v59  ;;  %v10135_v20 = vcombine.low %v2312_v3, %v2316_v52  ;;  %v10136_v57 = vcombine.high %v2312_v3, %v2316_v52  ;;  %v10138_v16 = vcombine.high %v2314_v63, %v2318_v59 }
 0x213   : > { %v2165_v25 = vrot.slane %v12186_v33, 4  ;;  %v10132_v9 = vcombine.high %v2265_v1, %v2269_v46  ;;  %v10134_v32 = vcombine.high %v2267_v11, %v2271_v35  ;;  %v2176_v2 = vsel %vm262_vm0, %v15864_v40, %v15863_v0 }
 0x214   : > { %3141 = vrot.lane.b32.xlu1 %v3124_v38, %s15671_s9  ;;  %3139 = vrot.lane.b32.xlu0 %v12108_v37, %s15671_s9  ;;  %v2224_v33 = vsel %vm15670_vm12, %v12218_v43, %v2223_v13  ;;  %v15865_v39 = vmov %v15864_v40  ;;  %v10106_v43 = vcombine.high %v12334_v23, %v12334_v23  ;;  %vm15673_vm15 = vcmask 605184   ;;  %s15677_s9 = smov 42  }
 0x215   : > { %2743 = vmatprep.subr.bf16.mxu0 %v10136_v57  ;;  %2784 = vmatprep.subr.bf16.mxu1 %v10138_v16  ;;  %v2174_v45 = vsel %vm262_vm0, %v2166_v60, %v15865_v39  ;;  %v2119_v15 = vrot.slane %v12160_v31, 4  ;;  %v2220_v13 = vsel %vm15670_vm12, %v12200_v4, %v2219_v5  ;;  %v10133_v51 = vcombine.low %v2267_v11, %v2271_v35  ;;  %v3168_v35 = vld [vmem:[%s11068_s21 + $0x10] sm:$0xf] }
 0x216   : > { %v12320_v59 = vpop.permute.xlu1 %2345  ;;  %v12322_v56 = vpop.permute.xlu0 %2343  ;;  %2744 = vmatpush1.bf16.msra.mxu0 %v10135_v20  ;;  %2785 = vmatpush1.bf16.msra.mxu1 %v10137_v54  ;;  %v10131_v19 = vcombine.low %v2265_v1, %v2269_v46  ;;  %v2118_v34 = vrot.slane %v12162_v6, 4  ;;  %v15866_v38 = vrot.slane %v12176_v7, 4  ;;  %v10128_v4 = vcombine.high %v2218_v12, %v2222_v29  ;;  %v15872_v39 = vld [vmem:[#allocation14_spill] sm:$0xff] }
 0x217   : > { %2745 = vmatprep.subr.bf16.mxu0 %v10132_v9  ;;  %2786 = vmatprep.subr.bf16.mxu1 %v10134_v32  ;;  %v10130_v52 = vcombine.high %v2220_v13, %v2224_v33  ;;  %v2074_v54 = vrot.slane %v12145_v58, 4  ;;  %v15867_v20 = vrot.slane %v12154_v14, 4  ;;  %v2177_v46 = vsel %vm15688_vm13, %v12194_v27, %v2176_v2 }
 0x218   : > { %3180 = vrot.lane.b32.xlu1 %v12120_v48, %s15675_s11  ;;  %3178 = vrot.lane.b32.xlu0 %v12123_v61, %s15675_s11  ;;  %v2172_v42 = vsel %vm262_vm0, %v15866_v38, %v2165_v25  ;;  %v2175_v57 = vsel %vm15688_vm13, %v12184_v17, %v2174_v45  ;;  %v2073_v16 = vrot.slane %v12147_v36, 4  ;;  %v2129_v30 = vsel %vm262_vm0, %v2120_v53, %v2121_v44 }
 0x219   : > { %10151 = vmatprep.mubr.msk.bf16.mxu0 %vm974_vm7, %v10106_v43  ;;  %10152 = vmatprep.mubr.msk.bf16.mxu1 %vm974_vm7, %v10106_v43  ;;  %v2122_v6 = vsel %vm262_vm0, %v2116_v18, %v15867_v20  ;;  %v2171_v58 = vsel %vm15688_vm13, %v12178_v26, %v12262_v24  ;;  %v2127_v18 = vsel %vm262_vm0, %v2119_v15, %v2120_v53  ;;  %vm2029_vm12 = vcmask 613376  }
 0x21a   : > { %v12355_v3 = vpop.permute.xlu1 %2349  ;;  %v12357_v63 = vpop.permute.xlu0 %2347  ;;  %2746 = vmatpush1.bf16.msra.mxu0 %v10131_v19  ;;  %2787 = vmatpush1.bf16.msra.mxu1 %v10133_v51  ;;  %v2072_v27 = vrot.slane %v12139_v8, 4  ;;  %v2173_v60 = vsel %vm15688_vm13, %v12176_v7, %v2172_v42  ;;  %v10129_v17 = vcombine.low %v2220_v13, %v2224_v33  ;;  %v10127_v21 = vcombine.low %v2218_v12, %v2222_v29  ;;  %v3171_v7 = vld [vmem:[%s11068_s21 + $0x2c] sm:$0xf]  ;;  %v15871_v33 = vld [vmem:[#allocation15_spill] sm:$0xff] }
 0x21b   : > { %2747 = vmatprep.subr.bf16.mxu0 %v10128_v4  ;;  %2788 = vmatprep.subr.bf16.mxu1 %v10130_v52  ;;  %v2071_v26 = vrot.slane %v12141_v62, 4  ;;  %v15868_v24 = vmov %v15867_v20  ;;  %v10124_v5 = vcombine.high %v2171_v58, %v2175_v57  ;;  %v10126_v9 = vcombine.high %v2173_v60, %v2177_v46  ;;  %v15876_v52 = vld [vmem:[#allocation18_spill] sm:$0xff] }
 0x21c   : > { %3184 = vrot.lane.b32.xlu1 %v12150_v28, %s15675_s11  ;;  %3182 = vrot.lane.b32.xlu0 %v3168_v35, %s15675_s11  ;;  %v2125_v1 = vsel %vm262_vm0, %v15868_v24, %v2118_v34  ;;  %v2027_v32 = vrot.slane %v12127_v22, 4  ;;  %v15869_v44 = vrot.slane %v12133_v50, 4  ;;  %v15870_v0 = vrot.slane %v12135_v55, 4 }
 0x21d   : > { %v2130_v62 = vsel %vm15674_vm8, %v12170_v47, %v2129_v30  ;;  %v2128_v2 = vsel %vm15674_vm8, %v12160_v31, %v2127_v18  ;;  %v2026_v29 = vrot.slane %v15871_v33, 4  ;;  %v2082_v53 = vsel %vm262_vm0, %v2073_v16, %v2074_v54  ;;  %v15873_v31 = vld [vmem:[#allocation13_spill] sm:$0xff]  ;;  %v15878_v54 = vld [vmem:[#allocation16_spill] sm:$0xff] }
 0x21e   : > { %v12386_v11 = vpop.permute.xlu1 %2388  ;;  %v12388_v25 = vpop.permute.xlu0 %2386  ;;  %v2075_v40 = vsel %vm262_vm0, %v15870_v0, %v15869_v44  ;;  %2748 = vmatpush1.bf16.msra.mxu0 %v10127_v21  ;;  %2789 = vmatpush1.bf16.msra.mxu1 %v10129_v17  ;;  %v2124_v22 = vsel %vm15674_vm8, %v12156_v41, %v2122_v6  ;;  %v2080_v12 = vsel %vm262_vm0, %v2072_v27, %v2073_v16  ;;  %v2025_v45 = vrot.slane %v15872_v39, 4  ;;  %v15880_v16 = vld [vmem:[#allocation20_spill] sm:$0xff] }
 0x21f   : > { %2749 = vmatprep.subr.bf16.mxu0 %v10124_v5  ;;  %2790 = vmatprep.subr.bf16.mxu1 %v10126_v9  ;;  %v2126_v47 = vsel %vm15674_vm8, %v12154_v14, %v2125_v1  ;;  %v10125_v43 = vcombine.low %v2173_v60, %v2177_v46  ;;  %v10123_v15 = vcombine.low %v2171_v58, %v2175_v57  ;;  %v2024_v13 = vrot.slane %v15873_v31, 4  ;;  %v15875_v14 = vld [vmem:[#allocation19_spill] sm:$0xff]  ;;  %v15881_v60 = vld [vmem:[#allocation22_spill] sm:$0xff] }
 0x220   : > { %3188 = vrot.lane.b32.xlu1 %v3171_v7, %s15675_s11  ;;  %3186 = vrot.lane.b32.xlu0 %v12108_v37, %s15675_s11  ;;  %v15874_v41 = vmov %v15869_v44  ;;  %v10120_v38 = vcombine.high %v2124_v22, %v2128_v2  ;;  %v10122_v42 = vcombine.high %v2126_v47, %v2130_v62  ;;  %v1980_v4 = vrot.slane %v15875_v14, 4  ;;  %v15884_v44 = vld [vmem:[#allocation23_spill] sm:$0xff]  ;;  %s15679_s11 = smov 41  }
 0x221   : > { %v2078_v51 = vsel %vm262_vm0, %v15874_v41, %v2071_v26  ;;  %v15877_v35 = vrot.slane %v15876_v52, 4  ;;  %v15879_v20 = vrot.slane %v15878_v54, 4  ;;  %v2083_v46 = vsel %vm15673_vm15, %v12147_v36, %v2082_v53 }
 0x222   : > { %v12416_v19 = vpop.permute.xlu1 %2392  ;;  %v12418_v34 = vpop.permute.xlu0 %2390  ;;  %2750 = vmatpush1.bf16.msra.mxu0 %v10123_v15  ;;  %2791 = vmatpush1.bf16.msra.mxu1 %v10125_v43  ;;  %v2081_v57 = vsel %vm15673_vm15, %v12139_v8, %v2080_v12  ;;  %v1979_v30 = vrot.slane %v15880_v16, 4  ;;  %v2035_v58 = vsel %vm262_vm0, %v2026_v29, %v2027_v32  ;;  %v2077_v18 = vsel %vm15673_vm15, %v12135_v55, %v2075_v40  ;;  %v15882_v55 = vld [vmem:[#allocation17_spill] sm:$0xff] }
 0x223   : > { %v2028_v6 = vsel %vm262_vm0, %v15879_v20, %v15877_v35  ;;  %2751 = vmatprep.subr.bf16.mxu0 %v10120_v38  ;;  %2792 = vmatprep.subr.bf16.mxu1 %v10122_v42  ;;  %v2033_v27 = vsel %vm262_vm0, %v2025_v45, %v2026_v29  ;;  %v1978_v17 = vrot.slane %v15881_v60, 4  ;;  %v2079_v36 = vsel %vm15673_vm15, %v12133_v50, %v2078_v51  ;;  %v3215_v32 = vld [vmem:[%s11068_s21 + $0x10] sm:$0xf]  ;;  %v3218_v38 = vld [vmem:[%s11068_s21 + $0x2c] sm:$0xf] }
 0x224   : > { %v10121_v21 = vcombine.low %v2126_v47, %v2130_v62  ;;  %v10119_v26 = vcombine.low %v2124_v22, %v2128_v2  ;;  %3227 = vrot.lane.b32.xlu1 %v12120_v48, %s15677_s9  ;;  %3225 = vrot.lane.b32.xlu0 %v12123_v61, %s15677_s9  ;;  %v1977_v8 = vrot.slane %v15882_v55, 4  ;;  %v15883_v24 = vmov %v15877_v35  ;;  %v15886_v40 = vld [vmem:[#allocation21_spill] sm:$0xff] }
 0x225   : > { %v2031_v1 = vsel %vm262_vm0, %v15883_v24, %v2024_v13  ;;  %v10116_v50 = vcombine.high %v2077_v18, %v2081_v57  ;;  %v10118_v7 = vcombine.high %v2079_v36, %v2083_v46  ;;  %v15885_v0 = vrot.slane %v15884_v44, 4 }
 0x226   : > { %v12446_v5 = vpop.permute.xlu1 %2396  ;;  %v12448_v9 = vpop.permute.xlu0 %2394  ;;  %v15887_v62 = vrot.slane %v15886_v40, 4  ;;  %v2036_v29 = vsel %vm2029_vm12, %v15871_v33, %v2035_v58  ;;  %2752 = vmatpush1.bf16.msra.mxu0 %v10119_v26  ;;  %2793 = vmatpush1.bf16.msra.mxu1 %v10121_v21  ;;  %v2034_v53 = vsel %vm2029_vm12, %v15872_v39, %v2033_v27  ;;  %v1988_v22 = vsel %vm262_vm0, %v1979_v30, %v1980_v4 }
 0x227   : > { %v2030_v12 = vsel %vm2029_vm12, %v15878_v54, %v2028_v6  ;;  %2753 = vmatprep.subr.bf16.mxu0 %v10116_v50  ;;  %2794 = vmatprep.subr.bf16.mxu1 %v10118_v7  ;;  %v1986_v45 = vsel %vm262_vm0, %v1978_v17, %v1979_v30  ;;  %vm1982_vm15 = vcmask 621568   ;;  %v2032_v47 = vsel %vm2029_vm12, %v15876_v52, %v2031_v1 }
 0x228   : > { %v1981_v2 = vsel %vm262_vm0, %v15887_v62, %v15885_v0  ;;  %v10117_v33 = vcombine.low %v2079_v36, %v2083_v46  ;;  %v10115_v43 = vcombine.low %v2077_v18, %v2081_v57  ;;  %3231 = vrot.lane.b32.xlu1 %v12150_v28, %s15677_s9  ;;  %3229 = vrot.lane.b32.xlu0 %v3215_v32, %s15677_s9  ;;  %vm15703_vm12 = vcmask 547840  }
 0x229   : > { %v15888_v39 = vmov %v15885_v0  ;;  %v10112_v41 = vcombine.high %v2030_v12, %v2034_v53  ;;  %v10114_v51 = vcombine.high %v2032_v47, %v2036_v29  ;;  %v1989_v42 = vsel %vm1982_vm15, %v15880_v16, %v1988_v22 }
 0x22a   : > { %v1984_v15 = vsel %vm262_vm0, %v15888_v39, %v1977_v8  ;;  %v12472_v31 = vpop.permute.xlu1 %2435  ;;  %v12474_v13 = vpop.permute.xlu0 %2433  ;;  %2754 = vmatpush1.bf16.msra.mxu0 %v10115_v43  ;;  %2795 = vmatpush1.bf16.msra.mxu1 %v10117_v33  ;;  %v1987_v14 = vsel %vm1982_vm15, %v15881_v60, %v1986_v45  ;;  %v1983_v4 = vsel %vm1982_vm15, %v15886_v40, %v1981_v2  ;;  %vm15687_vm8 = vcmask 539648  }
 0x22b   : > { %2755 = vmatprep.subr.bf16.mxu0 %v10112_v41  ;;  %2796 = vmatprep.subr.bf16.mxu1 %v10114_v51  ;;  %v1985_v52 = vsel %vm1982_vm15, %v15884_v44, %v1984_v15  ;;  %v10113_v35 = vcombine.low %v2032_v47, %v2036_v29  ;;  %v10111_v54 = vcombine.low %v2030_v12, %v2034_v53  ;;  %v2446_v20 = vrot.slane %v12472_v31, 4  ;;  %v3262_v44 = vld [vmem:[%s11068_s21 + $0x10] sm:$0xf]  ;;  %v3265_v41 = vld [vmem:[%s11068_s21 + $0x2c] sm:$0xf] }
 0x22c   : > { %3235 = vrot.lane.b32.xlu1 %v3218_v38, %s15677_s9  ;;  %3233 = vrot.lane.b32.xlu0 %v12108_v37, %s15677_s9  ;;  %v2445_v6 = vrot.slane %v12474_v13, 4  ;;  %v10108_v16 = vcombine.high %v1983_v4, %v1987_v14  ;;  %v10110_v30 = vcombine.high %v1985_v52, %v1989_v42  ;;  %v10109_v58 = vcombine.low %v1985_v52, %v1989_v42  ;;  %s15681_s9 = smov 40  }
 0x22d   : > { %v2399_v27 = vrot.slane %v12386_v11, 4  ;;  %v2398_v60 = vrot.slane %v12388_v25, 4  ;;  %v2403_v17 = vrot.slane %v12446_v5, 4  ;;  %v2402_v36 = vrot.slane %v12448_v9, 4 }
 0x22e   : > { %v2440_v46 = vpop.permute.xlu1 %2439  ;;  %v2438_v57 = vpop.permute.xlu0 %2437  ;;  %2756 = vmatpush1.bf16.msra.mxu0 %v10111_v54  ;;  %2797 = vmatpush1.bf16.msra.mxu1 %v10113_v35  ;;  %v2352_v21 = vrot.slane %v12298_v10, 4  ;;  %v2351_v26 = vrot.slane %v12300_v49, 4  ;;  %v2400_v55 = vrot.slane %v12418_v34, 4  ;;  %v10107_v8 = vcombine.low %v1983_v4, %v1987_v14 }
 0x22f   : > { %v2447_v18 = vrot.slane %v2438_v57, 4  ;;  %2757 = vmatprep.subr.bf16.mxu0 %v10108_v16  ;;  %2798 = vmatprep.subr.bf16.mxu1 %v10110_v30  ;;  %v2354_v24 = vrot.slane %v12320_v59, 4  ;;  %v2356_v1 = vrot.slane %v12355_v3, 4  ;;  %v2401_v5 = vrot.slane %v12416_v19, 4 }
 0x230   : > { %3274 = vrot.lane.b32.xlu1 %v12120_v48, %s15679_s11  ;;  %3272 = vrot.lane.b32.xlu0 %v12123_v61, %s15679_s11  ;;  %v2451_v50 = vsel %vm262_vm0, %v2445_v6, %v2446_v20  ;;  %v2448_v34 = vrot.slane %v2440_v46, 4  ;;  %v2355_v2 = vrot.slane %v12357_v63, 4  ;;  %v2404_v29 = vsel %vm262_vm0, %v2398_v60, %v2399_v27 }
 0x231   : > { %v2454_v0 = vsel %vm262_vm0, %v2446_v20, %v2447_v18  ;;  %v2411_v3 = vsel %vm262_vm0, %v2402_v36, %v2403_v17  ;;  %v2409_v53 = vsel %vm262_vm0, %v2401_v5, %v2402_v36  ;;  %v2353_v22 = vrot.slane %v12322_v56, 4  ;;  %v3309_v17 = vld [vmem:[%s11068_s21 + $0x10] sm:$0xf] }
 0x232   : > { %v2444_v7 = vpop.permute.xlu1 %2443  ;;  %v2442_v32 = vpop.permute.xlu0 %2441  ;;  %2758 = vmatpush1.bf16.msra.mxu0 %v10107_v8  ;;  %2799 = vmatpush1.bf16.msra.mxu1 %v10109_v58  ;;  %v2407_v12 = vsel %vm262_vm0, %v2399_v27, %v2400_v55  ;;  %v2453_v33 = vsel %vm15687_vm8, %v12474_v13, %v2451_v50  ;;  %v2455_v43 = vsel %vm15687_vm8, %v12472_v31, %v2454_v0  ;;  %vm15691_vm15 = vcmask 556032   ;;  %v3312_v55 = vld [vmem:[%s11068_s21 + $0x2c] sm:$0xf]  ;;  %v3725_v50 = vld [vmem:[%s11068_s21 + $0x10] sm:$0xf] }
 0x233   : > { %v2450_v40 = vrot.slane %v2444_v7, 4  ;;  %v2449_v62 = vrot.slane %v2442_v32, 4  ;;  %v2412_v38 = vsel %vm15703_vm12, %v12448_v9, %v2411_v3  ;;  %v2410_v13 = vsel %vm15703_vm12, %v12416_v19, %v2409_v53  ;;  %v3775_v3 = vld [vmem:[%s11068_s21 + $0x2c] sm:$0xf]  ;;  %v12614_v53 = vld [vmem:[%s11068_s21 + $0x24] sm:$0xff] }
 0x234   : > { %3278 = vrot.lane.b32.xlu1 %v12150_v28, %s15679_s11  ;;  %3276 = vrot.lane.b32.xlu0 %v3262_v44, %s15679_s11  ;;  %v2364_v4 = vsel %vm262_vm0, %v2355_v2, %v2356_v1  ;;  %v2362_v35 = vsel %vm262_vm0, %v2354_v24, %v2355_v2  ;;  %v2357_v54 = vsel %vm262_vm0, %v2351_v26, %v2352_v21  ;;  %v3728_v44 = vld [vmem:[%s11068_s21 + $0x2c] sm:$0xf]  ;;  %v3772_v2 = vld [vmem:[%s11068_s21 + $0x10] sm:$0xf]  ;;  %vm15719_vm13 = vcmask 359424  }
 0x235   : > { %v2458_v45 = vsel %vm262_vm0, %v2449_v62, %v2450_v40  ;;  %v2456_v47 = vsel %vm262_vm0, %v2448_v34, %v2449_v62  ;;  %v2406_v20 = vsel %vm15703_vm12, %v12388_v25, %v2404_v29  ;;  %v2408_v9 = vsel %vm15703_vm12, %v12386_v11, %v2407_v12  ;;  %v12625_v12 = vld [vmem:[%s11068_s21] sm:$0xff] }
 0x236   : > { %v2459_v39 = vsel %vm15687_vm8, %v2442_v32, %v2458_v45  ;;  %v12523_v56 = vpop.permute.xlu1 %2851  ;;  %v12525_v15 = vpop.permute.xlu0 %2849  ;;  %v2457_v51 = vsel %vm15687_vm8, %v2440_v46, %v2456_v47  ;;  %v2360_v19 = vsel %vm262_vm0, %v2352_v21, %v2353_v22  ;;  %v10144_v57 = vcombine.high %v2406_v20, %v2410_v13  ;;  %v12622_v22 = vld [vmem:[%s11068_s21 + $0x8] sm:$0xff] }
 0x237   : > { %15889 = vst [vmem:[#allocation15_spill] sm:$0xff] %v12523_v56  ;;  %15890 = vst [vmem:[#allocation14_spill] sm:$0xff] %v12525_v15  ;;  %v10149_v42 = vcombine.low %v2455_v43, %v2459_v39  ;;  %v10147_v14 = vcombine.low %v2453_v33, %v2457_v51  ;;  %v10148_v31 = vcombine.high %v2453_v33, %v2457_v51  ;;  %v3819_v33 = vld [vmem:[%s11068_s21 + $0x10] sm:$0xf]  ;;  %vm15706_vm8 = vcmask 351232  }
 0x238   : > { %v10150_v52 = vcombine.high %v2455_v43, %v2459_v39  ;;  %3282 = vrot.lane.b32.xlu1 %v3265_v41, %s15679_s11  ;;  %3280 = vrot.lane.b32.xlu0 %v12108_v37, %s15679_s11  ;;  %v10146_v16 = vcombine.high %v2408_v9, %v2412_v38  ;;  %v2365_v25 = vsel %vm15691_vm15, %v12357_v63, %v2364_v4  ;;  %s10910_s11 = smov 24   ;;  %v3822_v41 = vld [vmem:[%s11068_s21 + $0x2c] sm:$0xf]  ;;  %vm15713_vm12 = vcmask 375808  }
 0x239   : > { %2769 = vmatprep.subr.bf16.mxu0 %v10148_v31  ;;  %v2363_v11 = vsel %vm15691_vm15, %v12320_v59, %v2362_v35  ;;  %v2359_v30 = vsel %vm15691_vm15, %v12300_v49, %v2357_v54  ;;  %v2361_v58 = vsel %vm15691_vm15, %v12298_v10, %v2360_v19  ;;  %v10145_v18 = vcombine.low %v2408_v9, %v2412_v38  ;;  %v3913_v19 = vld [vmem:[%s11068_s21 + $0x10] sm:$0xf] }
 0x23a   : > { %2810 = vmatprep.subr.bf16.mxu1 %v10150_v52  ;;  %v12544_v6 = vpop.permute.xlu1 %2855  ;;  %v12546_v46 = vpop.permute.xlu0 %2853  ;;  %2770 = vmatpush2.bf16.msra.mxu0 %v10147_v14  ;;  %v10143_v27 = vcombine.low %v2406_v20, %v2410_v13  ;;  %v10140_v49 = vcombine.high %v2359_v30, %v2363_v11  ;;  %v10142_v60 = vcombine.high %v2361_v58, %v2365_v25  ;;  %v12660_v14 = vld [vmem:[%s11068_s21 + $0x1c] sm:$0xff]  ;;  %v3866_v13 = vld [vmem:[%s11068_s21 + $0x10] sm:$0xf]  ;;  %v3869_v52 = vld [vmem:[%s11068_s21 + $0x2c] sm:$0xf]  ;;  %vm15709_vm15 = vcmask 367616  }
 0x23b   : > { %15891 = vst [vmem:[#allocation13_spill] sm:$0xff] %v12544_v6  ;;  %15892 = vst [vmem:[#allocation19_spill] sm:$0xff] %v12546_v46  ;;  %2811 = vmatpush2.bf16.msra.mxu1 %v10149_v42  ;;  %2771 = vmatprep.subr.bf16.mxu0 %v10144_v57  ;;  %v10141_v10 = vcombine.low %v2361_v58, %v2365_v25  ;;  %v10139_v36 = vcombine.low %v2359_v30, %v2363_v11  ;;  %v3916_v25 = vld [vmem:[%s11068_s21 + $0x2c] sm:$0xf] }
 0x23c   : > { %2812 = vmatprep.subr.bf16.mxu1 %v10146_v16  ;;  %3321 = vrot.lane.b32.xlu1 %v12120_v48, %s15681_s9  ;;  %v10105_v8 = vcombine.low %v12334_v23, %v12334_v23 }
 0x23d   : > { %3319 = vrot.lane.b32.xlu0 %v12123_v61, %s15681_s9 }
 0x23e   : > { %v12560_v63 = vpop.permute.xlu1 %2859  ;;  %v12562_v59 = vpop.permute.xlu0 %2857  ;;  %2772 = vmatpush2.bf16.msra.mxu0 %v10143_v27  ;;  %v3960_v27 = vld [vmem:[%s11068_s21 + $0x10] sm:$0xf] }
 0x23f   : > { %15893 = vst [vmem:[#allocation18_spill] sm:$0xff] %v12560_v63  ;;  %15894 = vst [vmem:[#allocation16_spill] sm:$0xff] %v12562_v59  ;;  %2813 = vmatpush2.bf16.msra.mxu1 %v10145_v18  ;;  %2773 = vmatprep.subr.bf16.mxu0 %v10140_v49  ;;  %v3963_v49 = vld [vmem:[%s11068_s21 + $0x2c] sm:$0xf] }
 0x240   : > { %2814 = vmatprep.subr.bf16.mxu1 %v10142_v60  ;;  %3325 = vrot.lane.b32.xlu1 %v12150_v28, %s15681_s9 }
 0x241   : > { %3323 = vrot.lane.b32.xlu0 %v3309_v17, %s15681_s9 }
 0x242   : > { %v12568_v21 = vpop.permute.xlu1 %2898  ;;  %v12570_v26 = vpop.permute.xlu0 %2896  ;;  %2774 = vmatpush2.bf16.msra.mxu0 %v10139_v36 }
 0x243   : > { %15895 = vst [vmem:[#allocation20_spill] sm:$0xff] %v12568_v21  ;;  %15896 = vst [vmem:[#allocation22_spill] sm:$0xff] %v12570_v26  ;;  %2815 = vmatpush2.bf16.msra.mxu1 %v10141_v10 }
 0x244   : > { %3329 = vrot.lane.b32.xlu1 %v3312_v55, %s15681_s9 }
 0x245   : > { %3327 = vrot.lane.b32.xlu0 %v12108_v37, %s15681_s9  ;;  %2776 = vmatmul.mubr.bf16.vlgmr.msra.gmra.mxu0 %v10105_v8  ;;  %s10911_s9 = smov 23  }
 0x246   : > { %v12578_v24 = vpop.permute.xlu1 %2902  ;;  %v12580_v1 = vpop.permute.xlu0 %2900  ;;  %2817 = vmatmul.mubr.bf16.vlgmr.msra.gmra.mxu1 %v10105_v8 }
 0x247   : > { %15897 = vst [vmem:[#allocation17_spill] sm:$0xff] %v12578_v24  ;;  %15898 = vst [vmem:[#allocation23_spill] sm:$0xff] %v12580_v1 }
 0x248   : > { %3737 = vrot.lane.b32.xlu1 %v12120_v48, %s10910_s11 }
 0x249   : > { %3735 = vrot.lane.b32.xlu0 %v12123_v61, %s10910_s11 }
 0x24a   : > { %v12584_v23 = vpop.permute.xlu1 %2906  ;;  %v12586_v5 = vpop.permute.xlu0 %2904 }
 0x24b   : > { %15899 = vst [vmem:[#allocation21_spill] sm:$0xff] %v12586_v5 }
 0x24c   : > { %3741 = vrot.lane.b32.xlu1 %v12150_v28, %s10910_s11 }
 0x24d   : > { %3739 = vrot.lane.b32.xlu0 %v3725_v50, %s10910_s11 }
 0x24e   : > { %v12590_v7 = vpop.permute.xlu1 %2945  ;;  %v12592_v32 = vpop.permute.xlu0 %2943 }
 0x250   : > { %3745 = vrot.lane.b32.xlu1 %v3728_v44, %s10910_s11 }
 0x251   : > { %3743 = vrot.lane.b32.xlu0 %v12108_v37, %s10910_s11  ;;  %s15683_s11 = smov 22  }
 0x252   : > { %v12596_v34 = vpop.permute.xlu1 %2949  ;;  %v12598_v0 = vpop.permute.xlu0 %2947 }
 0x254   : > { %3784 = vrot.lane.b32.xlu1 %v12120_v48, %s10911_s9 }
 0x255   : > { %3782 = vrot.lane.b32.xlu0 %v12123_v61, %s10911_s9 }
 0x256   : > { %v12602_v40 = vpop.permute.xlu1 %2953  ;;  %v12604_v62 = vpop.permute.xlu0 %2951 }
 0x258   : > { %3788 = vrot.lane.b32.xlu1 %v12150_v28, %s10911_s9 }
 0x259   : > { %3786 = vrot.lane.b32.xlu0 %v3772_v2, %s10911_s9 }
 0x25a   : > { %v12608_v37 = vpop.permute.xlu1 %2992  ;;  %v12610_v29 = vpop.permute.xlu0 %2990 }
 0x25c   : > { %3792 = vrot.lane.b32.xlu1 %v3775_v3, %s10911_s9 }
 0x25d   : > { %3790 = vrot.lane.b32.xlu0 %v12614_v53, %s10911_s9  ;;  %s15685_s9 = smov 21  }
 0x25e   : > { %v12617_v48 = vpop.permute.xlu1 %2996  ;;  %v12619_v61 = vpop.permute.xlu0 %2994 }
 0x260   : > { %3831 = vrot.lane.b32.xlu1 %v12622_v22, %s15683_s11 }
 0x261   : > { %3829 = vrot.lane.b32.xlu0 %v12625_v12, %s15683_s11 }
 0x262   : > { %v12631_v45 = vpop.permute.xlu1 %3000  ;;  %v12633_v47 = vpop.permute.xlu0 %2998 }
 0x264   : > { %3835 = vrot.lane.b32.xlu1 %v12150_v28, %s15683_s11 }
 0x265   : > { %3833 = vrot.lane.b32.xlu0 %v3819_v33, %s15683_s11  ;;  %v4007_v33 = vld [vmem:[%s11068_s21 + $0x10] sm:$0xf] }
 0x266   : > { %v12639_v43 = vpop.permute.xlu1 %3039  ;;  %v12641_v39 = vpop.permute.xlu0 %3037 }
 0x267   : > { %v15692_v10 = vrot.slane %v12639_v43, 4  ;;  %v3049_v36 = vrot.slane %v12641_v39, 4 }
 0x268   : > { %3839 = vrot.lane.b32.xlu1 %v3822_v41, %s15683_s11 }
 0x269   : > { %3837 = vrot.lane.b32.xlu0 %v12614_v53, %s15683_s11  ;;  %s15689_s11 = smov 20  }
 0x26a   : > { %v12647_v51 = vpop.permute.xlu1 %3043  ;;  %v12649_v38 = vpop.permute.xlu0 %3041 }
 0x26c   : > { %3878 = vrot.lane.b32.xlu1 %v12622_v22, %s15685_s9 }
 0x26d   : > { %3876 = vrot.lane.b32.xlu0 %v12625_v12, %s15685_s9 }
 0x26e   : > { %v12655_v28 = vpop.permute.xlu1 %3047  ;;  %v12657_v42 = vpop.permute.xlu0 %3045 }
 0x270   : > { %3882 = vrot.lane.b32.xlu1 %v12660_v14, %s15685_s9 }
 0x271   : > { %3880 = vrot.lane.b32.xlu0 %v3866_v13, %s15685_s9 }
 0x272   : > { %v12666_v4 = vpop.permute.xlu1 %3086  ;;  %v12668_v31 = vpop.permute.xlu0 %3084 }
 0x274   : > { %3886 = vrot.lane.b32.xlu1 %v3869_v52, %s15685_s9 }
 0x275   : > { %3884 = vrot.lane.b32.xlu0 %v12614_v53, %s15685_s9  ;;  %s15707_s9 = smov 19  }
 0x276   : > { %v12674_v35 = vpop.permute.xlu1 %3090  ;;  %v12676_v54 = vpop.permute.xlu0 %3088 }
 0x277   : > { %v3098_v21 = vrot.slane %v12676_v54, 4 }
 0x278   : > { %3925 = vrot.lane.b32.xlu1 %v12622_v22, %s15689_s11 }
 0x279   : > { %3923 = vrot.lane.b32.xlu0 %v12625_v12, %s15689_s11 }
 0x27a   : > { %v12682_v20 = vpop.permute.xlu1 %3094  ;;  %v12684_v9 = vpop.permute.xlu0 %3092 }
 0x27b   : > { %v3101_v55 = vrot.slane %v12682_v20, 4  ;;  %v3100_v44 = vrot.slane %v12684_v9, 4 }
 0x27c   : > { %3929 = vrot.lane.b32.xlu1 %v12660_v14, %s15689_s11 }
 0x27d   : > { %3927 = vrot.lane.b32.xlu0 %v3913_v19, %s15689_s11 }
 0x27e   : > { %v12690_v57 = vpop.permute.xlu1 %3133  ;;  %v12692_v16 = vpop.permute.xlu0 %3131 }
 0x27f   : > { %v3144_v2 = vrot.slane %v12690_v57, 4 }
 0x280   : > { %3933 = vrot.lane.b32.xlu1 %v3916_v25, %s15689_s11  ;;  %v12728_v25 = vsel %vm262_vm0, %v3049_v36, %v15692_v10  ;;  %v3097_v36 = vrot.slane %v12666_v4, 4  ;;  %v3099_v10 = vrot.slane %v12674_v35, 4 }
 0x281   : > { %3931 = vrot.lane.b32.xlu0 %v12614_v53, %s15689_s11  ;;  %s15710_s11 = smov 18  }
 0x282   : > { %v12698_v11 = vpop.permute.xlu1 %3137  ;;  %v12700_v30 = vpop.permute.xlu0 %3135 }
 0x283   : > { %v3145_v20 = vrot.slane %v12700_v30, 4  ;;  %v3109_v30 = vsel %vm262_vm0, %v3100_v44, %v3101_v55 }
 0x284   : > { %3972 = vrot.lane.b32.xlu1 %v12622_v22, %s15707_s9 }
 0x285   : > { %3970 = vrot.lane.b32.xlu0 %v12625_v12, %s15707_s9 }
 0x286   : > { %v3142_v58 = vpop.permute.xlu1 %3141  ;;  %v12706_v18 = vpop.permute.xlu0 %3139 }
 0x287   : > { %v3148_v50 = vrot.slane %v3142_v58, 4  ;;  %v3147_v3 = vrot.slane %v12706_v18, 4  ;;  %v3096_v58 = vrot.slane %v12668_v31, 4 }
 0x288   : > { %3976 = vrot.lane.b32.xlu1 %v12660_v14, %s15707_s9 }
 0x289   : > { %3974 = vrot.lane.b32.xlu0 %v3960_v27, %s15707_s9  ;;  %v3156_v63 = vsel %vm262_vm0, %v3147_v3, %v3148_v50 }
 0x28a   : > { %v3181_v60 = vpop.permute.xlu1 %3180  ;;  %v3179_v17 = vpop.permute.xlu0 %3178 }
 0x28b   : > { %v3191_v41 = vrot.slane %v3181_v60, 4  ;;  %v3190_v13 = vrot.slane %v3179_v17, 4 }
 0x28c   : > { %3980 = vrot.lane.b32.xlu1 %v3963_v49, %s15707_s9  ;;  %v3146_v49 = vrot.slane %v12698_v11, 4 }
 0x28d   : > { %3978 = vrot.lane.b32.xlu0 %v12614_v53, %s15707_s9  ;;  %v3196_v27 = vsel %vm262_vm0, %v3190_v13, %v3191_v41  ;;  %s15714_s9 = smov 17  }
 0x28e   : > { %v3185_v52 = vpop.permute.xlu1 %3184  ;;  %v3183_v19 = vpop.permute.xlu0 %3182  ;;  %v3154_v13 = vsel %vm262_vm0, %v3146_v49, %v3147_v3  ;;  %v3198_v55 = vsel %vm15706_vm8, %v3179_v17, %v3196_v27  ;;  %v3052_v17 = vrot.slane %v12647_v51, 4  ;;  %v3105_v27 = vsel %vm262_vm0, %v3097_v36, %v3098_v21 }
 0x28f   : > { %v3192_v8 = vrot.slane %v3183_v19, 4  ;;  %v3143_v19 = vrot.slane %v12692_v16, 4  ;;  %v3193_v46 = vrot.slane %v3185_v52, 4 }
 0x290   : > { %4019 = vrot.lane.b32.xlu1 %v12622_v22, %s15710_s11 }
 0x291   : > { %4017 = vrot.lane.b32.xlu0 %v12625_v12, %s15710_s11  ;;  %v3199_v6 = vsel %vm262_vm0, %v3191_v41, %v3192_v8  ;;  %v3149_v1 = vsel %vm262_vm0, %v3143_v19, %v3144_v2  ;;  %v3152_v8 = vsel %vm262_vm0, %v3144_v2, %v3145_v20  ;;  %v4010_v41 = vld [vmem:[%s11068_s21 + $0x2c] sm:$0xf]  ;;  %v3157_v2 = vsel %vm15719_vm13, %v12706_v18, %v3156_v63 }
 0x292   : > { %v3189_v15 = vpop.permute.xlu1 %3188  ;;  %v3187_v56 = vpop.permute.xlu0 %3186  ;;  %v3200_v50 = vsel %vm15706_vm8, %v3181_v60, %v3199_v6  ;;  %v3107_v60 = vsel %vm262_vm0, %v3099_v10, %v3100_v44  ;;  %v3102_v63 = vsel %vm262_vm0, %v3096_v58, %v3097_v36  ;;  %v3151_v18 = vsel %vm15719_vm13, %v12692_v16, %v3149_v1  ;;  %v12800_v16 = vld [vmem:[#allocation7 + $0x18] sm:$0xff] }
 0x293   : > { %v3195_v59 = vrot.slane %v3189_v15, 4  ;;  %v3194_v26 = vrot.slane %v3187_v56, 4  ;;  %v3007_v20 = vrot.slane %v12631_v45, 4  ;;  %v15900_v58 = vrot.slane %v12655_v28, 4 }
 0x294   : > { %4023 = vrot.lane.b32.xlu1 %v12660_v14, %s15710_s11  ;;  %v15901_v1 = vrot.slane %v12657_v42, 4  ;;  %v3108_v21 = vsel %vm15709_vm15, %v12674_v35, %v3107_v60  ;;  %v3006_v36 = vrot.slane %v12633_v47, 4  ;;  %v3104_v45 = vsel %vm15709_vm15, %v12668_v31, %v3102_v63 }
 0x295   : > { %4021 = vrot.lane.b32.xlu0 %v4007_v33, %s15710_s11  ;;  %v3203_v15 = vsel %vm262_vm0, %v3194_v26, %v3195_v59  ;;  %v3201_v54 = vsel %vm262_vm0, %v3193_v46, %v3194_v26  ;;  %v3155_v46 = vsel %vm15719_vm13, %v12698_v11, %v3154_v13  ;;  %v3002_v26 = vrot.slane %v12610_v29, 4 }
 0x296   : > { %v3204_v24 = vsel %vm15706_vm8, %v3187_v56, %v3203_v15  ;;  %v12764_v5 = vpop.permute.xlu1 %3227  ;;  %v12766_v33 = vpop.permute.xlu0 %3225  ;;  %v3202_v3 = vsel %vm15706_vm8, %v3185_v52, %v3201_v54  ;;  %vm15712_vm8 = vcmask 384000   ;;  %v3153_v11 = vsel %vm15719_vm13, %v12690_v57, %v3152_v8 }
 0x297   : > { %v10185_v49 = vcombine.low %v3200_v50, %v3204_v24  ;;  %v10183_v59 = vcombine.low %v3198_v55, %v3202_v3  ;;  %v10184_v56 = vcombine.high %v3198_v55, %v3202_v3  ;;  %v10186_v6 = vcombine.high %v3200_v50, %v3204_v24 }
 0x298   : > { %4027 = vrot.lane.b32.xlu1 %v4010_v41, %s15710_s11  ;;  %v3051_v52 = vrot.slane %v12649_v38, 4  ;;  %v10180_v44 = vcombine.high %v3151_v18, %v3155_v46  ;;  %v10182_v19 = vcombine.high %v3153_v11, %v3157_v2  ;;  %v3062_v57 = vsel %vm262_vm0, %v15901_v1, %v15900_v58 }
 0x299   : > { %4025 = vrot.lane.b32.xlu0 %v12614_v53, %s15710_s11  ;;  %3629 = vmatprep.subr.bf16.mxu0 %v10184_v56  ;;  %v3110_v38 = vsel %vm15709_vm15, %v12684_v9, %v3109_v30  ;;  %v15902_v28 = vmov %v15901_v1  ;;  %v10154_v9 = vcombine.high %v12800_v16, %v12800_v16  ;;  %v3005_v30 = vrot.slane %v12617_v48, 4  ;;  %s15716_s11 = smov 16  }
 0x29a   : > { %3670 = vmatprep.subr.bf16.mxu1 %v10186_v6  ;;  %v12786_v24 = vpop.permute.xlu1 %3231  ;;  %v12788_v10 = vpop.permute.xlu0 %3229  ;;  %3630 = vmatpush1.bf16.msra.mxu0 %v10183_v59  ;;  %v3060_v13 = vsel %vm262_vm0, %v3052_v17, %v15902_v28  ;;  %v3106_v35 = vsel %vm15709_vm15, %v12666_v4, %v3105_v27  ;;  %v10181_v8 = vcombine.low %v3153_v11, %v3157_v2  ;;  %v3004_v31 = vrot.slane %v12619_v61, 4  ;;  %v4054_v2 = vld [vmem:[%s11068_s21 + $0x10] sm:$0xf] }
 0x29b   : > { %3671 = vmatpush1.bf16.msra.mxu1 %v10185_v49  ;;  %3631 = vmatprep.subr.bf16.mxu0 %v10180_v44  ;;  %v10179_v15 = vcombine.low %v3151_v18, %v3155_v46  ;;  %v15903_v41 = vrot.slane %v12639_v43, 4  ;;  %v10176_v4 = vcombine.high %v3104_v45, %v3108_v21  ;;  %v10178_v3 = vcombine.high %v3106_v35, %v3110_v38  ;;  %v15909_v28 = vld [vmem:[#allocation17_spill] sm:$0xff] }
 0x29c   : > { %3672 = vmatprep.subr.bf16.mxu1 %v10182_v19  ;;  %4066 = vrot.lane.b32.xlu1 %v12622_v22, %s15714_s9  ;;  %v2960_v49 = vrot.slane %v12602_v40, 4  ;;  %v15904_v59 = vrot.slane %v12608_v37, 4  ;;  %v3063_v46 = vsel %vm15713_vm12, %v12657_v42, %v3062_v57  ;;  %v3061_v56 = vsel %vm15713_vm12, %v12647_v51, %v3060_v13 }
 0x29d   : > { %4064 = vrot.lane.b32.xlu0 %v12625_v12, %s15714_s9  ;;  %v3058_v54 = vsel %vm262_vm0, %v15903_v41, %v3051_v52  ;;  %10199 = vmatprep.mubr.msk.bf16.mxu0 %vm974_vm7, %v10154_v9  ;;  %v2959_v6 = vrot.slane %v12604_v62, 4  ;;  %v3015_v60 = vsel %vm262_vm0, %v3006_v36, %v3007_v20  ;;  %v3057_v40 = vsel %vm15713_vm12, %v12641_v39, %v12728_v25 }
 0x29e   : > { %v12821_v55 = vpop.permute.xlu1 %3235  ;;  %v12823_v50 = vpop.permute.xlu0 %3233  ;;  %10200 = vmatprep.mubr.msk.bf16.mxu1 %vm974_vm7, %v10154_v9  ;;  %v3008_v61 = vsel %vm262_vm0, %v3002_v26, %v15904_v59  ;;  %3632 = vmatpush1.bf16.msra.mxu0 %v10179_v15  ;;  %v3013_v26 = vsel %vm262_vm0, %v3005_v30, %v3006_v36  ;;  %vm2915_vm15 = vcmask 400384   ;;  %v2958_v42 = vrot.slane %v12596_v34, 4 }
 0x29f   : > { %3673 = vmatpush1.bf16.msra.mxu1 %v10181_v8  ;;  %3633 = vmatprep.subr.bf16.mxu0 %v10176_v4  ;;  %v3059_v17 = vsel %vm15713_vm12, %v12639_v43, %v3058_v54  ;;  %v10177_v51 = vcombine.low %v3106_v35, %v3110_v38  ;;  %v10175_v63 = vcombine.low %v3104_v45, %v3108_v21  ;;  %v2957_v39 = vrot.slane %v12598_v0, 4  ;;  %v4057_v43 = vld [vmem:[%s11068_s21 + $0x2c] sm:$0xf] }
 0x2a0   : > { %3674 = vmatprep.subr.bf16.mxu1 %v10178_v3  ;;  %4070 = vrot.lane.b32.xlu1 %v12660_v14, %s15714_s9  ;;  %v15905_v25 = vmov %v15904_v59  ;;  %v10172_v27 = vcombine.high %v3057_v40, %v3061_v56  ;;  %v10174_v44 = vcombine.high %v3059_v17, %v3063_v46  ;;  %v2913_v19 = vrot.slane %v12584_v23, 4  ;;  %v15908_v38 = vld [vmem:[#allocation21_spill] sm:$0xff]  ;;  %v15913_v3 = vld [vmem:[#allocation20_spill] sm:$0xff] }
 0x2a1   : > { %4068 = vrot.lane.b32.xlu0 %v4054_v2, %s15714_s9  ;;  %v3011_v18 = vsel %vm262_vm0, %v15905_v25, %v3004_v31  ;;  %v15906_v20 = vrot.slane %v12590_v7, 4  ;;  %v15907_v58 = vrot.slane %v12592_v32, 4  ;;  %v3016_v0 = vsel %vm15712_vm8, %v12633_v47, %v3015_v60 }
 0x2a2   : > { %v12852_v11 = vpop.permute.xlu1 %3274  ;;  %v12854_v52 = vpop.permute.xlu0 %3272  ;;  %3634 = vmatpush1.bf16.msra.mxu0 %v10175_v63  ;;  %v3014_v57 = vsel %vm15712_vm8, %v12617_v48, %v3013_v26  ;;  %v2912_v21 = vrot.slane %v15908_v38, 4  ;;  %v2968_v36 = vsel %vm262_vm0, %v2959_v6, %v2960_v49  ;;  %v3010_v23 = vsel %vm15712_vm8, %v12610_v29, %v3008_v61  ;;  %v15910_v48 = vld [vmem:[#allocation23_spill] sm:$0xff]  ;;  %v15915_v49 = vld [vmem:[#allocation22_spill] sm:$0xff] }
 0x2a3   : > { %v2961_v1 = vsel %vm262_vm0, %v15907_v58, %v15906_v20  ;;  %3675 = vmatpush1.bf16.msra.mxu1 %v10177_v51  ;;  %3635 = vmatprep.subr.bf16.mxu0 %v10172_v27  ;;  %v2966_v45 = vsel %vm262_vm0, %v2958_v42, %v2959_v6  ;;  %v2911_v13 = vrot.slane %v15909_v28, 4  ;;  %v3012_v47 = vsel %vm15712_vm8, %v12608_v37, %v3011_v18  ;;  %v15912_v37 = vld [vmem:[#allocation18_spill] sm:$0xff]  ;;  %v15917_v6 = vld [vmem:[#allocation16_spill] sm:$0xff] }
 0x2a4   : > { %3676 = vmatprep.subr.bf16.mxu1 %v10174_v44  ;;  %v10173_v9 = vcombine.low %v3059_v17, %v3063_v46  ;;  %v10171_v30 = vcombine.low %v3057_v40, %v3061_v56  ;;  %4074 = vrot.lane.b32.xlu1 %v4057_v43, %s15714_s9  ;;  %v2910_v35 = vrot.slane %v15910_v48, 4  ;;  %v15911_v29 = vmov %v15906_v20  ;;  %v15918_v17 = vld [vmem:[#allocation13_spill] sm:$0xff]  ;;  %v15921_v20 = vld [vmem:[#allocation15_spill] sm:$0xff] }
 0x2a5   : > { %4072 = vrot.lane.b32.xlu0 %v12614_v53, %s15714_s9  ;;  %v2964_v8 = vsel %vm262_vm0, %v15911_v29, %v2957_v39  ;;  %v10168_v41 = vcombine.high %v3010_v23, %v3014_v57  ;;  %v10170_v54 = vcombine.high %v3012_v47, %v3016_v0  ;;  %v2866_v4 = vrot.slane %v15912_v37, 4  ;;  %s10919_s9 = smov 15  }
 0x2a6   : > { %v12882_v15 = vpop.permute.xlu1 %3278  ;;  %v12884_v31 = vpop.permute.xlu0 %3276  ;;  %v15914_v2 = vrot.slane %v15913_v3, 4  ;;  %v15916_v59 = vrot.slane %v15915_v49, 4  ;;  %v2969_v46 = vsel %vm974_vm7, %v12604_v62, %v2968_v36  ;;  %3636 = vmatpush1.bf16.msra.mxu0 %v10171_v30  ;;  %v2967_v56 = vsel %vm974_vm7, %v12596_v34, %v2966_v45 }
 0x2a7   : > { %3677 = vmatpush1.bf16.msra.mxu1 %v10173_v9  ;;  %v2865_v60 = vrot.slane %v15917_v6, 4  ;;  %v2921_v40 = vsel %vm262_vm0, %v2912_v21, %v2913_v19  ;;  %v2963_v26 = vsel %vm974_vm7, %v12592_v32, %v2961_v1  ;;  %3637 = vmatprep.subr.bf16.mxu0 %v10168_v41  ;;  %v2919_v42 = vsel %vm262_vm0, %v2911_v13, %v2912_v21  ;;  %v15919_v32 = vld [vmem:[#allocation19_spill] sm:$0xff]  ;;  %v4101_v19 = vld [vmem:[%s11068_s21 + $0x10] sm:$0xf]  ;;  %v4104_v41 = vld [vmem:[%s11068_s21 + $0x2c] sm:$0xf] }
 0x2a8   : > { %v2914_v61 = vsel %vm262_vm0, %v15916_v59, %v15914_v2  ;;  %3678 = vmatprep.subr.bf16.mxu1 %v10170_v54  ;;  %v2864_v51 = vrot.slane %v15918_v17, 4  ;;  %v2965_v62 = vsel %vm974_vm7, %v12590_v7, %v2964_v8  ;;  %v10169_v63 = vcombine.low %v3012_v47, %v3016_v0  ;;  %4113 = vrot.lane.b32.xlu1 %v12622_v22, %s15716_s11  ;;  %v15923_v1 = vld [vmem:[#allocation14_spill] sm:$0xff] }
 0x2a9   : > { %v10167_v39 = vcombine.low %v3010_v23, %v3014_v57  ;;  %4111 = vrot.lane.b32.xlu0 %v12625_v12, %s15716_s11  ;;  %v2863_v34 = vrot.slane %v15919_v32, 4  ;;  %v15920_v25 = vmov %v15914_v2  ;;  %v10164_v7 = vcombine.high %v2963_v26, %v2967_v56 }
 0x2aa   : > { %v2917_v18 = vsel %vm262_vm0, %v15920_v25, %v2910_v35  ;;  %v12912_v27 = vpop.permute.xlu1 %3282  ;;  %v12914_v44 = vpop.permute.xlu0 %3280  ;;  %v10166_v43 = vcombine.high %v2965_v62, %v2969_v46  ;;  %v15922_v58 = vrot.slane %v15921_v20, 4  ;;  %v15924_v0 = vrot.slane %v15923_v1, 4 }
 0x2ab   : > { %v2922_v21 = vsel %vm2915_vm15, %v15908_v38, %v2921_v40  ;;  %3638 = vmatpush1.bf16.msra.mxu0 %v10167_v39  ;;  %3679 = vmatpush1.bf16.msra.mxu1 %v10169_v63  ;;  %v2920_v36 = vsel %vm2915_vm15, %v15909_v28, %v2919_v42  ;;  %v2874_v23 = vsel %vm262_vm0, %v2865_v60, %v2866_v4  ;;  %vm2868_vm8 = vcmask 408576  }
 0x2ac   : > { %v2867_v57 = vsel %vm262_vm0, %v15924_v0, %v15922_v58  ;;  %v2916_v45 = vsel %vm2915_vm15, %v15915_v49, %v2914_v61  ;;  %3639 = vmatprep.subr.bf16.mxu0 %v10164_v7  ;;  %3680 = vmatprep.subr.bf16.mxu1 %v10166_v43  ;;  %v2872_v13 = vsel %vm262_vm0, %v2864_v51, %v2865_v60  ;;  %vm15718_vm12 = vcmask 326656  }
 0x2ad   : > { %v2918_v47 = vsel %vm2915_vm15, %v15913_v3, %v2917_v18  ;;  %v10165_v38 = vcombine.low %v2965_v62, %v2969_v46  ;;  %v10163_v9 = vcombine.low %v2963_v26, %v2967_v56  ;;  %4117 = vrot.lane.b32.xlu1 %v12660_v14, %s15716_s11  ;;  %4115 = vrot.lane.b32.xlu0 %v4101_v19, %s15716_s11  ;;  %vm15732_vm15 = vcmask 334848  }
 0x2ae   : > { %v15925_v28 = vmov %v15922_v58  ;;  %v12938_v48 = vpop.permute.xlu1 %3321  ;;  %v10160_v29 = vcombine.high %v2916_v45, %v2920_v36  ;;  %v10162_v8 = vcombine.high %v2918_v47, %v2922_v21  ;;  %v2875_v54 = vsel %vm2868_vm8, %v15917_v6, %v2874_v23 }
 0x2af   : > { %v2870_v30 = vsel %vm262_vm0, %v15925_v28, %v2863_v34  ;;  %v12940_v35 = vpop.permute.xlu0 %3319  ;;  %3640 = vmatpush1.bf16.msra.mxu0 %v10163_v9  ;;  %3681 = vmatpush1.bf16.msra.mxu1 %v10165_v38  ;;  %v2873_v37 = vsel %vm2868_vm8, %v15918_v17, %v2872_v13  ;;  %v2869_v4 = vsel %vm2868_vm8, %v15923_v1, %v2867_v57  ;;  %v3332_v59 = vrot.slane %v12938_v48, 4 }
 0x2b0   : > { %3641 = vmatprep.subr.bf16.mxu0 %v10160_v29  ;;  %3682 = vmatprep.subr.bf16.mxu1 %v10162_v8  ;;  %v2871_v3 = vsel %vm2868_vm8, %v15921_v20, %v2870_v30  ;;  %v10161_v2 = vcombine.low %v2918_v47, %v2922_v21  ;;  %v10159_v49 = vcombine.low %v2916_v45, %v2920_v36  ;;  %v3331_v61 = vrot.slane %v12940_v35, 4  ;;  %v4148_v20 = vld [vmem:[%s11068_s21 + $0x10] sm:$0xf]  ;;  %v4151_v29 = vld [vmem:[%s11068_s21 + $0x2c] sm:$0xf] }
 0x2b1   : > { %4121 = vrot.lane.b32.xlu1 %v4104_v41, %s15716_s11  ;;  %4119 = vrot.lane.b32.xlu0 %v12614_v53, %s15716_s11  ;;  %v10156_v6 = vcombine.high %v2869_v4, %v2873_v37  ;;  %v10158_v60 = vcombine.high %v2871_v3, %v2875_v54  ;;  %v10157_v40 = vcombine.low %v2871_v3, %v2875_v54  ;;  %v3285_v42 = vrot.slane %v12852_v11, 4  ;;  %s10920_s11 = smov 14  }
 0x2b2   : > { %v3326_v46 = vpop.permute.xlu1 %3325  ;;  %v3284_v17 = vrot.slane %v12854_v52, 4  ;;  %v3289_v51 = vrot.slane %v12912_v27, 4  ;;  %v3288_v62 = vrot.slane %v12914_v44, 4  ;;  %v3238_v63 = vrot.slane %v12764_v5, 4 }
 0x2b3   : > { %v3324_v56 = vpop.permute.xlu0 %3323  ;;  %3642 = vmatpush1.bf16.msra.mxu0 %v10159_v49  ;;  %3683 = vmatpush1.bf16.msra.mxu1 %v10161_v2  ;;  %v3237_v39 = vrot.slane %v12766_v33, 4  ;;  %v3286_v32 = vrot.slane %v12884_v31, 4  ;;  %v10155_v34 = vcombine.low %v2869_v4, %v2873_v37  ;;  %v3240_v25 = vrot.slane %v12786_v24, 4 }
 0x2b4   : > { %v3333_v26 = vrot.slane %v3324_v56, 4  ;;  %3643 = vmatprep.subr.bf16.mxu0 %v10156_v6  ;;  %3684 = vmatprep.subr.bf16.mxu1 %v10158_v60  ;;  %v3242_v18 = vrot.slane %v12821_v55, 4  ;;  %v3287_v27 = vrot.slane %v12882_v15, 4  ;;  %v3337_v7 = vsel %vm262_vm0, %v3331_v61, %v3332_v59 }
 0x2b5   : > { %4160 = vrot.lane.b32.xlu1 %v12622_v22, %s10919_s9  ;;  %4158 = vrot.lane.b32.xlu0 %v12625_v12, %s10919_s9  ;;  %v3334_v31 = vrot.slane %v3326_v46, 4  ;;  %v3241_v57 = vrot.slane %v12823_v50, 4  ;;  %v3290_v21 = vsel %vm262_vm0, %v3284_v17, %v3285_v42  ;;  %v3297_v55 = vsel %vm262_vm0, %v3288_v62, %v3289_v51  ;;  %v4195_v51 = vld [vmem:[%s11068_s21 + $0x10] sm:$0xf] }
 0x2b6   : > { %v3330_v43 = vpop.permute.xlu1 %3329  ;;  %v3340_v58 = vsel %vm262_vm0, %v3332_v59, %v3333_v26  ;;  %v3295_v36 = vsel %vm262_vm0, %v3287_v27, %v3288_v62  ;;  %v3239_v23 = vrot.slane %v12788_v10, 4  ;;  %v3293_v45 = vsel %vm262_vm0, %v3285_v42, %v3286_v32  ;;  %v4611_v27 = vld [vmem:[%s11068_s21 + $0x14] sm:$0xf] }
 0x2b7   : > { %v3328_v19 = vpop.permute.xlu0 %3327  ;;  %v3336_v1 = vrot.slane %v3330_v43, 4  ;;  %3644 = vmatpush1.bf16.msra.mxu0 %v10155_v34  ;;  %3685 = vmatpush1.bf16.msra.mxu1 %v10157_v40  ;;  %v3339_v38 = vsel %vm15718_vm12, %v12940_v35, %v3337_v7  ;;  %v3341_v9 = vsel %vm15718_vm12, %v12938_v48, %v3340_v58  ;;  %v3298_v41 = vsel %vm15732_vm15, %v12914_v44, %v3297_v55  ;;  %v13049_v34 = vld [vmem:[%s11068_s21 + $0xc] sm:$0xff] }
 0x2b8   : > { %v3335_v0 = vrot.slane %v3328_v19, 4  ;;  %v3296_v35 = vsel %vm15732_vm15, %v12882_v15, %v3295_v36  ;;  %v3250_v4 = vsel %vm262_vm0, %v3241_v57, %v3242_v18  ;;  %v3248_v2 = vsel %vm262_vm0, %v3240_v25, %v3241_v57  ;;  %v13052_v25 = vld [vmem:[%s11068_s21 + $0x4] sm:$0xff]  ;;  %v4657_v57 = vld [vmem:[%s11068_s21 + $0x14] sm:$0xf]  ;;  %v4660_v36 = vld [vmem:[%s11068_s21 + $0x30] sm:$0xf] }
 0x2b9   : > { %4164 = vrot.lane.b32.xlu1 %v12660_v14, %s10919_s9  ;;  %4162 = vrot.lane.b32.xlu0 %v4148_v20, %s10919_s9  ;;  %vm15720_vm8 = vcmask 343040   ;;  %v3243_v49 = vsel %vm262_vm0, %v3237_v39, %v3238_v63  ;;  %v3292_v59 = vsel %vm15732_vm15, %v12854_v52, %v3290_v21  ;;  %v3294_v44 = vsel %vm15732_vm15, %v12852_v11, %v3293_v45  ;;  %v13063_v18 = vld [vmem:[%s11068_s21 + $0x20] sm:$0xff]  ;;  %v13075_v20 = vld [vmem:[%s11068_s21 + $0x28] sm:$0xff] }
 0x2ba   : > { %v3344_v13 = vsel %vm262_vm0, %v3335_v0, %v3336_v1  ;;  %v3342_v47 = vsel %vm262_vm0, %v3334_v31, %v3335_v0  ;;  %v12989_v10 = vpop.permute.xlu1 %3737  ;;  %v3246_v15 = vsel %vm262_vm0, %v3238_v63, %v3239_v23  ;;  %v10192_v56 = vcombine.high %v3292_v59, %v3296_v35  ;;  %v4198_v63 = vld [vmem:[%s11068_s21 + $0x2c] sm:$0xf] }
 0x2bb   : > { %v3345_v28 = vsel %vm15718_vm12, %v3328_v19, %v3344_v13  ;;  %15926 = vst [vmem:[#allocation21_spill] sm:$0xff] %v12989_v10  ;;  %v12991_v30 = vpop.permute.xlu0 %3735  ;;  %v3343_v8 = vsel %vm15718_vm12, %v3326_v46, %v3342_v47  ;;  %v10194_v6 = vcombine.high %v3294_v44, %v3298_v41  ;;  %v3251_v52 = vsel %vm15720_vm8, %v12823_v50, %v3250_v4  ;;  %v4614_v19 = vld [vmem:[%s11068_s21 + $0x30] sm:$0xf] }
 0x2bc   : > { %15927 = vst [vmem:[#allocation17_spill] sm:$0xff] %v12991_v30  ;;  %v10197_v54 = vcombine.low %v3341_v9, %v3345_v28  ;;  %v10195_v37 = vcombine.low %v3339_v38, %v3343_v8  ;;  %v10196_v48 = vcombine.high %v3339_v38, %v3343_v8  ;;  %v10198_v3 = vcombine.high %v3341_v9, %v3345_v28  ;;  %v4703_v38 = vld [vmem:[%s11068_s21 + $0x14] sm:$0xf] }
 0x2bd   : > { %4168 = vrot.lane.b32.xlu1 %v4151_v29, %s10919_s9  ;;  %4166 = vrot.lane.b32.xlu0 %v12614_v53, %s10919_s9  ;;  %v3249_v11 = vsel %vm15720_vm8, %v12786_v24, %v3248_v2  ;;  %v3245_v60 = vsel %vm15720_vm8, %v12766_v33, %v3243_v49  ;;  %v3247_v40 = vsel %vm15720_vm8, %v12764_v5, %v3246_v15  ;;  %v4706_v29 = vld [vmem:[%s11068_s21 + $0x30] sm:$0xf]  ;;  %v4795_v15 = vld [vmem:[%s11068_s21 + $0x14] sm:$0xf]  ;;  %vm15735_vm12 = vcmask 138240  }
 0x2be   : > { %3655 = vmatprep.subr.bf16.mxu0 %v10196_v48  ;;  %3696 = vmatprep.subr.bf16.mxu1 %v10198_v3  ;;  %v13010_v61 = vpop.permute.xlu1 %3741  ;;  %v10193_v26 = vcombine.low %v3294_v44, %v3298_v41  ;;  %v10191_v42 = vcombine.low %v3292_v59, %v3296_v35  ;;  %v10188_v33 = vcombine.high %v3245_v60, %v3249_v11  ;;  %v4749_v35 = vld [vmem:[%s11068_s21 + $0x14] sm:$0xf]  ;;  %v4752_v3 = vld [vmem:[%s11068_s21 + $0x30] sm:$0xf]  ;;  %vm15736_vm13 = vcmask 146432  }
 0x2bf   : > { %15928 = vst [vmem:[#allocation23_spill] sm:$0xff] %v13010_v61  ;;  %v13012_v46 = vpop.permute.xlu0 %3739  ;;  %3656 = vmatpush2.bf16.msra.mxu0 %v10195_v37  ;;  %3697 = vmatpush2.bf16.msra.mxu1 %v10197_v54  ;;  %v10190_v17 = vcombine.high %v3247_v40, %v3251_v52  ;;  %v10189_v5 = vcombine.low %v3247_v40, %v3251_v52  ;;  %v4798_v52 = vld [vmem:[%s11068_s21 + $0x30] sm:$0xf]  ;;  %vm15737_vm8 = vcmask 154624   ;;  %vm3942_vm15 = vcmask 162816  }
 0x2c0   : > { %15929 = vst [vmem:[#allocation18_spill] sm:$0xff] %v13012_v46  ;;  %3657 = vmatprep.subr.bf16.mxu0 %v10192_v56  ;;  %3698 = vmatprep.subr.bf16.mxu1 %v10194_v6  ;;  %v10187_v62 = vcombine.low %v3245_v60, %v3249_v11  ;;  %v10153_v39 = vcombine.low %v12800_v16, %v12800_v16 }
 0x2c1   : > { %4207 = vrot.lane.b32.xlu1 %v12622_v22, %s10920_s11  ;;  %4205 = vrot.lane.b32.xlu0 %v12625_v12, %s10920_s11 }
 0x2c2   : > { %v13026_v50 = vpop.permute.xlu1 %3745 }
 0x2c3   : > { %15930 = vst [vmem:[#allocation20_spill] sm:$0xff] %v13026_v50  ;;  %v13028_v24 = vpop.permute.xlu0 %3743  ;;  %3658 = vmatpush2.bf16.msra.mxu0 %v10191_v42  ;;  %3699 = vmatpush2.bf16.msra.mxu1 %v10193_v26  ;;  %v4841_v42 = vld [vmem:[%s11068_s21 + $0x14] sm:$0xf] }
 0x2c4   : > { %15931 = vst [vmem:[#allocation22_spill] sm:$0xff] %v13028_v24  ;;  %3659 = vmatprep.subr.bf16.mxu0 %v10188_v33  ;;  %3700 = vmatprep.subr.bf16.mxu1 %v10190_v17  ;;  %v4844_v33 = vld [vmem:[%s11068_s21 + $0x30] sm:$0xf] }
 0x2c5   : > { %4211 = vrot.lane.b32.xlu1 %v12660_v14, %s10920_s11  ;;  %4209 = vrot.lane.b32.xlu0 %v4195_v51, %s10920_s11 }
 0x2c6   : > { %v13034_v22 = vpop.permute.xlu1 %3784 }
 0x2c7   : > { %15932 = vst [vmem:[#allocation16_spill] sm:$0xff] %v13034_v22  ;;  %v13036_v12 = vpop.permute.xlu0 %3782  ;;  %3660 = vmatpush2.bf16.msra.mxu0 %v10187_v62  ;;  %3701 = vmatpush2.bf16.msra.mxu1 %v10189_v5 }
 0x2c8   : > { %15933 = vst [vmem:[#allocation13_spill] sm:$0xff] %v13036_v12 }
 0x2c9   : > { %4215 = vrot.lane.b32.xlu1 %v4198_v63, %s10920_s11  ;;  %4213 = vrot.lane.b32.xlu0 %v12614_v53, %s10920_s11 }
 0x2ca   : > { %v13044_v14 = vpop.permute.xlu1 %3788  ;;  %3662 = vmatmul.mubr.bf16.vlgmr.msra.gmra.mxu0 %v10153_v39  ;;  %3703 = vmatmul.mubr.bf16.vlgmr.msra.gmra.mxu1 %v10153_v39 }
 0x2cb   : > { %15934 = vst [vmem:[#allocation19_spill] sm:$0xff] %v13044_v14  ;;  %v13046_v32 = vpop.permute.xlu0 %3786 }
 0x2cc   : > { %15935 = vst [vmem:[#allocation15_spill] sm:$0xff] %v13046_v32 }
 0x2cd   : > { %4623 = vrot.lane.b32.xlu1 %v13049_v34, %s10868_s20  ;;  %4621 = vrot.lane.b32.xlu0 %v13052_v25, %s10868_s20 }
 0x2ce   : > { %v13058_v16 = vpop.permute.xlu1 %3792 }
 0x2cf   : > { %v13060_v53 = vpop.permute.xlu0 %3790 }
 0x2d0   : > { %15936 = vst [vmem:[#allocation14_spill] sm:$0xff] %v13060_v53 }
 0x2d1   : > { %4627 = vrot.lane.b32.xlu1 %v13063_v18, %s10868_s20  ;;  %4625 = vrot.lane.b32.xlu0 %v4611_v27, %s10868_s20 }
 0x2d2   : > { %v13069_v7 = vpop.permute.xlu1 %3831 }
 0x2d3   : > { %v13071_v43 = vpop.permute.xlu0 %3829 }
 0x2d5   : > { %4631 = vrot.lane.b32.xlu1 %v4614_v19, %s10868_s20  ;;  %4629 = vrot.lane.b32.xlu0 %v13075_v20, %s10868_s20  ;;  %s10921_s20 = smov 117  }
 0x2d6   : > { %v13080_v31 = vpop.permute.xlu1 %3835 }
 0x2d7   : > { %v13082_v58 = vpop.permute.xlu0 %3833 }
 0x2d9   : > { %4669 = vrot.lane.b32.xlu1 %v13049_v34, %s10869_s22  ;;  %4667 = vrot.lane.b32.xlu0 %v13052_v25, %s10869_s22 }
 0x2da   : > { %v13088_v1 = vpop.permute.xlu1 %3839 }
 0x2db   : > { %v13090_v0 = vpop.permute.xlu0 %3837 }
 0x2dd   : > { %4673 = vrot.lane.b32.xlu1 %v13063_v18, %s10869_s22  ;;  %4671 = vrot.lane.b32.xlu0 %v4657_v57, %s10869_s22 }
 0x2de   : > { %v13096_v21 = vpop.permute.xlu1 %3878 }
 0x2df   : > { %v13098_v55 = vpop.permute.xlu0 %3876 }
 0x2e1   : > { %4677 = vrot.lane.b32.xlu1 %v4660_v36, %s10869_s22  ;;  %4675 = vrot.lane.b32.xlu0 %v13075_v20, %s10869_s22  ;;  %s10922_s22 = smov 116  }
 0x2e2   : > { %v13104_v23 = vpop.permute.xlu1 %3882 }
 0x2e3   : > { %v13106_v45 = vpop.permute.xlu0 %3880 }
 0x2e5   : > { %4715 = vrot.lane.b32.xlu1 %v13049_v34, %s10870_s26  ;;  %4713 = vrot.lane.b32.xlu0 %v13052_v25, %s10870_s26 }
 0x2e6   : > { %v13112_v13 = vpop.permute.xlu1 %3886 }
 0x2e7   : > { %v13114_v47 = vpop.permute.xlu0 %3884 }
 0x2e9   : > { %4719 = vrot.lane.b32.xlu1 %v13063_v18, %s10870_s26  ;;  %4717 = vrot.lane.b32.xlu0 %v4703_v38, %s10870_s26  ;;  %v4887_v38 = vld [vmem:[%s11068_s21 + $0x14] sm:$0xf] }
 0x2ea   : > { %v13120_v9 = vpop.permute.xlu1 %3925 }
 0x2eb   : > { %v13122_v28 = vpop.permute.xlu0 %3923  ;;  %v15721_v5 = vrot.slane %v13120_v9, 4 }
 0x2ec   : > { %v3935_v62 = vrot.slane %v13122_v28, 4 }
 0x2ed   : > { %4723 = vrot.lane.b32.xlu1 %v4706_v29, %s10870_s26  ;;  %4721 = vrot.lane.b32.xlu0 %v13075_v20, %s10870_s26 }
 0x2ee   : > { %v13128_v8 = vpop.permute.xlu1 %3929 }
 0x2ef   : > { %v13130_v41 = vpop.permute.xlu0 %3927 }
 0x2f1   : > { %4761 = vrot.lane.b32.xlu1 %v13049_v34, %s10871_s27  ;;  %4759 = vrot.lane.b32.xlu0 %v13052_v25, %s10871_s27 }
 0x2f2   : > { %v13136_v54 = vpop.permute.xlu1 %3933 }
 0x2f3   : > { %v13138_v37 = vpop.permute.xlu0 %3931 }
 0x2f5   : > { %4765 = vrot.lane.b32.xlu1 %v13063_v18, %s10871_s27  ;;  %4763 = vrot.lane.b32.xlu0 %v4749_v35, %s10871_s27 }
 0x2f6   : > { %v13144_v4 = vpop.permute.xlu1 %3972 }
 0x2f7   : > { %v13146_v48 = vpop.permute.xlu0 %3970 }
 0x2f9   : > { %4769 = vrot.lane.b32.xlu1 %v4752_v3, %s10871_s27  ;;  %4767 = vrot.lane.b32.xlu0 %v13075_v20, %s10871_s27 }
 0x2fa   : > { %v13152_v2 = vpop.permute.xlu1 %3976 }
 0x2fb   : > { %v13154_v49 = vpop.permute.xlu0 %3974 }
 0x2fc   : > { %v3984_v22 = vrot.slane %v13154_v49, 4 }
 0x2fd   : > { %4807 = vrot.lane.b32.xlu1 %v13049_v34, %s10872_s30  ;;  %4805 = vrot.lane.b32.xlu0 %v13052_v25, %s10872_s30 }
 0x2fe   : > { %v13160_v59 = vpop.permute.xlu1 %3980 }
 0x2ff   : > { %v13162_v44 = vpop.permute.xlu0 %3978  ;;  %v3987_v63 = vrot.slane %v13160_v59, 4 }
 0x300   : > { %v3986_v19 = vrot.slane %v13162_v44, 4 }
 0x301   : > { %4811 = vrot.lane.b32.xlu1 %v13063_v18, %s10872_s30  ;;  %4809 = vrot.lane.b32.xlu0 %v4795_v15, %s10872_s30 }
 0x302   : > { %v13168_v56 = vpop.permute.xlu1 %4019 }
 0x303   : > { %v13170_v6 = vpop.permute.xlu0 %4017  ;;  %v4030_v57 = vrot.slane %v13168_v56, 4 }
 0x305   : > { %4815 = vrot.lane.b32.xlu1 %v4798_v52, %s10872_s30  ;;  %4813 = vrot.lane.b32.xlu0 %v13075_v20, %s10872_s30  ;;  %v13206_v52 = vsel %vm262_vm0, %v3935_v62, %v15721_v5  ;;  %v3983_v62 = vrot.slane %v13144_v4, 4  ;;  %v3985_v5 = vrot.slane %v13152_v2, 4 }
 0x306   : > { %v13176_v11 = vpop.permute.xlu1 %4023 }
 0x307   : > { %v13178_v60 = vpop.permute.xlu0 %4021 }
 0x308   : > { %v4031_v59 = vrot.slane %v13178_v60, 4  ;;  %v3995_v60 = vsel %vm262_vm0, %v3986_v19, %v3987_v63 }
 0x309   : > { %4853 = vrot.lane.b32.xlu1 %v13049_v34, %s10873_s4  ;;  %4851 = vrot.lane.b32.xlu0 %v13052_v25, %s10873_s4 }
 0x30a   : > { %v4028_v40 = vpop.permute.xlu1 %4027 }
 0x30b   : > { %v13184_v26 = vpop.permute.xlu0 %4025  ;;  %v4034_v27 = vrot.slane %v4028_v40, 4  ;;  %v3982_v40 = vrot.slane %v13146_v48, 4 }
 0x30c   : > { %v4033_v36 = vrot.slane %v13184_v26, 4 }
 0x30d   : > { %4857 = vrot.lane.b32.xlu1 %v13063_v18, %s10873_s4  ;;  %4855 = vrot.lane.b32.xlu0 %v4841_v42, %s10873_s4 }
 0x30e   : > { %v4067_v17 = vpop.permute.xlu1 %4066  ;;  %v4042_v50 = vsel %vm262_vm0, %v4033_v36, %v4034_v27 }
 0x30f   : > { %v4065_v51 = vpop.permute.xlu0 %4064  ;;  %v4077_v29 = vrot.slane %v4067_v17, 4 }
 0x310   : > { %v4076_v35 = vrot.slane %v4065_v51, 4 }
 0x311   : > { %4861 = vrot.lane.b32.xlu1 %v4844_v33, %s10873_s4  ;;  %4859 = vrot.lane.b32.xlu0 %v13075_v20, %s10873_s4  ;;  %v4032_v33 = vrot.slane %v13176_v11, 4 }
 0x312   : > { %v4071_v3 = vpop.permute.xlu1 %4070  ;;  %v4082_v42 = vsel %vm262_vm0, %v4076_v35, %v4077_v29 }
 0x313   : > { %v4069_v15 = vpop.permute.xlu0 %4068  ;;  %v4079_v46 = vrot.slane %v4071_v3, 4  ;;  %v4040_v35 = vsel %vm262_vm0, %v4032_v33, %v4033_v36  ;;  %v4084_v63 = vsel %vm15735_vm12, %v4065_v51, %v4082_v42  ;;  %v3938_v51 = vrot.slane %v13128_v8, 4 }
 0x314   : > { %v4078_v39 = vrot.slane %v4069_v15, 4  ;;  %v4029_v15 = vrot.slane %v13170_v6, 4  ;;  %v3991_v42 = vsel %vm262_vm0, %v3983_v62, %v3984_v22 }
 0x315   : > { %4899 = vrot.lane.b32.xlu1 %v13049_v34, %s10874_s5  ;;  %4897 = vrot.lane.b32.xlu0 %v13052_v25, %s10874_s5 }
 0x316   : > { %v4075_v30 = vpop.permute.xlu1 %4074  ;;  %v4085_v61 = vsel %vm262_vm0, %v4077_v29, %v4078_v39  ;;  %v4035_v32 = vsel %vm262_vm0, %v4029_v15, %v4030_v57  ;;  %v4038_v39 = vsel %vm262_vm0, %v4030_v57, %v4031_v59  ;;  %v4890_v29 = vld [vmem:[%s11068_s21 + $0x30] sm:$0xf]  ;;  %v4043_v57 = vsel %vm15736_vm13, %v13184_v26, %v4042_v50 }
 0x317   : > { %v4073_v10 = vpop.permute.xlu0 %4072  ;;  %v4081_v24 = vrot.slane %v4075_v30, 4  ;;  %v4086_v27 = vsel %vm15735_vm12, %v4067_v17, %v4085_v61  ;;  %v3993_v17 = vsel %vm262_vm0, %v3985_v5, %v3986_v19  ;;  %v3988_v50 = vsel %vm262_vm0, %v3982_v40, %v3983_v62 }
 0x318   : > { %v4080_v12 = vrot.slane %v4073_v10, 4  ;;  %v4037_v26 = vsel %vm15736_vm13, %v13170_v6, %v4035_v32  ;;  %v3893_v59 = vrot.slane %v13112_v13, 4  ;;  %v15937_v40 = vrot.slane %v13136_v54, 4  ;;  %v13278_v6 = vld [vmem:[#allocation7 + $0x20] sm:$0xff] }
 0x319   : > { %4903 = vrot.lane.b32.xlu1 %v13063_v18, %s10874_s5  ;;  %4901 = vrot.lane.b32.xlu0 %v4887_v38, %s10874_s5  ;;  %v15938_v32 = vrot.slane %v13138_v37, 4  ;;  %v3994_v22 = vsel %vm15737_vm8, %v13152_v2, %v3993_v17  ;;  %v3892_v62 = vrot.slane %v13114_v47, 4  ;;  %v3990_v13 = vsel %vm15737_vm8, %v13146_v48, %v3988_v50 }
 0x31a   : > { %v4089_v30 = vsel %vm262_vm0, %v4080_v12, %v4081_v24  ;;  %v4087_v49 = vsel %vm262_vm0, %v4079_v46, %v4080_v12  ;;  %v13242_v53 = vpop.permute.xlu1 %4113  ;;  %v4041_v46 = vsel %vm15736_vm13, %v13176_v11, %v4040_v35  ;;  %v3888_v12 = vrot.slane %v13098_v55, 4 }
 0x31b   : > { %v4090_v14 = vsel %vm15735_vm12, %v4073_v10, %v4089_v30  ;;  %v13244_v38 = vpop.permute.xlu0 %4111  ;;  %v4088_v36 = vsel %vm15735_vm12, %v4071_v3, %v4087_v49  ;;  %vm15739_vm12 = vcmask 171008   ;;  %v4039_v11 = vsel %vm15736_vm13, %v13168_v56, %v4038_v39 }
 0x31c   : > { %v10233_v33 = vcombine.low %v4086_v27, %v4090_v14  ;;  %v10231_v24 = vcombine.low %v4084_v63, %v4088_v36  ;;  %v10232_v10 = vcombine.high %v4084_v63, %v4088_v36  ;;  %v10234_v61 = vcombine.high %v4086_v27, %v4090_v14 }
 0x31d   : > { %4907 = vrot.lane.b32.xlu1 %v4890_v29, %s10874_s5  ;;  %4905 = vrot.lane.b32.xlu0 %v13075_v20, %s10874_s5  ;;  %v3937_v3 = vrot.slane %v13130_v41, 4  ;;  %v10228_v19 = vcombine.high %v4037_v26, %v4041_v46  ;;  %v10230_v15 = vcombine.high %v4039_v11, %v4043_v57  ;;  %v3948_v56 = vsel %vm262_vm0, %v15938_v32, %v15937_v40 }
 0x31e   : > { %4515 = vmatprep.subr.bf16.mxu0 %v10232_v10  ;;  %4556 = vmatprep.subr.bf16.mxu1 %v10234_v61  ;;  %v3996_v41 = vsel %vm15737_vm8, %v13162_v44, %v3995_v60  ;;  %v15939_v54 = vmov %v15938_v32  ;;  %v10202_v44 = vcombine.high %v13278_v6, %v13278_v6  ;;  %vm15738_vm13 = vcmask 179200  }
 0x31f   : > { %v13264_v14 = vpop.permute.xlu1 %4117  ;;  %v13266_v5 = vpop.permute.xlu0 %4115  ;;  %4516 = vmatpush1.bf16.msra.mxu0 %v10231_v24  ;;  %4557 = vmatpush1.bf16.msra.mxu1 %v10233_v33  ;;  %v3946_v35 = vsel %vm262_vm0, %v3938_v51, %v15939_v54  ;;  %v3891_v2 = vrot.slane %v13104_v23, 4  ;;  %v3992_v60 = vsel %vm15737_vm8, %v13144_v4, %v3991_v42  ;;  %v10229_v39 = vcombine.low %v4039_v11, %v4043_v57  ;;  %v4933_v57 = vld [vmem:[%s11068_s21 + $0x14] sm:$0xf]  ;;  %v15946_v54 = vld [vmem:[#allocation19_spill] sm:$0xff] }
 0x320   : > { %4517 = vmatprep.subr.bf16.mxu0 %v10228_v19  ;;  %4558 = vmatprep.subr.bf16.mxu1 %v10230_v15  ;;  %v10227_v30 = vcombine.low %v4037_v26, %v4041_v46  ;;  %v3890_v48 = vrot.slane %v13106_v45, 4  ;;  %v15940_v29 = vrot.slane %v13120_v9, 4  ;;  %v10224_v36 = vcombine.high %v3990_v13, %v3994_v22 }
 0x321   : > { %4945 = vrot.lane.b32.xlu1 %v13049_v34, %s10875_s6  ;;  %4943 = vrot.lane.b32.xlu0 %v13052_v25, %s10875_s6  ;;  %v10226_v4 = vcombine.high %v3992_v60, %v3996_v41  ;;  %v3846_v33 = vrot.slane %v13088_v1, 4  ;;  %v15941_v24 = vrot.slane %v13096_v21, 4  ;;  %v3949_v46 = vsel %vm3942_vm15, %v13138_v37, %v3948_v56 }
 0x322   : > { %v3944_v49 = vsel %vm262_vm0, %v15940_v29, %v3937_v3  ;;  %10247 = vmatprep.mubr.msk.bf16.mxu0 %vm974_vm7, %v10202_v44  ;;  %10248 = vmatprep.mubr.msk.bf16.mxu1 %vm974_vm7, %v10202_v44  ;;  %v3947_v10 = vsel %vm3942_vm15, %v13128_v8, %v3946_v35  ;;  %v3845_v61 = vrot.slane %v13090_v0, 4  ;;  %v3901_v17 = vsel %vm262_vm0, %v3892_v62, %v3893_v59 }
 0x323   : > { %v13299_v63 = vpop.permute.xlu1 %4121  ;;  %v13301_v27 = vpop.permute.xlu0 %4119  ;;  %v3894_v45 = vsel %vm262_vm0, %v3888_v12, %v15941_v24  ;;  %4518 = vmatpush1.bf16.msra.mxu0 %v10227_v30  ;;  %4559 = vmatpush1.bf16.msra.mxu1 %v10229_v39  ;;  %v3943_v1 = vsel %vm3942_vm15, %v13122_v28, %v13206_v52  ;;  %v3899_v12 = vsel %vm262_vm0, %v3891_v2, %v3892_v62  ;;  %vm3801_vm8 = vcmask 187392  }
 0x324   : > { %4519 = vmatprep.subr.bf16.mxu0 %v10224_v36  ;;  %4560 = vmatprep.subr.bf16.mxu1 %v10226_v4  ;;  %v3844_v37 = vrot.slane %v13080_v31, 4  ;;  %v3945_v51 = vsel %vm3942_vm15, %v13120_v9, %v3944_v49  ;;  %v10225_v8 = vcombine.low %v3992_v60, %v3996_v41  ;;  %v10223_v50 = vcombine.low %v3990_v13, %v3994_v22  ;;  %v4936_v9 = vld [vmem:[%s11068_s21 + $0x30] sm:$0xf]  ;;  %v15950_v4 = vld [vmem:[#allocation16_spill] sm:$0xff] }
 0x325   : > { %4949 = vrot.lane.b32.xlu1 %v13063_v18, %s10875_s6  ;;  %4947 = vrot.lane.b32.xlu0 %v4933_v57, %s10875_s6  ;;  %v3843_v28 = vrot.slane %v13082_v58, 4  ;;  %v15942_v52 = vmov %v15941_v24  ;;  %v10220_v42 = vcombine.high %v3943_v1, %v3947_v10  ;;  %v10222_v19 = vcombine.high %v3945_v51, %v3949_v46  ;;  %v15945_v41 = vld [vmem:[#allocation14_spill] sm:$0xff] }
 0x326   : > { %v3897_v26 = vsel %vm262_vm0, %v15942_v52, %v3890_v48  ;;  %v3799_v15 = vrot.slane %v13058_v16, 4  ;;  %v15943_v59 = vrot.slane %v13069_v7, 4  ;;  %v15944_v40 = vrot.slane %v13071_v43, 4 }
 0x327   : > { %v13330_v11 = vpop.permute.xlu1 %4160  ;;  %v13332_v3 = vpop.permute.xlu0 %4158  ;;  %v3902_v58 = vsel %vm15739_vm12, %v13114_v47, %v3901_v17  ;;  %4520 = vmatpush1.bf16.msra.mxu0 %v10223_v50  ;;  %4561 = vmatpush1.bf16.msra.mxu1 %v10225_v8  ;;  %v3900_v56 = vsel %vm15739_vm12, %v13104_v23, %v3899_v12  ;;  %v3798_v22 = vrot.slane %v15945_v41, 4  ;;  %v3854_v62 = vsel %vm262_vm0, %v3845_v61, %v3846_v33  ;;  %v15947_v23 = vld [vmem:[#allocation15_spill] sm:$0xff]  ;;  %v15952_v33 = vld [vmem:[#allocation13_spill] sm:$0xff] }
 0x328   : > { %v3847_v32 = vsel %vm262_vm0, %v15944_v40, %v15943_v59  ;;  %v3896_v16 = vsel %vm15739_vm12, %v13098_v55, %v3894_v45  ;;  %4521 = vmatprep.subr.bf16.mxu0 %v10220_v42  ;;  %4562 = vmatprep.subr.bf16.mxu1 %v10222_v19  ;;  %v3852_v13 = vsel %vm262_vm0, %v3844_v37, %v3845_v61  ;;  %v3797_v35 = vrot.slane %v15946_v54, 4  ;;  %v15954_v61 = vld [vmem:[#allocation22_spill] sm:$0xff] }
 0x329   : > { %v3898_v47 = vsel %vm15739_vm12, %v13096_v21, %v3897_v26  ;;  %v10221_v44 = vcombine.low %v3945_v51, %v3949_v46  ;;  %v10219_v2 = vcombine.low %v3943_v1, %v3947_v10  ;;  %4953 = vrot.lane.b32.xlu1 %v4936_v9, %s10875_s6  ;;  %4951 = vrot.lane.b32.xlu0 %v13075_v20, %s10875_s6  ;;  %v3796_v60 = vrot.slane %v15947_v23, 4  ;;  %v15949_v21 = vld [vmem:[#allocation20_spill] sm:$0xff]  ;;  %v15955_v51 = vld [vmem:[#allocation23_spill] sm:$0xff] }
 0x32a   : > { %v15948_v55 = vmov %v15943_v59  ;;  %v10216_v29 = vcombine.high %v3896_v16, %v3900_v56  ;;  %v10218_v49 = vcombine.high %v3898_v47, %v3902_v58  ;;  %v3752_v36 = vrot.slane %v15949_v21, 4  ;;  %v15958_v59 = vld [vmem:[#allocation21_spill] sm:$0xff] }
 0x32b   : > { %v3850_v39 = vsel %vm262_vm0, %v15948_v55, %v3843_v28  ;;  %v13360_v30 = vpop.permute.xlu1 %4164  ;;  %v13362_v48 = vpop.permute.xlu0 %4162  ;;  %v15951_v57 = vrot.slane %v15950_v4, 4  ;;  %v15953_v24 = vrot.slane %v15952_v33, 4  ;;  %v3855_v46 = vsel %vm15738_vm13, %v13090_v0, %v3854_v62  ;;  %4522 = vmatpush1.bf16.msra.mxu0 %v10219_v2  ;;  %4563 = vmatpush1.bf16.msra.mxu1 %v10221_v44 }
 0x32c   : > { %v3853_v10 = vsel %vm15738_vm13, %v13080_v31, %v3852_v13  ;;  %v3751_v17 = vrot.slane %v15954_v61, 4  ;;  %v3807_v1 = vsel %vm262_vm0, %v3798_v22, %v3799_v15  ;;  %v3849_v12 = vsel %vm15738_vm13, %v13071_v43, %v3847_v32  ;;  %4523 = vmatprep.subr.bf16.mxu0 %v10216_v29  ;;  %4564 = vmatprep.subr.bf16.mxu1 %v10218_v49  ;;  %v15956_v31 = vld [vmem:[#allocation18_spill] sm:$0xff]  ;;  %v15960_v32 = vld [vmem:[#allocation17_spill] sm:$0xff] }
 0x32d   : > { %v3800_v45 = vsel %vm262_vm0, %v15953_v24, %v15951_v57  ;;  %v3805_v37 = vsel %vm262_vm0, %v3797_v35, %v3798_v22  ;;  %v3750_v8 = vrot.slane %v15955_v51, 4  ;;  %v3851_v0 = vsel %vm15738_vm13, %v13069_v7, %v3850_v39  ;;  %4991 = vrot.lane.b32.xlu1 %v13049_v34, %s10876_s7  ;;  %4989 = vrot.lane.b32.xlu0 %v13052_v25, %s10876_s7  ;;  %v4979_v15 = vld [vmem:[%s11068_s21 + $0x14] sm:$0xf]  ;;  %v4982_v29 = vld [vmem:[%s11068_s21 + $0x30] sm:$0xf] }
 0x32e   : > { %v10217_v50 = vcombine.low %v3898_v47, %v3902_v58  ;;  %v10215_v28 = vcombine.low %v3896_v16, %v3900_v56  ;;  %v3749_v43 = vrot.slane %v15956_v31, 4  ;;  %v15957_v52 = vmov %v15951_v57 }
 0x32f   : > { %v3803_v26 = vsel %vm262_vm0, %v15957_v52, %v3796_v60  ;;  %v13390_v42 = vpop.permute.xlu1 %4168  ;;  %v13392_v19 = vpop.permute.xlu0 %4166  ;;  %v10212_v9 = vcombine.high %v3849_v12, %v3853_v10  ;;  %v10214_v7 = vcombine.high %v3851_v0, %v3855_v46  ;;  %v15959_v40 = vrot.slane %v15958_v59, 4 }
 0x330   : > { %v15961_v58 = vrot.slane %v15960_v32, 4  ;;  %v3808_v22 = vsel %vm3801_vm8, %v15945_v41, %v3807_v1  ;;  %4524 = vmatpush1.bf16.msra.mxu0 %v10215_v28  ;;  %4565 = vmatpush1.bf16.msra.mxu1 %v10217_v50  ;;  %v3806_v62 = vsel %vm3801_vm8, %v15946_v54, %v3805_v37  ;;  %v3760_v16 = vsel %vm262_vm0, %v3751_v17, %v3752_v36 }
 0x331   : > { %v3802_v13 = vsel %vm3801_vm8, %v15952_v33, %v3800_v45  ;;  %4525 = vmatprep.subr.bf16.mxu0 %v10212_v9  ;;  %4566 = vmatprep.subr.bf16.mxu1 %v10214_v7  ;;  %v3758_v35 = vsel %vm262_vm0, %v3750_v8, %v3751_v17  ;;  %vm3754_vm13 = vcmask 195584   ;;  %v3804_v47 = vsel %vm3801_vm8, %v15950_v4, %v3803_v26 }
 0x332   : > { %v3753_v56 = vsel %vm262_vm0, %v15961_v58, %v15959_v40  ;;  %v10213_v41 = vcombine.low %v3851_v0, %v3855_v46  ;;  %v10211_v44 = vcombine.low %v3849_v12, %v3853_v10  ;;  %4995 = vrot.lane.b32.xlu1 %v13063_v18, %s10876_s7  ;;  %4993 = vrot.lane.b32.xlu0 %v4979_v15, %s10876_s7  ;;  %vm4177_vm8 = vcmask 121856  }
 0x333   : > { %v15962_v54 = vmov %v15959_v40  ;;  %v13416_v23 = vpop.permute.xlu1 %4207  ;;  %v13418_v60 = vpop.permute.xlu0 %4205  ;;  %v10208_v55 = vcombine.high %v3802_v13, %v3806_v62  ;;  %v10210_v39 = vcombine.high %v3804_v47, %v3808_v22  ;;  %v3761_v49 = vsel %vm3754_vm13, %v15954_v61, %v3760_v16 }
 0x334   : > { %v3756_v2 = vsel %vm262_vm0, %v15962_v54, %v3749_v43  ;;  %4526 = vmatpush1.bf16.msra.mxu0 %v10211_v44  ;;  %4567 = vmatpush1.bf16.msra.mxu1 %v10213_v41  ;;  %v3759_v21 = vsel %vm3754_vm13, %v15955_v51, %v3758_v35  ;;  %v3755_v36 = vsel %vm3754_vm13, %v15960_v32, %v3753_v56  ;;  %v4218_v24 = vrot.slane %v13416_v23, 4 }
 0x335   : > { %4527 = vmatprep.subr.bf16.mxu0 %v10208_v55  ;;  %4568 = vmatprep.subr.bf16.mxu1 %v10210_v39  ;;  %v3757_v4 = vsel %vm3754_vm13, %v15958_v59, %v3756_v2  ;;  %v10209_v57 = vcombine.low %v3804_v47, %v3808_v22  ;;  %v10207_v33 = vcombine.low %v3802_v13, %v3806_v62  ;;  %v4217_v45 = vrot.slane %v13418_v60, 4  ;;  %v5025_v59 = vld [vmem:[%s11068_s21 + $0x14] sm:$0xf]  ;;  %v5028_v55 = vld [vmem:[%s11068_s21 + $0x30] sm:$0xf] }
 0x336   : > { %4999 = vrot.lane.b32.xlu1 %v4982_v29, %s10876_s7  ;;  %4997 = vrot.lane.b32.xlu0 %v13075_v20, %s10876_s7  ;;  %v10204_v61 = vcombine.high %v3755_v36, %v3759_v21  ;;  %v10206_v17 = vcombine.high %v3757_v4, %v3761_v49  ;;  %v10205_v1 = vcombine.low %v3757_v4, %v3761_v49  ;;  %vm4224_vm12 = vcmask 113664  }
 0x337   : > { %v4212_v46 = vpop.permute.xlu1 %4211  ;;  %v4210_v10 = vpop.permute.xlu0 %4209  ;;  %v4171_v37 = vrot.slane %v13330_v11, 4  ;;  %v4170_v51 = vrot.slane %v13332_v3, 4  ;;  %v4175_v8 = vrot.slane %v13390_v42, 4  ;;  %v4174_v0 = vrot.slane %v13392_v19, 4 }
 0x338   : > { %v4219_v12 = vrot.slane %v4210_v10, 4  ;;  %4528 = vmatpush1.bf16.msra.mxu0 %v10207_v33  ;;  %4569 = vmatpush1.bf16.msra.mxu1 %v10209_v57  ;;  %v4124_v50 = vrot.slane %v13242_v53, 4  ;;  %v4123_v28 = vrot.slane %v13244_v38, 4  ;;  %v4172_v31 = vrot.slane %v13362_v48, 4 }
 0x339   : > { %4529 = vmatprep.subr.bf16.mxu0 %v10204_v61  ;;  %4570 = vmatprep.subr.bf16.mxu1 %v10206_v17  ;;  %v10203_v43 = vcombine.low %v3755_v36, %v3759_v21  ;;  %v4126_v52 = vrot.slane %v13264_v14, 4  ;;  %v4128_v26 = vrot.slane %v13299_v63, 4  ;;  %v4173_v42 = vrot.slane %v13360_v30, 4 }
 0x33a   : > { %5037 = vrot.lane.b32.xlu1 %v13049_v34, %s10921_s20  ;;  %5035 = vrot.lane.b32.xlu0 %v13052_v25, %s10921_s20  ;;  %v4223_v9 = vsel %vm262_vm0, %v4217_v45, %v4218_v24  ;;  %v4220_v48 = vrot.slane %v4212_v46, 4  ;;  %v4226_v40 = vsel %vm262_vm0, %v4218_v24, %v4219_v12  ;;  %v4127_v56 = vrot.slane %v13301_v27, 4 }
 0x33b   : > { %v4216_v7 = vpop.permute.xlu1 %4215  ;;  %v4214_v15 = vpop.permute.xlu0 %4213  ;;  %v4176_v22 = vsel %vm262_vm0, %v4170_v51, %v4171_v37  ;;  %v4183_v63 = vsel %vm262_vm0, %v4174_v0, %v4175_v8  ;;  %v4181_v62 = vsel %vm262_vm0, %v4173_v42, %v4174_v0  ;;  %v4125_v16 = vrot.slane %v13266_v5, 4  ;;  %v5072_v8 = vld [vmem:[%s11068_s21 + $0x14] sm:$0xf] }
 0x33c   : > { %v4222_v32 = vrot.slane %v4216_v7, 4  ;;  %v4221_v58 = vrot.slane %v4214_v15, 4  ;;  %4530 = vmatpush1.bf16.msra.mxu0 %v10203_v43  ;;  %4571 = vmatpush1.bf16.msra.mxu1 %v10205_v1  ;;  %v4179_v13 = vsel %vm262_vm0, %v4171_v37, %v4172_v31  ;;  %v4225_v41 = vsel %vm4224_vm12, %v13418_v60, %v4223_v9  ;;  %v5075_v31 = vld [vmem:[%s11068_s21 + $0x30] sm:$0xf]  ;;  %v5488_v9 = vld [vmem:[%s11068_s21 + $0x14] sm:$0xf] }
 0x33d   : > { %v4227_v44 = vsel %vm4224_vm12, %v13416_v23, %v4226_v40  ;;  %v4184_v29 = vsel %vm4177_vm8, %v13392_v19, %v4183_v63  ;;  %v4182_v60 = vsel %vm4177_vm8, %v13360_v30, %v4181_v62  ;;  %v4136_v36 = vsel %vm262_vm0, %v4127_v56, %v4128_v26 }
 0x33e   : > { %v4230_v35 = vsel %vm262_vm0, %v4221_v58, %v4222_v32  ;;  %5041 = vrot.lane.b32.xlu1 %v13063_v18, %s10921_s20  ;;  %5039 = vrot.lane.b32.xlu0 %v5025_v59, %s10921_s20  ;;  %v4228_v47 = vsel %vm262_vm0, %v4220_v48, %v4221_v58  ;;  %v4134_v57 = vsel %vm262_vm0, %v4126_v52, %v4127_v56  ;;  %vm4130_vm13 = vcmask 130048   ;;  %v5491_v59 = vld [vmem:[%s11068_s21 + $0x30] sm:$0xf]  ;;  %v5534_v56 = vld [vmem:[%s11068_s21 + $0x14] sm:$0xf] }
 0x33f   : > { %v4231_v54 = vsel %vm4224_vm12, %v4214_v15, %v4230_v35  ;;  %v13467_v5 = vpop.permute.xlu1 %4623  ;;  %v13469_v2 = vpop.permute.xlu0 %4621  ;;  %v4229_v39 = vsel %vm4224_vm12, %v4212_v46, %v4228_v47  ;;  %v4129_v33 = vsel %vm262_vm0, %v4123_v28, %v4124_v50  ;;  %v4178_v24 = vsel %vm4177_vm8, %v13332_v3, %v4176_v22  ;;  %v5580_v47 = vld [vmem:[%s11068_s21 + $0x14] sm:$0xf] }
 0x340   : > { %15963 = vst [vmem:[#allocation14_spill] sm:$0xff] %v13467_v5  ;;  %15964 = vst [vmem:[#allocation19_spill] sm:$0xff] %v13469_v2  ;;  %v10245_v49 = vcombine.low %v4227_v44, %v4231_v54  ;;  %v10243_v21 = vcombine.low %v4225_v41, %v4229_v39  ;;  %v10244_v23 = vcombine.high %v4225_v41, %v4229_v39 }
 0x341   : > { %v10246_v4 = vcombine.high %v4227_v44, %v4231_v54  ;;  %v4180_v19 = vsel %vm4177_vm8, %v13330_v11, %v4179_v13  ;;  %v4132_v30 = vsel %vm262_vm0, %v4124_v50, %v4125_v16  ;;  %v10240_v10 = vcombine.high %v4178_v24, %v4182_v60  ;;  %v13578_v16 = vld [vmem:[%s11068_s21 + $0x4] sm:$0xff]  ;;  %v5583_v54 = vld [vmem:[%s11068_s21 + $0x30] sm:$0xf] }
 0x342   : > { %5045 = vrot.lane.b32.xlu1 %v5028_v55, %s10921_s20  ;;  %5043 = vrot.lane.b32.xlu0 %v13075_v20, %s10921_s20  ;;  %v10242_v61 = vcombine.high %v4180_v19, %v4184_v29  ;;  %v4137_v3 = vsel %vm4130_vm13, %v13301_v27, %v4136_v36  ;;  %v4135_v11 = vsel %vm4130_vm13, %v13264_v14, %v4134_v57  ;;  %v13601_v55 = vld [vmem:[%s11068_s21 + $0x28] sm:$0xff] }
 0x343   : > { %4541 = vmatprep.subr.bf16.mxu0 %v10244_v23  ;;  %4582 = vmatprep.subr.bf16.mxu1 %v10246_v4  ;;  %v13488_v45 = vpop.permute.xlu1 %4627  ;;  %v13490_v46 = vpop.permute.xlu0 %4625  ;;  %v4131_v17 = vsel %vm4130_vm13, %v13244_v38, %v4129_v33  ;;  %v4133_v1 = vsel %vm4130_vm13, %v13242_v53, %v4132_v30  ;;  %v10241_v12 = vcombine.low %v4180_v19, %v4184_v29  ;;  %v5629_v4 = vld [vmem:[%s11068_s21 + $0x30] sm:$0xf]  ;;  %v5672_v30 = vld [vmem:[%s11068_s21 + $0x14] sm:$0xf] }
 0x344   : > { %15965 = vst [vmem:[#allocation15_spill] sm:$0xff] %v13488_v45  ;;  %15966 = vst [vmem:[#allocation20_spill] sm:$0xff] %v13490_v46  ;;  %4542 = vmatpush2.bf16.msra.mxu0 %v10243_v21  ;;  %4583 = vmatpush2.bf16.msra.mxu1 %v10245_v49  ;;  %v10239_v37 = vcombine.low %v4178_v24, %v4182_v60  ;;  %v10236_v38 = vcombine.high %v4131_v17, %v4135_v11  ;;  %v5626_v60 = vld [vmem:[%s11068_s21 + $0x14] sm:$0xf] }
 0x345   : > { %4543 = vmatprep.subr.bf16.mxu0 %v10240_v10  ;;  %4584 = vmatprep.subr.bf16.mxu1 %v10242_v61  ;;  %v10238_v51 = vcombine.high %v4133_v1, %v4137_v3  ;;  %v10237_v53 = vcombine.low %v4133_v1, %v4137_v3  ;;  %v10235_v0 = vcombine.low %v4131_v17, %v4135_v11  ;;  %v5675_v3 = vld [vmem:[%s11068_s21 + $0x30] sm:$0xf] }
 0x346   : > { %5084 = vrot.lane.b32.xlu1 %v13049_v34, %s10922_s22  ;;  %5082 = vrot.lane.b32.xlu0 %v13052_v25, %s10922_s22  ;;  %v10201_v43 = vcombine.low %v13278_v6, %v13278_v6 }
 0x347   : > { %v13504_v27 = vpop.permute.xlu1 %4631  ;;  %v13506_v14 = vpop.permute.xlu0 %4629 }
 0x348   : > { %15967 = vst [vmem:[#allocation16_spill] sm:$0xff] %v13504_v27  ;;  %15968 = vst [vmem:[#allocation13_spill] sm:$0xff] %v13506_v14  ;;  %4544 = vmatpush2.bf16.msra.mxu0 %v10239_v37  ;;  %4585 = vmatpush2.bf16.msra.mxu1 %v10241_v12  ;;  %v5718_v37 = vld [vmem:[%s11068_s21 + $0x14] sm:$0xf] }
 0x349   : > { %4545 = vmatprep.subr.bf16.mxu0 %v10236_v38  ;;  %4586 = vmatprep.subr.bf16.mxu1 %v10238_v51  ;;  %v5721_v38 = vld [vmem:[%s11068_s21 + $0x30] sm:$0xf] }
 0x34a   : > { %5088 = vrot.lane.b32.xlu1 %v13063_v18, %s10922_s22  ;;  %5086 = vrot.lane.b32.xlu0 %v5072_v8, %s10922_s22 }
 0x34b   : > { %v13512_v50 = vpop.permute.xlu1 %4669  ;;  %v13514_v28 = vpop.permute.xlu0 %4667 }
 0x34c   : > { %15969 = vst [vmem:[#allocation22_spill] sm:$0xff] %v13512_v50  ;;  %15970 = vst [vmem:[#allocation23_spill] sm:$0xff] %v13514_v28  ;;  %4546 = vmatpush2.bf16.msra.mxu0 %v10235_v0  ;;  %4587 = vmatpush2.bf16.msra.mxu1 %v10237_v53 }
 0x34e   : > { %5092 = vrot.lane.b32.xlu1 %v5075_v31, %s10922_s22  ;;  %5090 = vrot.lane.b32.xlu0 %v13075_v20, %s10922_s22 }
 0x34f   : > { %v13522_v52 = vpop.permute.xlu1 %4673  ;;  %v13524_v26 = vpop.permute.xlu0 %4671  ;;  %4548 = vmatmul.mubr.bf16.vlgmr.msra.gmra.mxu0 %v10201_v43  ;;  %4589 = vmatmul.mubr.bf16.vlgmr.msra.gmra.mxu1 %v10201_v43 }
 0x350   : > { %15971 = vst [vmem:[#allocation18_spill] sm:$0xff] %v13522_v52  ;;  %15972 = vst [vmem:[#allocation21_spill] sm:$0xff] %v13524_v26 }
 0x352   : > { %5500 = vrot.lane.b32.xlu1 %v13049_v34, %s10879_s19  ;;  %5498 = vrot.lane.b32.xlu0 %v13052_v25, %s10879_s19 }
 0x353   : > { %v13530_v6 = vpop.permute.xlu1 %4677  ;;  %v13532_v42 = vpop.permute.xlu0 %4675 }
 0x354   : > { %15973 = vst [vmem:[#allocation17_spill] sm:$0xff] %v13532_v42 }
 0x356   : > { %5504 = vrot.lane.b32.xlu1 %v13063_v18, %s10879_s19  ;;  %5502 = vrot.lane.b32.xlu0 %v5488_v9, %s10879_s19 }
 0x357   : > { %v13538_v7 = vpop.permute.xlu1 %4715  ;;  %v13540_v15 = vpop.permute.xlu0 %4713 }
 0x35a   : > { %5508 = vrot.lane.b32.xlu1 %v5491_v59, %s10879_s19  ;;  %5506 = vrot.lane.b32.xlu0 %v13075_v20, %s10879_s19  ;;  %s15974_s19 = smov 96  }
 0x35b   : > { %v13546_v48 = vpop.permute.xlu1 %4719  ;;  %v13548_v40 = vpop.permute.xlu0 %4717 }
 0x35e   : > { %5546 = vrot.lane.b32.xlu1 %v13049_v34, %s10880_s25  ;;  %5544 = vrot.lane.b32.xlu0 %v13052_v25, %s10880_s25  ;;  %v5537_v34 = vld [vmem:[%s11068_s21 + $0x30] sm:$0xf] }
 0x35f   : > { %v13554_v32 = vpop.permute.xlu1 %4723  ;;  %v13556_v58 = vpop.permute.xlu0 %4721 }
 0x362   : > { %5550 = vrot.lane.b32.xlu1 %v13063_v18, %s10880_s25  ;;  %5548 = vrot.lane.b32.xlu0 %v5534_v56, %s10880_s25  ;;  %v13575_v18 = vld [vmem:[%s11068_s21 + $0xc] sm:$0xff] }
 0x363   : > { %v13562_v22 = vpop.permute.xlu1 %4761  ;;  %v13564_v63 = vpop.permute.xlu0 %4759 }
 0x366   : > { %5554 = vrot.lane.b32.xlu1 %v5537_v34, %s10880_s25  ;;  %5552 = vrot.lane.b32.xlu0 %v13075_v20, %s10880_s25  ;;  %v13589_v20 = vld [vmem:[%s11068_s21 + $0x20] sm:$0xff]  ;;  %s15975_s25 = smov 95  }
 0x367   : > { %v13570_v25 = vpop.permute.xlu1 %4765  ;;  %v13572_v62 = vpop.permute.xlu0 %4763 }
 0x36a   : > { %5592 = vrot.lane.b32.xlu1 %v13575_v18, %s10881_s29  ;;  %5590 = vrot.lane.b32.xlu0 %v13578_v16, %s10881_s29 }
 0x36b   : > { %v13584_v13 = vpop.permute.xlu1 %4769  ;;  %v13586_v35 = vpop.permute.xlu0 %4767 }
 0x36e   : > { %5596 = vrot.lane.b32.xlu1 %v13589_v20, %s10881_s29  ;;  %5594 = vrot.lane.b32.xlu0 %v5580_v47, %s10881_s29 }
 0x36f   : > { %v13595_v41 = vpop.permute.xlu1 %4807  ;;  %v13597_v44 = vpop.permute.xlu0 %4805 }
 0x370   : > { %v15740_v53 = vrot.slane %v13595_v41, 4  ;;  %v4817_v0 = vrot.slane %v13597_v44, 4 }
 0x372   : > { %5600 = vrot.lane.b32.xlu1 %v5583_v54, %s10881_s29  ;;  %5598 = vrot.lane.b32.xlu0 %v13601_v55, %s10881_s29  ;;  %s15976_s29 = smov 94  }
 0x373   : > { %v13606_v39 = vpop.permute.xlu1 %4811  ;;  %v13608_v29 = vpop.permute.xlu0 %4809 }
 0x376   : > { %5638 = vrot.lane.b32.xlu1 %v13575_v18, %s10882_s24  ;;  %5636 = vrot.lane.b32.xlu0 %v13578_v16, %s10882_s24 }
 0x377   : > { %v13614_v49 = vpop.permute.xlu1 %4815  ;;  %v13616_v21 = vpop.permute.xlu0 %4813 }
 0x37a   : > { %5642 = vrot.lane.b32.xlu1 %v13589_v20, %s10882_s24  ;;  %5640 = vrot.lane.b32.xlu0 %v5626_v60, %s10882_s24 }
 0x37b   : > { %v13622_v36 = vpop.permute.xlu1 %4853  ;;  %v13624_v23 = vpop.permute.xlu0 %4851 }
 0x37e   : > { %5646 = vrot.lane.b32.xlu1 %v5629_v4, %s10882_s24  ;;  %5644 = vrot.lane.b32.xlu0 %v13601_v55, %s10882_s24  ;;  %s15980_s24 = smov 93  }
 0x37f   : > { %v13630_v57 = vpop.permute.xlu1 %4857  ;;  %v13632_v33 = vpop.permute.xlu0 %4855 }
 0x380   : > { %v4865_v50 = vrot.slane %v13632_v33, 4 }
 0x382   : > { %5684 = vrot.lane.b32.xlu1 %v13575_v18, %s15974_s19  ;;  %5682 = vrot.lane.b32.xlu0 %v13578_v16, %s15974_s19 }
 0x383   : > { %v13638_v24 = vpop.permute.xlu1 %4861  ;;  %v13640_v19 = vpop.permute.xlu0 %4859 }
 0x384   : > { %v4868_v31 = vrot.slane %v13638_v24, 4  ;;  %v4867_v59 = vrot.slane %v13640_v19, 4  ;;  %v4863_v24 = vrot.slane %v13624_v23, 4 }
 0x386   : > { %5688 = vrot.lane.b32.xlu1 %v13589_v20, %s15974_s19  ;;  %5686 = vrot.lane.b32.xlu0 %v5672_v30, %s15974_s19 }
 0x387   : > { %v13646_v10 = vpop.permute.xlu1 %4899  ;;  %v13648_v61 = vpop.permute.xlu0 %4897 }
 0x388   : > { %v4910_v56 = vrot.slane %v13646_v10, 4  ;;  %v4909_v47 = vrot.slane %v13648_v61, 4 }
 0x38a   : > { %5692 = vrot.lane.b32.xlu1 %v5675_v3, %s15974_s19  ;;  %5690 = vrot.lane.b32.xlu0 %v13601_v55, %s15974_s19  ;;  %v13682_v3 = vsel %vm262_vm0, %v4817_v0, %v15740_v53  ;;  %v4864_v0 = vrot.slane %v13622_v36, 4  ;;  %v5764_v53 = vld [vmem:[%s11068_s21 + $0x14] sm:$0xf]  ;;  %v4915_v26 = vsel %vm262_vm0, %v4909_v47, %v4910_v56  ;;  %s15997_s19 = smov 92  }
 0x38b   : > { %v13654_v11 = vpop.permute.xlu1 %4903  ;;  %v4902_v17 = vpop.permute.xlu0 %4901 }
 0x38e   : > { %5730 = vrot.lane.b32.xlu1 %v13575_v18, %s15975_s25  ;;  %5728 = vrot.lane.b32.xlu0 %v13578_v16, %s15975_s25 }
 0x38f   : > { %v4908_v1 = vpop.permute.xlu1 %4907  ;;  %v13660_v12 = vpop.permute.xlu0 %4905 }
 0x390   : > { %v4914_v9 = vrot.slane %v4908_v1, 4  ;;  %v4913_v34 = vrot.slane %v13660_v12, 4  ;;  %v4866_v1 = vrot.slane %v13630_v57, 4 }
 0x392   : > { %5734 = vrot.lane.b32.xlu1 %v13589_v20, %s15975_s25  ;;  %5732 = vrot.lane.b32.xlu0 %v5718_v37, %s15975_s25  ;;  %v4921_v27 = vsel %vm262_vm0, %v4913_v34, %v4914_v9 }
 0x393   : > { %v4946_v51 = vpop.permute.xlu1 %4945  ;;  %v4944_v8 = vpop.permute.xlu0 %4943 }
 0x394   : > { %v4956_v54 = vrot.slane %v4946_v51, 4  ;;  %v4955_v60 = vrot.slane %v4944_v8, 4 }
 0x396   : > { %5738 = vrot.lane.b32.xlu1 %v5721_v38, %s15975_s25  ;;  %5736 = vrot.lane.b32.xlu0 %v13601_v55, %s15975_s25  ;;  %v4912_v38 = vrot.slane %v13654_v11, 4  ;;  %v4961_v37 = vsel %vm262_vm0, %v4955_v60, %v4956_v54  ;;  %s10923_s25 = smov 91  }
 0x397   : > { %v4950_v4 = vpop.permute.xlu1 %4949  ;;  %v4948_v30 = vpop.permute.xlu0 %4947 }
 0x398   : > { %v4957_v43 = vrot.slane %v4948_v30, 4  ;;  %v4911_v30 = vrot.slane %v4902_v17, 4  ;;  %v4958_v46 = vrot.slane %v4950_v4, 4  ;;  %v4875_v17 = vsel %vm262_vm0, %v4867_v59, %v4868_v31 }
 0x399   : > { %v4919_v60 = vsel %vm262_vm0, %v4912_v38, %v4913_v34  ;;  %v4962_v31 = vsel %vm640_vm9, %v4944_v8, %v4961_v37  ;;  %v4820_v8 = vrot.slane %v13606_v39, 4  ;;  %v4871_v37 = vsel %vm262_vm0, %v4864_v0, %v4865_v50 }
 0x39a   : > { %5776 = vrot.lane.b32.xlu1 %v13575_v18, %s15976_s29  ;;  %5774 = vrot.lane.b32.xlu0 %v13578_v16, %s15976_s29  ;;  %v4963_v45 = vsel %vm262_vm0, %v4956_v54, %v4957_v43  ;;  %v4917_v52 = vsel %vm262_vm0, %v4910_v56, %v4911_v30  ;;  %v5767_v43 = vld [vmem:[%s11068_s21 + $0x30] sm:$0xf]  ;;  %v4922_v56 = vsel %vm593_vm11, %v13660_v12, %v4921_v27 }
 0x39b   : > { %v4954_v2 = vpop.permute.xlu1 %4953  ;;  %v4952_v5 = vpop.permute.xlu0 %4951  ;;  %v4964_v9 = vsel %vm640_vm9, %v4946_v51, %v4963_v45  ;;  %v4873_v51 = vsel %vm262_vm0, %v4866_v1, %v4867_v59  ;;  %v4869_v27 = vsel %vm262_vm0, %v4863_v24, %v4864_v0  ;;  %v4916_v12 = vsel %vm593_vm11, %v13648_v61, %v4915_v26 }
 0x39c   : > { %v4960_v14 = vrot.slane %v4954_v2, 4  ;;  %v4959_v28 = vrot.slane %v4952_v5, 4  ;;  %v4776_v24 = vrot.slane %v13584_v13, 4  ;;  %v15978_v26 = vrot.slane %v13616_v21, 4 }
 0x39d   : > { %v4874_v50 = vsel %vm15784_vm1, %v13630_v57, %v4873_v51  ;;  %v4775_v61 = vrot.slane %v13586_v35, 4  ;;  %v4870_v13 = vsel %vm15784_vm1, %v13624_v23, %v4869_v27  ;;  %v4872_v57 = vsel %vm15784_vm1, %v13622_v36, %v4871_v37 }
 0x39e   : > { %5780 = vrot.lane.b32.xlu1 %v13589_v20, %s15976_s29  ;;  %5778 = vrot.lane.b32.xlu0 %v5764_v53, %s15976_s29  ;;  %v4967_v2 = vsel %vm262_vm0, %v4959_v28, %v4960_v14  ;;  %v4965_v33 = vsel %vm262_vm0, %v4958_v46, %v4959_v28  ;;  %v4920_v46 = vsel %vm593_vm11, %v13654_v11, %v4919_v60  ;;  %v4771_v28 = vrot.slane %v13564_v63, 4 }
 0x39f   : > { %v4968_v54 = vsel %vm640_vm9, %v4952_v5, %v4967_v2  ;;  %v13717_v42 = vpop.permute.xlu1 %4991  ;;  %v13719_v53 = vpop.permute.xlu0 %4989  ;;  %v4966_v34 = vsel %vm640_vm9, %v4950_v4, %v4965_v33  ;;  %v4918_v11 = vsel %vm593_vm11, %v13646_v10, %v4917_v52  ;;  %v4819_v4 = vrot.slane %v13608_v29, 4  ;;  %v13753_v10 = vld [vmem:[#allocation7 + $0x28] sm:$0xff] }
 0x3a0   : > { %v10281_v47 = vcombine.low %v4964_v9, %v4968_v54  ;;  %v10279_v14 = vcombine.low %v4962_v31, %v4966_v34  ;;  %v10280_v5 = vcombine.high %v4962_v31, %v4966_v34  ;;  %v10282_v45 = vcombine.high %v4964_v9, %v4968_v54 }
 0x3a1   : > { %v10276_v59 = vcombine.high %v4916_v12, %v4920_v46  ;;  %v10278_v1 = vcombine.high %v4918_v11, %v4922_v56  ;;  %v15977_v60 = vrot.slane %v13614_v49, 4  ;;  %v4876_v29 = vsel %vm15784_vm1, %v13640_v19, %v4875_v17 }
 0x3a2   : > { %5784 = vrot.lane.b32.xlu1 %v5767_v43, %s15976_s29  ;;  %5782 = vrot.lane.b32.xlu0 %v13601_v55, %s15976_s29  ;;  %v15979_v49 = vmov %v15978_v26  ;;  %v10250_v19 = vcombine.high %v13753_v10, %v13753_v10  ;;  %v4774_v17 = vrot.slane %v13570_v25, 4  ;;  %v10277_v2 = vcombine.low %v4918_v11, %v4922_v56  ;;  %v5810_v56 = vld [vmem:[%s11068_s21 + $0x14] sm:$0xf]  ;;  %s10924_s29 = smov 90  }
 0x3a3   : > { %5392 = vmatprep.subr.bf16.mxu0 %v10280_v5  ;;  %5433 = vmatprep.subr.bf16.mxu1 %v10282_v45  ;;  %v4829_v52 = vsel %vm262_vm0, %v15978_v26, %v15977_v60  ;;  %v4827_v0 = vsel %vm262_vm0, %v4820_v8, %v15979_v49  ;;  %v10275_v43 = vcombine.low %v4916_v12, %v4920_v46  ;;  %v4773_v23 = vrot.slane %v13572_v62, 4  ;;  %v15987_v49 = vld [vmem:[#allocation18_spill] sm:$0xff] }
 0x3a4   : > { %v13739_v38 = vpop.permute.xlu1 %4995  ;;  %v13741_v30 = vpop.permute.xlu0 %4993  ;;  %5393 = vmatpush1.bf16.msra.mxu0 %v10279_v14  ;;  %5434 = vmatpush1.bf16.msra.mxu1 %v10281_v47  ;;  %v15981_v33 = vrot.slane %v13595_v41, 4  ;;  %v10272_v34 = vcombine.high %v4870_v13, %v4874_v50  ;;  %v10274_v36 = vcombine.high %v4872_v57, %v4876_v29  ;;  %v4730_v47 = vrot.slane %v13554_v32, 4 }
 0x3a5   : > { %5394 = vmatprep.subr.bf16.mxu0 %v10276_v59  ;;  %5435 = vmatprep.subr.bf16.mxu1 %v10278_v1  ;;  %v15982_v14 = vrot.slane %v13562_v22, 4  ;;  %v4830_v46 = vsel %vm15783_vm2, %v13616_v21, %v4829_v52  ;;  %v4828_v5 = vsel %vm15783_vm2, %v13606_v39, %v4827_v0  ;;  %v4729_v45 = vrot.slane %v13556_v58, 4 }
 0x3a6   : > { %5822 = vrot.lane.b32.xlu1 %v13575_v18, %s15980_s24  ;;  %5820 = vrot.lane.b32.xlu0 %v13578_v16, %s15980_s24  ;;  %v4825_v31 = vsel %vm262_vm0, %v15981_v33, %v4819_v4  ;;  %v4783_v51 = vsel %vm262_vm0, %v4775_v61, %v4776_v24  ;;  %v4824_v32 = vsel %vm15783_vm2, %v13597_v44, %v13682_v3  ;;  %v4728_v21 = vrot.slane %v13546_v48, 4 }
 0x3a7   : > { %10295 = vmatprep.mubr.msk.bf16.mxu0 %vm974_vm7, %v10250_v19  ;;  %10296 = vmatprep.mubr.msk.bf16.mxu1 %vm974_vm7, %v10250_v19  ;;  %v4777_v62 = vsel %vm262_vm0, %v4771_v28, %v15982_v14  ;;  %v4781_v28 = vsel %vm262_vm0, %v4774_v17, %v4775_v61  ;;  %v4826_v8 = vsel %vm15783_vm2, %v13595_v41, %v4825_v31  ;;  %v4727_v12 = vrot.slane %v13548_v40, 4  ;;  %v5813_v41 = vld [vmem:[%s11068_s21 + $0x30] sm:$0xf] }
 0x3a8   : > { %v13774_v9 = vpop.permute.xlu1 %4999  ;;  %v13776_v54 = vpop.permute.xlu0 %4997  ;;  %5395 = vmatpush1.bf16.msra.mxu0 %v10275_v43  ;;  %5436 = vmatpush1.bf16.msra.mxu1 %v10277_v2  ;;  %v10273_v27 = vcombine.low %v4872_v57, %v4876_v29  ;;  %v10271_v39 = vcombine.low %v4870_v13, %v4874_v50  ;;  %v15983_v44 = vmov %v15982_v14  ;;  %v10268_v37 = vcombine.high %v4824_v32, %v4828_v5  ;;  %v15986_v29 = vld [vmem:[#allocation17_spill] sm:$0xff] }
 0x3a9   : > { %5396 = vmatprep.subr.bf16.mxu0 %v10272_v34  ;;  %5437 = vmatprep.subr.bf16.mxu1 %v10274_v36  ;;  %v4779_v3 = vsel %vm262_vm0, %v15983_v44, %v4773_v23  ;;  %v10270_v59 = vcombine.high %v4826_v8, %v4830_v46  ;;  %v4684_v1 = vrot.slane %v13530_v6, 4  ;;  %v15984_v24 = vrot.slane %v13538_v7, 4  ;;  %v15991_v36 = vld [vmem:[#allocation22_spill] sm:$0xff] }
 0x3aa   : > { %5826 = vrot.lane.b32.xlu1 %v13589_v20, %s15980_s24  ;;  %5824 = vrot.lane.b32.xlu0 %v5810_v56, %s15980_s24  ;;  %v15985_v60 = vrot.slane %v13540_v15, 4  ;;  %v4784_v40 = vsel %vm15768_vm3, %v13586_v35, %v4783_v51  ;;  %v4782_v52 = vsel %vm15768_vm3, %v13570_v25, %v4781_v28  ;;  %v4683_v50 = vrot.slane %v15986_v29, 4  ;;  %v15988_v25 = vld [vmem:[#allocation21_spill] sm:$0xff] }
 0x3ab   : > { %v4737_v61 = vsel %vm262_vm0, %v4729_v45, %v4730_v47  ;;  %v4778_v6 = vsel %vm15768_vm3, %v13564_v63, %v4777_v62  ;;  %v4735_v13 = vsel %vm262_vm0, %v4728_v21, %v4729_v45  ;;  %v4682_v0 = vrot.slane %v15987_v49, 4  ;;  %v15993_v47 = vld [vmem:[#allocation23_spill] sm:$0xff]  ;;  %v15995_v45 = vld [vmem:[#allocation13_spill] sm:$0xff] }
 0x3ac   : > { %v13805_v11 = vpop.permute.xlu1 %5037  ;;  %v13807_v4 = vpop.permute.xlu0 %5035  ;;  %v4731_v26 = vsel %vm262_vm0, %v15985_v60, %v15984_v24  ;;  %5397 = vmatpush1.bf16.msra.mxu0 %v10271_v39  ;;  %5438 = vmatpush1.bf16.msra.mxu1 %v10273_v27  ;;  %v4780_v35 = vsel %vm15768_vm3, %v13562_v22, %v4779_v3  ;;  %v10269_v19 = vcombine.low %v4826_v8, %v4830_v46  ;;  %v4681_v57 = vrot.slane %v15988_v25, 4  ;;  %v15990_v22 = vld [vmem:[#allocation16_spill] sm:$0xff]  ;;  %v15996_v8 = vld [vmem:[#allocation15_spill] sm:$0xff] }
 0x3ad   : > { %5398 = vmatprep.subr.bf16.mxu0 %v10268_v37  ;;  %5439 = vmatprep.subr.bf16.mxu1 %v10270_v59  ;;  %v10267_v17 = vcombine.low %v4824_v32, %v4828_v5  ;;  %v15989_v63 = vmov %v15984_v24  ;;  %v10264_v33 = vcombine.high %v4778_v6, %v4782_v52  ;;  %v10266_v31 = vcombine.high %v4780_v35, %v4784_v40  ;;  %v16000_v24 = vld [vmem:[#allocation14_spill] sm:$0xff] }
 0x3ae   : > { %5830 = vrot.lane.b32.xlu1 %v5813_v41, %s15980_s24  ;;  %5828 = vrot.lane.b32.xlu0 %v13601_v55, %s15980_s24  ;;  %v4733_v2 = vsel %vm262_vm0, %v15989_v63, %v4727_v12  ;;  %v4638_v34 = vrot.slane %v15990_v22, 4  ;;  %v15992_v56 = vrot.slane %v15991_v36, 4  ;;  %v15994_v14 = vrot.slane %v15993_v47, 4  ;;  %s16015_s24 = smov 74  }
 0x3af   : > { %v4738_v46 = vsel %vm15753_vm4, %v13556_v58, %v4737_v61  ;;  %v4736_v5 = vsel %vm15753_vm4, %v13546_v48, %v4735_v13  ;;  %v4637_v51 = vrot.slane %v15995_v45, 4  ;;  %v4691_v32 = vsel %vm262_vm0, %v4683_v50, %v4684_v1  ;;  %v15998_v48 = vld [vmem:[#allocation20_spill] sm:$0xff]  ;;  %v5856_v1 = vld [vmem:[%s11068_s21 + $0x14] sm:$0xf] }
 0x3b0   : > { %v13835_v43 = vpop.permute.xlu1 %5041  ;;  %v13837_v23 = vpop.permute.xlu0 %5039  ;;  %v4685_v62 = vsel %vm262_vm0, %v15994_v14, %v15992_v56  ;;  %5399 = vmatpush1.bf16.msra.mxu0 %v10267_v17  ;;  %5440 = vmatpush1.bf16.msra.mxu1 %v10269_v19  ;;  %v4732_v28 = vsel %vm15753_vm4, %v13540_v15, %v4731_v26  ;;  %v4689_v21 = vsel %vm262_vm0, %v4682_v0, %v4683_v50  ;;  %v4636_v27 = vrot.slane %v15996_v8, 4  ;;  %v16002_v26 = vld [vmem:[#allocation19_spill] sm:$0xff] }
 0x3b1   : > { %5400 = vmatprep.subr.bf16.mxu0 %v10264_v33  ;;  %5441 = vmatprep.subr.bf16.mxu1 %v10266_v31  ;;  %v4734_v58 = vsel %vm15753_vm4, %v13538_v7, %v4733_v2  ;;  %v10265_v39 = vcombine.low %v4780_v35, %v4784_v40  ;;  %v10263_v12 = vcombine.low %v4778_v6, %v4782_v52  ;;  %v4635_v15 = vrot.slane %v15998_v48, 4  ;;  %v5859_v33 = vld [vmem:[%s11068_s21 + $0x30] sm:$0xf] }
 0x3b2   : > { %5868 = vrot.lane.b32.xlu1 %v13575_v18, %s15997_s19  ;;  %5866 = vrot.lane.b32.xlu0 %v13578_v16, %s15997_s19  ;;  %v15999_v44 = vmov %v15992_v56  ;;  %v10260_v41 = vcombine.high %v4732_v28, %v4736_v5  ;;  %v10262_v7 = vcombine.high %v4734_v58, %v4738_v46  ;;  %v16001_v60 = vrot.slane %v16000_v24, 4 }
 0x3b3   : > { %v4687_v3 = vsel %vm262_vm0, %v15999_v44, %v4681_v57  ;;  %v16003_v40 = vrot.slane %v16002_v26, 4  ;;  %v4692_v50 = vsel %vm358_vm5, %v15986_v29, %v4691_v32  ;;  %v4690_v61 = vsel %vm358_vm5, %v15987_v49, %v4689_v21 }
 0x3b4   : > { %v13865_v37 = vpop.permute.xlu1 %5045  ;;  %v13867_v59 = vpop.permute.xlu0 %5043  ;;  %5401 = vmatpush1.bf16.msra.mxu0 %v10263_v12  ;;  %5442 = vmatpush1.bf16.msra.mxu1 %v10265_v39  ;;  %v4645_v6 = vsel %vm262_vm0, %v4637_v51, %v4638_v34  ;;  %v4686_v13 = vsel %vm358_vm5, %v15993_v47, %v4685_v62  ;;  %v4643_v0 = vsel %vm262_vm0, %v4636_v27, %v4637_v51  ;;  %vm15767_vm4 = vcmask 949248  }
 0x3b5   : > { %v4639_v52 = vsel %vm262_vm0, %v16003_v40, %v16001_v60  ;;  %5402 = vmatprep.subr.bf16.mxu0 %v10260_v41  ;;  %5443 = vmatprep.subr.bf16.mxu1 %v10262_v7  ;;  %v4688_v35 = vsel %vm358_vm5, %v15991_v36, %v4687_v3  ;;  %v10261_v19 = vcombine.low %v4734_v58, %v4738_v46  ;;  %vm5054_vm5 = vcmask 957440  }
 0x3b6   : > { %v10259_v29 = vcombine.low %v4732_v28, %v4736_v5  ;;  %5872 = vrot.lane.b32.xlu1 %v13589_v20, %s15997_s19  ;;  %5870 = vrot.lane.b32.xlu0 %v5856_v1, %s15997_s19  ;;  %v16004_v49 = vmov %v16001_v60  ;;  %v10256_v63 = vcombine.high %v4686_v13, %v4690_v61  ;;  %v10258_v2 = vcombine.high %v4688_v35, %v4692_v50 }
 0x3b7   : > { %v4641_v17 = vsel %vm262_vm0, %v16004_v49, %v4635_v15  ;;  %v4646_v31 = vsel %vm311_vm6, %v15995_v45, %v4645_v6  ;;  %v4644_v22 = vsel %vm311_vm6, %v15996_v8, %v4643_v0  ;;  %v4640_v34 = vsel %vm311_vm6, %v16002_v26, %v4639_v52 }
 0x3b8   : > { %v13891_v25 = vpop.permute.xlu1 %5084  ;;  %v13893_v57 = vpop.permute.xlu0 %5082  ;;  %5403 = vmatpush1.bf16.msra.mxu0 %v10259_v29  ;;  %5444 = vmatpush1.bf16.msra.mxu1 %v10261_v19  ;;  %v4642_v36 = vsel %vm311_vm6, %v16000_v24, %v4641_v17  ;;  %v10257_v56 = vcombine.low %v4688_v35, %v4692_v50  ;;  %v10255_v47 = vcombine.low %v4686_v13, %v4690_v61  ;;  %v5048_v21 = vrot.slane %v13805_v11, 4  ;;  %v5902_v24 = vld [vmem:[%s11068_s21 + $0x14] sm:$0xf] }
 0x3b9   : > { %5404 = vmatprep.subr.bf16.mxu0 %v10256_v63  ;;  %5445 = vmatprep.subr.bf16.mxu1 %v10258_v2  ;;  %v5095_v14 = vrot.slane %v13891_v25, 4  ;;  %v5094_v62 = vrot.slane %v13893_v57, 4  ;;  %v10252_v45 = vcombine.high %v4640_v34, %v4644_v22  ;;  %v10254_v51 = vcombine.high %v4642_v36, %v4646_v31  ;;  %v5905_v63 = vld [vmem:[%s11068_s21 + $0x30] sm:$0xf] }
 0x3ba   : > { %5876 = vrot.lane.b32.xlu1 %v5859_v33, %s15997_s19  ;;  %5874 = vrot.lane.b32.xlu0 %v13601_v55, %s15997_s19  ;;  %v10253_v32 = vcombine.low %v4642_v36, %v4646_v31  ;;  %v5047_v8 = vrot.slane %v13807_v4, 4  ;;  %v5052_v27 = vrot.slane %v13865_v37, 4  ;;  %v5051_v58 = vrot.slane %v13867_v59, 4  ;;  %s16017_s19 = smov 73  }
 0x3bb   : > { %v5002_v39 = vrot.slane %v13717_v42, 4  ;;  %v5001_v12 = vrot.slane %v13719_v53, 4  ;;  %v5049_v48 = vrot.slane %v13837_v23, 4  ;;  %v10251_v15 = vcombine.low %v4640_v34, %v4644_v22 }
 0x3bc   : > { %v5089_v46 = vpop.permute.xlu1 %5088  ;;  %v5087_v5 = vpop.permute.xlu0 %5086  ;;  %5405 = vmatpush1.bf16.msra.mxu0 %v10255_v47  ;;  %5446 = vmatpush1.bf16.msra.mxu1 %v10257_v56  ;;  %v5004_v44 = vrot.slane %v13739_v38, 4  ;;  %v5006_v3 = vrot.slane %v13774_v9, 4  ;;  %v5050_v37 = vrot.slane %v13835_v43, 4  ;;  %v5100_v41 = vsel %vm262_vm0, %v5094_v62, %v5095_v14 }
 0x3bd   : > { %v5096_v28 = vrot.slane %v5087_v5, 4  ;;  %5406 = vmatprep.subr.bf16.mxu0 %v10252_v45  ;;  %5447 = vmatprep.subr.bf16.mxu1 %v10254_v51  ;;  %v5097_v23 = vrot.slane %v5089_v46, 4  ;;  %v5005_v52 = vrot.slane %v13776_v54, 4  ;;  %v5053_v50 = vsel %vm262_vm0, %v5047_v8, %v5048_v21 }
 0x3be   : > { %5914 = vrot.lane.b32.xlu1 %v13575_v18, %s10923_s25  ;;  %5912 = vrot.lane.b32.xlu0 %v13578_v16, %s10923_s25  ;;  %v5060_v9 = vsel %vm262_vm0, %v5051_v58, %v5052_v27  ;;  %v5058_v61 = vsel %vm262_vm0, %v5050_v37, %v5051_v58  ;;  %v5003_v6 = vrot.slane %v13741_v30, 4  ;;  %v5056_v13 = vsel %vm262_vm0, %v5048_v21, %v5049_v48  ;;  %v5952_v48 = vld [vmem:[%s11068_s21 + $0x30] sm:$0xf] }
 0x3bf   : > { %v5103_v60 = vsel %vm262_vm0, %v5095_v14, %v5096_v28  ;;  %v5102_v19 = vsel %vm15767_vm4, %v13893_v57, %v5100_v41  ;;  %v5061_v33 = vsel %vm5054_vm5, %v13867_v59, %v5060_v9  ;;  %v5059_v57 = vsel %vm5054_vm5, %v13835_v43, %v5058_v61  ;;  %v6365_v41 = vld [vmem:[%s11068_s21 + $0x14] sm:$0xf]  ;;  %v6414_v61 = vld [vmem:[%s11068_s21 + $0x30] sm:$0xf] }
 0x3c0   : > { %v5093_v7 = vpop.permute.xlu1 %5092  ;;  %v5091_v1 = vpop.permute.xlu0 %5090  ;;  %5407 = vmatpush1.bf16.msra.mxu0 %v10251_v15  ;;  %5448 = vmatpush1.bf16.msra.mxu1 %v10253_v32  ;;  %v5104_v29 = vsel %vm15767_vm4, %v13891_v25, %v5103_v60  ;;  %v5013_v34 = vsel %vm262_vm0, %v5005_v52, %v5006_v3  ;;  %v5011_v56 = vsel %vm262_vm0, %v5004_v44, %v5005_v52  ;;  %v6411_v52 = vld [vmem:[%s11068_s21 + $0x14] sm:$0xf]  ;;  %vm16023_vm6 = vcmask 769024  }
 0x3c1   : > { %v5099_v26 = vrot.slane %v5093_v7, 4  ;;  %v5098_v40 = vrot.slane %v5091_v1, 4  ;;  %v5007_v47 = vsel %vm262_vm0, %v5001_v12, %v5002_v39  ;;  %v5055_v14 = vsel %vm5054_vm5, %v13807_v4, %v5053_v50 }
 0x3c2   : > { %5918 = vrot.lane.b32.xlu1 %v13589_v20, %s10923_s25  ;;  %5916 = vrot.lane.b32.xlu0 %v5902_v24, %s10923_s25  ;;  %v5057_v62 = vsel %vm5054_vm5, %v13805_v11, %v5056_v13  ;;  %v5009_v43 = vsel %vm262_vm0, %v5002_v39, %v5003_v6  ;;  %v10288_v5 = vcombine.high %v5055_v14, %v5059_v57  ;;  %v6368_v24 = vld [vmem:[%s11068_s21 + $0x30] sm:$0xf]  ;;  %vm16103_vm2 = vcmask 556032  }
 0x3c3   : > { %v5107_v0 = vsel %vm262_vm0, %v5098_v40, %v5099_v26  ;;  %v5105_v35 = vsel %vm262_vm0, %v5097_v23, %v5098_v40  ;;  %v10290_v45 = vcombine.high %v5057_v62, %v5061_v33  ;;  %v5014_v4 = vsel %vm687_vm10, %v13776_v54, %v5013_v34  ;;  %vm16104_vm1 = vmmov %vm16103_vm2 }
 0x3c4   : > { %v5108_v49 = vsel %vm15767_vm4, %v5091_v1, %v5107_v0  ;;  %v13942_v30 = vpop.permute.xlu1 %5500  ;;  %v13944_v17 = vpop.permute.xlu0 %5498  ;;  %v5106_v2 = vsel %vm15767_vm4, %v5089_v46, %v5105_v35  ;;  %v5012_v11 = vsel %vm687_vm10, %v13739_v38, %v5011_v56  ;;  %v5008_v51 = vsel %vm687_vm10, %v13719_v53, %v5007_v47  ;;  %v5949_v53 = vld [vmem:[%s11068_s21 + $0x14] sm:$0xf]  ;;  %v14095_v56 = vld [vmem:[%s11068_s21 + $0x4] sm:$0xff]  ;;  %vm16024_vm4 = vmmov %vm16023_vm6 }
 0x3c5   : > { %16005 = vst [vmem:[#allocation17_spill] sm:$0xff] %v13942_v30  ;;  %16006 = vst [vmem:[#allocation18_spill] sm:$0xff] %v13944_v17  ;;  %v10293_v31 = vcombine.low %v5104_v29, %v5108_v49  ;;  %v10291_v22 = vcombine.low %v5102_v19, %v5106_v2  ;;  %v10292_v25 = vcombine.high %v5102_v19, %v5106_v2  ;;  %v6457_v19 = vld [vmem:[%s11068_s21 + $0x14] sm:$0xf] }
 0x3c6   : > { %v10294_v36 = vcombine.high %v5104_v29, %v5108_v49  ;;  %5922 = vrot.lane.b32.xlu1 %v5905_v63, %s10923_s25  ;;  %5920 = vrot.lane.b32.xlu0 %v13601_v55, %s10923_s25  ;;  %v5010_v32 = vsel %vm687_vm10, %v13717_v42, %v5009_v43  ;;  %v10289_v28 = vcombine.low %v5057_v62, %v5061_v33  ;;  %s16018_s25 = smov 72   ;;  %v6460_v63 = vld [vmem:[%s11068_s21 + $0x30] sm:$0xf]  ;;  %v6549_v62 = vld [vmem:[%s11068_s21 + $0x14] sm:$0xf] }
 0x3c7   : > { %5418 = vmatprep.subr.bf16.mxu0 %v10292_v25  ;;  %v10287_v21 = vcombine.low %v5055_v14, %v5059_v57  ;;  %v10284_v38 = vcombine.high %v5008_v51, %v5012_v11  ;;  %v10286_v27 = vcombine.high %v5010_v32, %v5014_v4  ;;  %v10285_v42 = vcombine.low %v5010_v32, %v5014_v4  ;;  %v6503_v57 = vld [vmem:[%s11068_s21 + $0x14] sm:$0xf]  ;;  %v14118_v4 = vld [vmem:[%s11068_s21 + $0x28] sm:$0xff] }
 0x3c8   : > { %5459 = vmatprep.subr.bf16.mxu1 %v10294_v36  ;;  %v13963_v59 = vpop.permute.xlu1 %5504  ;;  %v13965_v46 = vpop.permute.xlu0 %5502  ;;  %5419 = vmatpush2.bf16.msra.mxu0 %v10291_v22  ;;  %v10283_v58 = vcombine.low %v5008_v51, %v5012_v11  ;;  %v10249_v15 = vcombine.low %v13753_v10, %v13753_v10 }
 0x3c9   : > { %16007 = vst [vmem:[#allocation21_spill] sm:$0xff] %v13963_v59  ;;  %16008 = vst [vmem:[#allocation16_spill] sm:$0xff] %v13965_v46  ;;  %5460 = vmatpush2.bf16.msra.mxu1 %v10293_v31  ;;  %5420 = vmatprep.subr.bf16.mxu0 %v10288_v5 }
 0x3ca   : > { %5461 = vmatprep.subr.bf16.mxu1 %v10290_v45  ;;  %5961 = vrot.lane.b32.xlu1 %v13575_v18, %s10924_s29  ;;  %v6552_v45 = vld [vmem:[%s11068_s21 + $0x30] sm:$0xf] }
 0x3cb   : > { %5959 = vrot.lane.b32.xlu0 %v13578_v16, %s10924_s29 }
 0x3cc   : > { %v13977_v54 = vpop.permute.xlu1 %5508  ;;  %v13979_v8 = vpop.permute.xlu0 %5506  ;;  %5421 = vmatpush2.bf16.msra.mxu0 %v10287_v21  ;;  %v6595_v21 = vld [vmem:[%s11068_s21 + $0x14] sm:$0xf] }
 0x3cd   : > { %16009 = vst [vmem:[#allocation22_spill] sm:$0xff] %v13977_v54  ;;  %16010 = vst [vmem:[#allocation23_spill] sm:$0xff] %v13979_v8  ;;  %5462 = vmatpush2.bf16.msra.mxu1 %v10289_v28  ;;  %5422 = vmatprep.subr.bf16.mxu0 %v10284_v38  ;;  %v6598_v38 = vld [vmem:[%s11068_s21 + $0x30] sm:$0xf] }
 0x3ce   : > { %5463 = vmatprep.subr.bf16.mxu1 %v10286_v27  ;;  %5965 = vrot.lane.b32.xlu1 %v13589_v20, %s10924_s29 }
 0x3cf   : > { %5963 = vrot.lane.b32.xlu0 %v5949_v53, %s10924_s29 }
 0x3d0   : > { %v13983_v39 = vpop.permute.xlu1 %5546  ;;  %v13985_v12 = vpop.permute.xlu0 %5544  ;;  %5423 = vmatpush2.bf16.msra.mxu0 %v10283_v58 }
 0x3d1   : > { %16011 = vst [vmem:[#allocation13_spill] sm:$0xff] %v13983_v39  ;;  %16012 = vst [vmem:[#allocation15_spill] sm:$0xff] %v13985_v12  ;;  %5464 = vmatpush2.bf16.msra.mxu1 %v10285_v42 }
 0x3d2   : > { %5969 = vrot.lane.b32.xlu1 %v5952_v48, %s10924_s29 }
 0x3d3   : > { %5967 = vrot.lane.b32.xlu0 %v13601_v55, %s10924_s29  ;;  %5425 = vmatmul.mubr.bf16.vlgmr.msra.gmra.mxu0 %v10249_v15  ;;  %s16019_s29 = smov 71  }
 0x3d4   : > { %v13991_v44 = vpop.permute.xlu1 %5550  ;;  %v13993_v3 = vpop.permute.xlu0 %5548  ;;  %5466 = vmatmul.mubr.bf16.vlgmr.msra.gmra.mxu1 %v10249_v15 }
 0x3d5   : > { %16013 = vst [vmem:[#allocation20_spill] sm:$0xff] %v13991_v44  ;;  %16014 = vst [vmem:[#allocation14_spill] sm:$0xff] %v13993_v3 }
 0x3d6   : > { %6377 = vrot.lane.b32.xlu1 %v13575_v18, %s16015_s24 }
 0x3d7   : > { %6375 = vrot.lane.b32.xlu0 %v13578_v16, %s16015_s24 }
 0x3d8   : > { %v13999_v37 = vpop.permute.xlu1 %5554  ;;  %v14001_v10 = vpop.permute.xlu0 %5552 }
 0x3d9   : > { %16016 = vst [vmem:[#allocation19_spill] sm:$0xff] %v14001_v10 }
 0x3da   : > { %6381 = vrot.lane.b32.xlu1 %v13589_v20, %s16015_s24 }
 0x3db   : > { %6379 = vrot.lane.b32.xlu0 %v6365_v41, %s16015_s24 }
 0x3dc   : > { %v14007_v7 = vpop.permute.xlu1 %5592  ;;  %v14009_v1 = vpop.permute.xlu0 %5590 }
 0x3de   : > { %6385 = vrot.lane.b32.xlu1 %v6368_v24, %s16015_s24 }
 0x3df   : > { %6383 = vrot.lane.b32.xlu0 %v13601_v55, %s16015_s24  ;;  %s16020_s24 = smov 70  }
 0x3e0   : > { %v14015_v23 = vpop.permute.xlu1 %5596  ;;  %v14017_v60 = vpop.permute.xlu0 %5594 }
 0x3e2   : > { %6423 = vrot.lane.b32.xlu1 %v13575_v18, %s16017_s19 }
 0x3e3   : > { %6421 = vrot.lane.b32.xlu0 %v13578_v16, %s16017_s19 }
 0x3e4   : > { %v14023_v26 = vpop.permute.xlu1 %5600  ;;  %v14025_v40 = vpop.permute.xlu0 %5598 }
 0x3e6   : > { %6427 = vrot.lane.b32.xlu1 %v13589_v20, %s16017_s19 }
 0x3e7   : > { %6425 = vrot.lane.b32.xlu0 %v6411_v52, %s16017_s19 }
 0x3e8   : > { %v14031_v50 = vpop.permute.xlu1 %5638  ;;  %v14033_v9 = vpop.permute.xlu0 %5636 }
 0x3ea   : > { %6431 = vrot.lane.b32.xlu1 %v6414_v61, %s16017_s19 }
 0x3eb   : > { %6429 = vrot.lane.b32.xlu0 %v13601_v55, %s16017_s19  ;;  %s16021_s19 = smov 69  }
 0x3ec   : > { %v14039_v6 = vpop.permute.xlu1 %5642  ;;  %v14041_v13 = vpop.permute.xlu0 %5640 }
 0x3ee   : > { %6469 = vrot.lane.b32.xlu1 %v13575_v18, %s16018_s25 }
 0x3ef   : > { %6467 = vrot.lane.b32.xlu0 %v13578_v16, %s16018_s25 }
 0x3f0   : > { %v14047_v0 = vpop.permute.xlu1 %5646  ;;  %v14049_v35 = vpop.permute.xlu0 %5644 }
 0x3f2   : > { %6473 = vrot.lane.b32.xlu1 %v13589_v20, %s16018_s25 }
 0x3f3   : > { %6471 = vrot.lane.b32.xlu0 %v6457_v19, %s16018_s25 }
 0x3f4   : > { %v14055_v29 = vpop.permute.xlu1 %5684  ;;  %v14057_v49 = vpop.permute.xlu0 %5682 }
 0x3f5   : > { %v15754_v42 = vrot.slane %v14055_v29, 4  ;;  %v5694_v58 = vrot.slane %v14057_v49, 4 }
 0x3f6   : > { %6477 = vrot.lane.b32.xlu1 %v6460_v63, %s16018_s25 }
 0x3f7   : > { %6475 = vrot.lane.b32.xlu0 %v13601_v55, %s16018_s25  ;;  %s16022_s25 = smov 68  }
 0x3f8   : > { %v14063_v2 = vpop.permute.xlu1 %5688  ;;  %v14065_v33 = vpop.permute.xlu0 %5686 }
 0x3fa   : > { %6515 = vrot.lane.b32.xlu1 %v13575_v18, %s16019_s29  ;;  %v6506_v18 = vld [vmem:[%s11068_s21 + $0x30] sm:$0xf] }
 0x3fb   : > { %6513 = vrot.lane.b32.xlu0 %v13578_v16, %s16019_s29 }
 0x3fc   : > { %v14071_v31 = vpop.permute.xlu1 %5692  ;;  %v14073_v22 = vpop.permute.xlu0 %5690 }
 0x3fe   : > { %6519 = vrot.lane.b32.xlu1 %v13589_v20, %s16019_s29  ;;  %v14092_v20 = vld [vmem:[%s11068_s21 + $0xc] sm:$0xff] }
 0x3ff   : > { %6517 = vrot.lane.b32.xlu0 %v6503_v57, %s16019_s29 }
 0x400   : > { %v14079_v34 = vpop.permute.xlu1 %5730  ;;  %v14081_v25 = vpop.permute.xlu0 %5728 }
 0x402   : > { %6523 = vrot.lane.b32.xlu1 %v6506_v18, %s16019_s29 }
 0x403   : > { %6521 = vrot.lane.b32.xlu0 %v13601_v55, %s16019_s29  ;;  %v14106_v55 = vld [vmem:[%s11068_s21 + $0x20] sm:$0xff]  ;;  %s16033_s29 = smov 67  }
 0x404   : > { %v14087_v16 = vpop.permute.xlu1 %5734  ;;  %v14089_v36 = vpop.permute.xlu0 %5732 }
 0x405   : > { %v5742_v39 = vrot.slane %v14089_v36, 4 }
 0x406   : > { %6561 = vrot.lane.b32.xlu1 %v14092_v20, %s16020_s24 }
 0x407   : > { %6559 = vrot.lane.b32.xlu0 %v14095_v56, %s16020_s24 }
 0x408   : > { %v14101_v47 = vpop.permute.xlu1 %5738  ;;  %v14103_v14 = vpop.permute.xlu0 %5736 }
 0x409   : > { %v5745_v48 = vrot.slane %v14101_v47, 4  ;;  %v5744_v24 = vrot.slane %v14103_v14, 4  ;;  %v5740_v47 = vrot.slane %v14081_v25, 4 }
 0x40a   : > { %6565 = vrot.lane.b32.xlu1 %v14106_v55, %s16020_s24 }
 0x40b   : > { %6563 = vrot.lane.b32.xlu0 %v6549_v62, %s16020_s24 }
 0x40c   : > { %v14112_v43 = vpop.permute.xlu1 %5776  ;;  %v14114_v5 = vpop.permute.xlu0 %5774 }
 0x40d   : > { %v5787_v52 = vrot.slane %v14112_v43, 4  ;;  %v5786_v19 = vrot.slane %v14114_v5, 4 }
 0x40e   : > { %6569 = vrot.lane.b32.xlu1 %v6552_v45, %s16020_s24  ;;  %v14151_v45 = vsel %vm262_vm0, %v5694_v58, %v15754_v42  ;;  %v5741_v58 = vrot.slane %v14079_v34, 4  ;;  %v6641_v42 = vld [vmem:[%s11068_s21 + $0x14] sm:$0xf] }
 0x40f   : > { %6567 = vrot.lane.b32.xlu0 %v14118_v4, %s16020_s24  ;;  %v5792_v3 = vsel %vm262_vm0, %v5786_v19, %v5787_v52  ;;  %s16061_s24 = smov 66  }
 0x410   : > { %v14123_v11 = vpop.permute.xlu1 %5780  ;;  %v5779_v51 = vpop.permute.xlu0 %5778 }
 0x412   : > { %6607 = vrot.lane.b32.xlu1 %v14092_v20, %s16021_s19 }
 0x413   : > { %6605 = vrot.lane.b32.xlu0 %v14095_v56, %s16021_s19 }
 0x414   : > { %v5785_v32 = vpop.permute.xlu1 %5784  ;;  %v14129_v28 = vpop.permute.xlu0 %5782 }
 0x415   : > { %v5791_v41 = vrot.slane %v5785_v32, 4  ;;  %v5790_v61 = vrot.slane %v14129_v28, 4  ;;  %v5743_v32 = vrot.slane %v14087_v16, 4 }
 0x416   : > { %6611 = vrot.lane.b32.xlu1 %v14106_v55, %s16021_s19 }
 0x417   : > { %6609 = vrot.lane.b32.xlu0 %v6595_v21, %s16021_s19  ;;  %v5798_v54 = vsel %vm262_vm0, %v5790_v61, %v5791_v41 }
 0x418   : > { %v5823_v27 = vpop.permute.xlu1 %5822  ;;  %v5821_v53 = vpop.permute.xlu0 %5820 }
 0x419   : > { %v5833_v63 = vrot.slane %v5823_v27, 4  ;;  %v5832_v57 = vrot.slane %v5821_v53, 4 }
 0x41a   : > { %6615 = vrot.lane.b32.xlu1 %v6598_v38, %s16021_s19  ;;  %v5789_v38 = vrot.slane %v14123_v11, 4 }
 0x41b   : > { %6613 = vrot.lane.b32.xlu0 %v14118_v4, %s16021_s19  ;;  %v5838_v21 = vsel %vm262_vm0, %v5832_v57, %v5833_v63  ;;  %s10925_s19 = smov 65  }
 0x41c   : > { %v5827_v18 = vpop.permute.xlu1 %5826  ;;  %v5825_v62 = vpop.permute.xlu0 %5824  ;;  %v5796_v57 = vsel %vm262_vm0, %v5789_v38, %v5790_v61 }
 0x41d   : > { %v5834_v15 = vrot.slane %v5825_v62, 4  ;;  %v5788_v62 = vrot.slane %v5779_v51, 4  ;;  %v5835_v46 = vrot.slane %v5827_v18, 4  ;;  %v5752_v51 = vsel %vm262_vm0, %v5744_v24, %v5745_v48 }
 0x41e   : > { %6653 = vrot.lane.b32.xlu1 %v14092_v20, %s16022_s25  ;;  %v5839_v48 = vsel %vm1519_vm14, %v5821_v53, %v5838_v21  ;;  %v5697_v53 = vrot.slane %v14063_v2, 4  ;;  %v5748_v21 = vsel %vm262_vm0, %v5741_v58, %v5742_v39 }
 0x41f   : > { %6651 = vrot.lane.b32.xlu0 %v14095_v56, %s16022_s25  ;;  %v5840_v59 = vsel %vm262_vm0, %v5833_v63, %v5834_v15  ;;  %v5794_v44 = vsel %vm262_vm0, %v5787_v52, %v5788_v62  ;;  %v6644_v15 = vld [vmem:[%s11068_s21 + $0x30] sm:$0xf]  ;;  %v5799_v52 = vsel %vm16023_vm6, %v14129_v28, %v5798_v54  ;;  %v5746_v54 = vsel %vm262_vm0, %v5740_v47, %v5741_v58 }
 0x420   : > { %v5831_v17 = vpop.permute.xlu1 %5830  ;;  %v5829_v30 = vpop.permute.xlu0 %5828  ;;  %v5841_v41 = vsel %vm1519_vm14, %v5823_v27, %v5840_v59  ;;  %v5750_v27 = vsel %vm262_vm0, %v5743_v32, %v5744_v24  ;;  %v5653_v47 = vrot.slane %v14047_v0, 4  ;;  %vm16028_vm6 = vcmask 777216  }
 0x421   : > { %v5837_v8 = vrot.slane %v5831_v17, 4  ;;  %v5836_v12 = vrot.slane %v5829_v30, 4 }
 0x422   : > { %6657 = vrot.lane.b32.xlu1 %v14106_v55, %s16022_s25 }
 0x423   : > { %6655 = vrot.lane.b32.xlu0 %v6641_v42, %s16022_s25  ;;  %v5844_v17 = vsel %vm262_vm0, %v5836_v12, %v5837_v8  ;;  %v5842_v36 = vsel %vm262_vm0, %v5835_v46, %v5836_v12  ;;  %v5797_v46 = vsel %vm16024_vm4, %v14123_v11, %v5796_v57  ;;  %v5648_v12 = vrot.slane %v14033_v9, 4 }
 0x424   : > { %v5845_v63 = vsel %vm1519_vm14, %v5829_v30, %v5844_v17  ;;  %v14186_v10 = vpop.permute.xlu1 %5868  ;;  %v14188_v42 = vpop.permute.xlu0 %5866  ;;  %v5843_v61 = vsel %vm1519_vm14, %v5827_v18, %v5842_v36  ;;  %vm16025_vm14 = vmmov %vm16024_vm4  ;;  %v5795_v11 = vsel %vm16024_vm4, %v14112_v43, %v5794_v44  ;;  %v5696_v18 = vrot.slane %v14065_v33, 4  ;;  %v14222_v43 = vld [vmem:[#allocation7 + $0x30] sm:$0xff] }
 0x425   : > { %v10329_v19 = vcombine.low %v5841_v41, %v5845_v63  ;;  %v10327_v8 = vcombine.low %v5839_v48, %v5843_v61  ;;  %v10328_v30 = vcombine.high %v5839_v48, %v5843_v61  ;;  %v10330_v59 = vcombine.high %v5841_v41, %v5845_v63  ;;  %vm16030_vm4 = vmmov %vm16028_vm6 }
 0x426   : > { %6661 = vrot.lane.b32.xlu1 %v6644_v15, %s16022_s25  ;;  %v5793_v28 = vsel %vm16025_vm14, %v14114_v5, %v5792_v3  ;;  %v10326_v32 = vcombine.high %v5795_v11, %v5799_v52  ;;  %v16026_v57 = vrot.slane %v14071_v31, 4  ;;  %v16027_v3 = vrot.slane %v14073_v22, 4  ;;  %vm16029_vm14 = vmmov %vm16028_vm6 }
 0x427   : > { %6659 = vrot.lane.b32.xlu0 %v14118_v4, %s16022_s25  ;;  %6269 = vmatprep.subr.bf16.mxu0 %v10328_v30  ;;  %v10324_v24 = vcombine.high %v5793_v28, %v5797_v46  ;;  %v5753_v33 = vsel %vm16028_vm6, %v14103_v14, %v5752_v51  ;;  %v5751_v39 = vsel %vm16029_vm14, %v14087_v16, %v5750_v27  ;;  %v5652_v5 = vrot.slane %v14049_v35, 4  ;;  %vm16032_vm6 = vmmov %vm16030_vm4  ;;  %s10926_s25 = smov 64  }
 0x428   : > { %6310 = vmatprep.subr.bf16.mxu1 %v10330_v59  ;;  %v14208_v38 = vpop.permute.xlu1 %5872  ;;  %v14210_v62 = vpop.permute.xlu0 %5870  ;;  %v5706_v44 = vsel %vm262_vm0, %v16027_v3, %v16026_v57  ;;  %6270 = vmatpush1.bf16.msra.mxu0 %v10327_v8  ;;  %v5747_v0 = vsel %vm16030_vm4, %v14081_v25, %v5746_v54  ;;  %v16031_v31 = vmov %v16027_v3  ;;  %v10298_v14 = vcombine.high %v14222_v43, %v14222_v43 }
 0x429   : > { %6311 = vmatpush1.bf16.msra.mxu1 %v10329_v19  ;;  %6271 = vmatprep.subr.bf16.mxu0 %v10324_v24  ;;  %v5704_v58 = vsel %vm262_vm0, %v5697_v53, %v16031_v31  ;;  %v5651_v51 = vrot.slane %v14039_v6, 4  ;;  %v5749_v16 = vsel %vm16032_vm6, %v14079_v34, %v5748_v21  ;;  %v10325_v17 = vcombine.low %v5795_v11, %v5799_v52  ;;  %v6687_v52 = vld [vmem:[%s11068_s21 + $0x14] sm:$0xf]  ;;  %v16047_v31 = vld [vmem:[#allocation20_spill] sm:$0xff] }
 0x42a   : > { %6312 = vmatprep.subr.bf16.mxu1 %v10326_v32  ;;  %v10323_v15 = vcombine.low %v5793_v28, %v5797_v46  ;;  %6699 = vrot.lane.b32.xlu1 %v14092_v20, %s16033_s29  ;;  %v5650_v25 = vrot.slane %v14041_v13, 4  ;;  %v16034_v36 = vrot.slane %v14055_v29, 4  ;;  %v10320_v61 = vcombine.high %v5747_v0, %v5751_v39 }
 0x42b   : > { %6697 = vrot.lane.b32.xlu0 %v14095_v56, %s16033_s29  ;;  %v10322_v34 = vcombine.high %v5749_v16, %v5753_v33  ;;  %10343 = vmatprep.mubr.msk.bf16.mxu0 %vm974_vm7, %v10298_v14  ;;  %v5607_v19 = vrot.slane %v14023_v26, 4  ;;  %v16035_v8 = vrot.slane %v14031_v50, 4  ;;  %vm16036_vm14 = vcmask 785408  }
 0x42c   : > { %v5702_v48 = vsel %vm262_vm0, %v16034_v36, %v5696_v18  ;;  %v14243_v41 = vpop.permute.xlu1 %5876  ;;  %v14245_v63 = vpop.permute.xlu0 %5874  ;;  %10344 = vmatprep.mubr.msk.bf16.mxu1 %vm974_vm7, %v10298_v14  ;;  %v5707_v46 = vsel %vm16036_vm14, %v14073_v22, %v5706_v44  ;;  %6272 = vmatpush1.bf16.msra.mxu0 %v10323_v15  ;;  %vm16037_vm4 = vmmov %vm16036_vm14  ;;  %v5606_v59 = vrot.slane %v14025_v40, 4  ;;  %v5660_v27 = vsel %vm262_vm0, %v5652_v5, %v5653_v47 }
 0x42d   : > { %v5654_v13 = vsel %vm262_vm0, %v5648_v12, %v16035_v8  ;;  %6313 = vmatpush1.bf16.msra.mxu1 %v10325_v17  ;;  %v5705_v30 = vsel %vm16037_vm4, %v14063_v2, %v5704_v58  ;;  %vm16038_vm6 = vmmov %vm16037_vm4  ;;  %6273 = vmatprep.subr.bf16.mxu0 %v10320_v61  ;;  %v5658_v12 = vsel %vm262_vm0, %v5651_v51, %v5652_v5  ;;  %v5605_v22 = vrot.slane %v14015_v23, 4 }
 0x42e   : > { %v5701_v26 = vsel %vm16038_vm6, %v14057_v49, %v14151_v45  ;;  %6314 = vmatprep.subr.bf16.mxu1 %v10322_v34  ;;  %vm16039_vm14 = vmmov %vm16037_vm4  ;;  %v10321_v54 = vcombine.low %v5749_v16, %v5753_v33  ;;  %v10319_v2 = vcombine.low %v5747_v0, %v5751_v39  ;;  %6703 = vrot.lane.b32.xlu1 %v14106_v55, %s16033_s29  ;;  %v5604_v28 = vrot.slane %v14017_v60, 4  ;;  %v16045_v33 = vld [vmem:[#allocation19_spill] sm:$0xff]  ;;  %v16051_v34 = vld [vmem:[#allocation13_spill] sm:$0xff] }
 0x42f   : > { %v5703_v53 = vsel %vm16039_vm14, %v14055_v29, %v5702_v48  ;;  %6701 = vrot.lane.b32.xlu0 %v6687_v52, %s16033_s29  ;;  %v16040_v49 = vmov %v16035_v8  ;;  %v10316_v21 = vcombine.high %v5701_v26, %v5705_v30  ;;  %v6690_v29 = vld [vmem:[%s11068_s21 + $0x30] sm:$0xf]  ;;  %v5561_v32 = vrot.slane %v13999_v37, 4 }
 0x430   : > { %v5656_v45 = vsel %vm262_vm0, %v16040_v49, %v5650_v25  ;;  %v14274_v11 = vpop.permute.xlu1 %5914  ;;  %v14276_v18 = vpop.permute.xlu0 %5912  ;;  %v10318_v24 = vcombine.high %v5703_v53, %v5707_v46  ;;  %v16041_v47 = vrot.slane %v14007_v7, 4  ;;  %v16042_v57 = vrot.slane %v14009_v1, 4  ;;  %6274 = vmatpush1.bf16.msra.mxu0 %v10319_v2 }
 0x431   : > { %vm16043_vm4 = vcmask 793600   ;;  %6315 = vmatpush1.bf16.msra.mxu1 %v10321_v54  ;;  %v5560_v39 = vrot.slane %v16045_v33, 4  ;;  %v5614_v5 = vsel %vm262_vm0, %v5606_v59, %v5607_v19  ;;  %6275 = vmatprep.subr.bf16.mxu0 %v10316_v21  ;;  %v5612_v0 = vsel %vm262_vm0, %v5605_v22, %v5606_v59  ;;  %v16053_v19 = vld [vmem:[#allocation15_spill] sm:$0xff] }
 0x432   : > { %v5608_v3 = vsel %vm262_vm0, %v16042_v57, %v16041_v47  ;;  %v5661_v60 = vsel %vm16043_vm4, %v14049_v35, %v5660_v27  ;;  %vm16044_vm6 = vmmov %vm16043_vm4  ;;  %6316 = vmatprep.subr.bf16.mxu1 %v10318_v24  ;;  %v5559_v58 = vrot.slane %v16047_v31, 4  ;;  %v5657_v35 = vsel %vm16043_vm4, %v14031_v50, %v5656_v45  ;;  %6707 = vrot.lane.b32.xlu1 %v6690_v29, %s16033_s29  ;;  %v16050_v50 = vld [vmem:[#allocation22_spill] sm:$0xff]  ;;  %v16057_v59 = vld [vmem:[#allocation23_spill] sm:$0xff] }
 0x433   : > { %v5659_v44 = vsel %vm16044_vm6, %v14039_v6, %v5658_v12  ;;  %vm16046_vm14 = vmmov %vm16043_vm4  ;;  %v10317_v14 = vcombine.low %v5703_v53, %v5707_v46  ;;  %v10315_v51 = vcombine.low %v5701_v26, %v5705_v30  ;;  %6705 = vrot.lane.b32.xlu0 %v14118_v4, %s16033_s29  ;;  %v16048_v6 = vld [vmem:[#allocation14_spill] sm:$0xff]  ;;  %v10314_v48 = vcombine.high %v5657_v35, %v5661_v60  ;;  %v16059_v53 = vld [vmem:[#allocation21_spill] sm:$0xff]  ;;  %s16088_s29 = smov 48  }
 0x434   : > { %v5655_v37 = vsel %vm16046_vm14, %v14033_v9, %v5654_v13  ;;  %v5558_v16 = vrot.slane %v16048_v6, 4  ;;  %v16049_v9 = vmov %v16041_v47  ;;  %v14304_v15 = vpop.permute.xlu1 %5918  ;;  %v14306_v25 = vpop.permute.xlu0 %5916  ;;  %v5515_v61 = vrot.slane %v16050_v50, 4  ;;  %v16064_v47 = vld [vmem:[#allocation17_spill] sm:$0xff] }
 0x435   : > { %v5610_v17 = vsel %vm262_vm0, %v16049_v9, %v5604_v28  ;;  %v10312_v36 = vcombine.high %v5655_v37, %v5659_v44  ;;  %v16052_v52 = vrot.slane %v16051_v34, 4  ;;  %v16054_v8 = vrot.slane %v16053_v19, 4  ;;  %6276 = vmatpush1.bf16.msra.mxu0 %v10315_v51  ;;  %6317 = vmatpush1.bf16.msra.mxu1 %v10317_v14 }
 0x436   : > { %vm16055_vm6 = vcmask 801792   ;;  %v5514_v27 = vrot.slane %v16057_v59, 4  ;;  %v5568_v26 = vsel %vm262_vm0, %v5560_v39, %v5561_v32  ;;  %6318 = vmatprep.subr.bf16.mxu1 %v10314_v48  ;;  %v5566_v22 = vsel %vm262_vm0, %v5559_v58, %v5560_v39  ;;  %6745 = vrot.lane.b32.xlu1 %v14092_v20, %s16061_s24  ;;  %v6733_v32 = vld [vmem:[%s11068_s21 + $0x14] sm:$0xf] }
 0x437   : > { %v5562_v13 = vsel %vm262_vm0, %v16054_v8, %v16052_v52  ;;  %v5615_v46 = vsel %vm16055_vm6, %v14025_v40, %v5614_v5  ;;  %vm16056_vm14 = vmmov %vm16055_vm6  ;;  %6277 = vmatprep.subr.bf16.mxu0 %v10312_v36  ;;  %v5513_v54 = vrot.slane %v16059_v53, 4  ;;  %v10313_v2 = vcombine.low %v5657_v35, %v5661_v60  ;;  %6743 = vrot.lane.b32.xlu0 %v14095_v56, %s16061_s24  ;;  %v6736_v36 = vld [vmem:[%s11068_s21 + $0x30] sm:$0xf] }
 0x438   : > { %v5613_v30 = vsel %vm16056_vm14, %v14015_v23, %v5612_v0  ;;  %vm16058_vm4 = vmmov %vm16055_vm6  ;;  %v10311_v28 = vcombine.low %v5655_v37, %v5659_v44  ;;  %v16062_v23 = vld [vmem:[#allocation16_spill] sm:$0xff]  ;;  %v16063_v49 = vmov %v16052_v52  ;;  %v14334_v21 = vpop.permute.xlu1 %5922  ;;  %v14336_v24 = vpop.permute.xlu0 %5920  ;;  %v16065_v57 = vrot.slane %v16064_v47, 4 }
 0x439   : > { %v5609_v12 = vsel %vm16058_vm4, %v14009_v1, %v5608_v3  ;;  %vm16060_vm6 = vmmov %vm16058_vm4  ;;  %v5512_v1 = vrot.slane %v16062_v23, 4  ;;  %v5564_v45 = vsel %vm262_vm0, %v16063_v49, %v5558_v16  ;;  %v16066_v3 = vld [vmem:[#allocation18_spill] sm:$0xff]  ;;  %vm16068_vm14 = vcmask 809984   ;;  %6319 = vmatpush1.bf16.msra.mxu1 %v10313_v2 }
 0x43a   : > { %v5611_v40 = vsel %vm16060_vm6, %v14007_v7, %v5610_v17  ;;  %v10308_v29 = vcombine.high %v5609_v12, %v5613_v30  ;;  %v16067_v60 = vrot.slane %v16066_v3, 4  ;;  %v5569_v39 = vsel %vm16068_vm14, %v16045_v33, %v5568_v26  ;;  %6278 = vmatpush1.bf16.msra.mxu0 %v10311_v28  ;;  %vm16069_vm4 = vmmov %vm16068_vm14  ;;  %6749 = vrot.lane.b32.xlu1 %v14106_v55, %s16061_s24 }
 0x43b   : > { %v10310_v7 = vcombine.high %v5611_v40, %v5615_v46  ;;  %v5567_v5 = vsel %vm16069_vm4, %v16047_v31, %v5566_v22  ;;  %v5522_v37 = vsel %vm262_vm0, %v5514_v27, %v5515_v61  ;;  %vm16070_vm6 = vmmov %vm16069_vm4  ;;  %v5520_v58 = vsel %vm262_vm0, %v5513_v54, %v5514_v27  ;;  %6747 = vrot.lane.b32.xlu0 %v6733_v32, %s16061_s24 }
 0x43c   : > { %v5516_v44 = vsel %vm262_vm0, %v16067_v60, %v16065_v57  ;;  %v5563_v0 = vsel %vm16070_vm6, %v16053_v19, %v5562_v13  ;;  %6279 = vmatprep.subr.bf16.mxu0 %v10308_v29  ;;  %vm16071_vm3 = vmmov %vm16069_vm4  ;;  %v10309_v14 = vcombine.low %v5611_v40, %v5615_v46  ;;  %v10307_v33 = vcombine.low %v5609_v12, %v5613_v30  ;;  %v14360_v6 = vpop.permute.xlu1 %5961 }
 0x43d   : > { %6320 = vmatprep.subr.bf16.mxu1 %v10310_v7  ;;  %v5565_v35 = vsel %vm16071_vm3, %v16051_v34, %v5564_v45  ;;  %v16072_v31 = vmov %v16065_v57  ;;  %v14362_v16 = vpop.permute.xlu0 %5959  ;;  %v10304_v9 = vcombine.high %v5563_v0, %v5567_v5  ;;  %vm16073_vm3 = vcmask 818176  }
 0x43e   : > { %v5518_v51 = vsel %vm262_vm0, %v16072_v31, %v5512_v1  ;;  %v10306_v17 = vcombine.high %v5565_v35, %v5569_v39  ;;  %v5523_v48 = vsel %vm16073_vm3, %v16057_v59, %v5522_v37  ;;  %6280 = vmatpush1.bf16.msra.mxu0 %v10307_v33  ;;  %6321 = vmatpush1.bf16.msra.mxu1 %v10309_v14  ;;  %vm16074_vm14 = vmmov %vm16073_vm3  ;;  %v5972_v8 = vrot.slane %v14360_v6, 4 }
 0x43f   : > { %v5521_v50 = vsel %vm16074_vm14, %v16059_v53, %v5520_v58  ;;  %vm16075_vm4 = vmmov %vm16073_vm3  ;;  %6281 = vmatprep.subr.bf16.mxu0 %v10304_v9  ;;  %v10305_v52 = vcombine.low %v5565_v35, %v5569_v39  ;;  %v10303_v19 = vcombine.low %v5563_v0, %v5567_v5  ;;  %6753 = vrot.lane.b32.xlu1 %v6736_v36, %s16061_s24  ;;  %v5971_v13 = vrot.slane %v14362_v16, 4  ;;  %v6782_v9 = vld [vmem:[%s11068_s21 + $0x30] sm:$0xf] }
 0x440   : > { %v5517_v61 = vsel %vm16075_vm4, %v16066_v3, %v5516_v44  ;;  %6322 = vmatprep.subr.bf16.mxu1 %v10306_v17  ;;  %vm16076_vm6 = vmmov %vm16073_vm3  ;;  %6751 = vrot.lane.b32.xlu0 %v14118_v4, %s16061_s24  ;;  %v5966_v46 = vpop.permute.xlu1 %5965  ;;  %vm5931_vm3 = vcmask 744448   ;;  %vm5978_vm14 = vcmask 736256   ;;  %v5925_v22 = vrot.slane %v14274_v11, 4  ;;  %s16089_s24 = smov 41  }
 0x441   : > { %v5519_v34 = vsel %vm16076_vm6, %v16064_v47, %v5518_v51  ;;  %v5964_v30 = vpop.permute.xlu0 %5963  ;;  %v10300_v59 = vcombine.high %v5517_v61, %v5521_v50  ;;  %v5924_v53 = vrot.slane %v14276_v18, 4  ;;  %v5929_v54 = vrot.slane %v14334_v21, 4  ;;  %v6779_v47 = vld [vmem:[%s11068_s21 + $0x14] sm:$0xf] }
 0x442   : > { %v10302_v27 = vcombine.high %v5519_v34, %v5523_v48  ;;  %v10301_v26 = vcombine.low %v5519_v34, %v5523_v48  ;;  %v5973_v12 = vrot.slane %v5964_v30, 4  ;;  %6282 = vmatpush1.bf16.msra.mxu0 %v10303_v19  ;;  %6323 = vmatpush1.bf16.msra.mxu1 %v10305_v52  ;;  %v5928_v40 = vrot.slane %v14336_v24, 4 }
 0x443   : > { %6283 = vmatprep.subr.bf16.mxu0 %v10300_v59  ;;  %v5879_v2 = vrot.slane %v14186_v10, 4  ;;  %v5878_v28 = vrot.slane %v14188_v42, 4  ;;  %v5926_v23 = vrot.slane %v14306_v25, 4  ;;  %v10299_v1 = vcombine.low %v5517_v61, %v5521_v50  ;;  %6791 = vrot.lane.b32.xlu1 %v14092_v20, %s10925_s19 }
 0x444   : > { %6324 = vmatprep.subr.bf16.mxu1 %v10302_v27  ;;  %6789 = vrot.lane.b32.xlu0 %v14095_v56, %s10925_s19  ;;  %v5881_v49 = vrot.slane %v14208_v38, 4  ;;  %v5883_v45 = vrot.slane %v14243_v41, 4  ;;  %v5927_v21 = vrot.slane %v14304_v15, 4  ;;  %v5977_v29 = vsel %vm262_vm0, %v5971_v13, %v5972_v8  ;;  %v5970_v7 = vpop.permute.xlu1 %5969 }
 0x445   : > { %v5968_v32 = vpop.permute.xlu0 %5967  ;;  %v5974_v25 = vrot.slane %v5966_v46, 4  ;;  %v5980_v57 = vsel %vm262_vm0, %v5972_v8, %v5973_v12  ;;  %v5976_v3 = vrot.slane %v5970_v7, 4  ;;  %v5882_v44 = vrot.slane %v14245_v63, 4 }
 0x446   : > { %v5975_v60 = vrot.slane %v5968_v32, 4  ;;  %6284 = vmatpush1.bf16.msra.mxu0 %v10299_v1  ;;  %6325 = vmatpush1.bf16.msra.mxu1 %v10301_v26  ;;  %v5930_v39 = vsel %vm262_vm0, %v5924_v53, %v5925_v22  ;;  %v5937_v41 = vsel %vm262_vm0, %v5928_v40, %v5929_v54  ;;  %v5935_v5 = vsel %vm262_vm0, %v5927_v21, %v5928_v40  ;;  %v14464_v21 = vld [vmem:[#allocation7 + $0x38] sm:$0xff] }
 0x447   : > { %v5880_v37 = vrot.slane %v14210_v62, 4  ;;  %v5933_v0 = vsel %vm262_vm0, %v5925_v22, %v5926_v23  ;;  %6795 = vrot.lane.b32.xlu1 %v14106_v55, %s10925_s19  ;;  %v5979_v14 = vsel %vm5978_vm14, %v14362_v16, %v5977_v29  ;;  %v5981_v33 = vsel %vm5978_vm14, %v14360_v6, %v5980_v57  ;;  %v6829_v23 = vld [vmem:[%s11068_s21 + $0x30] sm:$0xf]  ;;  %16087 = vst [vmem:[#allocation23_spill] sm:$0xff] %v14464_v21 }
 0x448   : > { %v5984_v58 = vsel %vm262_vm0, %v5975_v60, %v5976_v3  ;;  %6793 = vrot.lane.b32.xlu0 %v6779_v47, %s10925_s19  ;;  %v5982_v35 = vsel %vm262_vm0, %v5974_v25, %v5975_v60  ;;  %v14411_v62 = vpop.permute.xlu1 %6377  ;;  %v5938_v36 = vsel %vm5931_vm3, %v14336_v24, %v5937_v41  ;;  %v5936_v16 = vsel %vm5931_vm3, %v14304_v15, %v5935_v5  ;;  %v7564_v25 = vld [vmem:[%s11068_s21 + $0x14] sm:$0xf]  ;;  %v7567_v60 = vld [vmem:[%s11068_s21 + $0x30] sm:$0xf] }
 0x449   : > { %v5985_v31 = vsel %vm5978_vm14, %v5968_v32, %v5984_v58  ;;  %16077 = vst [vmem:[#allocation19_spill] sm:$0xff] %v14411_v62  ;;  %v14413_v51 = vpop.permute.xlu0 %6375  ;;  %v5983_v17 = vsel %vm5978_vm14, %v5966_v46, %v5982_v35  ;;  %v5890_v61 = vsel %vm262_vm0, %v5882_v44, %v5883_v45  ;;  %v5888_v52 = vsel %vm262_vm0, %v5881_v49, %v5882_v44  ;;  %v7521_v35 = vld [vmem:[%s11068_s21 + $0x30] sm:$0xf] }
 0x44a   : > { %16078 = vst [vmem:[#allocation20_spill] sm:$0xff] %v14413_v51  ;;  %v10341_v48 = vcombine.low %v5981_v33, %v5985_v31  ;;  %v10339_v50 = vcombine.low %v5979_v14, %v5983_v17  ;;  %v10340_v6 = vcombine.high %v5979_v14, %v5983_v17  ;;  %v10342_v34 = vcombine.high %v5981_v33, %v5985_v31  ;;  %v7472_v17 = vld [vmem:[%s11068_s21 + $0x14] sm:$0xf] }
 0x44b   : > { %v5884_v19 = vsel %vm262_vm0, %v5878_v28, %v5879_v2  ;;  %v5932_v8 = vsel %vm5931_vm3, %v14276_v18, %v5930_v39  ;;  %v5934_v13 = vsel %vm5931_vm3, %v14274_v11, %v5933_v0  ;;  %6799 = vrot.lane.b32.xlu1 %v6782_v9, %s10925_s19  ;;  %v5886_v15 = vsel %vm262_vm0, %v5879_v2, %v5880_v37  ;;  %v7518_v37 = vld [vmem:[%s11068_s21 + $0x14] sm:$0xf] }
 0x44c   : > { %6797 = vrot.lane.b32.xlu0 %v14118_v4, %s10925_s19  ;;  %6295 = vmatprep.subr.bf16.mxu0 %v10340_v6  ;;  %v14432_v24 = vpop.permute.xlu1 %6381  ;;  %v10336_v30 = vcombine.high %v5932_v8, %v5936_v16  ;;  %v10338_v59 = vcombine.high %v5934_v13, %v5938_v36  ;;  %vm16081_vm4 = vcmask 752640   ;;  %v10337_v12 = vcombine.low %v5934_v13, %v5938_v36  ;;  %s16090_s19 = smov 42   ;;  %v7429_v13 = vld [vmem:[%s11068_s21 + $0x30] sm:$0xf] }
 0x44d   : > { %6336 = vmatprep.subr.bf16.mxu1 %v10342_v34  ;;  %16079 = vst [vmem:[#allocation14_spill] sm:$0xff] %v14432_v24  ;;  %v14434_v46 = vpop.permute.xlu0 %6379  ;;  %v5891_v18 = vsel %vm16081_vm4, %v14245_v63, %v5890_v61  ;;  %6296 = vmatpush2.bf16.msra.mxu0 %v10339_v50  ;;  %vm16082_vm6 = vmmov %vm16081_vm4  ;;  %v10335_v22 = vcombine.low %v5932_v8, %v5936_v16  ;;  %v7475_v50 = vld [vmem:[%s11068_s21 + $0x30] sm:$0xf] }
 0x44e   : > { %16080 = vst [vmem:[#allocation22_spill] sm:$0xff] %v14434_v46  ;;  %6337 = vmatpush2.bf16.msra.mxu1 %v10341_v48  ;;  %v5889_v11 = vsel %vm16082_vm6, %v14208_v38, %v5888_v52  ;;  %vm16083_vm3 = vmmov %vm16081_vm4  ;;  %6297 = vmatprep.subr.bf16.mxu0 %v10336_v30  ;;  %v10297_v1 = vcombine.low %v14222_v43, %v14222_v43  ;;  %v7426_v52 = vld [vmem:[%s11068_s21 + $0x14] sm:$0xf]  ;;  %vm16099_vm4 = vcmask 547840  }
 0x44f   : > { %v5885_v27 = vsel %vm16083_vm3, %v14188_v42, %v5884_v19  ;;  %6338 = vmatprep.subr.bf16.mxu1 %v10338_v59  ;;  %vm16084_vm14 = vmmov %vm16083_vm3  ;;  %6838 = vrot.lane.b32.xlu1 %v14092_v20, %s10926_s25  ;;  %v6826_v42 = vld [vmem:[%s11068_s21 + $0x14] sm:$0xf]  ;;  %v10346_v29 = vcombine.high %v14464_v21, %v14464_v21 }
 0x450   : > { %v5887_v26 = vsel %vm16084_vm14, %v14186_v10, %v5886_v15  ;;  %6836 = vrot.lane.b32.xlu0 %v14095_v56, %s10926_s25  ;;  %v14446_v63 = vpop.permute.xlu1 %6385  ;;  %v10332_v38 = vcombine.high %v5885_v27, %v5889_v11  ;;  %v10331_v40 = vcombine.low %v5885_v27, %v5889_v11  ;;  %v7380_v11 = vld [vmem:[%s11068_s21 + $0x14] sm:$0xf]  ;;  %vm16100_vm6 = vmmov %vm16099_vm4 }
 0x451   : > { %v14448_v53 = vpop.permute.xlu0 %6383  ;;  %v10334_v54 = vcombine.high %v5887_v26, %v5891_v18  ;;  %6298 = vmatpush2.bf16.msra.mxu0 %v10335_v22  ;;  %v10333_v10 = vcombine.low %v5887_v26, %v5891_v18  ;;  %vm16101_vm3 = vmmov %vm16099_vm4 }
 0x452   : > { %16085 = vst [vmem:[#allocation13_spill] sm:$0xff] %v14448_v53  ;;  %6339 = vmatpush2.bf16.msra.mxu1 %v10337_v12  ;;  %6299 = vmatprep.subr.bf16.mxu0 %v10332_v38  ;;  %v7383_v12 = vld [vmem:[%s11068_s21 + $0x30] sm:$0xf]  ;;  %vm16102_vm14 = vmmov %vm16101_vm3 }
 0x453   : > { %6340 = vmatprep.subr.bf16.mxu1 %v10334_v54  ;;  %6842 = vrot.lane.b32.xlu1 %v14106_v55, %s10926_s25  ;;  %v15769_v54 = vrot.slane %v14411_v62, 4 }
 0x454   : > { %6840 = vrot.lane.b32.xlu0 %v6826_v42, %s10926_s25  ;;  %v14452_v2 = vpop.permute.xlu1 %6423  ;;  %v6387_v42 = vrot.slane %v14413_v51, 4 }
 0x455   : > { %v14454_v28 = vpop.permute.xlu0 %6421  ;;  %6300 = vmatpush2.bf16.msra.mxu0 %v10331_v40 }
 0x456   : > { %16086 = vst [vmem:[#allocation15_spill] sm:$0xff] %v14454_v28  ;;  %6341 = vmatpush2.bf16.msra.mxu1 %v10333_v10  ;;  %v7334_v10 = vld [vmem:[%s11068_s21 + $0x14] sm:$0xf] }
 0x457   : > { %6846 = vrot.lane.b32.xlu1 %v6829_v23, %s10926_s25 }
 0x458   : > { %6844 = vrot.lane.b32.xlu0 %v14118_v4, %s10926_s25  ;;  %v14460_v49 = vpop.permute.xlu1 %6427  ;;  %6302 = vmatmul.mubr.bf16.vlgmr.msra.gmra.mxu0 %v10297_v1  ;;  %s16091_s25 = smov 43  }
 0x459   : > { %v14462_v45 = vpop.permute.xlu0 %6425  ;;  %6343 = vmatmul.mubr.bf16.vlgmr.msra.gmra.mxu1 %v10297_v1  ;;  %10391 = vmatprep.mubr.msk.bf16.mxu0 %vm974_vm7, %v10346_v29  ;;  %v14606_v1 = vsel %vm262_vm0, %v6387_v42, %v15769_v54 }
 0x45a   : > { %10392 = vmatprep.mubr.msk.bf16.mxu1 %vm974_vm7, %v10346_v29  ;;  %16095 = vst [vmem:[#allocation21_spill] sm:$0xff] %v14606_v1 }
 0x45b   : > { %7254 = vrot.lane.b32.xlu1 %v14092_v20, %s16088_s29 }
 0x45c   : > { %7252 = vrot.lane.b32.xlu0 %v14095_v56, %s16088_s29  ;;  %v14472_v43 = vpop.permute.xlu1 %6431 }
 0x45d   : > { %v14474_v7 = vpop.permute.xlu0 %6429 }
 0x45f   : > { %7576 = vrot.lane.b32.xlu1 %v14092_v20, %s16089_s24 }
 0x460   : > { %7574 = vrot.lane.b32.xlu0 %v14095_v56, %s16089_s24  ;;  %v14482_v32 = vpop.permute.xlu1 %6469 }
 0x461   : > { %v14484_v47 = vpop.permute.xlu0 %6467 }
 0x463   : > { %7580 = vrot.lane.b32.xlu1 %v14106_v55, %s16089_s24 }
 0x464   : > { %7578 = vrot.lane.b32.xlu0 %v7564_v25, %s16089_s24  ;;  %v14490_v57 = vpop.permute.xlu1 %6473 }
 0x465   : > { %v14492_v3 = vpop.permute.xlu0 %6471 }
 0x467   : > { %7584 = vrot.lane.b32.xlu1 %v7567_v60, %s16089_s24 }
 0x468   : > { %7582 = vrot.lane.b32.xlu0 %v14118_v4, %s16089_s24  ;;  %v14498_v44 = vpop.permute.xlu1 %6477  ;;  %s16092_s24 = smov 44  }
 0x469   : > { %v14500_v39 = vpop.permute.xlu0 %6475 }
 0x46b   : > { %7530 = vrot.lane.b32.xlu1 %v14092_v20, %s16090_s19 }
 0x46c   : > { %7528 = vrot.lane.b32.xlu0 %v14095_v56, %s16090_s19  ;;  %v14506_v41 = vpop.permute.xlu1 %6515 }
 0x46d   : > { %v14508_v5 = vpop.permute.xlu0 %6513 }
 0x46f   : > { %7534 = vrot.lane.b32.xlu1 %v14106_v55, %s16090_s19 }
 0x470   : > { %7532 = vrot.lane.b32.xlu0 %v7518_v37, %s16090_s19  ;;  %v14514_v0 = vpop.permute.xlu1 %6519  ;;  %v7337_v37 = vld [vmem:[%s11068_s21 + $0x30] sm:$0xf] }
 0x471   : > { %v14516_v58 = vpop.permute.xlu0 %6517 }
 0x473   : > { %7538 = vrot.lane.b32.xlu1 %v7521_v35, %s16090_s19  ;;  %v14633_v35 = vld [vmem:[%s11068_s21 + $0xc] sm:$0xff] }
 0x474   : > { %7536 = vrot.lane.b32.xlu0 %v14118_v4, %s16090_s19  ;;  %v14522_v14 = vpop.permute.xlu1 %6523  ;;  %s16093_s19 = smov 45   ;;  %16096 = vst [vmem:[#allocation16_spill] sm:$0xff] %v14633_v35 }
 0x475   : > { %v14524_v33 = vpop.permute.xlu0 %6521 }
 0x477   : > { %7484 = vrot.lane.b32.xlu1 %v14092_v20, %s16091_s25 }
 0x478   : > { %7482 = vrot.lane.b32.xlu0 %v14095_v56, %s16091_s25  ;;  %v14530_v31 = vpop.permute.xlu1 %6561 }
 0x479   : > { %v14532_v9 = vpop.permute.xlu0 %6559 }
 0x47b   : > { %7488 = vrot.lane.b32.xlu1 %v14106_v55, %s16091_s25 }
 0x47c   : > { %7486 = vrot.lane.b32.xlu0 %v7472_v17, %s16091_s25  ;;  %v14538_v36 = vpop.permute.xlu1 %6565 }
 0x47d   : > { %v14540_v48 = vpop.permute.xlu0 %6563 }
 0x47f   : > { %7492 = vrot.lane.b32.xlu1 %v7475_v50, %s16091_s25 }
 0x480   : > { %7490 = vrot.lane.b32.xlu0 %v14118_v4, %s16091_s25  ;;  %v14546_v16 = vpop.permute.xlu1 %6569  ;;  %s16094_s25 = smov 46  }
 0x481   : > { %v14548_v61 = vpop.permute.xlu0 %6567 }
 0x483   : > { %7438 = vrot.lane.b32.xlu1 %v14092_v20, %s16092_s24 }
 0x484   : > { %7436 = vrot.lane.b32.xlu0 %v14095_v56, %s16092_s24  ;;  %v14554_v6 = vpop.permute.xlu1 %6607 }
 0x485   : > { %v14556_v34 = vpop.permute.xlu0 %6605  ;;  %v6618_v60 = vrot.slane %v14554_v6, 4 }
 0x487   : > { %7442 = vrot.lane.b32.xlu1 %v14106_v55, %s16092_s24 }
 0x488   : > { %7440 = vrot.lane.b32.xlu0 %v7426_v52, %s16092_s24  ;;  %v14562_v19 = vpop.permute.xlu1 %6611 }
 0x489   : > { %v14564_v8 = vpop.permute.xlu0 %6609  ;;  %v6620_v42 = vrot.slane %v14562_v19, 4 }
 0x48a   : > { %v6619_v62 = vrot.slane %v14564_v8, 4  ;;  %v7288_v8 = vld [vmem:[%s11068_s21 + $0x14] sm:$0xf] }
 0x48b   : > { %7446 = vrot.lane.b32.xlu1 %v7429_v13, %s16092_s24 }
 0x48c   : > { %7444 = vrot.lane.b32.xlu0 %v14118_v4, %s16092_s24  ;;  %v14570_v15 = vpop.permute.xlu1 %6615  ;;  %s16098_s24 = smov 47  }
 0x48d   : > { %v14572_v30 = vpop.permute.xlu0 %6613  ;;  %v6622_v54 = vrot.slane %v14570_v15, 4  ;;  %v14636_v15 = vld [vmem:[%s11068_s21 + $0x4] sm:$0xff] }
 0x48e   : > { %v6621_v29 = vrot.slane %v14572_v30, 4  ;;  %16097 = vst [vmem:[#allocation17_spill] sm:$0xff] %v14636_v15 }
 0x48f   : > { %7392 = vrot.lane.b32.xlu1 %v14092_v20, %s16093_s19 }
 0x490   : > { %7390 = vrot.lane.b32.xlu0 %v14095_v56, %s16093_s19  ;;  %v14578_v59 = vpop.permute.xlu1 %6653  ;;  %v6629_v46 = vsel %vm262_vm0, %v6621_v29, %v6622_v54 }
 0x491   : > { %v14580_v18 = vpop.permute.xlu0 %6651 }
 0x492   : > { %v6663_v17 = vrot.slane %v14580_v18, 4 }
 0x493   : > { %7396 = vrot.lane.b32.xlu1 %v14106_v55, %s16093_s19 }
 0x494   : > { %7394 = vrot.lane.b32.xlu0 %v7380_v11, %s16093_s19  ;;  %v14586_v27 = vpop.permute.xlu1 %6657 }
 0x495   : > { %v14588_v26 = vpop.permute.xlu0 %6655 }
 0x497   : > { %7400 = vrot.lane.b32.xlu1 %v7383_v12, %s16093_s19 }
 0x498   : > { %7398 = vrot.lane.b32.xlu0 %v14118_v4, %s16093_s19  ;;  %v6662_v22 = vpop.permute.xlu1 %6661  ;;  %s10928_s19 = smov 39  }
 0x499   : > { %v14594_v38 = vpop.permute.xlu0 %6659  ;;  %v6668_v25 = vrot.slane %v6662_v22, 4  ;;  %v6617_v22 = vrot.slane %v14556_v34, 4 }
 0x49b   : > { %7346 = vrot.lane.b32.xlu1 %v14092_v20, %s16094_s25  ;;  %v6667_v20 = vrot.slane %v14594_v38, 4 }
 0x49c   : > { %7344 = vrot.lane.b32.xlu0 %v14095_v56, %s16094_s25  ;;  %v6700_v40 = vpop.permute.xlu1 %6699  ;;  %v6664_v56 = vrot.slane %v14578_v59, 4 }
 0x49d   : > { %v6698_v23 = vpop.permute.xlu0 %6697  ;;  %v6710_v50 = vrot.slane %v6700_v40, 4  ;;  %v6675_v24 = vsel %vm262_vm0, %v6667_v20, %v6668_v25 }
 0x49e   : > { %v6709_v52 = vrot.slane %v6698_v23, 4  ;;  %v6669_v53 = vsel %vm262_vm0, %v6663_v17, %v6664_v56 }
 0x49f   : > { %7350 = vrot.lane.b32.xlu1 %v14106_v55, %s16094_s25 }
 0x4a0   : > { %7348 = vrot.lane.b32.xlu0 %v7334_v10, %s16094_s25  ;;  %v6704_v13 = vpop.permute.xlu1 %6703 }
 0x4a1   : > { %v6702_v55 = vpop.permute.xlu0 %6701  ;;  %v6712_v21 = vrot.slane %v6704_v13, 4 }
 0x4a2   : > { %v6711_v10 = vrot.slane %v6702_v55, 4  ;;  %v6665_v55 = vrot.slane %v14588_v26, 4 }
 0x4a3   : > { %7354 = vrot.lane.b32.xlu1 %v7337_v37, %s16094_s25  ;;  %v6666_v37 = vrot.slane %v14586_v27, 4 }
 0x4a4   : > { %7352 = vrot.lane.b32.xlu0 %v14118_v4, %s16094_s25  ;;  %v6715_v4 = vsel %vm262_vm0, %v6709_v52, %v6710_v50  ;;  %v6708_v12 = vpop.permute.xlu1 %6707  ;;  %v6717_v51 = vsel %vm262_vm0, %v6710_v50, %v6711_v10  ;;  %v6671_v50 = vsel %vm262_vm0, %v6664_v56, %v6665_v55  ;;  %v14655_v10 = vld [vmem:[%s11068_s21 + $0x20] sm:$0xff]  ;;  %v6676_v56 = vsel %vm16103_vm2, %v14594_v38, %v6675_v24  ;;  %vm16105_vm2 = vmmov %vm16104_vm1  ;;  %s16158_s25 = smov 40  }
 0x4a5   : > { %v6706_v11 = vpop.permute.xlu0 %6705  ;;  %v6714_v26 = vrot.slane %v6708_v12, 4  ;;  %v6673_v52 = vsel %vm262_vm0, %v6666_v37, %v6667_v20  ;;  %v6716_v25 = vsel %vm16099_vm4, %v6698_v23, %v6715_v4  ;;  %v6575_v23 = vrot.slane %v14548_v61, 4 }
 0x4a6   : > { %v6713_v1 = vrot.slane %v6706_v11, 4  ;;  %v6574_v24 = vrot.slane %v14538_v36, 4  ;;  %v6623_v38 = vsel %vm262_vm0, %v6617_v22, %v6618_v60  ;;  %v6625_v4 = vsel %vm262_vm0, %v6618_v60, %v6619_v62  ;;  %v14690_v22 = vld [vmem:[%s11068_s21 + $0x28] sm:$0xff] }
 0x4a7   : > { %7300 = vrot.lane.b32.xlu1 %v14633_v35, %s16098_s24  ;;  %v6718_v35 = vsel %vm16100_vm6, %v6700_v40, %v6717_v51  ;;  %vm16108_vm4 = vcmask 564224  }
 0x4a8   : > { %7298 = vrot.lane.b32.xlu0 %v14636_v15, %s16098_s24  ;;  %v6721_v12 = vsel %vm262_vm0, %v6713_v1, %v6714_v26  ;;  %v6719_v54 = vsel %vm262_vm0, %v6712_v21, %v6713_v1  ;;  %v14662_v15 = vpop.permute.xlu1 %6745  ;;  %v6674_v21 = vsel %vm16104_vm1, %v14586_v27, %v6673_v52  ;;  %v6627_v1 = vsel %vm262_vm0, %v6620_v42, %v6621_v29  ;;  %v7291_v42 = vld [vmem:[%s11068_s21 + $0x30] sm:$0xf]  ;;  %vm16109_vm6 = vmmov %vm16108_vm4 }
 0x4a9   : > { %v6722_v28 = vsel %vm16101_vm3, %v6706_v11, %v6721_v12  ;;  %v14664_v20 = vpop.permute.xlu0 %6743  ;;  %v6720_v17 = vsel %vm16102_vm14, %v6704_v13, %v6719_v54  ;;  %v6670_v27 = vsel %vm16105_vm2, %v14580_v18, %v6669_v53  ;;  %v6672_v13 = vsel %vm16104_vm1, %v14578_v59, %v6671_v50  ;;  %vm16111_vm3 = vmmov %vm16108_vm4 }
 0x4aa   : > { %v10377_v55 = vcombine.low %v6718_v35, %v6722_v28  ;;  %v10375_v37 = vcombine.low %v6716_v25, %v6720_v17  ;;  %v10376_v51 = vcombine.high %v6716_v25, %v6720_v17  ;;  %v10378_v40 = vcombine.high %v6718_v35, %v6722_v28  ;;  %vm16112_vm14 = vmmov %vm16111_vm3 }
 0x4ab   : > { %7304 = vrot.lane.b32.xlu1 %v14655_v10, %s16098_s24  ;;  %v6573_v11 = vrot.slane %v14540_v48, 4  ;;  %v10372_v29 = vcombine.high %v6670_v27, %v6674_v21  ;;  %v10374_v35 = vcombine.high %v6672_v13, %v6676_v56  ;;  %v6530_v53 = vrot.slane %v14522_v14, 4 }
 0x4ac   : > { %7302 = vrot.lane.b32.xlu0 %v7288_v8, %s16098_s24  ;;  %7146 = vmatprep.subr.bf16.mxu0 %v10376_v51  ;;  %v14684_v26 = vpop.permute.xlu1 %6749  ;;  %v16106_v18 = vrot.slane %v14530_v31, 4  ;;  %v16107_v59 = vrot.slane %v14532_v9, 4  ;;  %v6630_v62 = vsel %vm16108_vm4, %v14572_v30, %v6629_v46  ;;  %v6628_v60 = vsel %vm16109_vm6, %v14562_v19, %v6627_v1 }
 0x4ad   : > { %7187 = vmatprep.subr.bf16.mxu1 %v10378_v40  ;;  %v14686_v28 = vpop.permute.xlu0 %6747  ;;  %7147 = vmatpush1.bf16.msra.mxu0 %v10375_v37  ;;  %v6529_v52 = vrot.slane %v14524_v33, 4  ;;  %v16110_v50 = vrot.slane %v14546_v16, 4  ;;  %v6624_v12 = vsel %vm16111_vm3, %v14556_v34, %v6623_v38  ;;  %v6581_v8 = vsel %vm262_vm0, %v6574_v24, %v6575_v23 }
 0x4ae   : > { %v6577_v48 = vsel %vm262_vm0, %v16107_v59, %v16106_v18  ;;  %7188 = vmatpush1.bf16.msra.mxu1 %v10377_v55  ;;  %7148 = vmatprep.subr.bf16.mxu0 %v10372_v29  ;;  %v6528_v46 = vrot.slane %v14514_v0, 4  ;;  %v6626_v30 = vsel %vm16112_vm14, %v14554_v6, %v6625_v4  ;;  %v10373_v19 = vcombine.low %v6672_v13, %v6676_v56  ;;  %v7242_v6 = vld [vmem:[%s11068_s21 + $0x14] sm:$0xf] }
 0x4af   : > { %v6583_v14 = vsel %vm262_vm0, %v6575_v23, %v16110_v50  ;;  %7189 = vmatprep.subr.bf16.mxu1 %v10374_v35  ;;  %v10371_v54 = vcombine.low %v6670_v27, %v6674_v21  ;;  %7308 = vrot.lane.b32.xlu1 %v7291_v42, %s16098_s24  ;;  %v6527_v16 = vrot.slane %v14516_v58, 4  ;;  %v16113_v34 = vmov %v16106_v18 }
 0x4b0   : > { %7306 = vrot.lane.b32.xlu0 %v14690_v22, %s16098_s24  ;;  %v6579_v25 = vsel %vm262_vm0, %v16113_v34, %v6573_v11  ;;  %v10368_v37 = vcombine.high %v6624_v12, %v6628_v60  ;;  %v10370_v23 = vcombine.high %v6626_v30, %v6630_v62  ;;  %v6484_v56 = vrot.slane %v14498_v44, 4  ;;  %s16173_s24 = smov 17  }
 0x4b1   : > { %v14719_v17 = vpop.permute.xlu1 %6753  ;;  %v16114_v21 = vrot.slane %v14506_v41, 4  ;;  %v16115_v51 = vrot.slane %v14508_v5, 4  ;;  %vm16116_vm2 = vcmask 572416   ;;  %7149 = vmatpush1.bf16.msra.mxu0 %v10371_v54  ;;  %v6483_v24 = vrot.slane %v14500_v39, 4 }
 0x4b2   : > { %v14721_v55 = vpop.permute.xlu0 %6751  ;;  %v6584_v58 = vsel %vm16116_vm2, %v14548_v61, %v6583_v14  ;;  %7190 = vmatpush1.bf16.msra.mxu1 %v10373_v19  ;;  %vm16117_vm1 = vmmov %vm16116_vm2  ;;  %v6537_v38 = vsel %vm262_vm0, %v6529_v52, %v6530_v53  ;;  %7150 = vmatprep.subr.bf16.mxu0 %v10368_v37  ;;  %v6535_v27 = vsel %vm262_vm0, %v6528_v46, %v6529_v52  ;;  %v6482_v13 = vrot.slane %v14490_v57, 4 }
 0x4b3   : > { %v6531_v40 = vsel %vm262_vm0, %v16115_v51, %v16114_v21  ;;  %v6582_v1 = vsel %vm16117_vm1, %v14538_v36, %v6581_v8  ;;  %vm16118_vm4 = vmmov %vm16117_vm1  ;;  %7191 = vmatprep.subr.bf16.mxu1 %v10370_v23  ;;  %v10369_v11 = vcombine.low %v6626_v30, %v6630_v62  ;;  %v10367_v4 = vcombine.low %v6624_v12, %v6628_v60  ;;  %v16129_v23 = vld [vmem:[#allocation15_spill] sm:$0xff]  ;;  %v16133_v51 = vld [vmem:[#allocation13_spill] sm:$0xff] }
 0x4b4   : > { %v6578_v44 = vsel %vm16118_vm4, %v14532_v9, %v6577_v48  ;;  %vm16119_vm6 = vmmov %vm16117_vm1  ;;  %7258 = vrot.lane.b32.xlu1 %v14655_v10, %s16088_s29  ;;  %7256 = vrot.lane.b32.xlu0 %v7242_v6, %s16088_s29  ;;  %v6481_v36 = vrot.slane %v14492_v3, 4  ;;  %v16120_v9 = vmov %v16114_v21  ;;  %v6438_v59 = vrot.slane %v14472_v43, 4 }
 0x4b5   : > { %v6580_v61 = vsel %vm16119_vm6, %v14530_v31, %v6579_v25  ;;  %v6533_v29 = vsel %vm262_vm0, %v16120_v9, %v6527_v16  ;;  %v14749_v35 = vpop.permute.xlu1 %6791  ;;  %v10364_v53 = vcombine.high %v6578_v44, %v6582_v1  ;;  %v7245_v31 = vld [vmem:[%s11068_s21 + $0x30] sm:$0xf]  ;;  %v16121_v48 = vrot.slane %v14482_v32, 4  ;;  %7151 = vmatpush1.bf16.msra.mxu0 %v10367_v4  ;;  %v7703_v9 = vld [vmem:[%s11068_s21 + $0x14] sm:$0xf] }
 0x4b6   : > { %v14751_v42 = vpop.permute.xlu0 %6789  ;;  %v10366_v18 = vcombine.high %v6580_v61, %v6584_v58  ;;  %v16122_v62 = vrot.slane %v14484_v47, 4  ;;  %vm16123_vm3 = vcmask 580608   ;;  %7192 = vmatpush1.bf16.msra.mxu1 %v10369_v11  ;;  %v6437_v50 = vrot.slane %v14474_v7, 4 }
 0x4b7   : > { %v6538_v3 = vsel %vm16123_vm3, %v14524_v33, %v6537_v38  ;;  %vm16124_vm14 = vmmov %vm16123_vm3  ;;  %v6491_v14 = vsel %vm262_vm0, %v6483_v24, %v6484_v56  ;;  %7152 = vmatprep.subr.bf16.mxu0 %v10364_v53  ;;  %v6489_v12 = vsel %vm262_vm0, %v6482_v13, %v6483_v24  ;;  %v6436_v8 = vrot.slane %v14460_v49, 4 }
 0x4b8   : > { %v6485_v60 = vsel %vm262_vm0, %v16122_v62, %v16121_v48  ;;  %v6536_v52 = vsel %vm16124_vm14, %v14514_v0, %v6535_v27  ;;  %vm16125_vm2 = vmmov %vm16123_vm3  ;;  %7193 = vmatprep.subr.bf16.mxu1 %v10366_v18  ;;  %v10365_v46 = vcombine.low %v6580_v61, %v6584_v58  ;;  %v10363_v30 = vcombine.low %v6578_v44, %v6582_v1  ;;  %v16137_v44 = vld [vmem:[#allocation17_spill] sm:$0xff]  ;;  %v16138_v27 = vld [vmem:[#allocation14_spill] sm:$0xff] }
 0x4b9   : > { %v6532_v43 = vsel %vm16125_vm2, %v14508_v5, %v6531_v40  ;;  %vm16126_vm1 = vmmov %vm16125_vm2  ;;  %7262 = vrot.lane.b32.xlu1 %v7245_v31, %s16088_s29  ;;  %7260 = vrot.lane.b32.xlu0 %v14690_v22, %s16088_s29  ;;  %v6435_v0 = vrot.slane %v14462_v45, 4  ;;  %v16127_v5 = vmov %v16121_v48  ;;  %v14779_v54 = vpop.permute.xlu1 %6795  ;;  %v16128_v37 = vrot.slane %v14452_v2, 4  ;;  %s10927_s29 = smov 38   ;;  %v16142_v18 = vld [vmem:[#allocation19_spill] sm:$0xff] }
 0x4ba   : > { %v6534_v33 = vsel %vm16126_vm1, %v14506_v41, %v6533_v29  ;;  %v6487_v19 = vsel %vm262_vm0, %v16127_v5, %v6481_v36  ;;  %v14781_v16 = vpop.permute.xlu0 %6793  ;;  %v10360_v34 = vcombine.high %v6532_v43, %v6536_v52  ;;  %v6392_v41 = vrot.slane %v14446_v63, 4  ;;  %7153 = vmatpush1.bf16.msra.mxu0 %v10363_v30  ;;  %7194 = vmatpush1.bf16.msra.mxu1 %v10365_v46  ;;  %v16140_v29 = vld [vmem:[#allocation22_spill] sm:$0xff]  ;;  %v16150_v30 = vld [vmem:[#allocation21_spill] sm:$0xff] }
 0x4bb   : > { %v10362_v25 = vcombine.high %v6534_v33, %v6538_v3  ;;  %v16130_v6 = vrot.slane %v16129_v23, 4  ;;  %vm16131_vm4 = vcmask 588800   ;;  %v6391_v40 = vrot.slane %v16133_v51, 4 }
 0x4bc   : > { %v6492_v45 = vsel %vm16131_vm4, %v14500_v39, %v6491_v14  ;;  %vm16132_vm6 = vmmov %vm16131_vm4  ;;  %v6445_v58 = vsel %vm262_vm0, %v6437_v50, %v6438_v59  ;;  %7154 = vmatprep.subr.bf16.mxu0 %v10360_v34  ;;  %v6443_v1 = vsel %vm262_vm0, %v6436_v8, %v6437_v50  ;;  %v10361_v24 = vcombine.low %v6534_v33, %v6538_v3  ;;  %v7706_v33 = vld [vmem:[%s11068_s21 + $0x30] sm:$0xf]  ;;  %v14845_v34 = vpop.f32.mrf.mxu0 }
 0x4bd   : > { %v6439_v56 = vsel %vm262_vm0, %v16130_v6, %v16128_v37  ;;  %v6490_v21 = vsel %vm16132_vm6, %v14490_v57, %v6489_v12  ;;  %vm16134_vm3 = vmmov %vm16131_vm4  ;;  %7195 = vmatprep.subr.bf16.mxu1 %v10362_v25  ;;  %v10359_v38 = vcombine.low %v6532_v43, %v6536_v52  ;;  %v16136_v57 = vld [vmem:[#allocation16_spill] sm:$0xff]  ;;  %7713 = vrot.lane.b32.xlu0 %v16137_v44, %s10927_s29  ;;  %v6390_v13 = vrot.slane %v16138_v27, 4  ;;  %v14808_v11 = vpop.permute.xlu1 %6799  ;;  %v14847_v25 = vpop.f32.mrf.mxu1 }
 0x4be   : > { %v6486_v63 = vsel %vm16134_vm3, %v14484_v47, %v6485_v60  ;;  %vm16135_vm14 = vmmov %vm16134_vm3  ;;  %7715 = vrot.lane.b32.xlu1 %v16136_v57, %s10927_s29  ;;  %v16139_v47 = vmov %v16128_v37  ;;  %v14810_v4 = vpop.permute.xlu0 %6797  ;;  %v16141_v53 = vrot.slane %v16140_v29, 4  ;;  %v16143_v31 = vrot.slane %v16142_v18, 4  ;;  %7196 = vmatpush1.bf16.msra.mxu1 %v10361_v24 }
 0x4bf   : > { %v6488_v39 = vsel %vm16135_vm14, %v14482_v32, %v6487_v19  ;;  %v6441_v61 = vsel %vm262_vm0, %v16139_v47, %v6435_v0  ;;  %v10356_v32 = vcombine.high %v6486_v63, %v6490_v21  ;;  %vm16144_vm2 = vcmask 596992   ;;  %7155 = vmatpush1.bf16.msra.mxu0 %v10359_v38  ;;  %v16151_v0 = vld [vmem:[#allocation20_spill] sm:$0xff]  ;;  %v1014_v38 = vpop.f32.mrf.mxu0 }
 0x4c0   : > { %v10358_v36 = vcombine.high %v6488_v39, %v6492_v45  ;;  %v6395_v59 = vsel %vm262_vm0, %v16143_v31, %v16141_v53  ;;  %v6446_v48 = vsel %vm16144_vm2, %v14474_v7, %v6445_v58  ;;  %vm16145_vm1 = vmmov %vm16144_vm2  ;;  %v6399_v60 = vsel %vm262_vm0, %v6391_v40, %v6392_v41 }
 0x4c1   : > { %v6444_v62 = vsel %vm16145_vm1, %v14460_v49, %v6443_v1  ;;  %vm16146_vm4 = vmmov %vm16145_vm1  ;;  %7156 = vmatprep.subr.bf16.mxu0 %v10356_v32  ;;  %v6397_v52 = vsel %vm262_vm0, %v6390_v13, %v6391_v40  ;;  %v10357_v14 = vcombine.low %v6488_v39, %v6492_v45  ;;  %v10355_v7 = vcombine.low %v6486_v63, %v6490_v21  ;;  %v14831_v49 = vpop.permute.xlu1 %6838 }
 0x4c2   : > { %v6440_v3 = vsel %vm16146_vm4, %v16129_v23, %v6439_v56  ;;  %7197 = vmatprep.subr.bf16.mxu1 %v10358_v36  ;;  %vm16147_vm6 = vmmov %vm16145_vm1  ;;  %7719 = vrot.lane.b32.xlu1 %v14655_v10, %s10927_s29  ;;  %v14833_v43 = vpop.permute.xlu0 %6836  ;;  %vm16148_vm3 = vcmask 605184   ;;  %vm6855_vm4 = vcmask 523264   ;;  %v6849_v37 = vrot.slane %v14831_v49, 4 }
 0x4c3   : > { %v6442_v50 = vsel %vm16147_vm6, %v14452_v2, %v6441_v61  ;;  %7717 = vrot.lane.b32.xlu0 %v7703_v9, %s10927_s29  ;;  %v10352_v12 = vcombine.high %v6440_v3, %v6444_v62  ;;  %v6400_v46 = vsel %vm16148_vm3, %v16133_v51, %v6399_v60  ;;  %7157 = vmatpush1.bf16.msra.mxu0 %v10355_v7  ;;  %vm16149_vm14 = vmmov %vm16148_vm3  ;;  %v6848_v23 = vrot.slane %v14833_v43, 4 }
 0x4c4   : > { %v10354_v8 = vcombine.high %v6442_v50, %v6446_v48  ;;  %7198 = vmatpush1.bf16.msra.mxu1 %v10357_v14  ;;  %v6398_v2 = vsel %vm16149_vm14, %v16138_v27, %v6397_v52  ;;  %vm16152_vm2 = vmmov %vm16148_vm3  ;;  %v10353_v41 = vcombine.low %v6442_v50, %v6446_v48  ;;  %v10351_v6 = vcombine.low %v6440_v3, %v6444_v62  ;;  %v1055_v27 = vpop.f32.mrf.mxu1  ;;  %v7656_v62 = vld [vmem:[%s11068_s21 + $0x14] sm:$0xf] }
 0x4c5   : > { %v6394_v5 = vsel %vm16152_vm2, %v16151_v0, %v16150_v30  ;;  %vm16153_vm1 = vmmov %vm16152_vm2  ;;  %7158 = vmatprep.subr.bf16.mxu0 %v10352_v12  ;;  %v6760_v56 = vrot.slane %v14719_v17, 4  ;;  %v6759_v45 = vrot.slane %v14721_v55, 4  ;;  %vm6808_vm6 = vcmask 531456   ;;  %v6843_v21 = vpop.permute.xlu1 %6842 }
 0x4c6   : > { %v6396_v19 = vsel %vm16153_vm1, %v16142_v18, %v6395_v59  ;;  %7199 = vmatprep.subr.bf16.mxu1 %v10354_v8  ;;  %7723 = vrot.lane.b32.xlu1 %v7706_v33, %s10927_s29  ;;  %v6841_v51 = vpop.permute.xlu0 %6840  ;;  %v10348_v40 = vcombine.high %v6394_v5, %v6398_v2  ;;  %v6802_v1 = vrot.slane %v14749_v35, 4  ;;  %v6801_v39 = vrot.slane %v14751_v42, 4 }
 0x4c7   : > { %7721 = vrot.lane.b32.xlu0 %v14690_v22, %s10927_s29  ;;  %v10350_v58 = vcombine.high %v6396_v19, %v6400_v46  ;;  %v10349_v63 = vcombine.low %v6396_v19, %v6400_v46  ;;  %v6850_v24 = vrot.slane %v6841_v51, 4  ;;  %7159 = vmatpush1.bf16.msra.mxu0 %v10351_v6  ;;  %v6758_v13 = vrot.slane %v14684_v26, 4  ;;  %s16178_s29 = smov 18  }
 0x4c8   : > { %7200 = vmatpush1.bf16.msra.mxu1 %v10353_v41  ;;  %v6803_v17 = vrot.slane %v14781_v16, 4  ;;  %v6806_v47 = vrot.slane %v14808_v11, 4  ;;  %v6805_v61 = vrot.slane %v14810_v4, 4  ;;  %7160 = vmatprep.subr.bf16.mxu0 %v10348_v40  ;;  %v6756_v32 = vrot.slane %v14662_v15, 4  ;;  %v1016_v16 = vpop.f32.mrf.mxu0  ;;  %v1057_v11 = vpop.f32.mrf.mxu1 }
 0x4c9   : > { %7201 = vmatprep.subr.bf16.mxu1 %v10350_v58  ;;  %v6755_v36 = vrot.slane %v14664_v20, 4  ;;  %v6854_v9 = vsel %vm262_vm0, %v6848_v23, %v6849_v37  ;;  %v10347_v29 = vcombine.low %v6394_v5, %v6398_v2  ;;  %v6767_v53 = vsel %vm262_vm0, %v6759_v45, %v6760_v56  ;;  %v6847_v59 = vpop.permute.xlu1 %6846 }
 0x4ca   : > { %7668 = vrot.lane.b32.xlu1 %v16136_v57, %s10928_s19  ;;  %v6804_v18 = vrot.slane %v14779_v54, 4  ;;  %v6857_v31 = vsel %vm262_vm0, %v6849_v37, %v6850_v24  ;;  %v6845_v48 = vpop.permute.xlu0 %6844  ;;  %v6765_v60 = vsel %vm262_vm0, %v6758_v13, %v6759_v45  ;;  %v6807_v3 = vsel %vm262_vm0, %v6801_v39, %v6802_v1  ;;  %v1017_v7 = vpop.f32.mrf.mxu0 }
 0x4cb   : > { %7666 = vrot.lane.b32.xlu0 %v16137_v44, %s10928_s19  ;;  %v6851_v52 = vrot.slane %v6843_v21, 4  ;;  %v6853_v50 = vrot.slane %v6847_v59, 4  ;;  %v6852_v14 = vrot.slane %v6845_v48, 4  ;;  %7161 = vmatpush1.bf16.msra.mxu0 %v10347_v29  ;;  %v1058_v12 = vpop.f32.mrf.mxu1  ;;  %v6810_v8 = vsel %vm262_vm0, %v6802_v1, %v6803_v17 }
 0x4cc   : > { %7202 = vmatpush1.bf16.msra.mxu1 %v10349_v63  ;;  %v6814_v33 = vsel %vm262_vm0, %v6805_v61, %v6806_v47  ;;  %v6856_v46 = vsel %vm6855_vm4, %v14833_v43, %v6854_v9  ;;  %v6812_v2 = vsel %vm262_vm0, %v6804_v18, %v6805_v61  ;;  %v6757_v30 = vrot.slane %v14686_v28, 4  ;;  %v1891_v41 = vpop.f32.mrf.mxu0  ;;  %v7659_v28 = vld [vmem:[%s11068_s21 + $0x30] sm:$0xf] }
 0x4cd   : > { %v6858_v0 = vsel %vm6855_vm4, %v14831_v49, %v6857_v31  ;;  %v6861_v5 = vsel %vm262_vm0, %v6852_v14, %v6853_v50  ;;  %v6859_v19 = vsel %vm262_vm0, %v6851_v52, %v6852_v14  ;;  %v1932_v37 = vpop.f32.mrf.mxu1  ;;  %v14889_v23 = vpop.permute.xlu1 %7254  ;;  %v1943_v56 = vadd.f32 %v1891_v41, %v14845_v34 }
 0x4ce   : > { %7672 = vrot.lane.b32.xlu1 %v14655_v10, %s10928_s19  ;;  %v6862_v43 = vsel %vm6855_vm4, %v6845_v48, %v6861_v5  ;;  %v14891_v6 = vpop.permute.xlu0 %7252  ;;  %v6860_v49 = vsel %vm6855_vm4, %v6843_v21, %v6859_v19  ;;  %v1945_v45 = vadd.f32 %v1932_v37, %v14847_v25  ;;  %v6815_v51 = vsel %vm6808_vm6, %v14810_v4, %v6814_v33  ;;  %v1893_v1 = vpop.f32.mrf.mxu0  ;;  %v14926_v33 = vld [vmem:[#allocation7 + $0x40] sm:$0xff] }
 0x4cf   : > { %7670 = vrot.lane.b32.xlu0 %v7656_v62, %s10928_s19  ;;  %v10389_v40 = vcombine.low %v6858_v0, %v6862_v43  ;;  %v10387_v58 = vcombine.low %v6856_v46, %v6860_v49  ;;  %v6813_v63 = vsel %vm6808_vm6, %v14779_v54, %v6812_v2  ;;  %v1934_v39 = vpop.f32.mrf.mxu1  ;;  %v10388_v24 = vcombine.high %v6856_v46, %v6860_v49 }
 0x4d0   : > { %v10390_v13 = vcombine.high %v6858_v0, %v6862_v43  ;;  %v1944_v17 = vadd.f32 %v1893_v1, %v1014_v38  ;;  %v1946_v47 = vadd.f32 %v1934_v39, %v1055_v27  ;;  %v6761_v21 = vsel %vm262_vm0, %v6755_v36, %v6756_v32  ;;  %v1895_v54 = vpop.f32.mrf.mxu0  ;;  %v7613_v43 = vld [vmem:[%s11068_s21 + $0x30] sm:$0xf] }
 0x4d1   : > { %v6809_v34 = vsel %vm6808_vm6, %v14751_v42, %v6807_v3  ;;  %v6811_v25 = vsel %vm6808_vm6, %v14749_v35, %v6810_v8  ;;  %v1936_v4 = vpop.f32.mrf.mxu1  ;;  %v6763_v61 = vsel %vm262_vm0, %v6756_v32, %v6757_v30  ;;  %7172 = vmatprep.subr.bf16.mxu0 %v10388_v24  ;;  %v14910_v38 = vpop.permute.xlu1 %7576  ;;  %vm16154_vm3 = vcmask 539648   ;;  %v7610_v3 = vld [vmem:[%s11068_s21 + $0x14] sm:$0xf] }
 0x4d2   : > { %7676 = vrot.lane.b32.xlu1 %v7659_v28, %s10928_s19  ;;  %7213 = vmatprep.subr.bf16.mxu1 %v10390_v13  ;;  %v7575_v27 = vpop.permute.xlu0 %7574  ;;  %v10384_v36 = vcombine.high %v6809_v34, %v6813_v63  ;;  %v10386_v9 = vcombine.high %v6811_v25, %v6815_v51  ;;  %v6768_v42 = vsel %vm16154_vm3, %v14721_v55, %v6767_v53  ;;  %vm16155_vm14 = vmmov %vm16154_vm3  ;;  %v1896_v29 = vpop.f32.mrf.mxu0  ;;  %v7587_v53 = vrot.slane %v14910_v38, 4  ;;  %v16159_v28 = vld [vmem:[#allocation23_spill] sm:$0xff] }
 0x4d3   : > { %7674 = vrot.lane.b32.xlu0 %v14690_v22, %s10928_s19  ;;  %7173 = vmatpush2.bf16.msra.mxu0 %v10387_v58  ;;  %v6766_v35 = vsel %vm16155_vm14, %v14684_v26, %v6765_v60  ;;  %v1937_v16 = vpop.f32.mrf.mxu1  ;;  %vm16156_vm2 = vmmov %vm16154_vm3  ;;  %v10385_v18 = vcombine.low %v6811_v25, %v6815_v51  ;;  %v10383_v31 = vcombine.low %v6809_v34, %v6813_v63  ;;  %v7586_v59 = vrot.slane %v7575_v27, 4  ;;  %s16183_s19 = smov 19  }
 0x4d4   : > { %7214 = vmatpush2.bf16.msra.mxu1 %v10389_v40  ;;  %v6762_v32 = vsel %vm16156_vm2, %v14664_v20, %v6761_v21  ;;  %7174 = vmatprep.subr.bf16.mxu0 %v10384_v36  ;;  %vm16157_vm1 = vmmov %vm16156_vm2  ;;  %v2777_v26 = vpop.f32.mrf.mxu0  ;;  %v10345_v49 = vcombine.low %v16159_v28, %v16159_v28  ;;  %v10394_v63 = vcombine.high %v14926_v33, %v14926_v33  ;;  %vm16160_vm4 = vcmask 334848  }
 0x4d5   : > { %7215 = vmatprep.subr.bf16.mxu1 %v10386_v9  ;;  %v6764_v11 = vsel %vm16157_vm1, %v14662_v15, %v6763_v61  ;;  %v2818_v55 = vpop.f32.mrf.mxu1  ;;  %v7581_v20 = vpop.permute.xlu1 %7580  ;;  %v10380_v62 = vcombine.high %v6762_v32, %v6766_v35  ;;  %v2829_v15 = vadd.f32 %v2777_v26, %v1943_v56  ;;  %v10379_v2 = vcombine.low %v6762_v32, %v6766_v35  ;;  %vm16161_vm6 = vmmov %vm16160_vm4 }
 0x4d6   : > { %7622 = vrot.lane.b32.xlu1 %v16136_v57, %s16158_s25  ;;  %v7579_v48 = vpop.permute.xlu0 %7578  ;;  %v10382_v60 = vcombine.high %v6764_v11, %v6768_v42  ;;  %v2831_v50 = vadd.f32 %v2818_v55, %v1945_v45  ;;  %v2779_v14 = vpop.f32.mrf.mxu0  ;;  %v10381_v46 = vcombine.low %v6764_v11, %v6768_v42  ;;  %v7592_v5 = vsel %vm262_vm0, %v7586_v59, %v7587_v53  ;;  %vm16162_vm3 = vmmov %vm16160_vm4 }
 0x4d7   : > { %7620 = vrot.lane.b32.xlu0 %v16137_v44, %s16158_s25  ;;  %v7588_v52 = vrot.slane %v7579_v48, 4  ;;  %7175 = vmatpush2.bf16.msra.mxu0 %v10383_v31  ;;  %v2820_v7 = vpop.f32.mrf.mxu1  ;;  %v2830_v12 = vadd.f32 %v2779_v14, %v1944_v17  ;;  %v7589_v19 = vrot.slane %v7581_v20, 4  ;;  %v7593_v1 = vsel %vm16160_vm4, %v7575_v27, %v7592_v5  ;;  %vm16163_vm14 = vmmov %vm16162_vm3 }
 0x4d8   : > { %7216 = vmatpush2.bf16.msra.mxu1 %v10385_v18  ;;  %7176 = vmatprep.subr.bf16.mxu0 %v10380_v62  ;;  %v2832_v8 = vadd.f32 %v2820_v7, %v1946_v47  ;;  %v2781_v30 = vpop.f32.mrf.mxu0  ;;  %vm16164_vm2 = vcmask 343040  }
 0x4d9   : > { %7217 = vmatprep.subr.bf16.mxu1 %v10382_v60  ;;  %v2822_v0 = vpop.f32.mrf.mxu1  ;;  %v7585_v41 = vpop.permute.xlu1 %7584  ;;  %v7594_v56 = vsel %vm262_vm0, %v7587_v53, %v7588_v52  ;;  %v8441_v53 = vld [vmem:[%s11068_s21 + $0x14] sm:$0xf]  ;;  %vm16165_vm1 = vmmov %vm16164_vm2 }
 0x4da   : > { %7626 = vrot.lane.b32.xlu1 %v14655_v10, %s16158_s25  ;;  %v7583_v37 = vpop.permute.xlu0 %7582  ;;  %v7591_v45 = vrot.slane %v7585_v41, 4  ;;  %v2782_v40 = vpop.f32.mrf.mxu0  ;;  %v7595_v47 = vsel %vm16161_vm6, %v14910_v38, %v7594_v56  ;;  %vm16166_vm4 = vmmov %vm16165_vm1 }
 0x4db   : > { %7624 = vrot.lane.b32.xlu0 %v7610_v3, %s16158_s25  ;;  %v7590_v51 = vrot.slane %v7583_v37, 4  ;;  %7177 = vmatpush2.bf16.msra.mxu0 %v10379_v2  ;;  %v2823_v58 = vpop.f32.mrf.mxu1  ;;  %vm16167_vm6 = vmmov %vm16165_vm1 }
 0x4dc   : > { %7218 = vmatpush2.bf16.msra.mxu1 %v10381_v46  ;;  %v3663_v13 = vpop.f32.mrf.mxu0 }
 0x4dd   : > { %v7598_v39 = vsel %vm262_vm0, %v7590_v51, %v7591_v45  ;;  %v7596_v24 = vsel %vm262_vm0, %v7589_v19, %v7590_v51  ;;  %v3704_v17 = vpop.f32.mrf.mxu1  ;;  %v7531_v34 = vpop.permute.xlu1 %7530  ;;  %v3715_v38 = vadd.f32 %v3663_v13, %v2829_v15 }
 0x4de   : > { %7630 = vrot.lane.b32.xlu1 %v7613_v43, %s16158_s25  ;;  %v7599_v21 = vsel %vm16162_vm3, %v7583_v37, %v7598_v39  ;;  %7179 = vmatmul.mubr.bf16.vlgmr.msra.gmra.mxu0 %v10345_v49  ;;  %v7529_v25 = vpop.permute.xlu0 %7528  ;;  %v7597_v54 = vsel %vm16163_vm14, %v7581_v20, %v7596_v24  ;;  %v3665_v27 = vpop.f32.mrf.mxu0  ;;  %v3717_v35 = vadd.f32 %v3704_v17, %v2831_v50  ;;  %v7541_v18 = vrot.slane %v7531_v34, 4  ;;  %v8444_v50 = vld [vmem:[%s11068_s21 + $0x30] sm:$0xf] }
 0x4df   : > { %7628 = vrot.lane.b32.xlu0 %v14690_v22, %s16158_s25  ;;  %7220 = vmatmul.mubr.bf16.vlgmr.msra.gmra.mxu1 %v10345_v49  ;;  %v10425_v4 = vcombine.low %v7595_v47, %v7599_v21  ;;  %v10423_v61 = vcombine.low %v7593_v1, %v7597_v54  ;;  %v3706_v36 = vpop.f32.mrf.mxu1  ;;  %v10424_v9 = vcombine.high %v7593_v1, %v7597_v54  ;;  %v7540_v31 = vrot.slane %v7529_v25, 4  ;;  %s16188_s25 = smov 20  }
 0x4e0   : > { %10439 = vmatprep.mubr.msk.bf16.mxu0 %vm974_vm7, %v10394_v63  ;;  %10440 = vmatprep.mubr.msk.bf16.mxu1 %vm974_vm7, %v10394_v63  ;;  %v10426_v42 = vcombine.high %v7595_v47, %v7599_v21  ;;  %v3716_v29 = vadd.f32 %v3665_v27, %v2830_v12  ;;  %v3718_v16 = vadd.f32 %v3706_v36, %v2832_v8  ;;  %v3667_v32 = vpop.f32.mrf.mxu0  ;;  %vm16169_vm3 = vcmask 351232  }
 0x4e1   : > { %v3708_v11 = vpop.f32.mrf.mxu1  ;;  %8023 = vmatprep.subr.bf16.mxu0 %v10424_v9  ;;  %v7535_v26 = vpop.permute.xlu1 %7534  ;;  %v7546_v3 = vsel %vm262_vm0, %v7540_v31, %v7541_v18  ;;  %vm16170_vm14 = vmmov %vm16169_vm3 }
 0x4e2   : > { %8453 = vrot.lane.b32.xlu1 %v16136_v57, %s10919_s9  ;;  %8064 = vmatprep.subr.bf16.mxu1 %v10426_v42  ;;  %v7533_v55 = vpop.permute.xlu0 %7532  ;;  %v3668_v20 = vpop.f32.mrf.mxu0  ;;  %v7543_v12 = vrot.slane %v7535_v26, 4  ;;  %v7547_v49 = vsel %vm16164_vm2, %v7529_v25, %v7546_v3  ;;  %vm16171_vm2 = vmmov %vm16169_vm3 }
 0x4e3   : > { %8451 = vrot.lane.b32.xlu0 %v16137_v44, %s10919_s9  ;;  %v7542_v59 = vrot.slane %v7533_v55, 4  ;;  %8024 = vmatpush1.bf16.msra.mxu0 %v10423_v61  ;;  %v3709_v48 = vpop.f32.mrf.mxu1  ;;  %v8395_v61 = vld [vmem:[%s11068_s21 + $0x14] sm:$0xf] }
 0x4e4   : > { %8065 = vmatpush1.bf16.msra.mxu1 %v10425_v4  ;;  %v4549_v62 = vpop.f32.mrf.mxu0 }
 0x4e5   : > { %v4590_v60 = vpop.f32.mrf.mxu1  ;;  %v7539_v52 = vpop.permute.xlu1 %7538  ;;  %v4601_v14 = vadd.f32 %v4549_v62, %v3715_v38  ;;  %v7548_v8 = vsel %vm262_vm0, %v7541_v18, %v7542_v59 }
 0x4e6   : > { %8457 = vrot.lane.b32.xlu1 %v14655_v10, %s10919_s9  ;;  %v7537_v15 = vpop.permute.xlu0 %7536  ;;  %v4603_v7 = vadd.f32 %v4590_v60, %v3717_v35  ;;  %v7545_v46 = vrot.slane %v7539_v52, 4  ;;  %v4551_v30 = vpop.f32.mrf.mxu0  ;;  %v7549_v56 = vsel %vm16165_vm1, %v7531_v34, %v7548_v8  ;;  %vm16172_vm1 = vmmov %vm16171_vm2 }
 0x4e7   : > { %8455 = vrot.lane.b32.xlu0 %v8441_v53, %s10919_s9  ;;  %v7544_v2 = vrot.slane %v7537_v15, 4  ;;  %v4592_v0 = vpop.f32.mrf.mxu1  ;;  %v4602_v5 = vadd.f32 %v4551_v30, %v3716_v29 }
 0x4e8   : > { %v4604_v19 = vadd.f32 %v4592_v0, %v3718_v16  ;;  %v4553_v43 = vpop.f32.mrf.mxu0 }
 0x4e9   : > { %v7552_v41 = vsel %vm262_vm0, %v7544_v2, %v7545_v46  ;;  %v7550_v37 = vsel %vm262_vm0, %v7543_v12, %v7544_v2  ;;  %v4594_v28 = vpop.f32.mrf.mxu1  ;;  %v7485_v51 = vpop.permute.xlu1 %7484 }
 0x4ea   : > { %8461 = vrot.lane.b32.xlu1 %v8444_v50, %s10919_s9  ;;  %v7553_v45 = vsel %vm16166_vm4, %v7537_v15, %v7552_v41  ;;  %v7483_v40 = vpop.permute.xlu0 %7482  ;;  %v7551_v58 = vsel %vm16167_vm6, %v7535_v26, %v7550_v37  ;;  %v4554_v39 = vpop.f32.mrf.mxu0  ;;  %v7495_v34 = vrot.slane %v7485_v51, 4  ;;  %v8398_v26 = vld [vmem:[%s11068_s21 + $0x30] sm:$0xf]  ;;  %v8349_v37 = vld [vmem:[%s11068_s21 + $0x14] sm:$0xf]  ;;  %vm16174_vm4 = vcmask 359424  }
 0x4eb   : > { %8459 = vrot.lane.b32.xlu0 %v14690_v22, %s10919_s9  ;;  %v10421_v63 = vcombine.low %v7549_v56, %v7553_v45  ;;  %v10419_v1 = vcombine.low %v7547_v49, %v7551_v58  ;;  %v4595_v24 = vpop.f32.mrf.mxu1  ;;  %v10420_v13 = vcombine.high %v7547_v49, %v7551_v58  ;;  %v10422_v17 = vcombine.high %v7549_v56, %v7553_v45  ;;  %s16168_s9 = smov 16   ;;  %v8352_v45 = vld [vmem:[%s11068_s21 + $0x30] sm:$0xf]  ;;  %vm16175_vm6 = vmmov %vm16174_vm4 }
 0x4ec   : > { %v5426_v47 = vpop.f32.mrf.mxu0  ;;  %v7494_v25 = vrot.slane %v7483_v40, 4 }
 0x4ed   : > { %v5467_v21 = vpop.f32.mrf.mxu1  ;;  %8025 = vmatprep.subr.bf16.mxu0 %v10420_v13  ;;  %8066 = vmatprep.subr.bf16.mxu1 %v10422_v17  ;;  %v7489_v54 = vpop.permute.xlu1 %7488  ;;  %v14975_v36 = vadd.f32 %v5426_v47, %v4601_v14 }
 0x4ee   : > { %8407 = vrot.lane.b32.xlu1 %v16136_v57, %s16168_s9  ;;  %v7487_v4 = vpop.permute.xlu0 %7486  ;;  %8026 = vmatpush1.bf16.msra.mxu0 %v10419_v1  ;;  %v14977_v9 = vadd.f32 %v5467_v21, %v4603_v7  ;;  %v5428_v42 = vpop.f32.mrf.mxu0  ;;  %v7500_v11 = vsel %vm262_vm0, %v7494_v25, %v7495_v34  ;;  %v7497_v55 = vrot.slane %v7489_v54, 4 }
 0x4ef   : > { %8405 = vrot.lane.b32.xlu0 %v16137_v44, %s16168_s9  ;;  %v7496_v27 = vrot.slane %v7487_v4, 4  ;;  %8067 = vmatpush1.bf16.msra.mxu1 %v10421_v63  ;;  %v5469_v38 = vpop.f32.mrf.mxu1  ;;  %v14979_v35 = vadd.f32 %v5428_v42, %v4602_v5  ;;  %v7501_v52 = vsel %vm16169_vm3, %v7483_v40, %v7500_v11  ;;  %vm16176_vm3 = vmmov %vm16174_vm4 }
 0x4f0   : > { %v14981_v29 = vadd.f32 %v5469_v38, %v4604_v19  ;;  %v5430_v16 = vpop.f32.mrf.mxu0 }
 0x4f1   : > { %v5471_v32 = vpop.f32.mrf.mxu1  ;;  %v7493_v18 = vpop.permute.xlu1 %7492  ;;  %v7502_v53 = vsel %vm262_vm0, %v7495_v34, %v7496_v27 }
 0x4f2   : > { %8411 = vrot.lane.b32.xlu1 %v14655_v10, %s16168_s9  ;;  %v7491_v31 = vpop.permute.xlu0 %7490  ;;  %v7499_v59 = vrot.slane %v7493_v18, 4  ;;  %v5431_v48 = vpop.f32.mrf.mxu0  ;;  %v7503_v15 = vsel %vm16170_vm14, %v7485_v51, %v7502_v53  ;;  %vm16177_vm14 = vmmov %vm16176_vm3  ;;  %v8303_v32 = vld [vmem:[%s11068_s21 + $0x14] sm:$0xf] }
 0x4f3   : > { %8409 = vrot.lane.b32.xlu0 %v8395_v61, %s16168_s9  ;;  %v7498_v20 = vrot.slane %v7491_v31, 4  ;;  %v5472_v62 = vpop.f32.mrf.mxu1 }
 0x4f5   : > { %v7506_v60 = vsel %vm262_vm0, %v7498_v20, %v7499_v59  ;;  %v7504_v3 = vsel %vm262_vm0, %v7497_v55, %v7498_v20  ;;  %v7439_v14 = vpop.permute.xlu1 %7438 }
 0x4f6   : > { %8415 = vrot.lane.b32.xlu1 %v8398_v26, %s16168_s9  ;;  %v7507_v50 = vsel %vm16171_vm2, %v7491_v31, %v7506_v60  ;;  %v7437_v7 = vpop.permute.xlu0 %7436  ;;  %v7505_v12 = vsel %vm16172_vm1, %v7489_v54, %v7504_v3  ;;  %v7449_v0 = vrot.slane %v7439_v14, 4  ;;  %v8306_v31 = vld [vmem:[%s11068_s21 + $0x30] sm:$0xf]  ;;  %vm16179_vm2 = vcmask 367616  }
 0x4f7   : > { %8413 = vrot.lane.b32.xlu0 %v14690_v22, %s16168_s9  ;;  %v10417_v8 = vcombine.low %v7503_v15, %v7507_v50  ;;  %v10415_v46 = vcombine.low %v7501_v52, %v7505_v12  ;;  %v10416_v2 = vcombine.high %v7501_v52, %v7505_v12  ;;  %v10418_v30 = vcombine.high %v7503_v15, %v7507_v50  ;;  %vm16180_vm1 = vmmov %vm16179_vm2  ;;  %s16193_s9 = smov 21  }
 0x4f8   : > { %v7448_v5 = vrot.slane %v7437_v7, 4 }
 0x4f9   : > { %8027 = vmatprep.subr.bf16.mxu0 %v10416_v2  ;;  %8068 = vmatprep.subr.bf16.mxu1 %v10418_v30  ;;  %v7443_v19 = vpop.permute.xlu1 %7442  ;;  %v15039_v2 = vld [vmem:[%s11068_s21 + $0xc] sm:$0xff]  ;;  %v15044_v30 = vld [vmem:[%s11068_s21 + $0x4] sm:$0xff] }
 0x4fa   : > { %8361 = vrot.lane.b32.xlu1 %v16136_v57, %s16173_s24  ;;  %v7441_v41 = vpop.permute.xlu0 %7440  ;;  %8028 = vmatpush1.bf16.msra.mxu0 %v10415_v46  ;;  %v7454_v28 = vsel %vm262_vm0, %v7448_v5, %v7449_v0  ;;  %v7451_v51 = vrot.slane %v7443_v19, 4 }
 0x4fb   : > { %8359 = vrot.lane.b32.xlu0 %v16137_v44, %s16173_s24  ;;  %v7450_v43 = vrot.slane %v7441_v41, 4  ;;  %8069 = vmatpush1.bf16.msra.mxu1 %v10417_v8  ;;  %v7455_v24 = vsel %vm16174_vm4, %v7437_v7, %v7454_v28  ;;  %vm16181_vm4 = vmmov %vm16180_vm1 }
 0x4fd   : > { %v7447_v49 = vpop.permute.xlu1 %7446  ;;  %v7456_v40 = vsel %vm262_vm0, %v7449_v0, %v7450_v43  ;;  %v15051_v43 = vld [vmem:[%s11068_s21 + $0x20] sm:$0xff] }
 0x4fe   : > { %8365 = vrot.lane.b32.xlu1 %v14655_v10, %s16173_s24  ;;  %v7445_v56 = vpop.permute.xlu0 %7444  ;;  %v7453_v58 = vrot.slane %v7447_v49, 4  ;;  %v7457_v13 = vsel %vm16175_vm6, %v7439_v14, %v7456_v40  ;;  %vm16182_vm6 = vmmov %vm16180_vm1 }
 0x4ff   : > { %8363 = vrot.lane.b32.xlu0 %v8349_v37, %s16173_s24  ;;  %v7452_v63 = vrot.slane %v7445_v56, 4 }
 0x501   : > { %v7460_v1 = vsel %vm262_vm0, %v7452_v63, %v7453_v58  ;;  %v7458_v39 = vsel %vm262_vm0, %v7451_v51, %v7452_v63  ;;  %v7393_v47 = vpop.permute.xlu1 %7392 }
 0x502   : > { %8369 = vrot.lane.b32.xlu1 %v8352_v45, %s16173_s24  ;;  %v7461_v17 = vsel %vm16176_vm3, %v7445_v56, %v7460_v1  ;;  %v7391_v21 = vpop.permute.xlu0 %7390  ;;  %v7459_v34 = vsel %vm16177_vm14, %v7443_v19, %v7458_v39  ;;  %v7403_v27 = vrot.slane %v7393_v47, 4  ;;  %v8257_v19 = vld [vmem:[%s11068_s21 + $0x14] sm:$0xf]  ;;  %v8260_v45 = vld [vmem:[%s11068_s21 + $0x30] sm:$0xf]  ;;  %vm16184_vm3 = vcmask 375808  }
 0x503   : > { %8367 = vrot.lane.b32.xlu0 %v14690_v22, %s16173_s24  ;;  %v10413_v25 = vcombine.low %v7457_v13, %v7461_v17  ;;  %v10411_v54 = vcombine.low %v7455_v24, %v7459_v34  ;;  %v10412_v4 = vcombine.high %v7455_v24, %v7459_v34  ;;  %v10414_v61 = vcombine.high %v7457_v13, %v7461_v17  ;;  %vm16185_vm14 = vmmov %vm16184_vm3  ;;  %s16194_s24 = smov 22  }
 0x504   : > { %v7402_v42 = vrot.slane %v7391_v21, 4 }
 0x505   : > { %8029 = vmatprep.subr.bf16.mxu0 %v10412_v4  ;;  %8070 = vmatprep.subr.bf16.mxu1 %v10414_v61  ;;  %v7397_v38 = vpop.permute.xlu1 %7396 }
 0x506   : > { %8315 = vrot.lane.b32.xlu1 %v16136_v57, %s16178_s29  ;;  %v7395_v16 = vpop.permute.xlu0 %7394  ;;  %8030 = vmatpush1.bf16.msra.mxu0 %v10411_v54  ;;  %v7408_v57 = vsel %vm262_vm0, %v7402_v42, %v7403_v27  ;;  %v7405_v26 = vrot.slane %v7397_v38, 4 }
 0x507   : > { %8313 = vrot.lane.b32.xlu0 %v16137_v44, %s16178_s29  ;;  %v7404_v11 = vrot.slane %v7395_v16, 4  ;;  %8071 = vmatpush1.bf16.msra.mxu1 %v10413_v25  ;;  %v7409_v48 = vsel %vm16179_vm2, %v7391_v21, %v7408_v57  ;;  %vm16186_vm2 = vmmov %vm16184_vm3 }
 0x509   : > { %v7401_v18 = vpop.permute.xlu1 %7400  ;;  %v7410_v55 = vsel %vm262_vm0, %v7403_v27, %v7404_v11 }
 0x50a   : > { %8319 = vrot.lane.b32.xlu1 %v14655_v10, %s16178_s29  ;;  %v7399_v44 = vpop.permute.xlu0 %7398  ;;  %v7407_v53 = vrot.slane %v7401_v18, 4  ;;  %v7411_v62 = vsel %vm16180_vm1, %v7393_v47, %v7410_v55  ;;  %vm16187_vm1 = vmmov %vm16186_vm2 }
 0x50b   : > { %8317 = vrot.lane.b32.xlu0 %v8303_v32, %s16178_s29  ;;  %v7406_v59 = vrot.slane %v7399_v44, 4 }
 0x50d   : > { %v7414_v20 = vsel %vm262_vm0, %v7406_v59, %v7407_v53  ;;  %v7412_v10 = vsel %vm262_vm0, %v7405_v26, %v7406_v59  ;;  %v7347_v3 = vpop.permute.xlu1 %7346  ;;  %v8214_v53 = vld [vmem:[%s11068_s21 + $0x30] sm:$0xf] }
 0x50e   : > { %8323 = vrot.lane.b32.xlu1 %v8306_v31, %s16178_s29  ;;  %v7415_v60 = vsel %vm16181_vm4, %v7399_v44, %v7414_v20  ;;  %v7345_v52 = vpop.permute.xlu0 %7344  ;;  %v7413_v15 = vsel %vm16182_vm6, %v7397_v38, %v7412_v10  ;;  %v7357_v8 = vrot.slane %v7347_v3, 4  ;;  %v8211_v44 = vld [vmem:[%s11068_s21 + $0x14] sm:$0xf]  ;;  %vm16189_vm4 = vcmask 384000  }
 0x50f   : > { %8321 = vrot.lane.b32.xlu0 %v14690_v22, %s16178_s29  ;;  %v10409_v50 = vcombine.low %v7411_v62, %v7415_v60  ;;  %v10407_v14 = vcombine.low %v7409_v48, %v7413_v15  ;;  %v10408_v7 = vcombine.high %v7409_v48, %v7413_v15  ;;  %v10410_v12 = vcombine.high %v7411_v62, %v7415_v60  ;;  %vm16190_vm6 = vmmov %vm16189_vm4  ;;  %s10929_s29 = smov 12  }
 0x510   : > { %v7356_v46 = vrot.slane %v7345_v52, 4  ;;  %v7265_v15 = vrot.slane %v14889_v23, 4 }
 0x511   : > { %8031 = vmatprep.subr.bf16.mxu0 %v10408_v7  ;;  %8072 = vmatprep.subr.bf16.mxu1 %v10410_v12  ;;  %v7351_v0 = vpop.permute.xlu1 %7350 }
 0x512   : > { %8269 = vrot.lane.b32.xlu1 %v15039_v2, %s16183_s19  ;;  %v7349_v5 = vpop.permute.xlu0 %7348  ;;  %8032 = vmatpush1.bf16.msra.mxu0 %v10407_v14  ;;  %v7362_v37 = vsel %vm262_vm0, %v7356_v46, %v7357_v8  ;;  %v7359_v51 = vrot.slane %v7351_v0, 4 }
 0x513   : > { %8267 = vrot.lane.b32.xlu0 %v15044_v30, %s16183_s19  ;;  %v7358_v41 = vrot.slane %v7349_v5, 4  ;;  %8073 = vmatpush1.bf16.msra.mxu1 %v10409_v50  ;;  %v7363_v63 = vsel %vm16184_vm3, %v7345_v52, %v7362_v37  ;;  %v10720_v52 = vld [vmem:[%s11068_s21 + $0x28] sm:$0xff]  ;;  %v7264_v50 = vrot.slane %v14891_v6, 4  ;;  %vm16191_vm3 = vmmov %vm16189_vm4 }
 0x515   : > { %v7364_v28 = vsel %vm262_vm0, %v7357_v8, %v7358_v41  ;;  %v7355_v49 = vpop.permute.xlu1 %7354 }
 0x516   : > { %8273 = vrot.lane.b32.xlu1 %v15051_v43, %s16183_s19  ;;  %v7353_v56 = vpop.permute.xlu0 %7352  ;;  %v7361_v40 = vrot.slane %v7355_v49, 4  ;;  %v7365_v1 = vsel %vm16185_vm14, %v7347_v3, %v7364_v28  ;;  %vm16192_vm14 = vmmov %vm16191_vm3 }
 0x517   : > { %8271 = vrot.lane.b32.xlu0 %v8257_v19, %s16183_s19  ;;  %v7360_v58 = vrot.slane %v7353_v56, 4 }
 0x518   : > { %v6303_v13 = vpop.f32.mrf.mxu0 }
 0x519   : > { %v7368_v39 = vsel %vm262_vm0, %v7360_v58, %v7361_v40  ;;  %v7366_v24 = vsel %vm262_vm0, %v7359_v51, %v7360_v58  ;;  %v6344_v17 = vpop.f32.mrf.mxu1  ;;  %v7301_v21 = vpop.permute.xlu1 %7300  ;;  %v15068_v54 = vadd.f32 %v6303_v13, %v14975_v36  ;;  %v7270_v51 = vsel %vm262_vm0, %v7264_v50, %v7265_v15 }
 0x51a   : > { %8277 = vrot.lane.b32.xlu1 %v8260_v45, %s16183_s19  ;;  %v7369_v47 = vsel %vm16186_vm2, %v7353_v56, %v7368_v39  ;;  %v7299_v34 = vpop.permute.xlu0 %7298  ;;  %v7367_v25 = vsel %vm16187_vm1, %v7351_v0, %v7366_v24  ;;  %v15071_v4 = vadd.f32 %v6344_v17, %v14977_v9  ;;  %v7311_v31 = vrot.slane %v7301_v21, 4  ;;  %v8165_v45 = vld [vmem:[%s11068_s21 + $0x14] sm:$0xf] }
 0x51b   : > { %8275 = vrot.lane.b32.xlu0 %v14690_v22, %s16183_s19  ;;  %v10405_v61 = vcombine.low %v7365_v1, %v7369_v47  ;;  %v10403_v27 = vcombine.low %v7363_v63, %v7367_v25  ;;  %v6305_v22 = vpop.f32.mrf.mxu0  ;;  %v6346_v42 = vpop.f32.mrf.mxu1  ;;  %v10404_v38 = vcombine.high %v7363_v63, %v7367_v25  ;;  %v10406_v16 = vcombine.high %v7365_v1, %v7369_v47  ;;  %s10930_s19 = smov 13  }
 0x51c   : > { %v15074_v32 = vadd.f32 %v6305_v22, %v14979_v35  ;;  %v15077_v11 = vadd.f32 %v6346_v42, %v14981_v29  ;;  %v7310_v35 = vrot.slane %v7299_v34, 4  ;;  %v7271_v17 = vsel %vm974_vm7, %v14891_v6, %v7270_v51  ;;  %v15123_v6 = vld [vmem:[%s11068_s21 + $0xc] sm:$0xff] }
 0x51d   : > { %v6307_v36 = vpop.f32.mrf.mxu0  ;;  %v6348_v9 = vpop.f32.mrf.mxu1  ;;  %8033 = vmatprep.subr.bf16.mxu0 %v10404_v38  ;;  %8074 = vmatprep.subr.bf16.mxu1 %v10406_v16  ;;  %v15126_v38 = vld [vmem:[%s11068_s21 + $0x4] sm:$0xff]  ;;  %vm7732_vm2 = vcmask 310272   ;;  %vm7685_vm1 = vcmask 318464  }
 0x51e   : > { %8223 = vrot.lane.b32.xlu1 %v15039_v2, %s16188_s25  ;;  %v7305_v57 = vpop.permute.xlu1 %7304  ;;  %v7303_v18 = vpop.permute.xlu0 %7302  ;;  %8034 = vmatpush1.bf16.msra.mxu0 %v10403_v27  ;;  %v7316_v59 = vsel %vm262_vm0, %v7310_v35, %v7311_v31 }
 0x51f   : > { %8221 = vrot.lane.b32.xlu0 %v15044_v30, %s16188_s25  ;;  %8075 = vmatpush1.bf16.msra.mxu1 %v10405_v61  ;;  %v6308_v29 = vpop.f32.mrf.mxu0  ;;  %v6349_v26 = vpop.f32.mrf.mxu1  ;;  %v7312_v55 = vrot.slane %v7303_v18, 4  ;;  %v7313_v48 = vrot.slane %v7305_v57, 4  ;;  %v7317_v12 = vsel %vm16189_vm4, %v7299_v34, %v7316_v59  ;;  %v15133_v18 = vld [vmem:[%s11068_s21 + $0x20] sm:$0xff]  ;;  %vm16195_vm4 = vcmask 326656  }
 0x521   : > { %v7318_v62 = vsel %vm262_vm0, %v7311_v31, %v7312_v55 }
 0x522   : > { %8227 = vrot.lane.b32.xlu1 %v15051_v43, %s16188_s25  ;;  %v7309_v20 = vpop.permute.xlu1 %7308  ;;  %v7307_v10 = vpop.permute.xlu0 %7306  ;;  %v7319_v8 = vsel %vm16190_vm6, %v7301_v21, %v7318_v62  ;;  %vm16196_vm6 = vmmov %vm16195_vm4 }
 0x523   : > { %8225 = vrot.lane.b32.xlu0 %v8211_v44, %s16188_s25  ;;  %v7315_v60 = vrot.slane %v7309_v20, 4  ;;  %v7314_v3 = vrot.slane %v7307_v10, 4  ;;  %v8119_v44 = vld [vmem:[%s11068_s21 + $0x14] sm:$0xf] }
 0x525   : > { %v7322_v14 = vsel %vm262_vm0, %v7314_v3, %v7315_v60  ;;  %v7320_v7 = vsel %vm262_vm0, %v7313_v48, %v7314_v3  ;;  %v15144_v48 = vld [vmem:[%s11068_s21 + $0x28] sm:$0xff] }
 0x526   : > { %8231 = vrot.lane.b32.xlu1 %v8214_v53, %s16188_s25  ;;  %v7323_v46 = vsel %vm16191_vm3, %v7307_v10, %v7322_v14  ;;  %v7259_v0 = vpop.permute.xlu1 %7258  ;;  %v7257_v5 = vpop.permute.xlu0 %7256  ;;  %v7321_v19 = vsel %vm16192_vm14, %v7305_v57, %v7320_v7  ;;  %v8122_v10 = vld [vmem:[%s11068_s21 + $0x30] sm:$0xf]  ;;  %vm16197_vm3 = vmmov %vm16195_vm4 }
 0x527   : > { %8229 = vrot.lane.b32.xlu0 %v10720_v52, %s16188_s25  ;;  %v10401_v41 = vcombine.low %v7319_v8, %v7323_v46  ;;  %v7266_v37 = vrot.slane %v7257_v5, 4  ;;  %v10399_v28 = vcombine.low %v7317_v12, %v7321_v19  ;;  %v10400_v49 = vcombine.high %v7317_v12, %v7321_v19  ;;  %vm16198_vm14 = vmmov %vm16197_vm3 }
 0x528   : > { %v10402_v56 = vcombine.high %v7319_v8, %v7323_v46  ;;  %v7267_v63 = vrot.slane %v7259_v0, 4 }
 0x529   : > { %8035 = vmatprep.subr.bf16.mxu0 %v10400_v49  ;;  %v7272_v1 = vsel %vm262_vm0, %v7265_v15, %v7266_v37 }
 0x52a   : > { %8177 = vrot.lane.b32.xlu1 %v15039_v2, %s16193_s9  ;;  %8076 = vmatprep.subr.bf16.mxu1 %v10402_v56  ;;  %v7273_v47 = vsel %vm974_vm7, %v14889_v23, %v7272_v1 }
 0x52b   : > { %8175 = vrot.lane.b32.xlu0 %v15044_v30, %s16193_s9  ;;  %v7263_v40 = vpop.permute.xlu1 %7262  ;;  %v7261_v58 = vpop.permute.xlu0 %7260  ;;  %8036 = vmatpush1.bf16.msra.mxu0 %v10399_v28  ;;  %v8168_v30 = vld [vmem:[%s11068_s21 + $0x30] sm:$0xf]  ;;  %v8580_v28 = vld [vmem:[%s11068_s21 + $0x14] sm:$0xf] }
 0x52c   : > { %v7269_v39 = vrot.slane %v7263_v40, 4  ;;  %v7268_v24 = vrot.slane %v7261_v58, 4  ;;  %8077 = vmatpush1.bf16.msra.mxu1 %v10401_v41 }
 0x52e   : > { %8181 = vrot.lane.b32.xlu1 %v15051_v43, %s16193_s9  ;;  %v7276_v2 = vsel %vm262_vm0, %v7268_v24, %v7269_v39  ;;  %v7274_v13 = vsel %vm262_vm0, %v7267_v63, %v7268_v24  ;;  %v8583_v39 = vld [vmem:[%s11068_s21 + $0x30] sm:$0xf] }
 0x52f   : > { %8179 = vrot.lane.b32.xlu0 %v8165_v45, %s16193_s9  ;;  %v7277_v21 = vsel %vm974_vm7, %v7261_v58, %v7276_v2  ;;  %v7714_v25 = vpop.permute.xlu0 %7713  ;;  %v7275_v43 = vsel %vm974_vm7, %v7259_v0, %v7274_v13 }
 0x530   : > { %v7716_v34 = vpop.permute.xlu1 %7715  ;;  %v10397_v61 = vcombine.low %v7273_v47, %v7277_v21  ;;  %v10395_v27 = vcombine.low %v7271_v17, %v7275_v43  ;;  %v10396_v22 = vcombine.high %v7271_v17, %v7275_v43  ;;  %v10398_v42 = vcombine.high %v7273_v47, %v7277_v21 }
 0x531   : > { %v7726_v23 = vrot.slane %v7716_v34, 4  ;;  %v7725_v16 = vrot.slane %v7714_v25, 4 }
 0x532   : > { %8185 = vrot.lane.b32.xlu1 %v8168_v30, %s16193_s9  ;;  %8037 = vmatprep.subr.bf16.mxu0 %v10396_v22 }
 0x533   : > { %8183 = vrot.lane.b32.xlu0 %v10720_v52, %s16193_s9  ;;  %8078 = vmatprep.subr.bf16.mxu1 %v10398_v42  ;;  %v7731_v31 = vsel %vm262_vm0, %v7725_v16, %v7726_v23  ;;  %s10934_s9 = smov [#allocation9]  }
 0x534   : > { %v7720_v36 = vpop.permute.xlu1 %7719  ;;  %8038 = vmatpush1.bf16.msra.mxu0 %v10395_v27  ;;  %8079 = vmatpush1.bf16.msra.mxu1 %v10397_v61  ;;  %v7733_v60 = vsel %vm7732_vm2, %v7714_v25, %v7731_v31 }
 0x535   : > { %v7718_v9 = vpop.permute.xlu0 %7717  ;;  %v7728_v26 = vrot.slane %v7720_v36, 4 }
 0x536   : > { %v7727_v57 = vrot.slane %v7718_v9, 4  ;;  %8131 = vrot.lane.b32.xlu1 %v15123_v6, %s16194_s24 }
 0x537   : > { %8129 = vrot.lane.b32.xlu0 %v15126_v38, %s16194_s24 }
 0x538   : > { %v7724_v35 = vpop.permute.xlu1 %7723  ;;  %v7734_v55 = vsel %vm262_vm0, %v7726_v23, %v7727_v57 }
 0x539   : > { %v7722_v29 = vpop.permute.xlu0 %7721  ;;  %v7730_v53 = vrot.slane %v7724_v35, 4  ;;  %v7735_v3 = vsel %vm7732_vm2, %v7716_v34, %v7734_v55 }
 0x53a   : > { %v7729_v59 = vrot.slane %v7722_v29, 4  ;;  %8135 = vrot.lane.b32.xlu1 %v15133_v18, %s16194_s24 }
 0x53b   : > { %8133 = vrot.lane.b32.xlu0 %v8119_v44, %s16194_s24 }
 0x53c   : > { %v7738_v20 = vsel %vm262_vm0, %v7729_v59, %v7730_v53  ;;  %v7736_v62 = vsel %vm262_vm0, %v7728_v26, %v7729_v59  ;;  %v7669_v15 = vpop.permute.xlu1 %7668  ;;  %v8536_v53 = vld [vmem:[%s11068_s21 + $0x30] sm:$0xf] }
 0x53d   : > { %v7739_v52 = vsel %vm7732_vm2, %v7722_v29, %v7738_v20  ;;  %v7667_v50 = vpop.permute.xlu0 %7666  ;;  %v7737_v14 = vsel %vm7732_vm2, %v7720_v36, %v7736_v62  ;;  %v7679_v0 = vrot.slane %v7669_v15, 4  ;;  %v8533_v36 = vld [vmem:[%s11068_s21 + $0x14] sm:$0xf] }
 0x53e   : > { %v10437_v7 = vcombine.low %v7735_v3, %v7739_v52  ;;  %v10435_v12 = vcombine.low %v7733_v60, %v7737_v14  ;;  %8139 = vrot.lane.b32.xlu1 %v8122_v10, %s16194_s24  ;;  %v10436_v8 = vcombine.high %v7733_v60, %v7737_v14  ;;  %v10438_v46 = vcombine.high %v7735_v3, %v7739_v52 }
 0x53f   : > { %8137 = vrot.lane.b32.xlu0 %v15144_v48, %s16194_s24  ;;  %v7678_v5 = vrot.slane %v7667_v50, 4  ;;  %s10779_s24 = sshll.u32 %s10934_s9, 4  ;;  %s10780_s24 = int_to_ptr.vmem [resolvable:$false] %s10779_s24 }
 0x540   : > { %8049 = vmatprep.subr.bf16.mxu0 %v10436_v8  ;;  %8090 = vmatprep.subr.bf16.mxu1 %v10438_v46  ;;  %v7673_v19 = vpop.permute.xlu1 %7672 }
 0x541   : > { %v7671_v41 = vpop.permute.xlu0 %7670  ;;  %8050 = vmatpush2.bf16.msra.mxu0 %v10435_v12  ;;  %8091 = vmatpush2.bf16.msra.mxu1 %v10437_v7  ;;  %v7684_v49 = vsel %vm262_vm0, %v7678_v5, %v7679_v0  ;;  %v7681_v51 = vrot.slane %v7673_v19, 4  ;;  %v10393_v5 = vcombine.low %v14926_v33, %v14926_v33 }
 0x542   : > { %v7680_v37 = vrot.slane %v7671_v41, 4  ;;  %8592 = vrot.lane.b32.xlu1 %v15123_v6, %s10929_s29  ;;  %v7686_v2 = vsel %vm7685_vm1, %v7667_v50, %v7684_v49  ;;  %v8487_v41 = vld [vmem:[%s11068_s21 + $0x14] sm:$0xf] }
 0x543   : > { %8590 = vrot.lane.b32.xlu0 %v15126_v38, %s10929_s29 }
 0x544   : > { %v7677_v56 = vpop.permute.xlu1 %7676  ;;  %v7687_v40 = vsel %vm262_vm0, %v7679_v0, %v7680_v37 }
 0x545   : > { %v7675_v45 = vpop.permute.xlu0 %7674  ;;  %v7683_v58 = vrot.slane %v7677_v56, 4  ;;  %v7688_v30 = vsel %vm7685_vm1, %v7669_v15, %v7687_v40 }
 0x546   : > { %v7682_v63 = vrot.slane %v7675_v45, 4  ;;  %8596 = vrot.lane.b32.xlu1 %v15133_v18, %s10929_s29 }
 0x547   : > { %8594 = vrot.lane.b32.xlu0 %v8580_v28, %s10929_s29 }
 0x548   : > { %v7691_v1 = vsel %vm262_vm0, %v7682_v63, %v7683_v58  ;;  %v7689_v24 = vsel %vm262_vm0, %v7681_v51, %v7682_v63  ;;  %v7623_v17 = vpop.permute.xlu1 %7622  ;;  %v8490_v58 = vld [vmem:[%s11068_s21 + $0x30] sm:$0xf] }
 0x549   : > { %v7692_v13 = vsel %vm7685_vm1, %v7675_v45, %v7691_v1  ;;  %v7621_v47 = vpop.permute.xlu0 %7620  ;;  %v7690_v21 = vsel %vm7685_vm1, %v7673_v19, %v7689_v24  ;;  %v7633_v27 = vrot.slane %v7623_v17, 4  ;;  %v15190_v45 = vld [vmem:[#allocation7 + $0x48] sm:$0xff] }
 0x54a   : > { %v10433_v34 = vcombine.low %v7688_v30, %v7692_v13  ;;  %v10431_v25 = vcombine.low %v7686_v2, %v7690_v21  ;;  %8600 = vrot.lane.b32.xlu1 %v8583_v39, %s10929_s29  ;;  %v10432_v43 = vcombine.high %v7686_v2, %v7690_v21  ;;  %v10434_v61 = vcombine.high %v7688_v30, %v7692_v13 }
 0x54b   : > { %8598 = vrot.lane.b32.xlu0 %v15144_v48, %s10929_s29  ;;  %v7632_v22 = vrot.slane %v7621_v47, 4  ;;  %s10781_s29 = scalar_lea.vmem %s10780_s24, 1024 }
 0x54c   : > { %8051 = vmatprep.subr.bf16.mxu0 %v10432_v43  ;;  %8092 = vmatprep.subr.bf16.mxu1 %v10434_v61  ;;  %v7627_v42 = vpop.permute.xlu1 %7626 }
 0x54d   : > { %v7625_v23 = vpop.permute.xlu0 %7624  ;;  %8052 = vmatpush2.bf16.msra.mxu0 %v10431_v25  ;;  %8093 = vmatpush2.bf16.msra.mxu1 %v10433_v34  ;;  %v7638_v9 = vsel %vm262_vm0, %v7632_v22, %v7633_v27  ;;  %v7635_v31 = vrot.slane %v7627_v42, 4  ;;  %v15211_v34 = vld [vmem:[%s11068_s21 + $0x10] sm:$0xff]  ;;  %v15214_v25 = vld [vmem:[%s11068_s21 + $0x8] sm:$0xff] }
 0x54e   : > { %v7634_v16 = vrot.slane %v7625_v23, 4  ;;  %8545 = vrot.lane.b32.xlu1 %v15123_v6, %s10930_s19  ;;  %v7639_v20 = vsel %vm16195_vm4, %v7621_v47, %v7638_v9  ;;  %v9318_v23 = vld [vmem:[%s11068_s21 + $0x18] sm:$0xf]  ;;  %vm16203_vm4 = vcmask 146432  }
 0x54f   : > { %8543 = vrot.lane.b32.xlu0 %v15126_v38, %s10930_s19 }
 0x550   : > { %v7631_v57 = vpop.permute.xlu1 %7630  ;;  %v7640_v35 = vsel %vm262_vm0, %v7633_v27, %v7634_v16 }
 0x551   : > { %v7629_v44 = vpop.permute.xlu0 %7628  ;;  %v7637_v29 = vrot.slane %v7631_v57, 4  ;;  %v7641_v10 = vsel %vm16196_vm6, %v7623_v17, %v7640_v35  ;;  %vm16204_vm6 = vmmov %vm16203_vm4 }
 0x552   : > { %v7636_v26 = vrot.slane %v7629_v44, 4  ;;  %8549 = vrot.lane.b32.xlu1 %v15133_v18, %s10930_s19 }
 0x553   : > { %8547 = vrot.lane.b32.xlu0 %v8533_v36, %s10930_s19 }
 0x554   : > { %v7644_v55 = vsel %vm262_vm0, %v7636_v26, %v7637_v29  ;;  %v7642_v59 = vsel %vm262_vm0, %v7635_v31, %v7636_v26  ;;  %v8454_v60 = vpop.permute.xlu1 %8453  ;;  %v9321_v26 = vld [vmem:[%s11068_s21 + $0x34] sm:$0xf] }
 0x555   : > { %v7645_v62 = vsel %vm16197_vm3, %v7629_v44, %v7644_v55  ;;  %v8452_v3 = vpop.permute.xlu0 %8451  ;;  %v7643_v52 = vsel %vm16198_vm14, %v7627_v42, %v7642_v59  ;;  %v8464_v12 = vrot.slane %v8454_v60, 4  ;;  %v15232_v55 = vld [vmem:[%s11068_s21 + $0x2c] sm:$0xff]  ;;  %vm16205_vm3 = vmmov %vm16203_vm4 }
 0x556   : > { %v10429_v15 = vcombine.low %v7641_v10, %v7645_v62  ;;  %v10427_v50 = vcombine.low %v7639_v20, %v7643_v52  ;;  %8553 = vrot.lane.b32.xlu1 %v8536_v53, %s10930_s19  ;;  %v10428_v14 = vcombine.high %v7639_v20, %v7643_v52  ;;  %v10430_v7 = vcombine.high %v7641_v10, %v7645_v62  ;;  %vm16206_vm14 = vmmov %vm16205_vm3 }
 0x557   : > { %8551 = vrot.lane.b32.xlu0 %v15144_v48, %s10930_s19  ;;  %v8463_v8 = vrot.slane %v8452_v3, 4 }
 0x558   : > { %8053 = vmatprep.subr.bf16.mxu0 %v10428_v14  ;;  %8094 = vmatprep.subr.bf16.mxu1 %v10430_v7  ;;  %v8458_v46 = vpop.permute.xlu1 %8457 }
 0x559   : > { %v8456_v0 = vpop.permute.xlu0 %8455  ;;  %8054 = vmatpush2.bf16.msra.mxu0 %v10427_v50  ;;  %8095 = vmatpush2.bf16.msra.mxu1 %v10429_v15  ;;  %v8469_v37 = vsel %vm262_vm0, %v8463_v8, %v8464_v12  ;;  %v8466_v28 = vrot.slane %v8458_v46, 4 }
 0x55a   : > { %v8465_v19 = vrot.slane %v8456_v0, 4  ;;  %8499 = vrot.lane.b32.xlu1 %v15123_v6, %s10920_s11  ;;  %v10442_v6 = vcombine.high %v15190_v45, %v15190_v45  ;;  %v8470_v1 = vsel %vm4177_vm8, %v8452_v3, %v8469_v37 }
 0x55b   : > { %8497 = vrot.lane.b32.xlu0 %v15126_v38, %s10920_s11 }
 0x55c   : > { %8056 = vmatmul.mubr.bf16.vlgmr.msra.gmra.mxu0 %v10393_v5  ;;  %8097 = vmatmul.mubr.bf16.vlgmr.msra.gmra.mxu1 %v10393_v5  ;;  %v8462_v49 = vpop.permute.xlu1 %8461  ;;  %v8471_v33 = vsel %vm262_vm0, %v8464_v12, %v8465_v19  ;;  %v9272_v5 = vld [vmem:[%s11068_s21 + $0x18] sm:$0xf] }
 0x55d   : > { %v8460_v56 = vpop.permute.xlu0 %8459  ;;  %v8468_v51 = vrot.slane %v8462_v49, 4  ;;  %10487 = vmatprep.mubr.msk.bf16.mxu0 %vm974_vm7, %v10442_v6  ;;  %10488 = vmatprep.mubr.msk.bf16.mxu1 %vm974_vm7, %v10442_v6  ;;  %v8472_v39 = vsel %vm4177_vm8, %v8454_v60, %v8471_v33 }
 0x55e   : > { %v8467_v40 = vrot.slane %v8460_v56, 4  ;;  %8503 = vrot.lane.b32.xlu1 %v15133_v18, %s10920_s11 }
 0x55f   : > { %8501 = vrot.lane.b32.xlu0 %v8487_v41, %s10920_s11 }
 0x560   : > { %v8475_v38 = vsel %vm262_vm0, %v8467_v40, %v8468_v51  ;;  %v8473_v63 = vsel %vm262_vm0, %v8466_v28, %v8467_v40  ;;  %v8408_v18 = vpop.permute.xlu1 %8407  ;;  %v9275_v40 = vld [vmem:[%s11068_s21 + $0x34] sm:$0xf] }
 0x561   : > { %v8476_v24 = vsel %vm4177_vm8, %v8460_v56, %v8475_v38  ;;  %v8406_v2 = vpop.permute.xlu0 %8405  ;;  %v8474_v30 = vsel %vm4177_vm8, %v8458_v46, %v8473_v63  ;;  %v8418_v43 = vrot.slane %v8408_v18, 4  ;;  %vm16199_vm8 = vcmask 138240  }
 0x562   : > { %v10473_v13 = vcombine.low %v8472_v39, %v8476_v24  ;;  %v10471_v17 = vcombine.low %v8470_v1, %v8474_v30  ;;  %8507 = vrot.lane.b32.xlu1 %v8490_v58, %s10920_s11  ;;  %v10472_v47 = vcombine.high %v8470_v1, %v8474_v30  ;;  %v10474_v21 = vcombine.high %v8472_v39, %v8476_v24  ;;  %vm16201_vm2 = vmmov %vm16199_vm8 }
 0x563   : > { %8505 = vrot.lane.b32.xlu0 %v15144_v48, %s10920_s11  ;;  %v8417_v61 = vrot.slane %v8406_v2, 4  ;;  %v15221_v48 = vld [vmem:[%s11068_s21 + $0x24] sm:$0xff]  ;;  %vm16202_vm1 = vmmov %vm16201_vm2 }
 0x564   : > { %8900 = vmatprep.subr.bf16.mxu0 %v10472_v47  ;;  %8941 = vmatprep.subr.bf16.mxu1 %v10474_v21  ;;  %v8412_v27 = vpop.permute.xlu1 %8411 }
 0x565   : > { %v8410_v22 = vpop.permute.xlu0 %8409  ;;  %8901 = vmatpush1.bf16.msra.mxu0 %v10471_v17  ;;  %8942 = vmatpush1.bf16.msra.mxu1 %v10473_v13  ;;  %v8423_v16 = vsel %vm262_vm0, %v8417_v61, %v8418_v43  ;;  %v8420_v57 = vrot.slane %v8412_v27, 4 }
 0x566   : > { %v8419_v42 = vrot.slane %v8410_v22, 4  ;;  %9330 = vrot.lane.b32.xlu1 %v15211_v34, %s10921_s20  ;;  %v8424_v59 = vsel %vm4130_vm13, %v8406_v2, %v8423_v16 }
 0x567   : > { %9328 = vrot.lane.b32.xlu0 %v15214_v25, %s10921_s20 }
 0x568   : > { %v8416_v36 = vpop.permute.xlu1 %8415  ;;  %v8425_v44 = vsel %vm262_vm0, %v8418_v43, %v8419_v42 }
 0x569   : > { %v8414_v9 = vpop.permute.xlu0 %8413  ;;  %v8422_v31 = vrot.slane %v8416_v36, 4  ;;  %v8426_v20 = vsel %vm4130_vm13, %v8408_v18, %v8425_v44 }
 0x56a   : > { %v8421_v35 = vrot.slane %v8414_v9, 4  ;;  %9334 = vrot.lane.b32.xlu1 %v15221_v48, %s10921_s20 }
 0x56b   : > { %9332 = vrot.lane.b32.xlu0 %v9318_v23, %s10921_s20 }
 0x56c   : > { %v8429_v29 = vsel %vm262_vm0, %v8421_v35, %v8422_v31  ;;  %v8427_v53 = vsel %vm262_vm0, %v8420_v57, %v8421_v35  ;;  %v8362_v62 = vpop.permute.xlu1 %8361  ;;  %v9229_v31 = vld [vmem:[%s11068_s21 + $0x34] sm:$0xf] }
 0x56d   : > { %v8430_v10 = vsel %vm4130_vm13, %v8414_v9, %v8429_v29  ;;  %v8360_v60 = vpop.permute.xlu0 %8359  ;;  %v8428_v3 = vsel %vm4130_vm13, %v8412_v27, %v8427_v53  ;;  %v8372_v7 = vrot.slane %v8362_v62, 4  ;;  %vm16200_vm13 = vmmov %vm16199_vm8  ;;  %v9226_v27 = vld [vmem:[%s11068_s21 + $0x18] sm:$0xf] }
 0x56e   : > { %v10469_v52 = vcombine.low %v8426_v20, %v8430_v10  ;;  %v10467_v15 = vcombine.low %v8424_v59, %v8428_v3  ;;  %9338 = vrot.lane.b32.xlu1 %v9321_v26, %s10921_s20  ;;  %v10468_v50 = vcombine.high %v8424_v59, %v8428_v3  ;;  %v10470_v14 = vcombine.high %v8426_v20, %v8430_v10 }
 0x56f   : > { %9336 = vrot.lane.b32.xlu0 %v15232_v55, %s10921_s20  ;;  %v8371_v12 = vrot.slane %v8360_v60, 4 }
 0x570   : > { %8902 = vmatprep.subr.bf16.mxu0 %v10468_v50  ;;  %8943 = vmatprep.subr.bf16.mxu1 %v10470_v14  ;;  %v8366_v8 = vpop.permute.xlu1 %8365 }
 0x571   : > { %v8364_v46 = vpop.permute.xlu0 %8363  ;;  %8903 = vmatpush1.bf16.msra.mxu0 %v10467_v15  ;;  %8944 = vmatpush1.bf16.msra.mxu1 %v10469_v52  ;;  %v8377_v19 = vsel %vm262_vm0, %v8371_v12, %v8372_v7  ;;  %v8374_v28 = vrot.slane %v8366_v8, 4 }
 0x572   : > { %v8373_v0 = vrot.slane %v8364_v46, 4  ;;  %9284 = vrot.lane.b32.xlu1 %v15211_v34, %s10876_s7  ;;  %v8378_v38 = vsel %vm16199_vm8, %v8360_v60, %v8377_v19  ;;  %vm16207_vm8 = vcmask 154624  }
 0x573   : > { %9282 = vrot.lane.b32.xlu0 %v15214_v25, %s10876_s7 }
 0x574   : > { %v8370_v41 = vpop.permute.xlu1 %8369  ;;  %v8379_v49 = vsel %vm262_vm0, %v8372_v7, %v8373_v0 }
 0x575   : > { %v8368_v37 = vpop.permute.xlu0 %8367  ;;  %v8376_v56 = vrot.slane %v8370_v41, 4  ;;  %v8380_v58 = vsel %vm16200_vm13, %v8362_v62, %v8379_v49  ;;  %vm16208_vm13 = vmmov %vm16207_vm8 }
 0x576   : > { %v8375_v33 = vrot.slane %v8368_v37, 4  ;;  %9288 = vrot.lane.b32.xlu1 %v15221_v48, %s10876_s7 }
 0x577   : > { %9286 = vrot.lane.b32.xlu0 %v9272_v5, %s10876_s7 }
 0x578   : > { %v8383_v51 = vsel %vm262_vm0, %v8375_v33, %v8376_v56  ;;  %v8381_v6 = vsel %vm262_vm0, %v8374_v28, %v8375_v33  ;;  %v8316_v1 = vpop.permute.xlu1 %8315  ;;  %v9183_v56 = vld [vmem:[%s11068_s21 + $0x34] sm:$0xf] }
 0x579   : > { %v8384_v63 = vsel %vm16201_vm2, %v8368_v37, %v8383_v51  ;;  %v8314_v39 = vpop.permute.xlu0 %8313  ;;  %v8382_v24 = vsel %vm16202_vm1, %v8366_v8, %v8381_v6  ;;  %v8326_v17 = vrot.slane %v8316_v1, 4  ;;  %v9180_v8 = vld [vmem:[%s11068_s21 + $0x18] sm:$0xf]  ;;  %vm16209_vm2 = vmmov %vm16207_vm8 }
 0x57a   : > { %v10465_v18 = vcombine.low %v8380_v58, %v8384_v63  ;;  %v10463_v2 = vcombine.low %v8378_v38, %v8382_v24  ;;  %9292 = vrot.lane.b32.xlu1 %v9275_v40, %s10876_s7  ;;  %v10464_v30 = vcombine.high %v8378_v38, %v8382_v24  ;;  %v10466_v13 = vcombine.high %v8380_v58, %v8384_v63  ;;  %vm16210_vm1 = vmmov %vm16209_vm2 }
 0x57b   : > { %9290 = vrot.lane.b32.xlu0 %v15232_v55, %s10876_s7  ;;  %v8325_v47 = vrot.slane %v8314_v39, 4 }
 0x57c   : > { %8904 = vmatprep.subr.bf16.mxu0 %v10464_v30  ;;  %8945 = vmatprep.subr.bf16.mxu1 %v10466_v13  ;;  %v8320_v21 = vpop.permute.xlu1 %8319 }
 0x57d   : > { %v8318_v43 = vpop.permute.xlu0 %8317  ;;  %8905 = vmatpush1.bf16.msra.mxu0 %v10463_v2  ;;  %8946 = vmatpush1.bf16.msra.mxu1 %v10465_v18  ;;  %v8331_v22 = vsel %vm262_vm0, %v8325_v47, %v8326_v17  ;;  %v8328_v16 = vrot.slane %v8320_v21, 4 }
 0x57e   : > { %v8327_v61 = vrot.slane %v8318_v43, 4  ;;  %9238 = vrot.lane.b32.xlu1 %v15211_v34, %s10875_s6  ;;  %v8332_v29 = vsel %vm16203_vm4, %v8314_v39, %v8331_v22 }
 0x57f   : > { %9236 = vrot.lane.b32.xlu0 %v15214_v25, %s10875_s6 }
 0x580   : > { %v8324_v42 = vpop.permute.xlu1 %8323  ;;  %v8333_v36 = vsel %vm262_vm0, %v8326_v17, %v8327_v61 }
 0x581   : > { %v8322_v23 = vpop.permute.xlu0 %8321  ;;  %v8330_v9 = vrot.slane %v8324_v42, 4  ;;  %v8334_v26 = vsel %vm16204_vm6, %v8316_v1, %v8333_v36 }
 0x582   : > { %v8329_v57 = vrot.slane %v8322_v23, 4  ;;  %9242 = vrot.lane.b32.xlu1 %v15221_v48, %s10875_s6 }
 0x583   : > { %9240 = vrot.lane.b32.xlu0 %v9226_v27, %s10875_s6 }
 0x584   : > { %v8337_v44 = vsel %vm262_vm0, %v8329_v57, %v8330_v9  ;;  %v8335_v35 = vsel %vm262_vm0, %v8328_v16, %v8329_v57  ;;  %v8270_v59 = vpop.permute.xlu1 %8269  ;;  %v9137_v9 = vld [vmem:[%s11068_s21 + $0x34] sm:$0xf] }
 0x585   : > { %v8338_v53 = vsel %vm16205_vm3, %v8322_v23, %v8337_v44  ;;  %v8268_v20 = vpop.permute.xlu0 %8267  ;;  %v8336_v10 = vsel %vm16206_vm14, %v8320_v21, %v8335_v35  ;;  %v8280_v15 = vrot.slane %v8270_v59, 4  ;;  %v9134_v21 = vld [vmem:[%s11068_s21 + $0x18] sm:$0xf]  ;;  %vm16215_vm14 = vcmask 179200  }
 0x586   : > { %v10461_v62 = vcombine.low %v8334_v26, %v8338_v53  ;;  %v10459_v60 = vcombine.low %v8332_v29, %v8336_v10  ;;  %9246 = vrot.lane.b32.xlu1 %v9229_v31, %s10875_s6  ;;  %v10460_v3 = vcombine.high %v8332_v29, %v8336_v10  ;;  %v10462_v52 = vcombine.high %v8334_v26, %v8338_v53 }
 0x587   : > { %9244 = vrot.lane.b32.xlu0 %v15232_v55, %s10875_s6  ;;  %v8279_v50 = vrot.slane %v8268_v20, 4 }
 0x588   : > { %8906 = vmatprep.subr.bf16.mxu0 %v10460_v3  ;;  %8947 = vmatprep.subr.bf16.mxu1 %v10462_v52  ;;  %v8274_v14 = vpop.permute.xlu1 %8273 }
 0x589   : > { %v8272_v7 = vpop.permute.xlu0 %8271  ;;  %8907 = vmatpush1.bf16.msra.mxu0 %v10459_v60  ;;  %8948 = vmatpush1.bf16.msra.mxu1 %v10461_v62  ;;  %v8285_v46 = vsel %vm262_vm0, %v8279_v50, %v8280_v15  ;;  %v8282_v19 = vrot.slane %v8274_v14, 4 }
 0x58a   : > { %v8281_v12 = vrot.slane %v8272_v7, 4  ;;  %9192 = vrot.lane.b32.xlu1 %v15211_v34, %s10874_s5  ;;  %v8286_v51 = vsel %vm16207_vm8, %v8268_v20, %v8285_v46  ;;  %vm16216_vm8 = vmmov %vm16215_vm14 }
 0x58b   : > { %9190 = vrot.lane.b32.xlu0 %v15214_v25, %s10874_s5 }
 0x58c   : > { %v8278_v0 = vpop.permute.xlu1 %8277  ;;  %v8287_v41 = vsel %vm262_vm0, %v8280_v15, %v8281_v12 }
 0x58d   : > { %v8276_v5 = vpop.permute.xlu0 %8275  ;;  %v8284_v37 = vrot.slane %v8278_v0, 4  ;;  %v8288_v40 = vsel %vm16208_vm13, %v8270_v59, %v8287_v41  ;;  %vm16217_vm13 = vmmov %vm16216_vm8 }
 0x58e   : > { %v8283_v28 = vrot.slane %v8276_v5, 4  ;;  %9196 = vrot.lane.b32.xlu1 %v15221_v48, %s10874_s5 }
 0x58f   : > { %9194 = vrot.lane.b32.xlu0 %v9180_v8, %s10874_s5 }
 0x590   : > { %v8291_v49 = vsel %vm262_vm0, %v8283_v28, %v8284_v37  ;;  %v8289_v33 = vsel %vm262_vm0, %v8282_v19, %v8283_v28  ;;  %v8224_v38 = vpop.permute.xlu1 %8223 }
 0x591   : > { %v8292_v6 = vsel %vm16209_vm2, %v8276_v5, %v8291_v49  ;;  %v8222_v58 = vpop.permute.xlu0 %8221  ;;  %v8290_v63 = vsel %vm16210_vm1, %v8274_v14, %v8289_v33  ;;  %v8234_v2 = vrot.slane %v8224_v38, 4  ;;  %vm16218_vm2 = vmmov %vm16216_vm8  ;;  %vm8609_vm1 = vcmask 97280  }
 0x592   : > { %v10457_v1 = vcombine.low %v8288_v40, %v8292_v6  ;;  %v10455_v39 = vcombine.low %v8286_v51, %v8290_v63  ;;  %9200 = vrot.lane.b32.xlu1 %v9183_v56, %s10874_s5  ;;  %v10456_v24 = vcombine.high %v8286_v51, %v8290_v63  ;;  %v10458_v18 = vcombine.high %v8288_v40, %v8292_v6 }
 0x593   : > { %9198 = vrot.lane.b32.xlu0 %v15232_v55, %s10874_s5  ;;  %v8233_v30 = vrot.slane %v8222_v58, 4  ;;  %s10542_s5 = sshll.u32 %s10851_s15, 9  ;;  %s9890_s15 = scalar_lea.sflag [#allocation6], %s11064_s10 }
 0x594   : > { %8908 = vmatprep.subr.bf16.mxu0 %v10456_v24  ;;  %8949 = vmatprep.subr.bf16.mxu1 %v10458_v18  ;;  %v8228_v13 = vpop.permute.xlu1 %8227 }
 0x595   : > { %v8226_v17 = vpop.permute.xlu0 %8225  ;;  %8909 = vmatpush1.bf16.msra.mxu0 %v10455_v39  ;;  %8950 = vmatpush1.bf16.msra.mxu1 %v10457_v1  ;;  %v8239_v43 = vsel %vm262_vm0, %v8233_v30, %v8234_v2  ;;  %v8236_v22 = vrot.slane %v8228_v13, 4 }
 0x596   : > { %v8235_v47 = vrot.slane %v8226_v17, 4  ;;  %9146 = vrot.lane.b32.xlu1 %v15211_v34, %s10873_s4  ;;  %v8240_v44 = vsel %vm3942_vm15, %v8222_v58, %v8239_v43  ;;  %v9091_v58 = vld [vmem:[%s11068_s21 + $0x34] sm:$0xf] }
 0x597   : > { %9144 = vrot.lane.b32.xlu0 %v15214_v25, %s10873_s4 }
 0x598   : > { %v8232_v61 = vpop.permute.xlu1 %8231  ;;  %v8241_v42 = vsel %vm262_vm0, %v8234_v2, %v8235_v47 }
 0x599   : > { %v8230_v27 = vpop.permute.xlu0 %8229  ;;  %v8238_v23 = vrot.slane %v8232_v61, 4  ;;  %v8242_v31 = vsel %vm3942_vm15, %v8224_v38, %v8241_v42  ;;  %v9042_v42 = vld [vmem:[%s11068_s21 + $0x18] sm:$0xf] }
 0x59a   : > { %v8237_v16 = vrot.slane %v8230_v27, 4  ;;  %9150 = vrot.lane.b32.xlu1 %v15221_v48, %s10873_s4 }
 0x59b   : > { %9148 = vrot.lane.b32.xlu0 %v9134_v21, %s10873_s4 }
 0x59c   : > { %v8245_v36 = vsel %vm262_vm0, %v8237_v16, %v8238_v23  ;;  %v8243_v57 = vsel %vm262_vm0, %v8236_v22, %v8237_v16  ;;  %v8178_v29 = vpop.permute.xlu1 %8177 }
 0x59d   : > { %v8246_v35 = vsel %vm3942_vm15, %v8230_v27, %v8245_v36  ;;  %v8176_v26 = vpop.permute.xlu0 %8175  ;;  %v8244_v53 = vsel %vm3942_vm15, %v8228_v13, %v8243_v57  ;;  %v8188_v46 = vrot.slane %v8178_v29, 4  ;;  %vm16211_vm15 = vcmask 171008  }
 0x59e   : > { %v10453_v59 = vcombine.low %v8242_v31, %v8246_v35  ;;  %v10451_v20 = vcombine.low %v8240_v44, %v8244_v53  ;;  %9154 = vrot.lane.b32.xlu1 %v9137_v9, %s10873_s4  ;;  %v10452_v10 = vcombine.high %v8240_v44, %v8244_v53  ;;  %v10454_v62 = vcombine.high %v8242_v31, %v8246_v35  ;;  %v7180_v60 = vpop.f32.mrf.mxu0  ;;  %vm16212_vm4 = vmmov %vm16211_vm15 }
 0x59f   : > { %9152 = vrot.lane.b32.xlu0 %v15232_v55, %s10873_s4  ;;  %v7221_v3 = vpop.f32.mrf.mxu1  ;;  %v15323_v52 = vadd.f32 %v7180_v60, %v15068_v54  ;;  %v8187_v0 = vrot.slane %v8176_v26, 4  ;;  %vm16213_vm6 = vmmov %vm16212_vm4  ;;  %s10008_s4 = sshll.u32 %s11064_s10, 5 }
 0x5a0   : > { %v15326_v15 = vadd.f32 %v7221_v3, %v15071_v4  ;;  %8910 = vmatprep.subr.bf16.mxu0 %v10452_v10  ;;  %8951 = vmatprep.subr.bf16.mxu1 %v10454_v62  ;;  %v8182_v50 = vpop.permute.xlu1 %8181  ;;  %v7182_v12 = vpop.f32.mrf.mxu0  ;;  %v9088_v4 = vld [vmem:[%s11068_s21 + $0x18] sm:$0xf]  ;;  %vm16214_vm3 = vmmov %vm16212_vm4  ;;  %s221_s6 = scalar_lea.vmem [#allocation9], %s10008_s4 }
 0x5a1   : > { %v8180_v14 = vpop.permute.xlu0 %8179  ;;  %8911 = vmatpush1.bf16.msra.mxu0 %v10451_v20  ;;  %8952 = vmatpush1.bf16.msra.mxu1 %v10453_v59  ;;  %v7223_v8 = vpop.f32.mrf.mxu1  ;;  %v15329_v5 = vadd.f32 %v7182_v12, %v15074_v32  ;;  %v8190_v49 = vrot.slane %v8182_v50, 4  ;;  %v8193_v40 = vsel %vm262_vm0, %v8187_v0, %v8188_v46  ;;  %s9906_s7 = sshll.u32 %s221_s6, 4  ;;  %s15542_s7 = int_to_ptr.vmem [resolvable:$true] %s9906_s7 }
 0x5a2   : > { %v8189_v7 = vrot.slane %v8180_v14, 4  ;;  %v15332_v54 = vadd.f32 %v7223_v8, %v15077_v11  ;;  %9100 = vrot.lane.b32.xlu1 %v15211_v34, %s10872_s30  ;;  %v7184_v19 = vpop.f32.mrf.mxu0  ;;  %v8194_v2 = vsel %vm16214_vm3, %v8176_v26, %v8193_v40  ;;  %v9045_v26 = vld [vmem:[%s11068_s21 + $0x34] sm:$0xf]  ;;  %vm16227_vm3 = vcmask 1006592   ;;  %s10775_s25 = scalar_lea.vmem %s15542_s7, 512  ;;  %p10782_p2 = scmp.lt.s32.totalorder %s15542_s7, %s10780_s24 }
 0x5a3   : > { %9098 = vrot.lane.b32.xlu0 %v15214_v25, %s10872_s30  ;;  %v7225_v41 = vpop.f32.mrf.mxu1  ;;  %v8996_v19 = vld [vmem:[%s11068_s21 + $0x18] sm:$0xf]  ;;  %v8999_v40 = vld [vmem:[%s11068_s21 + $0x34] sm:$0xf]  ;;  %p10776_p1 = scmp.ne.s32.totalorder %s15542_s7, %s10775_s25  ;;  %p10783_p5 = scmp.lt.s32.totalorder %s10781_s29, %s10775_s25 }
 0x5a4   : > { %v8186_v37 = vpop.permute.xlu1 %8185  ;;  %v8195_v56 = vsel %vm262_vm0, %v8188_v46, %v8189_v7  ;;  %v7185_v51 = vpop.f32.mrf.mxu0 }
 0x5a5   : > { %v8184_v28 = vpop.permute.xlu0 %8183  ;;  %v8192_v32 = vrot.slane %v8186_v37, 4  ;;  %v7226_v11 = vpop.f32.mrf.mxu1  ;;  %v8196_v63 = vsel %vm16211_vm15, %v8178_v29, %v8195_v56  ;;  %vm8562_vm15 = vcmask 105472   ;;  %p10777_p8 = pnand %p10776_p1, %p11038_p13  ;;  %p10784_p7 = por %p10783_p5, %p10782_p2 }
 0x5a6   : > { %v8191_v33 = vrot.slane %v8184_v28, 4  ;;  %9104 = vrot.lane.b32.xlu1 %v15221_v48, %s10872_s30 }
 0x5a7   : > { %9102 = vrot.lane.b32.xlu0 %v9088_v4, %s10872_s30  ;;  %p10778_p11 = pneg %p10777_p8 }
 0x5a8   : > { %v8197_v6 = vsel %vm262_vm0, %v8190_v49, %v8191_v33  ;;  %v8199_v38 = vsel %vm262_vm0, %v8191_v33, %v8192_v32  ;;  %v8132_v39 = vpop.permute.xlu1 %8131 }
 0x5a9   : > { %v8200_v1 = vsel %vm16212_vm4, %v8184_v28, %v8199_v38  ;;  %v8130_v24 = vpop.permute.xlu0 %8129  ;;  %v8198_v18 = vsel %vm16213_vm6, %v8182_v50, %v8197_v6  ;;  %v8142_v27 = vrot.slane %v8132_v39, 4  ;;  %p10785_p6 = pnand %p10784_p7, %p10778_p11 }
 0x5aa   : > { %v10449_v30 = vcombine.low %v8196_v63, %v8200_v1  ;;  %v10450_v13 = vcombine.high %v8196_v63, %v8200_v1  ;;  %9108 = vrot.lane.b32.xlu1 %v9091_v58, %s10872_s30  ;;  %v10447_v17 = vcombine.low %v8194_v2, %v8198_v18  ;;  %v10448_v47 = vcombine.high %v8194_v2, %v8198_v18 }
 0x5ab   : > { %9106 = vrot.lane.b32.xlu0 %v15232_v55, %s10872_s30  ;;  %v8141_v22 = vrot.slane %v8130_v24, 4 }
 0x5ac   : > { %8953 = vmatprep.subr.bf16.mxu1 %v10450_v13  ;;  %8912 = vmatprep.subr.bf16.mxu0 %v10448_v47  ;;  %v8136_v21 = vpop.permute.xlu1 %8135 }
 0x5ad   : > { %v8134_v43 = vpop.permute.xlu0 %8133  ;;  %8954 = vmatpush1.bf16.msra.mxu1 %v10449_v30  ;;  %8913 = vmatpush1.bf16.msra.mxu0 %v10447_v17  ;;  %v8144_v36 = vrot.slane %v8136_v21, 4  ;;  %v8147_v31 = vsel %vm262_vm0, %v8141_v22, %v8142_v27 }
 0x5ae   : > { %v8143_v61 = vrot.slane %v8134_v43, 4  ;;  %9054 = vrot.lane.b32.xlu1 %v15211_v34, %s10871_s27  ;;  %v8148_v60 = vsel %vm16218_vm2, %v8130_v24, %v8147_v31  ;;  %v9460_v31 = vld [vmem:[%s11068_s21 + $0x34] sm:$0xf]  ;;  %vm16231_vm2 = vcmask 1014784  }
 0x5af   : > { %9052 = vrot.lane.b32.xlu0 %v15214_v25, %s10871_s27 }
 0x5b0   : > { %v8140_v23 = vpop.permute.xlu1 %8139  ;;  %v8149_v9 = vsel %vm262_vm0, %v8142_v27, %v8143_v61  ;;  %v9457_v61 = vld [vmem:[%s11068_s21 + $0x18] sm:$0xf] }
 0x5b1   : > { %v8138_v16 = vpop.permute.xlu0 %8137  ;;  %v8146_v57 = vrot.slane %v8140_v23, 4  ;;  %v8150_v53 = vsel %vm16215_vm14, %v8132_v39, %v8149_v9  ;;  %vm16228_vm14 = vmmov %vm16227_vm3 }
 0x5b2   : > { %v8145_v44 = vrot.slane %v8138_v16, 4  ;;  %9058 = vrot.lane.b32.xlu1 %v15221_v48, %s10871_s27 }
 0x5b3   : > { %9056 = vrot.lane.b32.xlu0 %v9042_v42, %s10871_s27 }
 0x5b4   : > { %v8151_v35 = vsel %vm262_vm0, %v8144_v36, %v8145_v44  ;;  %v8153_v29 = vsel %vm262_vm0, %v8145_v44, %v8146_v57  ;;  %v8593_v20 = vpop.permute.xlu1 %8592 }
 0x5b5   : > { %v8154_v59 = vsel %vm16216_vm8, %v8138_v16, %v8153_v29  ;;  %v8591_v10 = vpop.permute.xlu0 %8590  ;;  %v8152_v62 = vsel %vm16217_vm13, %v8136_v21, %v8151_v35  ;;  %v8603_v0 = vrot.slane %v8593_v20, 4  ;;  %vm16229_vm8 = vmmov %vm16227_vm3 }
 0x5b6   : > { %v10445_v3 = vcombine.low %v8150_v53, %v8154_v59  ;;  %v10446_v50 = vcombine.high %v8150_v53, %v8154_v59  ;;  %9062 = vrot.lane.b32.xlu1 %v9045_v26, %s10871_s27  ;;  %v10443_v14 = vcombine.low %v8148_v60, %v8152_v62  ;;  %v10444_v7 = vcombine.high %v8148_v60, %v8152_v62  ;;  %vm16230_vm13 = vmmov %vm16227_vm3 }
 0x5b7   : > { %9060 = vrot.lane.b32.xlu0 %v15232_v55, %s10871_s27  ;;  %v8602_v4 = vrot.slane %v8591_v10, 4  ;;  %s10931_s27 = smov 114  }
 0x5b8   : > { %8955 = vmatprep.subr.bf16.mxu1 %v10446_v50  ;;  %8914 = vmatprep.subr.bf16.mxu0 %v10444_v7  ;;  %v8597_v12 = vpop.permute.xlu1 %8596 }
 0x5b9   : > { %v8595_v8 = vpop.permute.xlu0 %8594  ;;  %8956 = vmatpush1.bf16.msra.mxu1 %v10445_v3  ;;  %8915 = vmatpush1.bf16.msra.mxu0 %v10443_v14  ;;  %v8605_v28 = vrot.slane %v8597_v12, 4  ;;  %v8608_v33 = vsel %vm262_vm0, %v8602_v4, %v8603_v0 }
 0x5ba   : > { %v8604_v46 = vrot.slane %v8595_v8, 4  ;;  %9008 = vrot.lane.b32.xlu1 %v15211_v34, %s10870_s26  ;;  %v8610_v39 = vsel %vm8609_vm1, %v8591_v10, %v8608_v33  ;;  %v9413_v33 = vld [vmem:[%s11068_s21 + $0x34] sm:$0xf] }
 0x5bb   : > { %9006 = vrot.lane.b32.xlu0 %v15214_v25, %s10870_s26 }
 0x5bc   : > { %v8601_v41 = vpop.permute.xlu1 %8600  ;;  %v8611_v49 = vsel %vm262_vm0, %v8603_v0, %v8604_v46  ;;  %v9410_v46 = vld [vmem:[%s11068_s21 + $0x18] sm:$0xf] }
 0x5bd   : > { %v8599_v37 = vpop.permute.xlu0 %8598  ;;  %v8607_v56 = vrot.slane %v8601_v41, 4  ;;  %v8612_v6 = vsel %vm8609_vm1, %v8593_v20, %v8611_v49 }
 0x5be   : > { %v8606_v32 = vrot.slane %v8599_v37, 4  ;;  %9012 = vrot.lane.b32.xlu1 %v15221_v48, %s10870_s26 }
 0x5bf   : > { %9010 = vrot.lane.b32.xlu0 %v8996_v19, %s10870_s26 }
 0x5c0   : > { %v8613_v51 = vsel %vm262_vm0, %v8605_v28, %v8606_v32  ;;  %v8615_v11 = vsel %vm262_vm0, %v8606_v32, %v8607_v56  ;;  %v8546_v58 = vpop.permute.xlu1 %8545 }
 0x5c1   : > { %v8616_v38 = vsel %vm8609_vm1, %v8599_v37, %v8615_v11  ;;  %v8544_v63 = vpop.permute.xlu0 %8543  ;;  %v8614_v1 = vsel %vm8609_vm1, %v8597_v12, %v8613_v51  ;;  %v8556_v21 = vrot.slane %v8546_v58, 4  ;;  %vm16232_vm1 = vmmov %vm16231_vm2 }
 0x5c2   : > { %v10485_v24 = vcombine.low %v8612_v6, %v8616_v38  ;;  %v10486_v18 = vcombine.high %v8612_v6, %v8616_v38  ;;  %9016 = vrot.lane.b32.xlu1 %v8999_v40, %s10870_s26  ;;  %v10483_v2 = vcombine.low %v8610_v39, %v8614_v1  ;;  %v10484_v30 = vcombine.high %v8610_v39, %v8614_v1 }
 0x5c3   : > { %9014 = vrot.lane.b32.xlu0 %v15232_v55, %s10870_s26  ;;  %v8555_v43 = vrot.slane %v8544_v63, 4  ;;  %s10932_s26 = smov 115  }
 0x5c4   : > { %8967 = vmatprep.subr.bf16.mxu1 %v10486_v18  ;;  %8926 = vmatprep.subr.bf16.mxu0 %v10484_v30  ;;  %v8550_v13 = vpop.permute.xlu1 %8549  ;;  %v10441_v18 = vcombine.low %v15190_v45, %v15190_v45 }
 0x5c5   : > { %v8548_v17 = vpop.permute.xlu0 %8547  ;;  %8968 = vmatpush2.bf16.msra.mxu1 %v10485_v24  ;;  %8927 = vmatpush2.bf16.msra.mxu0 %v10483_v2  ;;  %v8558_v42 = vrot.slane %v8550_v13, 4  ;;  %v8561_v9 = vsel %vm262_vm0, %v8555_v43, %v8556_v21 }
 0x5c6   : > { %v8557_v47 = vrot.slane %v8548_v17, 4  ;;  %9469 = vrot.lane.b32.xlu1 %v15211_v34, %s10931_s27  ;;  %v8563_v20 = vsel %vm8562_vm15, %v8544_v63, %v8561_v9  ;;  %v9367_v9 = vld [vmem:[%s11068_s21 + $0x34] sm:$0xf] }
 0x5c7   : > { %9467 = vrot.lane.b32.xlu0 %v15214_v25, %s10931_s27 }
 0x5c8   : > { %v8554_v27 = vpop.permute.xlu1 %8553  ;;  %v8564_v23 = vsel %vm262_vm0, %v8556_v21, %v8557_v47  ;;  %v9364_v21 = vld [vmem:[%s11068_s21 + $0x18] sm:$0xf] }
 0x5c9   : > { %v8552_v22 = vpop.permute.xlu0 %8551  ;;  %v8560_v16 = vrot.slane %v8554_v27, 4  ;;  %v8565_v35 = vsel %vm8562_vm15, %v8546_v58, %v8564_v23  ;;  %v15422_v23 = vld [vmem:[#allocation7 + $0x50] sm:$0xff] }
 0x5ca   : > { %v8559_v36 = vrot.slane %v8552_v22, 4  ;;  %9473 = vrot.lane.b32.xlu1 %v15221_v48, %s10931_s27 }
 0x5cb   : > { %9471 = vrot.lane.b32.xlu0 %v9457_v61, %s10931_s27 }
 0x5cc   : > { %v8566_v57 = vsel %vm262_vm0, %v8558_v42, %v8559_v36  ;;  %v8568_v44 = vsel %vm262_vm0, %v8559_v36, %v8560_v16  ;;  %v8500_v26 = vpop.permute.xlu1 %8499 }
 0x5cd   : > { %v8569_v29 = vsel %vm8562_vm15, %v8552_v22, %v8568_v44  ;;  %v8498_v53 = vpop.permute.xlu0 %8497  ;;  %v8567_v59 = vsel %vm8562_vm15, %v8550_v13, %v8566_v57  ;;  %v8510_v12 = vrot.slane %v8500_v26, 4  ;;  %vm16233_vm15 = vmmov %vm16232_vm1 }
 0x5ce   : > { %v10481_v10 = vcombine.low %v8565_v35, %v8569_v29  ;;  %v10482_v62 = vcombine.high %v8565_v35, %v8569_v29  ;;  %9477 = vrot.lane.b32.xlu1 %v9460_v31, %s10931_s27  ;;  %v10479_v60 = vcombine.low %v8563_v20, %v8567_v59  ;;  %v10480_v3 = vcombine.high %v8563_v20, %v8567_v59 }
 0x5cf   : > { %9475 = vrot.lane.b32.xlu0 %v15232_v55, %s10931_s27  ;;  %v8509_v8 = vrot.slane %v8498_v53, 4 }
 0x5d0   : > { %8969 = vmatprep.subr.bf16.mxu1 %v10482_v62  ;;  %8928 = vmatprep.subr.bf16.mxu0 %v10480_v3  ;;  %v8504_v50 = vpop.permute.xlu1 %8503 }
 0x5d1   : > { %v8502_v14 = vpop.permute.xlu0 %8501  ;;  %8970 = vmatpush2.bf16.msra.mxu1 %v10481_v10  ;;  %8929 = vmatpush2.bf16.msra.mxu0 %v10479_v60  ;;  %v8512_v19 = vrot.slane %v8504_v50, 4  ;;  %v8515_v49 = vsel %vm262_vm0, %v8509_v8, %v8510_v12 }
 0x5d2   : > { %v8511_v7 = vrot.slane %v8502_v14, 4  ;;  %9422 = vrot.lane.b32.xlu1 %v15211_v34, %s10932_s26  ;;  %v8516_v58 = vsel %vm4224_vm12, %v8498_v53, %v8515_v49 }
 0x5d3   : > { %9420 = vrot.lane.b32.xlu0 %v15214_v25, %s10932_s26 }
 0x5d4   : > { %v8508_v0 = vpop.permute.xlu1 %8507  ;;  %v8517_v41 = vsel %vm262_vm0, %v8510_v12, %v8511_v7 }
 0x5d5   : > { %v8506_v4 = vpop.permute.xlu0 %8505  ;;  %v8514_v37 = vrot.slane %v8508_v0, 4  ;;  %v8518_v51 = vsel %vm4224_vm12, %v8500_v26, %v8517_v41 }
 0x5d6   : > { %v8513_v28 = vrot.slane %v8506_v4, 4  ;;  %9426 = vrot.lane.b32.xlu1 %v15221_v48, %s10932_s26 }
 0x5d7   : > { %9424 = vrot.lane.b32.xlu0 %v9410_v46, %s10932_s26 }
 0x5d8   : > { %v8519_v56 = vsel %vm262_vm0, %v8512_v19, %v8513_v28  ;;  %v8521_v32 = vsel %vm262_vm0, %v8513_v28, %v8514_v37  ;;  %v9331_v40 = vpop.permute.xlu1 %9330 }
 0x5d9   : > { %v8522_v11 = vsel %vm4224_vm12, %v8506_v4, %v8521_v32  ;;  %v9329_v6 = vpop.permute.xlu0 %9328  ;;  %v8520_v38 = vsel %vm4224_vm12, %v8504_v50, %v8519_v56  ;;  %v9341_v17 = vrot.slane %v9331_v40, 4  ;;  %vm16223_vm12 = vcmask 998400  }
 0x5da   : > { %v10477_v63 = vcombine.low %v8518_v51, %v8522_v11  ;;  %v10478_v1 = vcombine.high %v8518_v51, %v8522_v11  ;;  %9430 = vrot.lane.b32.xlu1 %v9413_v33, %s10932_s26  ;;  %v10475_v39 = vcombine.low %v8516_v58, %v8520_v38  ;;  %v10476_v24 = vcombine.high %v8516_v58, %v8520_v38 }
 0x5db   : > { %9428 = vrot.lane.b32.xlu0 %v15232_v55, %s10932_s26  ;;  %v9340_v47 = vrot.slane %v9329_v6, 4 }
 0x5dc   : > { %8971 = vmatprep.subr.bf16.mxu1 %v10478_v1  ;;  %8930 = vmatprep.subr.bf16.mxu0 %v10476_v24  ;;  %v9335_v2 = vpop.permute.xlu1 %9334 }
 0x5dd   : > { %v9333_v30 = vpop.permute.xlu0 %9332  ;;  %8972 = vmatpush2.bf16.msra.mxu1 %v10477_v63  ;;  %8931 = vmatpush2.bf16.msra.mxu0 %v10475_v39  ;;  %v9343_v61 = vrot.slane %v9335_v2, 4  ;;  %v9346_v16 = vsel %vm262_vm0, %v9340_v47, %v9341_v17 }
 0x5de   : > { %v9342_v13 = vrot.slane %v9333_v30, 4  ;;  %9376 = vrot.lane.b32.xlu1 %v15211_v34, %s10922_s22  ;;  %v10490_v34 = vcombine.high %v15422_v23, %v15422_v23 }
 0x5df   : > { %9374 = vrot.lane.b32.xlu0 %v15214_v25, %s10922_s22 }
 0x5e0   : > { %8974 = vmatmul.mubr.bf16.vlgmr.msra.gmra.mxu1 %v10441_v18  ;;  %8933 = vmatmul.mubr.bf16.vlgmr.msra.gmra.mxu0 %v10441_v18  ;;  %v9339_v43 = vpop.permute.xlu1 %9338  ;;  %v9348_v27 = vsel %vm262_vm0, %v9341_v17, %v9342_v13 }
 0x5e1   : > { %v9337_v45 = vpop.permute.xlu0 %9336  ;;  %v9345_v22 = vrot.slane %v9339_v43, 4  ;;  %v9349_v57 = vsel %vm5054_vm5, %v9331_v40, %v9348_v27  ;;  %10535 = vmatprep.mubr.msk.bf16.mxu0 %vm974_vm7, %v10490_v34  ;;  %10536 = vmatprep.mubr.msk.bf16.mxu1 %vm974_vm7, %v10490_v34  ;;  %vm16219_vm7 = vcmask 990208  }
 0x5e2   : > { %v9344_v42 = vrot.slane %v9337_v45, 4  ;;  %9380 = vrot.lane.b32.xlu1 %v15221_v48, %s10922_s22  ;;  %v9347_v48 = vsel %vm5054_vm5, %v9329_v6, %v9346_v16 }
 0x5e3   : > { %9378 = vrot.lane.b32.xlu0 %v9364_v21, %s10922_s22 }
 0x5e4   : > { %v9350_v25 = vsel %vm262_vm0, %v9343_v61, %v9344_v42  ;;  %v9352_v36 = vsel %vm262_vm0, %v9344_v42, %v9345_v22  ;;  %v9285_v31 = vpop.permute.xlu1 %9284 }
 0x5e5   : > { %v9353_v44 = vsel %vm5054_vm5, %v9337_v45, %v9352_v36  ;;  %v9283_v35 = vpop.permute.xlu0 %9282  ;;  %v9351_v29 = vsel %vm5054_vm5, %v9335_v2, %v9350_v25  ;;  %v9295_v3 = vrot.slane %v9285_v31, 4  ;;  %vm16224_vm5 = vmmov %vm16223_vm12 }
 0x5e6   : > { %v10521_v26 = vcombine.low %v9349_v57, %v9353_v44  ;;  %v10522_v53 = vcombine.high %v9349_v57, %v9353_v44  ;;  %9384 = vrot.lane.b32.xlu1 %v9367_v9, %s10922_s22  ;;  %v10519_v59 = vcombine.low %v9347_v48, %v9351_v29  ;;  %v10520_v20 = vcombine.high %v9347_v48, %v9351_v29  ;;  %vm16225_vm4 = vmmov %vm16224_vm5 }
 0x5e7   : > { %9382 = vrot.lane.b32.xlu0 %v15232_v55, %s10922_s22  ;;  %v9294_v50 = vrot.slane %v9283_v35, 4  ;;  %vm16226_vm6 = vmmov %vm16225_vm4  ;;  %s15540_s22 = scalar_lea.hbm %s15591_s3, %s10542_s5 }
 0x5e8   : > { %9818 = vmatprep.subr.bf16.mxu1 %v10522_v53  ;;  %9777 = vmatprep.subr.bf16.mxu0 %v10520_v20  ;;  %v9289_v10 = vpop.permute.xlu1 %9288 }
 0x5e9   : > { %v9287_v62 = vpop.permute.xlu0 %9286  ;;  %9819 = vmatpush1.bf16.msra.mxu1 %v10521_v26  ;;  %9778 = vmatpush1.bf16.msra.mxu0 %v10519_v59  ;;  %v9297_v12 = vrot.slane %v9289_v10, 4  ;;  %v9300_v55 = vsel %vm262_vm0, %v9294_v50, %v9295_v3 }
 0x5ea   : > { %v9296_v60 = vrot.slane %v9287_v62, 4  ;;  %v9301_v32 = vsel %vm687_vm10, %v9283_v35, %v9300_v55 }
 0x5ec   : > { %v9293_v14 = vpop.permute.xlu1 %9292  ;;  %v9302_v8 = vsel %vm262_vm0, %v9295_v3, %v9296_v60 }
 0x5ed   : > { %v9291_v7 = vpop.permute.xlu0 %9290  ;;  %v9299_v46 = vrot.slane %v9293_v14, 4  ;;  %v9303_v41 = vsel %vm687_vm10, %v9285_v31, %v9302_v8 }
 0x5ee   : > { %v9298_v0 = vrot.slane %v9291_v7, 4 }
 0x5f0   : > { %v9304_v4 = vsel %vm262_vm0, %v9297_v12, %v9298_v0  ;;  %v9306_v19 = vsel %vm262_vm0, %v9298_v0, %v9299_v46  ;;  %v9239_v28 = vpop.permute.xlu1 %9238 }
 0x5f1   : > { %v9307_v37 = vsel %vm687_vm10, %v9291_v7, %v9306_v19  ;;  %v9237_v49 = vpop.permute.xlu0 %9236  ;;  %v9305_v56 = vsel %vm687_vm10, %v9289_v10, %v9304_v4  ;;  %v9249_v63 = vrot.slane %v9239_v28, 4  ;;  %vm16221_vm10 = vmmov %vm16219_vm7 }
 0x5f2   : > { %v10517_v33 = vcombine.low %v9303_v41, %v9307_v37  ;;  %v10518_v51 = vcombine.high %v9303_v41, %v9307_v37  ;;  %v10515_v11 = vcombine.low %v9301_v32, %v9305_v56  ;;  %v10516_v40 = vcombine.high %v9301_v32, %v9305_v56 }
 0x5f3   : > { %v9248_v1 = vrot.slane %v9237_v49, 4 }
 0x5f4   : > { %9820 = vmatprep.subr.bf16.mxu1 %v10518_v51  ;;  %9779 = vmatprep.subr.bf16.mxu0 %v10516_v40  ;;  %v9243_v6 = vpop.permute.xlu1 %9242 }
 0x5f5   : > { %v9241_v38 = vpop.permute.xlu0 %9240  ;;  %9821 = vmatpush1.bf16.msra.mxu1 %v10517_v33  ;;  %9780 = vmatpush1.bf16.msra.mxu0 %v10515_v11  ;;  %v9251_v18 = vrot.slane %v9243_v6, 4  ;;  %v9254_v17 = vsel %vm262_vm0, %v9248_v1, %v9249_v63 }
 0x5f6   : > { %v9250_v58 = vrot.slane %v9241_v38, 4  ;;  %v9255_v42 = vsel %vm640_vm9, %v9237_v49, %v9254_v17 }
 0x5f8   : > { %v9247_v39 = vpop.permute.xlu1 %9246  ;;  %v9256_v2 = vsel %vm262_vm0, %v9249_v63, %v9250_v58 }
 0x5f9   : > { %v9245_v24 = vpop.permute.xlu0 %9244  ;;  %v9253_v30 = vrot.slane %v9247_v39, 4  ;;  %v9257_v43 = vsel %vm640_vm9, %v9239_v28, %v9256_v2 }
 0x5fa   : > { %v9252_v13 = vrot.slane %v9245_v24, 4 }
 0x5fc   : > { %v9258_v47 = vsel %vm262_vm0, %v9251_v18, %v9252_v13  ;;  %v9260_v21 = vsel %vm262_vm0, %v9252_v13, %v9253_v30  ;;  %v9193_v61 = vpop.permute.xlu1 %9192 }
 0x5fd   : > { %v9261_v45 = vsel %vm640_vm9, %v9245_v24, %v9260_v21  ;;  %v9191_v27 = vpop.permute.xlu0 %9190  ;;  %v9259_v22 = vsel %vm640_vm9, %v9243_v6, %v9258_v47  ;;  %v9203_v31 = vrot.slane %v9193_v61, 4  ;;  %vm16220_vm9 = vmmov %vm16219_vm7 }
 0x5fe   : > { %v10513_v16 = vcombine.low %v9257_v43, %v9261_v45  ;;  %v10514_v34 = vcombine.high %v9257_v43, %v9261_v45  ;;  %v10511_v25 = vcombine.low %v9255_v42, %v9259_v22  ;;  %v10512_v36 = vcombine.high %v9255_v42, %v9259_v22 }
 0x5ff   : > { %v9202_v35 = vrot.slane %v9191_v27, 4 }
 0x600   : > { %9822 = vmatprep.subr.bf16.mxu1 %v10514_v34  ;;  %9781 = vmatprep.subr.bf16.mxu0 %v10512_v36  ;;  %v9197_v9 = vpop.permute.xlu1 %9196 }
 0x601   : > { %v9195_v57 = vpop.permute.xlu0 %9194  ;;  %9823 = vmatpush1.bf16.msra.mxu1 %v10513_v16  ;;  %9782 = vmatpush1.bf16.msra.mxu0 %v10511_v25  ;;  %v9205_v26 = vrot.slane %v9197_v9, 4  ;;  %v9208_v10 = vsel %vm262_vm0, %v9202_v35, %v9203_v31 }
 0x602   : > { %v9204_v44 = vrot.slane %v9195_v57, 4  ;;  %v9209_v8 = vsel %vm593_vm11, %v9191_v27, %v9208_v10 }
 0x604   : > { %v9201_v29 = vpop.permute.xlu1 %9200  ;;  %v9210_v53 = vsel %vm262_vm0, %v9203_v31, %v9204_v44 }
 0x605   : > { %v9199_v48 = vpop.permute.xlu0 %9198  ;;  %v9207_v59 = vrot.slane %v9201_v29, 4  ;;  %v9211_v3 = vsel %vm593_vm11, %v9193_v61, %v9210_v53 }
 0x606   : > { %v9206_v20 = vrot.slane %v9199_v48, 4 }
 0x608   : > { %v9212_v62 = vsel %vm262_vm0, %v9205_v26, %v9206_v20  ;;  %v9214_v60 = vsel %vm262_vm0, %v9206_v20, %v9207_v59  ;;  %v9147_v14 = vpop.permute.xlu1 %9146 }
 0x609   : > { %v9215_v50 = vsel %vm593_vm11, %v9199_v48, %v9214_v60  ;;  %v9145_v7 = vpop.permute.xlu0 %9144  ;;  %v9213_v12 = vsel %vm593_vm11, %v9197_v9, %v9212_v62  ;;  %v9157_v28 = vrot.slane %v9147_v14, 4  ;;  %vm16222_vm11 = vmmov %vm16219_vm7 }
 0x60a   : > { %v10509_v46 = vcombine.low %v9211_v3, %v9215_v50  ;;  %v10510_v0 = vcombine.high %v9211_v3, %v9215_v50  ;;  %v10507_v55 = vcombine.low %v9209_v8, %v9213_v12  ;;  %v10508_v4 = vcombine.high %v9209_v8, %v9213_v12 }
 0x60b   : > { %v9156_v49 = vrot.slane %v9145_v7, 4 }
 0x60c   : > { %9824 = vmatprep.subr.bf16.mxu1 %v10510_v0  ;;  %9783 = vmatprep.subr.bf16.mxu0 %v10508_v4  ;;  %v9151_v19 = vpop.permute.xlu1 %9150  ;;  %v9875_v0 = vld [vmem:[%s15590_s2] sm:$0xff] }
 0x60d   : > { %v9149_v41 = vpop.permute.xlu0 %9148  ;;  %9825 = vmatpush1.bf16.msra.mxu1 %v10509_v46  ;;  %9784 = vmatpush1.bf16.msra.mxu0 %v10507_v55  ;;  %v9159_v33 = vrot.slane %v9151_v19, 4  ;;  %v9162_v6 = vsel %vm262_vm0, %v9156_v49, %v9157_v28  ;;  %v10933_v55 = vmov 0  }
 0x60e   : > { %v9158_v37 = vrot.slane %v9149_v41, 4  ;;  %v9163_v2 = vsel %vm16222_vm11, %v9145_v7, %v9162_v6  ;;  %10690 = vset.pattern.permute.xlu0 %v10933_v55  ;;  %vm16235_vm11 = vcmask 949248  }
 0x60f   : > { %9878 = vperm.xlu0 %10690, %v9875_v0  }
 0x610   : > { %v9155_v56 = vpop.permute.xlu1 %9154  ;;  %v9164_v51 = vsel %vm262_vm0, %v9157_v28, %v9158_v37 }
 0x611   : > { %v9153_v32 = vpop.permute.xlu0 %9152  ;;  %v9161_v11 = vrot.slane %v9155_v56, 4  ;;  %v9165_v63 = vsel %vm16219_vm7, %v9147_v14, %v9164_v51  ;;  %vm16234_vm7 = vmmov %vm16232_vm1 }
 0x612   : > { %v9160_v40 = vrot.slane %v9153_v32, 4 }
 0x614   : > { %v9166_v38 = vsel %vm262_vm0, %v9159_v33, %v9160_v40  ;;  %v9168_v58 = vsel %vm262_vm0, %v9160_v40, %v9161_v11  ;;  %v9101_v39 = vpop.permute.xlu1 %9100 }
 0x615   : > { %v9169_v1 = vsel %vm16220_vm9, %v9153_v32, %v9168_v58  ;;  %v9099_v24 = vpop.permute.xlu0 %9098  ;;  %v9167_v18 = vsel %vm16221_vm10, %v9151_v19, %v9166_v38  ;;  %v9111_v61 = vrot.slane %v9101_v39, 4  ;;  %vm9486_vm9 = vcmask 932864  }
 0x616   : > { %v10505_v30 = vcombine.low %v9165_v63, %v9169_v1  ;;  %v10506_v13 = vcombine.high %v9165_v63, %v9169_v1  ;;  %v10503_v17 = vcombine.low %v9163_v2, %v9167_v18  ;;  %v10504_v47 = vcombine.high %v9163_v2, %v9167_v18 }
 0x617   : > { %v9110_v27 = vrot.slane %v9099_v24, 4  ;;  %vm9439_vm10 = vcmask 941056  }
 0x618   : > { %9826 = vmatprep.subr.bf16.mxu1 %v10506_v13  ;;  %9785 = vmatprep.subr.bf16.mxu0 %v10504_v47  ;;  %v9105_v21 = vpop.permute.xlu1 %9104 }
 0x619   : > { %v9103_v43 = vpop.permute.xlu0 %9102  ;;  %9827 = vmatpush1.bf16.msra.mxu1 %v10505_v30  ;;  %9786 = vmatpush1.bf16.msra.mxu0 %v10503_v17  ;;  %v9113_v9 = vrot.slane %v9105_v21, 4  ;;  %v9116_v48 = vsel %vm262_vm0, %v9110_v27, %v9111_v61 }
 0x61a   : > { %v9112_v45 = vrot.slane %v9103_v43, 4 }
 0x61c   : > { %v8057_v22 = vpop.f32.mrf.mxu0  ;;  %v8098_v42 = vpop.f32.mrf.mxu1  ;;  %v9118_v57 = vsel %vm262_vm0, %v9111_v61, %v9112_v45 }
 0x61d   : > { %v15475_v16 = vadd.f32 %v8057_v22, %v15323_v52  ;;  %v15478_v34 = vadd.f32 %v8098_v42, %v15326_v15  ;;  %v9109_v25 = vpop.permute.xlu1 %9108  ;;  %v9107_v36 = vpop.permute.xlu0 %9106  ;;  %v9119_v10 = vsel %vm16223_vm12, %v9101_v39, %v9118_v57  ;;  %vm16236_vm12 = vmmov %vm16235_vm11 }
 0x61e   : > { %v9115_v44 = vrot.slane %v9109_v25, 4  ;;  %v9114_v31 = vrot.slane %v9107_v36, 4  ;;  %v8059_v35 = vpop.f32.mrf.mxu0  ;;  %v8100_v29 = vpop.f32.mrf.mxu1 }
 0x61f   : > { %v15483_v26 = vadd.f32 %v8059_v35, %v15329_v5  ;;  %v15486_v52 = vadd.f32 %v8100_v29, %v15332_v54  ;;  %v9117_v5 = vsel %vm16226_vm6, %v9099_v24, %v9116_v48 }
 0x620   : > { %v9120_v15 = vsel %vm262_vm0, %v9113_v9, %v9114_v31  ;;  %v9122_v53 = vsel %vm262_vm0, %v9114_v31, %v9115_v44  ;;  %v8061_v59 = vpop.f32.mrf.mxu0  ;;  %v8102_v20 = vpop.f32.mrf.mxu1 }
 0x621   : > { %v9123_v62 = vsel %vm16224_vm5, %v9107_v36, %v9122_v53  ;;  %v9055_v60 = vpop.permute.xlu1 %9054  ;;  %v9053_v3 = vpop.permute.xlu0 %9052  ;;  %v9121_v50 = vsel %vm16225_vm4, %v9105_v21, %v9120_v15  ;;  %vm16237_vm5 = vmmov %vm16235_vm11 }
 0x622   : > { %v10501_v14 = vcombine.low %v9119_v10, %v9123_v62  ;;  %v10502_v7 = vcombine.high %v9119_v10, %v9123_v62  ;;  %v8062_v54 = vpop.f32.mrf.mxu0  ;;  %v8103_v12 = vpop.f32.mrf.mxu1  ;;  %v10499_v8 = vcombine.low %v9117_v5, %v9121_v50  ;;  %v10500_v46 = vcombine.high %v9117_v5, %v9121_v50  ;;  %vm16238_vm4 = vmmov %vm16237_vm5 }
 0x623   : > { %v9065_v37 = vrot.slane %v9055_v60, 4  ;;  %v9064_v28 = vrot.slane %v9053_v3, 4 }
 0x624   : > { %9828 = vmatprep.subr.bf16.mxu1 %v10502_v7  ;;  %9787 = vmatprep.subr.bf16.mxu0 %v10500_v46 }
 0x625   : > { %v9059_v4 = vpop.permute.xlu1 %9058  ;;  %v9057_v19 = vpop.permute.xlu0 %9056  ;;  %9829 = vmatpush1.bf16.msra.mxu1 %v10501_v14  ;;  %9788 = vmatpush1.bf16.msra.mxu0 %v10499_v8  ;;  %v9070_v40 = vsel %vm262_vm0, %v9064_v28, %v9065_v37 }
 0x626   : > { %v9066_v41 = vrot.slane %v9057_v19, 4  ;;  %v9067_v32 = vrot.slane %v9059_v4, 4  ;;  %v9071_v18 = vsel %vm16230_vm13, %v9053_v3, %v9070_v40 }
 0x628   : > { %v9072_v33 = vsel %vm262_vm0, %v9065_v37, %v9066_v41 }
 0x629   : > { %v9063_v49 = vpop.permute.xlu1 %9062  ;;  %v9061_v56 = vpop.permute.xlu0 %9060  ;;  %v9073_v58 = vsel %vm16227_vm3, %v9055_v60, %v9072_v33 }
 0x62a   : > { %v9069_v51 = vrot.slane %v9063_v49, 4  ;;  %v9068_v11 = vrot.slane %v9061_v56, 4 }
 0x62c   : > { %v9074_v6 = vsel %vm262_vm0, %v9067_v32, %v9068_v11  ;;  %v9076_v38 = vsel %vm262_vm0, %v9068_v11, %v9069_v51 }
 0x62d   : > { %v9077_v63 = vsel %vm16228_vm14, %v9061_v56, %v9076_v38  ;;  %v9009_v1 = vpop.permute.xlu1 %9008  ;;  %v9007_v39 = vpop.permute.xlu0 %9006  ;;  %v9075_v24 = vsel %vm16229_vm8, %v9059_v4, %v9074_v6 }
 0x62e   : > { %v10497_v2 = vcombine.low %v9073_v58, %v9077_v63  ;;  %v10498_v30 = vcombine.high %v9073_v58, %v9077_v63  ;;  %v10495_v13 = vcombine.low %v9071_v18, %v9075_v24  ;;  %v10496_v17 = vcombine.high %v9071_v18, %v9075_v24 }
 0x62f   : > { %v9019_v45 = vrot.slane %v9009_v1, 4  ;;  %v9018_v61 = vrot.slane %v9007_v39, 4 }
 0x630   : > { %9830 = vmatprep.subr.bf16.mxu1 %v10498_v30  ;;  %9789 = vmatprep.subr.bf16.mxu0 %v10496_v17 }
 0x631   : > { %v9013_v47 = vpop.permute.xlu1 %9012  ;;  %v9011_v21 = vpop.permute.xlu0 %9010  ;;  %9831 = vmatpush1.bf16.msra.mxu1 %v10497_v2  ;;  %9790 = vmatpush1.bf16.msra.mxu0 %v10495_v13  ;;  %v9024_v57 = vsel %vm262_vm0, %v9018_v61, %v9019_v45 }
 0x632   : > { %v9020_v43 = vrot.slane %v9011_v21, 4  ;;  %v9021_v42 = vrot.slane %v9013_v47, 4  ;;  %v9025_v59 = vsel %vm16234_vm7, %v9007_v39, %v9024_v57 }
 0x634   : > { %v9026_v25 = vsel %vm262_vm0, %v9019_v45, %v9020_v43 }
 0x635   : > { %v9017_v27 = vpop.permute.xlu1 %9016  ;;  %v9015_v22 = vpop.permute.xlu0 %9014  ;;  %v9027_v35 = vsel %vm16231_vm2, %v9009_v1, %v9026_v25 }
 0x636   : > { %v9023_v36 = vrot.slane %v9017_v27, 4  ;;  %v9022_v9 = vrot.slane %v9015_v22, 4 }
 0x638   : > { %v9028_v44 = vsel %vm262_vm0, %v9021_v42, %v9022_v9  ;;  %v9030_v31 = vsel %vm262_vm0, %v9022_v9, %v9023_v36 }
 0x639   : > { %v9031_v29 = vsel %vm16232_vm1, %v9015_v22, %v9030_v31  ;;  %v9470_v48 = vpop.permute.xlu1 %9469  ;;  %v9468_v15 = vpop.permute.xlu0 %9467  ;;  %v9029_v53 = vsel %vm16233_vm15, %v9013_v47, %v9028_v44 }
 0x63a   : > { %v10493_v20 = vcombine.low %v9027_v35, %v9031_v29  ;;  %v10494_v10 = vcombine.high %v9027_v35, %v9031_v29  ;;  %v10491_v62 = vcombine.low %v9025_v59, %v9029_v53  ;;  %v10492_v60 = vcombine.high %v9025_v59, %v9029_v53 }
 0x63b   : > { %v9480_v14 = vrot.slane %v9470_v48, 4  ;;  %v9479_v7 = vrot.slane %v9468_v15, 4 }
 0x63c   : > { %9832 = vmatprep.subr.bf16.mxu1 %v10494_v10  ;;  %9791 = vmatprep.subr.bf16.mxu0 %v10492_v60 }
 0x63d   : > { %v9474_v3 = vpop.permute.xlu1 %9473  ;;  %v9472_v50 = vpop.permute.xlu0 %9471  ;;  %9833 = vmatpush1.bf16.msra.mxu1 %v10493_v20  ;;  %9792 = vmatpush1.bf16.msra.mxu0 %v10491_v62  ;;  %v9485_v4 = vsel %vm262_vm0, %v9479_v7, %v9480_v14 }
 0x63e   : > { %v9481_v5 = vrot.slane %v9472_v50, 4  ;;  %v9482_v8 = vrot.slane %v9474_v3, 4  ;;  %v9487_v33 = vsel %vm9486_vm9, %v9468_v15, %v9485_v4  ;;  %v10489_v4 = vcombine.low %v15422_v23, %v15422_v23 }
 0x640   : > { %v9488_v46 = vsel %vm262_vm0, %v9480_v14, %v9481_v5 }
 0x641   : > { %v9478_v54 = vpop.permute.xlu1 %9477  ;;  %v9476_v12 = vpop.permute.xlu0 %9475  ;;  %v9489_v37 = vsel %vm9486_vm9, %v9470_v48, %v9488_v46 }
 0x642   : > { %v9484_v0 = vrot.slane %v9478_v54, 4  ;;  %v9483_v55 = vrot.slane %v9476_v12, 4 }
 0x644   : > { %v9490_v19 = vsel %vm262_vm0, %v9482_v8, %v9483_v55  ;;  %v9492_v41 = vsel %vm262_vm0, %v9483_v55, %v9484_v0 }
 0x645   : > { %v9493_v28 = vsel %vm9486_vm9, %v9476_v12, %v9492_v41  ;;  %v9423_v49 = vpop.permute.xlu1 %9422  ;;  %v9421_v56 = vpop.permute.xlu0 %9420  ;;  %v9491_v32 = vsel %vm9486_vm9, %v9474_v3, %v9490_v19 }
 0x646   : > { %v10533_v51 = vcombine.low %v9489_v37, %v9493_v28  ;;  %v10534_v11 = vcombine.high %v9489_v37, %v9493_v28  ;;  %v10531_v40 = vcombine.low %v9487_v33, %v9491_v32  ;;  %v10532_v6 = vcombine.high %v9487_v33, %v9491_v32 }
 0x647   : > { %v9433_v1 = vrot.slane %v9423_v49, 4  ;;  %v9432_v39 = vrot.slane %v9421_v56, 4 }
 0x648   : > { %9844 = vmatprep.subr.bf16.mxu1 %v10534_v11  ;;  %9803 = vmatprep.subr.bf16.mxu0 %v10532_v6 }
 0x649   : > { %v9427_v38 = vpop.permute.xlu1 %9426  ;;  %v9425_v58 = vpop.permute.xlu0 %9424  ;;  %9845 = vmatpush2.bf16.msra.mxu1 %v10533_v51  ;;  %9804 = vmatpush2.bf16.msra.mxu0 %v10531_v40  ;;  %v9438_v47 = vsel %vm262_vm0, %v9432_v39, %v9433_v1 }
 0x64a   : > { %v9434_v63 = vrot.slane %v9425_v58, 4  ;;  %v9435_v2 = vrot.slane %v9427_v38, 4  ;;  %v9440_v25 = vsel %vm9439_vm10, %v9421_v56, %v9438_v47 }
 0x64c   : > { %v9441_v30 = vsel %vm262_vm0, %v9433_v1, %v9434_v63 }
 0x64d   : > { %v9431_v24 = vpop.permute.xlu1 %9430  ;;  %v9429_v18 = vpop.permute.xlu0 %9428  ;;  %v9442_v45 = vsel %vm9439_vm10, %v9423_v49, %v9441_v30 }
 0x64e   : > { %v9437_v13 = vrot.slane %v9431_v24, 4  ;;  %v9436_v17 = vrot.slane %v9429_v18, 4 }
 0x650   : > { %v9443_v21 = vsel %vm262_vm0, %v9435_v2, %v9436_v17  ;;  %v9445_v43 = vsel %vm262_vm0, %v9436_v17, %v9437_v13 }
 0x651   : > { %v9446_v61 = vsel %vm9439_vm10, %v9429_v18, %v9445_v43  ;;  %v9377_v27 = vpop.permute.xlu1 %9376  ;;  %v9375_v22 = vpop.permute.xlu0 %9374  ;;  %v9444_v42 = vsel %vm9439_vm10, %v9427_v38, %v9443_v21 }
 0x652   : > { %v10529_v36 = vcombine.low %v9442_v45, %v9446_v61  ;;  %v10530_v9 = vcombine.high %v9442_v45, %v9446_v61  ;;  %v10527_v57 = vcombine.low %v9440_v25, %v9444_v42  ;;  %v10528_v44 = vcombine.high %v9440_v25, %v9444_v42 }
 0x653   : > { %v9387_v31 = vrot.slane %v9377_v27, 4  ;;  %v9386_v35 = vrot.slane %v9375_v22, 4 }
 0x654   : > { %9846 = vmatprep.subr.bf16.mxu1 %v10530_v9  ;;  %9805 = vmatprep.subr.bf16.mxu0 %v10528_v44 }
 0x655   : > { %v9381_v29 = vpop.permute.xlu1 %9380  ;;  %v9379_v48 = vpop.permute.xlu0 %9378  ;;  %9847 = vmatpush2.bf16.msra.mxu1 %v10529_v36  ;;  %9806 = vmatpush2.bf16.msra.mxu0 %v10527_v57  ;;  %v9392_v53 = vsel %vm262_vm0, %v9386_v35, %v9387_v31 }
 0x656   : > { %v9388_v15 = vrot.slane %v9379_v48, 4  ;;  %v9389_v10 = vrot.slane %v9381_v29, 4  ;;  %v9393_v14 = vsel %vm16235_vm11, %v9375_v22, %v9392_v53 }
 0x658   : > { %v9394_v62 = vsel %vm262_vm0, %v9387_v31, %v9388_v15 }
 0x659   : > { %v9385_v59 = vpop.permute.xlu1 %9384  ;;  %v9383_v20 = vpop.permute.xlu0 %9382  ;;  %v9395_v7 = vsel %vm16236_vm12, %v9377_v27, %v9394_v62 }
 0x65a   : > { %v9391_v60 = vrot.slane %v9385_v59, 4  ;;  %v9390_v3 = vrot.slane %v9383_v20, 4 }
 0x65c   : > { %v9396_v50 = vsel %vm262_vm0, %v9389_v10, %v9390_v3  ;;  %v9398_v5 = vsel %vm262_vm0, %v9390_v3, %v9391_v60 }
 0x65d   : > { %v9399_v54 = vsel %vm16237_vm5, %v9383_v20, %v9398_v5  ;;  %v9397_v12 = vsel %vm16238_vm4, %v9381_v29, %v9396_v50 }
 0x65e   : > { %v10525_v8 = vcombine.low %v9395_v7, %v9399_v54  ;;  %v10526_v46 = vcombine.high %v9395_v7, %v9399_v54  ;;  %v10523_v0 = vcombine.low %v9393_v14, %v9397_v12  ;;  %v10524_v55 = vcombine.high %v9393_v14, %v9397_v12 }
 0x660   : > { %9807 = vmatprep.subr.bf16.mxu0 %v10524_v55  ;;  %9848 = vmatprep.subr.bf16.mxu1 %v10526_v46 }
 0x661   : > { %9808 = vmatpush2.bf16.msra.mxu0 %v10523_v0  ;;  %9849 = vmatpush2.bf16.msra.mxu1 %v10525_v8 }
 0x664   : > { %9810 = vmatmul.mubr.bf16.vlgmr.msra.gmra.mxu0 %v10489_v4  ;;  %9851 = vmatmul.mubr.bf16.vlgmr.msra.gmra.mxu1 %v10489_v4 }
 0x68a   : > { %v9879_v6 = vpop.permute.xlu0 %9878 }
 0x6a0   : > { %v8975_v19 = vpop.f32.mrf.mxu1  ;;  %v8934_v41 = vpop.f32.mrf.mxu0 }
 0x6a1   : > { %v8988_v37 = vadd.f32 %v8975_v19, %v15478_v34  ;;  %v8986_v28 = vadd.f32 %v8934_v41, %v15475_v16 }
 0x6a2   : > { %v8977_v49 = vpop.f32.mrf.mxu1  ;;  %v8936_v56 = vpop.f32.mrf.mxu0 }
 0x6a3   : > { %v8989_v32 = vadd.f32 %v8977_v49, %v15486_v52  ;;  %v8987_v33 = vadd.f32 %v8936_v56, %v15483_v26 }
 0x6a4   : > { %v8979_v51 = vpop.f32.mrf.mxu1  ;;  %v8938_v23 = vpop.f32.mrf.mxu0 }
 0x6a6   : > { %v8980_v11 = vpop.f32.mrf.mxu1  ;;  %v8939_v40 = vpop.f32.mrf.mxu0 }
 0x724   : > { %v9811_v38 = vpop.f32.mrf.mxu0  ;;  %v9852_v58 = vpop.f32.mrf.mxu1 }
 0x725   : > { %v9863_v63 = vadd.f32 %v9811_v38, %v8986_v28  ;;  %v9865_v1 = vadd.f32 %v9852_v58, %v8988_v37 }
 0x726   : > { %v9813_v34 = vpop.f32.mrf.mxu0  ;;  %v9854_v39 = vpop.f32.mrf.mxu1 }
 0x727   : > { %v9881_v16 = vadd.f32 %v9879_v6, %v9863_v63  ;;  %v9883_v52 = vadd.f32 %v9879_v6, %v9865_v1  ;;  %v9864_v24 = vadd.f32 %v9813_v34, %v8987_v33  ;;  %v9866_v26 = vadd.f32 %v9854_v39, %v8989_v32 }
 0x728   : > { %v9815_v18 = vpop.f32.mrf.mxu0  ;;  %v9856_v2 = vpop.f32.mrf.mxu1 }
 0x729   : > { %9885 = vst [vmem:[%s221_s6] sm:$0xff] %v9881_v16  ;;  %9887 = vst [vmem:[%s221_s6 + $0x10] sm:$0xff] %v9883_v52  ;;  %v9882_v30 = vadd.f32 %v9879_v6, %v9864_v24  ;;  %v9884_v13 = vadd.f32 %v9879_v6, %v9866_v26 }
 0x72a   : > { %v9816_v17 = vpop.f32.mrf.mxu0  ;;  %v9857_v47 = vpop.f32.mrf.mxu1 }
 0x72b   : > { %9886 = vst [vmem:[%s221_s6 + $0x8] sm:$0xff] %v9882_v30  ;;  %9888 = vst [vmem:[%s221_s6 + $0x18] sm:$0xff] %v9884_v13 }
 0x72c   : > { %10788 = shalt.err (!%p10785_p6)
}
 0x72d   : > { %s10789_s19 = scalar_lea.hbm %s15540_s22, 512  ;;  %s10793_s26 = scalar_lea.hbm %s15591_s3, 1024 }
 0x72e   : > { %p10790_p4 = scmp.ne.s32.totalorder %s15540_s22, %s10789_s19  ;;  %p10794_p0 = scmp.lt.s32.totalorder %s15540_s22, %s15591_s3 }
 0x72f   : > { %p10795_p3 = scmp.lt.s32.totalorder %s10793_s26, %s10789_s19 }
 0x730   : > { %p10791_p9 = pnand %p10790_p4, %p11038_p13 }
 0x731   : > { %p10796_p1 = por %p10795_p3, %p10794_p0 }
 0x732   : > { %p10792_p12 = pneg %p10791_p9 }
 0x734   : > { %p10797_p8 = pnand %p10796_p1, %p10792_p12 }
 0x736   : > { %10800 = shalt.err (!%p10797_p8)
}
 0x737   : > { %10552 = dma.vmem_to_hbm [thread:$0]  (%p11038_p13), %s15542_s7, 512, %s15540_s22, %s9890_s15  }
 0x738 PF: > { %s9918_s4 = sand.u32 1, %s10839_s12   ;;  %p16239_p11 = scmp.ne.s32.totalorder %s15788_s23, 0 }
 0x739   : > { %s9919_s5 = scalar_lea.sflag [#allocation6], %s9918_s4 }
 0x73a   : > { %p10563_p2 = pnand %p10004_p10, %p16239_p11 }
 0x73c   : > { %p10564_p5 = pneg %p10563_p2 }
 0x73e   : > { %10834 = dma.done.wait (%p10564_p5), %s9919_s5, 512  }
 0x73f   : > { %10836 = vsyncadd (%p10564_p5), %s9919_s5, 4294966784  ;;  %s20_s17 = sadd.s32 1, %s10859_s17   ;;  %s16240_s12 = smov %s10843_s13 }
 0x740   : > { %p17_p7 = scmp.ge.s32.totalorder %s20_s17, 4   ;;  %s16241_s13 = smov %s10847_s14 }
 0x741   : > { %s16242_s14 = smov %s11047_s18  ;;  %s16243_s15 = smov %s10855_s16 }
 0x742   : > { %s16244_s16 = smov %s16246_s28  ;;  %19 = sbr.rel (!%p17_p7) target bundleno = 7 (0x7), region = 92 }
 0x747   :  { %9924 = vsyncpa [#allocation5], 1 }
 0x748   :  { %9926 = vsyncpa [#allocation5 + $0x1], 1 }
 0x749   :  { %9927 = vsyncpa [#allocation8], 1 }
 0x74a   :  { %9928 = vsyncpa [#allocation6], 1 }
 0x74b   :  { %9930 = vsyncpa [#allocation6 + $0x1], 1 }

</bundles_post_ra>
